<compile_context>
chip_gen: v7x
topology: tpu7x:2x2x1
jax: 0.10.0
libtpu: 0.0.40
codegen_flags: <defaults>
</compile_context>

<pallas_src>
import numpy as np
import jax
import jax.numpy as jnp
from jax import lax
from jax.experimental import pallas as pl
from jax.experimental.pallas import tpu as pltpu


# ----------------------------------------------------------------------------
# Bilinear align_corners=True interpolation tables (host side, static shapes)
# ----------------------------------------------------------------------------
def _axis_lerp_tables(n_out, n_in):
    """Per-output-index (i0, i1, frac) for 1-D align_corners=True interpolation."""
    if n_out > 1:
        src = np.arange(n_out, dtype=np.float64) * (n_in - 1) / (n_out - 1)
    else:
        src = np.zeros((1,), np.float64)
    i0 = np.clip(np.floor(src).astype(np.int64), 0, n_in - 1)
    i1 = np.minimum(i0 + 1, n_in - 1)
    frac = (src - i0).astype(np.float32)
    return i0.astype(np.int32), i1.astype(np.int32), frac


def _interp_matrix(n_out, n_in):
    """Dense (n_out, n_in) interpolation matrix (align_corners=True)."""
    i0, i1, f = _axis_lerp_tables(n_out, n_in)
    A = np.zeros((n_out, n_in), np.float32)
    A[np.arange(n_out), i0] += 1.0 - f
    A[np.arange(n_out), i1] += f
    return A


def _pick_tile_rows(H, W, requested=None):
    """Row-block size: divides H and keeps the flattened block lane-dense."""
    if requested is not None:
        th = int(requested)
    else:
        target = max(1, 1024 // max(W, 1))          # ~1K pixels per block
        th = 0
        for cand in range(1, H + 1):
            if H % cand == 0 and cand <= target:
                if (cand * W) % 128 == 0 or cand * W == H * W:
                    th = cand
        if th == 0:
            th = H                                   # single block fallback
    assert H % th == 0, (H, th)
    assert (th * W) % 128 == 0 or th * W == H * W, (th, W)
    return th


# ----------------------------------------------------------------------------
# Pass 1: upsample + weighted fuse + ReLU + conv1 3x3 (im2col) + BN statistics
# ----------------------------------------------------------------------------
def _make_pass1_kernel(H, W, TH, n_src, cin):
    def kernel(y0_ref, y1_ref, fy_ref, *refs):      # 3 SMEM prefetch tables
        srcs = refs[:n_src]                          # (h_i, w_i, 128) resident
        hmats = refs[n_src:2 * n_src]                # (W, w_i) weighted col-interp
        w1t_ref = refs[2 * n_src]                    # (64, 9*128) bf16
        y1out_ref = refs[2 * n_src + 1]              # (64, TH*W) lane-dense out
        stats_ref = refs[2 * n_src + 2]              # (64, 2) resident accumulator

        rb = pl.program_id(1)
        r0 = rb * TH

        # Fused (weighted-sum + ReLU) tile with a 1-row halo on each side; the
        # halo rows are recomputed locally from the resident source maps so the
        # 3x3 conv needs no cross-block communication.
        rows = []
        for j in range(TH + 2):
            r = r0 + (j - 1)
            valid = jnp.logical_and(r >= 0, r < H).astype(jnp.float32)
            rc = jnp.clip(r, 0, H - 1)
            acc_row = jnp.zeros((W, cin), jnp.float32)
            for i in range(n_src):
                yy0 = y0_ref[i, rc]
                yy1 = y1_ref[i, rc]
                fy = fy_ref[i, rc]
                # vertical VPU lerp between two source rows
                vrow = srcs[i][yy0] * (1.0 - fy) + srcs[i][yy1] * fy  # (w_i, 128)
                # horizontal interpolation (fuse weight folded into hmats[i])
                acc_row = acc_row + jnp.dot(
                    hmats[i][...], vrow, preferred_element_type=jnp.float32)
            fused_row = jnp.maximum(acc_row, 0.0)     # ReLU after weighted sum
            rows.append(fused_row * valid)            # zero rows outside image
        fused = jnp.stack(rows, axis=0)               # (TH+2, W, 128)
        zcol = jnp.zeros((TH + 2, 1, cin), jnp.float32)
        fused = jnp.concatenate([zcol, fused, zcol], axis=1)   # (TH+2, W+2, 128)

        # conv1 3x3 as a single deep-K im2col matmul (K = 9*128) in bf16.
        pieces = []
        for dy in range(3):
            for dx in range(3):
                pieces.append(
                    fused[dy:dy + TH, dx:dx + W, :].reshape(TH * W, cin))
        patch = jnp.concatenate(pieces, axis=1).astype(jnp.bfloat16)  # (M, 1152)

        # acc_t[c_out, m] = sum_k w1t[c_out, k] * patch[m, k]  -> (64, M), f32 acc
        acc_t = lax.dot_general(w1t_ref[...], patch,
                                (((1,), (1,)), ((), ())),
                                preferred_element_type=jnp.float32)
        # conv1 bias omitted: exactly cancelled by the training-mode BatchNorm
        # mean subtraction applied in pass 2.

        y1out_ref[...] = acc_t                        # lane-dense store

        # One-pass BatchNorm statistics, accumulated across the row-block axis.
        @pl.when(rb == 0)
        def _init():
            stats_ref[...] = jnp.zeros_like(stats_ref)

        csum = jnp.sum(acc_t, axis=1, keepdims=True)
        csq = jnp.sum(acc_t * acc_t, axis=1, keepdims=True)
        stats_ref[...] += jnp.concatenate([csum, csq], axis=1)

    return kernel


def _head_pass1(srcs_nhwc, hmats, w1col_t, H, W, TH, vmem_limit):
    N = srcs_nhwc[0].shape[0]
    cin = srcs_nhwc[0].shape[3]
    cmid = w1col_t.shape[0]
    RB = H // TH
    M = TH * W
    n_src = len(srcs_nhwc)

    # Vertical (row) interpolation tables, one row per source: (n_src, H).
    y0_rows, y1_rows, fy_rows = [], [], []
    for s in srcs_nhwc:
        i0, i1, f = _axis_lerp_tables(H, s.shape[1])
        y0_rows.append(i0)
        y1_rows.append(i1)
        fy_rows.append(f)
    y0_tab = jnp.asarray(np.stack(y0_rows))
    y1_tab = jnp.asarray(np.stack(y1_rows))
    fy_tab = jnp.asarray(np.stack(fy_rows))

    src_specs = [
        pl.BlockSpec((None,) + s.shape[1:], lambda b, rb, *_: (b, 0, 0, 0))
        for s in srcs_nhwc
    ]
    hmat_specs = [
        pl.BlockSpec(hm.shape, lambda b, rb, *_: (0, 0)) for hm in hmats
    ]
    w1_spec = pl.BlockSpec(w1col_t.shape, lambda b, rb, *_: (0, 0))

    grid_spec = pltpu.PrefetchScalarGridSpec(
        num_scalar_prefetch=3,
        grid=(N, RB),
        in_specs=src_specs + hmat_specs + [w1_spec],
        out_specs=(
            pl.BlockSpec((None, cmid, M), lambda b, rb, *_: (b, 0, rb)),
            pl.BlockSpec((None, cmid, 2), lambda b, rb, *_: (b, 0, 0)),
        ),
    )
    kernel = _make_pass1_kernel(H, W, TH, n_src, cin)
    y1_flat, stats = pl.pallas_call(
        kernel,
        grid_spec=grid_spec,
        out_shape=(
            jax.ShapeDtypeStruct((N, cmid, H * W), jnp.float32),
            jax.ShapeDtypeStruct((N, cmid, 2), jnp.float32),
        ),
        compiler_params=pltpu.CompilerParams(
            dimension_semantics=("parallel", "arbitrary"),
            vmem_limit_bytes=vmem_limit),
    )(y0_tab, y1_tab, fy_tab, *srcs_nhwc, *hmats, w1col_t)
    return y1_flat, stats


# ----------------------------------------------------------------------------
# Pass 2: folded BatchNorm scale/shift + ReLU + conv2 1x1 + predict 1x1
# ----------------------------------------------------------------------------
def _pass2_kernel(y1_ref, scale_ref, shift_ref, w2t_ref, b2_ref,
                  wpt_ref, bp_ref, up1_ref, pred_ref):
    # folded training-mode BatchNorm + ReLU
    y = jnp.maximum(y1_ref[...] * scale_ref[...] + shift_ref[...], 0.0)  # (64, M)
    # conv2 1x1 (64 -> 32)  == WFFPN output n1 / TextNet up1
    up1 = jnp.dot(w2t_ref[...], y, preferred_element_type=jnp.float32) + b2_ref[...]
    # predict 1x1 (32 -> 8)
    pred = jnp.dot(wpt_ref[...], up1, preferred_element_type=jnp.float32) + bp_ref[...]
    up1_ref[...] = up1
    pred_ref[...] = pred


def _head_pass2(y1_flat, scale, shift, w2t, b2c, wpt, bpc, H, W, TH, vmem_limit):
    N, cmid, HW = y1_flat.shape
    c2 = w2t.shape[0]
    co = wpt.shape[0]
    RB = H // TH
    M = TH * W
    return pl.pallas_call(
        _pass2_kernel,
        grid=(N, RB),
        in_specs=[
            pl.BlockSpec((None, cmid, M), lambda b, rb: (b, 0, rb)),
            pl.BlockSpec(scale.shape, lambda b, rb: (0, 0)),
            pl.BlockSpec(shift.shape, lambda b, rb: (0, 0)),
            pl.BlockSpec(w2t.shape, lambda b, rb: (0, 0)),
            pl.BlockSpec(b2c.shape, lambda b, rb: (0, 0)),
            pl.BlockSpec(wpt.shape, lambda b, rb: (0, 0)),
            pl.BlockSpec(bpc.shape, lambda b, rb: (0, 0)),
        ],
        out_specs=(
            pl.BlockSpec((None, c2, M), lambda b, rb: (b, 0, rb)),
            pl.BlockSpec((None, co, M), lambda b, rb: (b, 0, rb)),
        ),
        out_shape=(
            jax.ShapeDtypeStruct((N, c2, HW), jnp.float32),
            jax.ShapeDtypeStruct((N, co, HW), jnp.float32),
        ),
        compiler_params=pltpu.CompilerParams(
            dimension_semantics=("parallel", "parallel"),
            vmem_limit_bytes=vmem_limit),
    )(y1_flat, scale, shift, w2t, b2c, wpt, bpc)


# ----------------------------------------------------------------------------
# End-to-end (the implementable portion of TextNet.forward)
# ----------------------------------------------------------------------------
def textnet_forward(x_nchw, feats_nchw, fuse_w, params, tile_rows=None):
    N, _, H, W = x_nchw.shape
    n1, n2, n3, n4, n5 = feats_nchw
    W1, b1, gamma, beta, W2, b2, Wp, bp = params     # b1 cancelled by train-mode BN
    cmid = W1.shape[3]                               # 64
    c2 = W2.shape[1]                                 # 32
    co = Wp.shape[1]                                 # 8

    TH = _pick_tile_rows(H, W, tile_rows)
    vmem_limit = 48 * 1024 * 1024                    # safe on v5e/v6e/v7x

    # WFFPN fuse order: weight[0..4] * (n2_up, n3_up, n4_up, n5_up, n1_up)
    srcs_nchw = (n2, n3, n4, n5, n1)
    # Glue: NCHW -> NHWC on the SMALL source maps only (channels on lanes).
    srcs = [jnp.transpose(t, (0, 2, 3, 1)) for t in srcs_nchw]

    # relu + normalize of the 5 fuse scalars, folded into the column-interp
    # matrices so the kernel applies weighting + interpolation in one matmul.
    fw = jnp.maximum(fuse_w, 0.0)
    wn = fw / (jnp.sum(fw) + 1e-4)
    hmats = [wn[i] * jnp.asarray(_interp_matrix(W, s.shape[2]))
             for i, s in enumerate(srcs)]

    # conv1 weights (HWIO) -> (C_out, 9*C_in) bf16 for the im2col matmul.
    w1col_t = jnp.transpose(W1.reshape(-1, cmid)).astype(jnp.bfloat16)

    y1_flat, stats = _head_pass1(srcs, hmats, w1col_t, H, W, TH, vmem_limit)

    # Glue: fold training-mode BatchNorm2d (biased batch stats, eps=1e-5) into
    # a per-channel scale/shift (64 scalars).
    tot = jnp.sum(stats, axis=0)                     # (64, 2)
    cnt = float(N * H * W)
    mean = tot[:, 0] / cnt
    var = jnp.maximum(tot[:, 1] / cnt - mean * mean, 0.0)
    rstd = lax.rsqrt(var + 1e-5)
    scale = (gamma * rstd).reshape(cmid, 1)
    shift = (beta - mean * gamma * rstd).reshape(cmid, 1)

    up1_flat, pred_flat = _head_pass2(
        y1_flat, scale, shift,
        jnp.transpose(W2), b2.reshape(c2, 1),
        jnp.transpose(Wp), bp.reshape(co, 1),
        H, W, TH, vmem_limit)

    # Kernel outputs are channel-major and lane-dense -> free reshape to NCHW.
    up1 = up1_flat.reshape(N, c2, H, W)              # [N, 32, H, W]
    predict_out = pred_flat.reshape(N, co, H, W)     # [N,  8, H, W]
    graph_feat = jnp.concatenate([up1, predict_out], axis=1)   # [N, 40, H, W]
    # TODO(synk): self.graph(graph_feat, roi_data) and self.gcn_model(...) need
    # KnnGraph / RROIAlign / GCN definitions that are not provided.
    return predict_out, up1, graph_feat


# ----------------------------------------------------------------------------
# Pure-JAX f32 reference of the same forward math (for correctness checking)
# ----------------------------------------------------------------------------
def _reference_forward(x, feats, fuse_w, params):
    N, _, H, W = x.shape
    n1, n2, n3, n4, n5 = feats
    W1, b1, gamma, beta, W2, b2, Wp, bp = params

    def up(t):
        Ah = jnp.asarray(_interp_matrix(H, t.shape[2]))
        Aw = jnp.asarray(_interp_matrix(W, t.shape[3]))
        return jnp.einsum('Hh,nchw,Ww->ncHW', Ah, t, Aw)

    ups = [up(t) for t in (n2, n3, n4, n5, n1)]
    fw = jnp.maximum(fuse_w, 0.0)
    wn = fw / (jnp.sum(fw) + 1e-4)
    fused = jnp.maximum(sum(wn[i] * ups[i] for i in range(5)), 0.0)

    dn = lax.conv_dimension_numbers(fused.shape, W1.shape,
                                    ('NCHW', 'HWIO', 'NCHW'))
    c1 = lax.conv_general_dilated(fused, W1, (1, 1), ((1, 1), (1, 1)),
                                  dimension_numbers=dn)
    c1 = c1 + b1[None, :, None, None]
    mean = jnp.mean(c1, axis=(0, 2, 3), keepdims=True)
    var = jnp.mean((c1 - mean) ** 2, axis=(0, 2, 3), keepdims=True)
    y = (c1 - mean) * lax.rsqrt(var + 1e-5)
    y = y * gamma[None, :, None, None] + beta[None, :, None, None]
    y = jnp.maximum(y, 0.0)
    up1 = jnp.einsum('nchw,co->nohw', y, W2) + b2[None, :, None, None]
    pred = jnp.einsum('nohw,op->nphw', up1, Wp) + bp[None, :, None, None]
    return pred, up1


if __name__ == "__main__":
    key = jax.random.PRNGKey(0)
    N, H, W = 2, 16, 16
    x = jax.random.normal(jax.random.fold_in(key, 0), (N, 3, H, W), jnp.float32)

    # TODO(synk): stand-ins for backbone -> WFeature -> FPEM_v2 outputs n1..n5
    # (128-channel multi-scale features), since those modules are not provided.
    scales = [1, 2, 4, 8, 8]
    feats = [
        jax.random.normal(jax.random.fold_in(key, 10 + i),
                          (N, 128, H // sc, W // sc), jnp.float32)
        for i, sc in enumerate(scales)
    ]

    def k(i):
        return jax.random.fold_in(key, 100 + i)

    fuse_w = jnp.ones((5,), jnp.float32)                               # nn.Parameter(torch.ones(5))
    W1 = jax.random.normal(k(0), (3, 3, 128, 64), jnp.float32) * 0.05  # conv1 3x3 (HWIO)
    b1 = jax.random.normal(k(1), (64,), jnp.float32) * 0.05            # conv1 bias (cancelled by BN)
    gamma = jnp.ones((64,), jnp.float32)                               # bn1.weight
    beta = jnp.zeros((64,), jnp.float32)                               # bn1.bias
    W2 = jax.random.normal(k(2), (64, 32), jnp.float32) * 0.05         # conv2 1x1
    b2 = jax.random.normal(k(3), (32,), jnp.float32) * 0.05
    Wp = jax.random.normal(k(4), (32, 8), jnp.float32) * 0.05          # predict 1x1
    bp = jax.random.normal(k(5), (8,), jnp.float32) * 0.05
    params = (W1, b1, gamma, beta, W2, b2, Wp, bp)

    fwd = jax.jit(textnet_forward, static_argnames=("tile_rows",))
    predict_out, up1, graph_feat = fwd(x, feats, fuse_w, params, tile_rows=8)
    jax.block_until_ready((predict_out, up1, graph_feat))

    assert predict_out.shape == (N, 8, H, W)
    assert up1.shape == (N, 32, H, W)
    assert graph_feat.shape == (N, 40, H, W)
    assert bool(jnp.all(jnp.isfinite(predict_out)))
    assert bool(jnp.all(jnp.isfinite(up1)))

    # Cross-check against the pure-JAX f32 reference (bf16 is only used for
    # the conv1 MXU matmul, so a loose absolute tolerance is sufficient).
    pred_ref, up1_ref = jax.jit(_reference_forward)(x, feats, fuse_w, params)
    err_up1 = float(jnp.max(jnp.abs(up1 - up1_ref)))
    err_pred = float(jnp.max(jnp.abs(predict_out - pred_ref)))
    assert err_up1 < 5e-2 and err_pred < 5e-2, (err_up1, err_pred)

    print("KERNEL_OK")
</pallas_src>

<mosaic_0001>
module attributes {stable_mosaic.version = 11 : i64} {
  func.func @kernel(%arg0: i32, %arg1: i32, %arg2: memref<5x16xi32, #tpu.memory_space<smem>>, %arg3: memref<5x16xi32, #tpu.memory_space<smem>>, %arg4: memref<5x16xf32, #tpu.memory_space<smem>>, %arg5: memref<1x8x8x128xf32, #tpu.memory_space<vmem>>, %arg6: memref<1x4x4x128xf32, #tpu.memory_space<vmem>>, %arg7: memref<1x2x2x128xf32, #tpu.memory_space<vmem>>, %arg8: memref<1x2x2x128xf32, #tpu.memory_space<vmem>>, %arg9: memref<1x16x16x128xf32, #tpu.memory_space<vmem>>, %arg10: memref<16x8xf32, #tpu.memory_space<vmem>>, %arg11: memref<16x4xf32, #tpu.memory_space<vmem>>, %arg12: memref<16x2xf32, #tpu.memory_space<vmem>>, %arg13: memref<16x2xf32, #tpu.memory_space<vmem>>, %arg14: memref<16x16xf32, #tpu.memory_space<vmem>>, %arg15: memref<64x1152xbf16, #tpu.memory_space<vmem>>, %arg16: memref<1x64x128xf32, #tpu.memory_space<vmem>>, %arg17: memref<1x64x2xf32, #tpu.memory_space<vmem>>) attributes {dimension_semantics = [#tpu.dimension_semantics<parallel>, #tpu.dimension_semantics<arbitrary>], iteration_bounds = array<i64: 2, 2>, scalar_prefetch = 3 : i64, scratch_operands = 0 : i64, tpu.core_type = #tpu.core_type<tc>, window_params = [{transform_indices = @transform_0, window_bounds = array<i64: 1, 8, 8, 128>}, {transform_indices = @transform_1, window_bounds = array<i64: 1, 4, 4, 128>}, {transform_indices = @transform_2, window_bounds = array<i64: 1, 2, 2, 128>}, {transform_indices = @transform_3, window_bounds = array<i64: 1, 2, 2, 128>}, {transform_indices = @transform_4, window_bounds = array<i64: 1, 16, 16, 128>}, {pipeline_mode = #tpu.pipeline_mode<synchronous>, transform_indices = @transform_5, window_bounds = array<i64: 16, 8>}, {pipeline_mode = #tpu.pipeline_mode<synchronous>, transform_indices = @transform_6, window_bounds = array<i64: 16, 4>}, {pipeline_mode = #tpu.pipeline_mode<synchronous>, transform_indices = @transform_7, window_bounds = array<i64: 16, 2>}, {pipeline_mode = #tpu.pipeline_mode<synchronous>, transform_indices = @transform_8, window_bounds = array<i64: 16, 2>}, {pipeline_mode = #tpu.pipeline_mode<synchronous>, transform_indices = @transform_9, window_bounds = array<i64: 16, 16>}, {pipeline_mode = #tpu.pipeline_mode<synchronous>, transform_indices = @transform_10, window_bounds = array<i64: 64, 1152>}, {transform_indices = @transform_11, window_bounds = array<i64: 1, 64, 128>}, {transform_indices = @transform_12, window_bounds = array<i64: 1, 64, 2>}]} {
    %c8_i32 = arith.constant 8 : i32
    %0 = arith.muli %arg1, %c8_i32 : i32
    %c-1_i32 = arith.constant -1 : i32
    %1 = arith.addi %0, %c-1_i32 : i32
    %c0_i32 = arith.constant 0 : i32
    %2 = arith.cmpi sge, %1, %c0_i32 : i32
    %c16_i32 = arith.constant 16 : i32
    %3 = arith.cmpi slt, %1, %c16_i32 : i32
    %4 = arith.andi %2, %3 : i1
    %5 = arith.extui %4 : i1 to i32
    %6 = arith.sitofp %5 : i32 to f32
    %c0_i32_0 = arith.constant 0 : i32
    %c15_i32 = arith.constant 15 : i32
    %7 = arith.maxsi %c0_i32_0, %1 : i32
    %8 = arith.minsi %c15_i32, %7 : i32
    %cst = arith.constant 0.000000e+00 : f32
    %9 = vector.broadcast %cst : f32 to vector<16x128xf32>
    %c0 = arith.constant 0 : index
    %10 = arith.index_cast %8 : i32 to index
    %11 = memref.load %arg2[%c0, %10] : memref<5x16xi32, #tpu.memory_space<smem>>
    %c0_1 = arith.constant 0 : index
    %12 = arith.index_cast %8 : i32 to index
    %13 = memref.load %arg3[%c0_1, %12] : memref<5x16xi32, #tpu.memory_space<smem>>
    %c0_2 = arith.constant 0 : index
    %14 = arith.index_cast %8 : i32 to index
    %15 = memref.load %arg4[%c0_2, %14] : memref<5x16xf32, #tpu.memory_space<smem>>
    %c0_3 = arith.constant 0 : index
    %16 = arith.index_cast %11 : i32 to index
    %c0_4 = arith.constant 0 : index
    %c0_5 = arith.constant 0 : index
    %17 = vector.load %arg5[%c0_3, %16, %c0_4, %c0_5] : memref<1x8x8x128xf32, #tpu.memory_space<vmem>>, vector<1x1x8x128xf32>
    %18 = vector.shape_cast %17 : vector<1x1x8x128xf32> to vector<8x128xf32>
    %cst_6 = arith.constant 1.000000e+00 : f32
    %19 = arith.subf %cst_6, %15 : f32
    %20 = vector.broadcast %19 : f32 to vector<8x128xf32>
    %21 = arith.mulf %18, %20 : vector<8x128xf32>
    %c0_7 = arith.constant 0 : index
    %22 = arith.index_cast %13 : i32 to index
    %c0_8 = arith.constant 0 : index
    %c0_9 = arith.constant 0 : index
    %23 = vector.load %arg5[%c0_7, %22, %c0_8, %c0_9] : memref<1x8x8x128xf32, #tpu.memory_space<vmem>>, vector<1x1x8x128xf32>
    %24 = vector.shape_cast %23 : vector<1x1x8x128xf32> to vector<8x128xf32>
    %25 = vector.broadcast %15 : f32 to vector<8x128xf32>
    %26 = arith.mulf %24, %25 : vector<8x128xf32>
    %27 = arith.addf %21, %26 : vector<8x128xf32>
    %c0_10 = arith.constant 0 : index
    %c0_11 = arith.constant 0 : index
    %28 = vector.load %arg10[%c0_10, %c0_11] : memref<16x8xf32, #tpu.memory_space<vmem>>, vector<16x8xf32>
    %cst_12 = arith.constant dense<0.000000e+00> : vector<16x128xf32>
    %29 = tpu.matmul %28, %27, %cst_12 {dimension_numbers = #tpu.dot_dimension_numbers<[1], [0], [0], [1], [0, 0, 1, 1], [], []>} : vector<16x8xf32>, vector<8x128xf32>, vector<16x128xf32> -> vector<16x128xf32>
    %30 = arith.addf %9, %29 : vector<16x128xf32>
    %c1 = arith.constant 1 : index
    %31 = arith.index_cast %8 : i32 to index
    %32 = memref.load %arg2[%c1, %31] : memref<5x16xi32, #tpu.memory_space<smem>>
    %c1_13 = arith.constant 1 : index
    %33 = arith.index_cast %8 : i32 to index
    %34 = memref.load %arg3[%c1_13, %33] : memref<5x16xi32, #tpu.memory_space<smem>>
    %c1_14 = arith.constant 1 : index
    %35 = arith.index_cast %8 : i32 to index
    %36 = memref.load %arg4[%c1_14, %35] : memref<5x16xf32, #tpu.memory_space<smem>>
    %c0_15 = arith.constant 0 : index
    %37 = arith.index_cast %32 : i32 to index
    %c0_16 = arith.constant 0 : index
    %c0_17 = arith.constant 0 : index
    %38 = vector.load %arg6[%c0_15, %37, %c0_16, %c0_17] : memref<1x4x4x128xf32, #tpu.memory_space<vmem>>, vector<1x1x4x128xf32>
    %39 = vector.shape_cast %38 : vector<1x1x4x128xf32> to vector<4x128xf32>
    %cst_18 = arith.constant 1.000000e+00 : f32
    %40 = arith.subf %cst_18, %36 : f32
    %41 = vector.broadcast %40 : f32 to vector<4x128xf32>
    %42 = arith.mulf %39, %41 : vector<4x128xf32>
    %c0_19 = arith.constant 0 : index
    %43 = arith.index_cast %34 : i32 to index
    %c0_20 = arith.constant 0 : index
    %c0_21 = arith.constant 0 : index
    %44 = vector.load %arg6[%c0_19, %43, %c0_20, %c0_21] : memref<1x4x4x128xf32, #tpu.memory_space<vmem>>, vector<1x1x4x128xf32>
    %45 = vector.shape_cast %44 : vector<1x1x4x128xf32> to vector<4x128xf32>
    %46 = vector.broadcast %36 : f32 to vector<4x128xf32>
    %47 = arith.mulf %45, %46 : vector<4x128xf32>
    %48 = arith.addf %42, %47 : vector<4x128xf32>
    %c0_22 = arith.constant 0 : index
    %c0_23 = arith.constant 0 : index
    %49 = vector.load %arg11[%c0_22, %c0_23] : memref<16x4xf32, #tpu.memory_space<vmem>>, vector<16x4xf32>
    %cst_24 = arith.constant dense<0.000000e+00> : vector<16x128xf32>
    %50 = tpu.matmul %49, %48, %cst_24 {dimension_numbers = #tpu.dot_dimension_numbers<[1], [0], [0], [1], [0, 0, 1, 1], [], []>} : vector<16x4xf32>, vector<4x128xf32>, vector<16x128xf32> -> vector<16x128xf32>
    %51 = arith.addf %30, %50 : vector<16x128xf32>
    %c2 = arith.constant 2 : index
    %52 = arith.index_cast %8 : i32 to index
    %53 = memref.load %arg2[%c2, %52] : memref<5x16xi32, #tpu.memory_space<smem>>
    %c2_25 = arith.constant 2 : index
    %54 = arith.index_cast %8 : i32 to index
    %55 = memref.load %arg3[%c2_25, %54] : memref<5x16xi32, #tpu.memory_space<smem>>
    %c2_26 = arith.constant 2 : index
    %56 = arith.index_cast %8 : i32 to index
    %57 = memref.load %arg4[%c2_26, %56] : memref<5x16xf32, #tpu.memory_space<smem>>
    %c0_27 = arith.constant 0 : index
    %58 = arith.index_cast %53 : i32 to index
    %c0_28 = arith.constant 0 : index
    %c0_29 = arith.constant 0 : index
    %59 = vector.load %arg7[%c0_27, %58, %c0_28, %c0_29] : memref<1x2x2x128xf32, #tpu.memory_space<vmem>>, vector<1x1x2x128xf32>
    %60 = vector.shape_cast %59 : vector<1x1x2x128xf32> to vector<2x128xf32>
    %cst_30 = arith.constant 1.000000e+00 : f32
    %61 = arith.subf %cst_30, %57 : f32
    %62 = vector.broadcast %61 : f32 to vector<2x128xf32>
    %63 = arith.mulf %60, %62 : vector<2x128xf32>
    %c0_31 = arith.constant 0 : index
    %64 = arith.index_cast %55 : i32 to index
    %c0_32 = arith.constant 0 : index
    %c0_33 = arith.constant 0 : index
    %65 = vector.load %arg7[%c0_31, %64, %c0_32, %c0_33] : memref<1x2x2x128xf32, #tpu.memory_space<vmem>>, vector<1x1x2x128xf32>
    %66 = vector.shape_cast %65 : vector<1x1x2x128xf32> to vector<2x128xf32>
    %67 = vector.broadcast %57 : f32 to vector<2x128xf32>
    %68 = arith.mulf %66, %67 : vector<2x128xf32>
    %69 = arith.addf %63, %68 : vector<2x128xf32>
    %c0_34 = arith.constant 0 : index
    %c0_35 = arith.constant 0 : index
    %70 = vector.load %arg12[%c0_34, %c0_35] : memref<16x2xf32, #tpu.memory_space<vmem>>, vector<16x2xf32>
    %cst_36 = arith.constant dense<0.000000e+00> : vector<16x128xf32>
    %71 = tpu.matmul %70, %69, %cst_36 {dimension_numbers = #tpu.dot_dimension_numbers<[1], [0], [0], [1], [0, 0, 1, 1], [], []>} : vector<16x2xf32>, vector<2x128xf32>, vector<16x128xf32> -> vector<16x128xf32>
    %72 = arith.addf %51, %71 : vector<16x128xf32>
    %c3 = arith.constant 3 : index
    %73 = arith.index_cast %8 : i32 to index
    %74 = memref.load %arg2[%c3, %73] : memref<5x16xi32, #tpu.memory_space<smem>>
    %c3_37 = arith.constant 3 : index
    %75 = arith.index_cast %8 : i32 to index
    %76 = memref.load %arg3[%c3_37, %75] : memref<5x16xi32, #tpu.memory_space<smem>>
    %c3_38 = arith.constant 3 : index
    %77 = arith.index_cast %8 : i32 to index
    %78 = memref.load %arg4[%c3_38, %77] : memref<5x16xf32, #tpu.memory_space<smem>>
    %c0_39 = arith.constant 0 : index
    %79 = arith.index_cast %74 : i32 to index
    %c0_40 = arith.constant 0 : index
    %c0_41 = arith.constant 0 : index
    %80 = vector.load %arg8[%c0_39, %79, %c0_40, %c0_41] : memref<1x2x2x128xf32, #tpu.memory_space<vmem>>, vector<1x1x2x128xf32>
    %81 = vector.shape_cast %80 : vector<1x1x2x128xf32> to vector<2x128xf32>
    %cst_42 = arith.constant 1.000000e+00 : f32
    %82 = arith.subf %cst_42, %78 : f32
    %83 = vector.broadcast %82 : f32 to vector<2x128xf32>
    %84 = arith.mulf %81, %83 : vector<2x128xf32>
    %c0_43 = arith.constant 0 : index
    %85 = arith.index_cast %76 : i32 to index
    %c0_44 = arith.constant 0 : index
    %c0_45 = arith.constant 0 : index
    %86 = vector.load %arg8[%c0_43, %85, %c0_44, %c0_45] : memref<1x2x2x128xf32, #tpu.memory_space<vmem>>, vector<1x1x2x128xf32>
    %87 = vector.shape_cast %86 : vector<1x1x2x128xf32> to vector<2x128xf32>
    %88 = vector.broadcast %78 : f32 to vector<2x128xf32>
    %89 = arith.mulf %87, %88 : vector<2x128xf32>
    %90 = arith.addf %84, %89 : vector<2x128xf32>
    %c0_46 = arith.constant 0 : index
    %c0_47 = arith.constant 0 : index
    %91 = vector.load %arg13[%c0_46, %c0_47] : memref<16x2xf32, #tpu.memory_space<vmem>>, vector<16x2xf32>
    %cst_48 = arith.constant dense<0.000000e+00> : vector<16x128xf32>
    %92 = tpu.matmul %91, %90, %cst_48 {dimension_numbers = #tpu.dot_dimension_numbers<[1], [0], [0], [1], [0, 0, 1, 1], [], []>} : vector<16x2xf32>, vector<2x128xf32>, vector<16x128xf32> -> vector<16x128xf32>
    %93 = arith.addf %72, %92 : vector<16x128xf32>
    %c4 = arith.constant 4 : index
    %94 = arith.index_cast %8 : i32 to index
    %95 = memref.load %arg2[%c4, %94] : memref<5x16xi32, #tpu.memory_space<smem>>
    %c4_49 = arith.constant 4 : index
    %96 = arith.index_cast %8 : i32 to index
    %97 = memref.load %arg3[%c4_49, %96] : memref<5x16xi32, #tpu.memory_space<smem>>
    %c4_50 = arith.constant 4 : index
    %98 = arith.index_cast %8 : i32 to index
    %99 = memref.load %arg4[%c4_50, %98] : memref<5x16xf32, #tpu.memory_space<smem>>
    %c0_51 = arith.constant 0 : index
    %100 = arith.index_cast %95 : i32 to index
    %c0_52 = arith.constant 0 : index
    %c0_53 = arith.constant 0 : index
    %101 = vector.load %arg9[%c0_51, %100, %c0_52, %c0_53] : memref<1x16x16x128xf32, #tpu.memory_space<vmem>>, vector<1x1x16x128xf32>
    %102 = vector.shape_cast %101 : vector<1x1x16x128xf32> to vector<16x128xf32>
    %cst_54 = arith.constant 1.000000e+00 : f32
    %103 = arith.subf %cst_54, %99 : f32
    %104 = vector.broadcast %103 : f32 to vector<16x128xf32>
    %105 = arith.mulf %102, %104 : vector<16x128xf32>
    %c0_55 = arith.constant 0 : index
    %106 = arith.index_cast %97 : i32 to index
    %c0_56 = arith.constant 0 : index
    %c0_57 = arith.constant 0 : index
    %107 = vector.load %arg9[%c0_55, %106, %c0_56, %c0_57] : memref<1x16x16x128xf32, #tpu.memory_space<vmem>>, vector<1x1x16x128xf32>
    %108 = vector.shape_cast %107 : vector<1x1x16x128xf32> to vector<16x128xf32>
    %109 = vector.broadcast %99 : f32 to vector<16x128xf32>
    %110 = arith.mulf %108, %109 : vector<16x128xf32>
    %111 = arith.addf %105, %110 : vector<16x128xf32>
    %c0_58 = arith.constant 0 : index
    %c0_59 = arith.constant 0 : index
    %112 = vector.load %arg14[%c0_58, %c0_59] : memref<16x16xf32, #tpu.memory_space<vmem>>, vector<16x16xf32>
    %cst_60 = arith.constant dense<0.000000e+00> : vector<16x128xf32>
    %113 = tpu.matmul %112, %111, %cst_60 {dimension_numbers = #tpu.dot_dimension_numbers<[1], [0], [0], [1], [0, 0, 1, 1], [], []>} : vector<16x16xf32>, vector<16x128xf32>, vector<16x128xf32> -> vector<16x128xf32>
    %114 = arith.addf %93, %113 : vector<16x128xf32>
    %cst_61 = arith.constant 0.000000e+00 : f32
    %115 = vector.broadcast %cst_61 : f32 to vector<16x128xf32>
    %116 = arith.maximumf %114, %115 : vector<16x128xf32>
    %117 = vector.broadcast %6 : f32 to vector<16x128xf32>
    %118 = arith.mulf %116, %117 : vector<16x128xf32>
    %c0_i32_62 = arith.constant 0 : i32
    %119 = arith.addi %0, %c0_i32_62 : i32
    %c0_i32_63 = arith.constant 0 : i32
    %120 = arith.cmpi sge, %119, %c0_i32_63 : i32
    %c16_i32_64 = arith.constant 16 : i32
    %121 = arith.cmpi slt, %119, %c16_i32_64 : i32
    %122 = arith.andi %120, %121 : i1
    %123 = arith.extui %122 : i1 to i32
    %124 = arith.sitofp %123 : i32 to f32
    %c0_i32_65 = arith.constant 0 : i32
    %c15_i32_66 = arith.constant 15 : i32
    %125 = arith.maxsi %c0_i32_65, %119 : i32
    %126 = arith.minsi %c15_i32_66, %125 : i32
    %cst_67 = arith.constant 0.000000e+00 : f32
    %127 = vector.broadcast %cst_67 : f32 to vector<16x128xf32>
    %c0_68 = arith.constant 0 : index
    %128 = arith.index_cast %126 : i32 to index
    %129 = memref.load %arg2[%c0_68, %128] : memref<5x16xi32, #tpu.memory_space<smem>>
    %c0_69 = arith.constant 0 : index
    %130 = arith.index_cast %126 : i32 to index
    %131 = memref.load %arg3[%c0_69, %130] : memref<5x16xi32, #tpu.memory_space<smem>>
    %c0_70 = arith.constant 0 : index
    %132 = arith.index_cast %126 : i32 to index
    %133 = memref.load %arg4[%c0_70, %132] : memref<5x16xf32, #tpu.memory_space<smem>>
    %c0_71 = arith.constant 0 : index
    %134 = arith.index_cast %129 : i32 to index
    %c0_72 = arith.constant 0 : index
    %c0_73 = arith.constant 0 : index
    %135 = vector.load %arg5[%c0_71, %134, %c0_72, %c0_73] : memref<1x8x8x128xf32, #tpu.memory_space<vmem>>, vector<1x1x8x128xf32>
    %136 = vector.shape_cast %135 : vector<1x1x8x128xf32> to vector<8x128xf32>
    %cst_74 = arith.constant 1.000000e+00 : f32
    %137 = arith.subf %cst_74, %133 : f32
    %138 = vector.broadcast %137 : f32 to vector<8x128xf32>
    %139 = arith.mulf %136, %138 : vector<8x128xf32>
    %c0_75 = arith.constant 0 : index
    %140 = arith.index_cast %131 : i32 to index
    %c0_76 = arith.constant 0 : index
    %c0_77 = arith.constant 0 : index
    %141 = vector.load %arg5[%c0_75, %140, %c0_76, %c0_77] : memref<1x8x8x128xf32, #tpu.memory_space<vmem>>, vector<1x1x8x128xf32>
    %142 = vector.shape_cast %141 : vector<1x1x8x128xf32> to vector<8x128xf32>
    %143 = vector.broadcast %133 : f32 to vector<8x128xf32>
    %144 = arith.mulf %142, %143 : vector<8x128xf32>
    %145 = arith.addf %139, %144 : vector<8x128xf32>
    %c0_78 = arith.constant 0 : index
    %c0_79 = arith.constant 0 : index
    %146 = vector.load %arg10[%c0_78, %c0_79] : memref<16x8xf32, #tpu.memory_space<vmem>>, vector<16x8xf32>
    %cst_80 = arith.constant dense<0.000000e+00> : vector<16x128xf32>
    %147 = tpu.matmul %146, %145, %cst_80 {dimension_numbers = #tpu.dot_dimension_numbers<[1], [0], [0], [1], [0, 0, 1, 1], [], []>} : vector<16x8xf32>, vector<8x128xf32>, vector<16x128xf32> -> vector<16x128xf32>
    %148 = arith.addf %127, %147 : vector<16x128xf32>
    %c1_81 = arith.constant 1 : index
    %149 = arith.index_cast %126 : i32 to index
    %150 = memref.load %arg2[%c1_81, %149] : memref<5x16xi32, #tpu.memory_space<smem>>
    %c1_82 = arith.constant 1 : index
    %151 = arith.index_cast %126 : i32 to index
    %152 = memref.load %arg3[%c1_82, %151] : memref<5x16xi32, #tpu.memory_space<smem>>
    %c1_83 = arith.constant 1 : index
    %153 = arith.index_cast %126 : i32 to index
    %154 = memref.load %arg4[%c1_83, %153] : memref<5x16xf32, #tpu.memory_space<smem>>
    %c0_84 = arith.constant 0 : index
    %155 = arith.index_cast %150 : i32 to index
    %c0_85 = arith.constant 0 : index
    %c0_86 = arith.constant 0 : index
    %156 = vector.load %arg6[%c0_84, %155, %c0_85, %c0_86] : memref<1x4x4x128xf32, #tpu.memory_space<vmem>>, vector<1x1x4x128xf32>
    %157 = vector.shape_cast %156 : vector<1x1x4x128xf32> to vector<4x128xf32>
    %cst_87 = arith.constant 1.000000e+00 : f32
    %158 = arith.subf %cst_87, %154 : f32
    %159 = vector.broadcast %158 : f32 to vector<4x128xf32>
    %160 = arith.mulf %157, %159 : vector<4x128xf32>
    %c0_88 = arith.constant 0 : index
    %161 = arith.index_cast %152 : i32 to index
    %c0_89 = arith.constant 0 : index
    %c0_90 = arith.constant 0 : index
    %162 = vector.load %arg6[%c0_88, %161, %c0_89, %c0_90] : memref<1x4x4x128xf32, #tpu.memory_space<vmem>>, vector<1x1x4x128xf32>
    %163 = vector.shape_cast %162 : vector<1x1x4x128xf32> to vector<4x128xf32>
    %164 = vector.broadcast %154 : f32 to vector<4x128xf32>
    %165 = arith.mulf %163, %164 : vector<4x128xf32>
    %166 = arith.addf %160, %165 : vector<4x128xf32>
    %c0_91 = arith.constant 0 : index
    %c0_92 = arith.constant 0 : index
    %167 = vector.load %arg11[%c0_91, %c0_92] : memref<16x4xf32, #tpu.memory_space<vmem>>, vector<16x4xf32>
    %cst_93 = arith.constant dense<0.000000e+00> : vector<16x128xf32>
    %168 = tpu.matmul %167, %166, %cst_93 {dimension_numbers = #tpu.dot_dimension_numbers<[1], [0], [0], [1], [0, 0, 1, 1], [], []>} : vector<16x4xf32>, vector<4x128xf32>, vector<16x128xf32> -> vector<16x128xf32>
    %169 = arith.addf %148, %168 : vector<16x128xf32>
    %c2_94 = arith.constant 2 : index
    %170 = arith.index_cast %126 : i32 to index
    %171 = memref.load %arg2[%c2_94, %170] : memref<5x16xi32, #tpu.memory_space<smem>>
    %c2_95 = arith.constant 2 : index
    %172 = arith.index_cast %126 : i32 to index
    %173 = memref.load %arg3[%c2_95, %172] : memref<5x16xi32, #tpu.memory_space<smem>>
    %c2_96 = arith.constant 2 : index
    %174 = arith.index_cast %126 : i32 to index
    %175 = memref.load %arg4[%c2_96, %174] : memref<5x16xf32, #tpu.memory_space<smem>>
    %c0_97 = arith.constant 0 : index
    %176 = arith.index_cast %171 : i32 to index
    %c0_98 = arith.constant 0 : index
    %c0_99 = arith.constant 0 : index
    %177 = vector.load %arg7[%c0_97, %176, %c0_98, %c0_99] : memref<1x2x2x128xf32, #tpu.memory_space<vmem>>, vector<1x1x2x128xf32>
    %178 = vector.shape_cast %177 : vector<1x1x2x128xf32> to vector<2x128xf32>
    %cst_100 = arith.constant 1.000000e+00 : f32
    %179 = arith.subf %cst_100, %175 : f32
    %180 = vector.broadcast %179 : f32 to vector<2x128xf32>
    %181 = arith.mulf %178, %180 : vector<2x128xf32>
    %c0_101 = arith.constant 0 : index
    %182 = arith.index_cast %173 : i32 to index
    %c0_102 = arith.constant 0 : index
    %c0_103 = arith.constant 0 : index
    %183 = vector.load %arg7[%c0_101, %182, %c0_102, %c0_103] : memref<1x2x2x128xf32, #tpu.memory_space<vmem>>, vector<1x1x2x128xf32>
    %184 = vector.shape_cast %183 : vector<1x1x2x128xf32> to vector<2x128xf32>
    %185 = vector.broadcast %175 : f32 to vector<2x128xf32>
    %186 = arith.mulf %184, %185 : vector<2x128xf32>
    %187 = arith.addf %181, %186 : vector<2x128xf32>
    %c0_104 = arith.constant 0 : index
    %c0_105 = arith.constant 0 : index
    %188 = vector.load %arg12[%c0_104, %c0_105] : memref<16x2xf32, #tpu.memory_space<vmem>>, vector<16x2xf32>
    %cst_106 = arith.constant dense<0.000000e+00> : vector<16x128xf32>
    %189 = tpu.matmul %188, %187, %cst_106 {dimension_numbers = #tpu.dot_dimension_numbers<[1], [0], [0], [1], [0, 0, 1, 1], [], []>} : vector<16x2xf32>, vector<2x128xf32>, vector<16x128xf32> -> vector<16x128xf32>
    %190 = arith.addf %169, %189 : vector<16x128xf32>
    %c3_107 = arith.constant 3 : index
    %191 = arith.index_cast %126 : i32 to index
    %192 = memref.load %arg2[%c3_107, %191] : memref<5x16xi32, #tpu.memory_space<smem>>
    %c3_108 = arith.constant 3 : index
    %193 = arith.index_cast %126 : i32 to index
    %194 = memref.load %arg3[%c3_108, %193] : memref<5x16xi32, #tpu.memory_space<smem>>
    %c3_109 = arith.constant 3 : index
    %195 = arith.index_cast %126 : i32 to index
    %196 = memref.load %arg4[%c3_109, %195] : memref<5x16xf32, #tpu.memory_space<smem>>
    %c0_110 = arith.constant 0 : index
    %197 = arith.index_cast %192 : i32 to index
    %c0_111 = arith.constant 0 : index
    %c0_112 = arith.constant 0 : index
    %198 = vector.load %arg8[%c0_110, %197, %c0_111, %c0_112] : memref<1x2x2x128xf32, #tpu.memory_space<vmem>>, vector<1x1x2x128xf32>
    %199 = vector.shape_cast %198 : vector<1x1x2x128xf32> to vector<2x128xf32>
    %cst_113 = arith.constant 1.000000e+00 : f32
    %200 = arith.subf %cst_113, %196 : f32
    %201 = vector.broadcast %200 : f32 to vector<2x128xf32>
    %202 = arith.mulf %199, %201 : vector<2x128xf32>
    %c0_114 = arith.constant 0 : index
    %203 = arith.index_cast %194 : i32 to index
    %c0_115 = arith.constant 0 : index
    %c0_116 = arith.constant 0 : index
    %204 = vector.load %arg8[%c0_114, %203, %c0_115, %c0_116] : memref<1x2x2x128xf32, #tpu.memory_space<vmem>>, vector<1x1x2x128xf32>
    %205 = vector.shape_cast %204 : vector<1x1x2x128xf32> to vector<2x128xf32>
    %206 = vector.broadcast %196 : f32 to vector<2x128xf32>
    %207 = arith.mulf %205, %206 : vector<2x128xf32>
    %208 = arith.addf %202, %207 : vector<2x128xf32>
    %c0_117 = arith.constant 0 : index
    %c0_118 = arith.constant 0 : index
    %209 = vector.load %arg13[%c0_117, %c0_118] : memref<16x2xf32, #tpu.memory_space<vmem>>, vector<16x2xf32>
    %cst_119 = arith.constant dense<0.000000e+00> : vector<16x128xf32>
    %210 = tpu.matmul %209, %208, %cst_119 {dimension_numbers = #tpu.dot_dimension_numbers<[1], [0], [0], [1], [0, 0, 1, 1], [], []>} : vector<16x2xf32>, vector<2x128xf32>, vector<16x128xf32> -> vector<16x128xf32>
    %211 = arith.addf %190, %210 : vector<16x128xf32>
    %c4_120 = arith.constant 4 : index
    %212 = arith.index_cast %126 : i32 to index
    %213 = memref.load %arg2[%c4_120, %212] : memref<5x16xi32, #tpu.memory_space<smem>>
    %c4_121 = arith.constant 4 : index
    %214 = arith.index_cast %126 : i32 to index
    %215 = memref.load %arg3[%c4_121, %214] : memref<5x16xi32, #tpu.memory_space<smem>>
    %c4_122 = arith.constant 4 : index
    %216 = arith.index_cast %126 : i32 to index
    %217 = memref.load %arg4[%c4_122, %216] : memref<5x16xf32, #tpu.memory_space<smem>>
    %c0_123 = arith.constant 0 : index
    %218 = arith.index_cast %213 : i32 to index
    %c0_124 = arith.constant 0 : index
    %c0_125 = arith.constant 0 : index
    %219 = vector.load %arg9[%c0_123, %218, %c0_124, %c0_125] : memref<1x16x16x128xf32, #tpu.memory_space<vmem>>, vector<1x1x16x128xf32>
    %220 = vector.shape_cast %219 : vector<1x1x16x128xf32> to vector<16x128xf32>
    %cst_126 = arith.constant 1.000000e+00 : f32
    %221 = arith.subf %cst_126, %217 : f32
    %222 = vector.broadcast %221 : f32 to vector<16x128xf32>
    %223 = arith.mulf %220, %222 : vector<16x128xf32>
    %c0_127 = arith.constant 0 : index
    %224 = arith.index_cast %215 : i32 to index
    %c0_128 = arith.constant 0 : index
    %c0_129 = arith.constant 0 : index
    %225 = vector.load %arg9[%c0_127, %224, %c0_128, %c0_129] : memref<1x16x16x128xf32, #tpu.memory_space<vmem>>, vector<1x1x16x128xf32>
    %226 = vector.shape_cast %225 : vector<1x1x16x128xf32> to vector<16x128xf32>
    %227 = vector.broadcast %217 : f32 to vector<16x128xf32>
    %228 = arith.mulf %226, %227 : vector<16x128xf32>
    %229 = arith.addf %223, %228 : vector<16x128xf32>
    %c0_130 = arith.constant 0 : index
    %c0_131 = arith.constant 0 : index
    %230 = vector.load %arg14[%c0_130, %c0_131] : memref<16x16xf32, #tpu.memory_space<vmem>>, vector<16x16xf32>
    %cst_132 = arith.constant dense<0.000000e+00> : vector<16x128xf32>
    %231 = tpu.matmul %230, %229, %cst_132 {dimension_numbers = #tpu.dot_dimension_numbers<[1], [0], [0], [1], [0, 0, 1, 1], [], []>} : vector<16x16xf32>, vector<16x128xf32>, vector<16x128xf32> -> vector<16x128xf32>
    %232 = arith.addf %211, %231 : vector<16x128xf32>
    %cst_133 = arith.constant 0.000000e+00 : f32
    %233 = vector.broadcast %cst_133 : f32 to vector<16x128xf32>
    %234 = arith.maximumf %232, %233 : vector<16x128xf32>
    %235 = vector.broadcast %124 : f32 to vector<16x128xf32>
    %236 = arith.mulf %234, %235 : vector<16x128xf32>
    %c1_i32 = arith.constant 1 : i32
    %237 = arith.addi %0, %c1_i32 : i32
    %c0_i32_134 = arith.constant 0 : i32
    %238 = arith.cmpi sge, %237, %c0_i32_134 : i32
    %c16_i32_135 = arith.constant 16 : i32
    %239 = arith.cmpi slt, %237, %c16_i32_135 : i32
    %240 = arith.andi %238, %239 : i1
    %241 = arith.extui %240 : i1 to i32
    %242 = arith.sitofp %241 : i32 to f32
    %c0_i32_136 = arith.constant 0 : i32
    %c15_i32_137 = arith.constant 15 : i32
    %243 = arith.maxsi %c0_i32_136, %237 : i32
    %244 = arith.minsi %c15_i32_137, %243 : i32
    %cst_138 = arith.constant 0.000000e+00 : f32
    %245 = vector.broadcast %cst_138 : f32 to vector<16x128xf32>
    %c0_139 = arith.constant 0 : index
    %246 = arith.index_cast %244 : i32 to index
    %247 = memref.load %arg2[%c0_139, %246] : memref<5x16xi32, #tpu.memory_space<smem>>
    %c0_140 = arith.constant 0 : index
    %248 = arith.index_cast %244 : i32 to index
    %249 = memref.load %arg3[%c0_140, %248] : memref<5x16xi32, #tpu.memory_space<smem>>
    %c0_141 = arith.constant 0 : index
    %250 = arith.index_cast %244 : i32 to index
    %251 = memref.load %arg4[%c0_141, %250] : memref<5x16xf32, #tpu.memory_space<smem>>
    %c0_142 = arith.constant 0 : index
    %252 = arith.index_cast %247 : i32 to index
    %c0_143 = arith.constant 0 : index
    %c0_144 = arith.constant 0 : index
    %253 = vector.load %arg5[%c0_142, %252, %c0_143, %c0_144] : memref<1x8x8x128xf32, #tpu.memory_space<vmem>>, vector<1x1x8x128xf32>
    %254 = vector.shape_cast %253 : vector<1x1x8x128xf32> to vector<8x128xf32>
    %cst_145 = arith.constant 1.000000e+00 : f32
    %255 = arith.subf %cst_145, %251 : f32
    %256 = vector.broadcast %255 : f32 to vector<8x128xf32>
    %257 = arith.mulf %254, %256 : vector<8x128xf32>
    %c0_146 = arith.constant 0 : index
    %258 = arith.index_cast %249 : i32 to index
    %c0_147 = arith.constant 0 : index
    %c0_148 = arith.constant 0 : index
    %259 = vector.load %arg5[%c0_146, %258, %c0_147, %c0_148] : memref<1x8x8x128xf32, #tpu.memory_space<vmem>>, vector<1x1x8x128xf32>
    %260 = vector.shape_cast %259 : vector<1x1x8x128xf32> to vector<8x128xf32>
    %261 = vector.broadcast %251 : f32 to vector<8x128xf32>
    %262 = arith.mulf %260, %261 : vector<8x128xf32>
    %263 = arith.addf %257, %262 : vector<8x128xf32>
    %c0_149 = arith.constant 0 : index
    %c0_150 = arith.constant 0 : index
    %264 = vector.load %arg10[%c0_149, %c0_150] : memref<16x8xf32, #tpu.memory_space<vmem>>, vector<16x8xf32>
    %cst_151 = arith.constant dense<0.000000e+00> : vector<16x128xf32>
    %265 = tpu.matmul %264, %263, %cst_151 {dimension_numbers = #tpu.dot_dimension_numbers<[1], [0], [0], [1], [0, 0, 1, 1], [], []>} : vector<16x8xf32>, vector<8x128xf32>, vector<16x128xf32> -> vector<16x128xf32>
    %266 = arith.addf %245, %265 : vector<16x128xf32>
    %c1_152 = arith.constant 1 : index
    %267 = arith.index_cast %244 : i32 to index
    %268 = memref.load %arg2[%c1_152, %267] : memref<5x16xi32, #tpu.memory_space<smem>>
    %c1_153 = arith.constant 1 : index
    %269 = arith.index_cast %244 : i32 to index
    %270 = memref.load %arg3[%c1_153, %269] : memref<5x16xi32, #tpu.memory_space<smem>>
    %c1_154 = arith.constant 1 : index
    %271 = arith.index_cast %244 : i32 to index
    %272 = memref.load %arg4[%c1_154, %271] : memref<5x16xf32, #tpu.memory_space<smem>>
    %c0_155 = arith.constant 0 : index
    %273 = arith.index_cast %268 : i32 to index
    %c0_156 = arith.constant 0 : index
    %c0_157 = arith.constant 0 : index
    %274 = vector.load %arg6[%c0_155, %273, %c0_156, %c0_157] : memref<1x4x4x128xf32, #tpu.memory_space<vmem>>, vector<1x1x4x128xf32>
    %275 = vector.shape_cast %274 : vector<1x1x4x128xf32> to vector<4x128xf32>
    %cst_158 = arith.constant 1.000000e+00 : f32
    %276 = arith.subf %cst_158, %272 : f32
    %277 = vector.broadcast %276 : f32 to vector<4x128xf32>
    %278 = arith.mulf %275, %277 : vector<4x128xf32>
    %c0_159 = arith.constant 0 : index
    %279 = arith.index_cast %270 : i32 to index
    %c0_160 = arith.constant 0 : index
    %c0_161 = arith.constant 0 : index
    %280 = vector.load %arg6[%c0_159, %279, %c0_160, %c0_161] : memref<1x4x4x128xf32, #tpu.memory_space<vmem>>, vector<1x1x4x128xf32>
    %281 = vector.shape_cast %280 : vector<1x1x4x128xf32> to vector<4x128xf32>
    %282 = vector.broadcast %272 : f32 to vector<4x128xf32>
    %283 = arith.mulf %281, %282 : vector<4x128xf32>
    %284 = arith.addf %278, %283 : vector<4x128xf32>
    %c0_162 = arith.constant 0 : index
    %c0_163 = arith.constant 0 : index
    %285 = vector.load %arg11[%c0_162, %c0_163] : memref<16x4xf32, #tpu.memory_space<vmem>>, vector<16x4xf32>
    %cst_164 = arith.constant dense<0.000000e+00> : vector<16x128xf32>
    %286 = tpu.matmul %285, %284, %cst_164 {dimension_numbers = #tpu.dot_dimension_numbers<[1], [0], [0], [1], [0, 0, 1, 1], [], []>} : vector<16x4xf32>, vector<4x128xf32>, vector<16x128xf32> -> vector<16x128xf32>
    %287 = arith.addf %266, %286 : vector<16x128xf32>
    %c2_165 = arith.constant 2 : index
    %288 = arith.index_cast %244 : i32 to index
    %289 = memref.load %arg2[%c2_165, %288] : memref<5x16xi32, #tpu.memory_space<smem>>
    %c2_166 = arith.constant 2 : index
    %290 = arith.index_cast %244 : i32 to index
    %291 = memref.load %arg3[%c2_166, %290] : memref<5x16xi32, #tpu.memory_space<smem>>
    %c2_167 = arith.constant 2 : index
    %292 = arith.index_cast %244 : i32 to index
    %293 = memref.load %arg4[%c2_167, %292] : memref<5x16xf32, #tpu.memory_space<smem>>
    %c0_168 = arith.constant 0 : index
    %294 = arith.index_cast %289 : i32 to index
    %c0_169 = arith.constant 0 : index
    %c0_170 = arith.constant 0 : index
    %295 = vector.load %arg7[%c0_168, %294, %c0_169, %c0_170] : memref<1x2x2x128xf32, #tpu.memory_space<vmem>>, vector<1x1x2x128xf32>
    %296 = vector.shape_cast %295 : vector<1x1x2x128xf32> to vector<2x128xf32>
    %cst_171 = arith.constant 1.000000e+00 : f32
    %297 = arith.subf %cst_171, %293 : f32
    %298 = vector.broadcast %297 : f32 to vector<2x128xf32>
    %299 = arith.mulf %296, %298 : vector<2x128xf32>
    %c0_172 = arith.constant 0 : index
    %300 = arith.index_cast %291 : i32 to index
    %c0_173 = arith.constant 0 : index
    %c0_174 = arith.constant 0 : index
    %301 = vector.load %arg7[%c0_172, %300, %c0_173, %c0_174] : memref<1x2x2x128xf32, #tpu.memory_space<vmem>>, vector<1x1x2x128xf32>
    %302 = vector.shape_cast %301 : vector<1x1x2x128xf32> to vector<2x128xf32>
    %303 = vector.broadcast %293 : f32 to vector<2x128xf32>
    %304 = arith.mulf %302, %303 : vector<2x128xf32>
    %305 = arith.addf %299, %304 : vector<2x128xf32>
    %c0_175 = arith.constant 0 : index
    %c0_176 = arith.constant 0 : index
    %306 = vector.load %arg12[%c0_175, %c0_176] : memref<16x2xf32, #tpu.memory_space<vmem>>, vector<16x2xf32>
    %cst_177 = arith.constant dense<0.000000e+00> : vector<16x128xf32>
    %307 = tpu.matmul %306, %305, %cst_177 {dimension_numbers = #tpu.dot_dimension_numbers<[1], [0], [0], [1], [0, 0, 1, 1], [], []>} : vector<16x2xf32>, vector<2x128xf32>, vector<16x128xf32> -> vector<16x128xf32>
    %308 = arith.addf %287, %307 : vector<16x128xf32>
    %c3_178 = arith.constant 3 : index
    %309 = arith.index_cast %244 : i32 to index
    %310 = memref.load %arg2[%c3_178, %309] : memref<5x16xi32, #tpu.memory_space<smem>>
    %c3_179 = arith.constant 3 : index
    %311 = arith.index_cast %244 : i32 to index
    %312 = memref.load %arg3[%c3_179, %311] : memref<5x16xi32, #tpu.memory_space<smem>>
    %c3_180 = arith.constant 3 : index
    %313 = arith.index_cast %244 : i32 to index
    %314 = memref.load %arg4[%c3_180, %313] : memref<5x16xf32, #tpu.memory_space<smem>>
    %c0_181 = arith.constant 0 : index
    %315 = arith.index_cast %310 : i32 to index
    %c0_182 = arith.constant 0 : index
    %c0_183 = arith.constant 0 : index
    %316 = vector.load %arg8[%c0_181, %315, %c0_182, %c0_183] : memref<1x2x2x128xf32, #tpu.memory_space<vmem>>, vector<1x1x2x128xf32>
    %317 = vector.shape_cast %316 : vector<1x1x2x128xf32> to vector<2x128xf32>
    %cst_184 = arith.constant 1.000000e+00 : f32
    %318 = arith.subf %cst_184, %314 : f32
    %319 = vector.broadcast %318 : f32 to vector<2x128xf32>
    %320 = arith.mulf %317, %319 : vector<2x128xf32>
    %c0_185 = arith.constant 0 : index
    %321 = arith.index_cast %312 : i32 to index
    %c0_186 = arith.constant 0 : index
    %c0_187 = arith.constant 0 : index
    %322 = vector.load %arg8[%c0_185, %321, %c0_186, %c0_187] : memref<1x2x2x128xf32, #tpu.memory_space<vmem>>, vector<1x1x2x128xf32>
    %323 = vector.shape_cast %322 : vector<1x1x2x128xf32> to vector<2x128xf32>
    %324 = vector.broadcast %314 : f32 to vector<2x128xf32>
    %325 = arith.mulf %323, %324 : vector<2x128xf32>
    %326 = arith.addf %320, %325 : vector<2x128xf32>
    %c0_188 = arith.constant 0 : index
    %c0_189 = arith.constant 0 : index
    %327 = vector.load %arg13[%c0_188, %c0_189] : memref<16x2xf32, #tpu.memory_space<vmem>>, vector<16x2xf32>
    %cst_190 = arith.constant dense<0.000000e+00> : vector<16x128xf32>
    %328 = tpu.matmul %327, %326, %cst_190 {dimension_numbers = #tpu.dot_dimension_numbers<[1], [0], [0], [1], [0, 0, 1, 1], [], []>} : vector<16x2xf32>, vector<2x128xf32>, vector<16x128xf32> -> vector<16x128xf32>
    %329 = arith.addf %308, %328 : vector<16x128xf32>
    %c4_191 = arith.constant 4 : index
    %330 = arith.index_cast %244 : i32 to index
    %331 = memref.load %arg2[%c4_191, %330] : memref<5x16xi32, #tpu.memory_space<smem>>
    %c4_192 = arith.constant 4 : index
    %332 = arith.index_cast %244 : i32 to index
    %333 = memref.load %arg3[%c4_192, %332] : memref<5x16xi32, #tpu.memory_space<smem>>
    %c4_193 = arith.constant 4 : index
    %334 = arith.index_cast %244 : i32 to index
    %335 = memref.load %arg4[%c4_193, %334] : memref<5x16xf32, #tpu.memory_space<smem>>
    %c0_194 = arith.constant 0 : index
    %336 = arith.index_cast %331 : i32 to index
    %c0_195 = arith.constant 0 : index
    %c0_196 = arith.constant 0 : index
    %337 = vector.load %arg9[%c0_194, %336, %c0_195, %c0_196] : memref<1x16x16x128xf32, #tpu.memory_space<vmem>>, vector<1x1x16x128xf32>
    %338 = vector.shape_cast %337 : vector<1x1x16x128xf32> to vector<16x128xf32>
    %cst_197 = arith.constant 1.000000e+00 : f32
    %339 = arith.subf %cst_197, %335 : f32
    %340 = vector.broadcast %339 : f32 to vector<16x128xf32>
    %341 = arith.mulf %338, %340 : vector<16x128xf32>
    %c0_198 = arith.constant 0 : index
    %342 = arith.index_cast %333 : i32 to index
    %c0_199 = arith.constant 0 : index
    %c0_200 = arith.constant 0 : index
    %343 = vector.load %arg9[%c0_198, %342, %c0_199, %c0_200] : memref<1x16x16x128xf32, #tpu.memory_space<vmem>>, vector<1x1x16x128xf32>
    %344 = vector.shape_cast %343 : vector<1x1x16x128xf32> to vector<16x128xf32>
    %345 = vector.broadcast %335 : f32 to vector<16x128xf32>
    %346 = arith.mulf %344, %345 : vector<16x128xf32>
    %347 = arith.addf %341, %346 : vector<16x128xf32>
    %c0_201 = arith.constant 0 : index
    %c0_202 = arith.constant 0 : index
    %348 = vector.load %arg14[%c0_201, %c0_202] : memref<16x16xf32, #tpu.memory_space<vmem>>, vector<16x16xf32>
    %cst_203 = arith.constant dense<0.000000e+00> : vector<16x128xf32>
    %349 = tpu.matmul %348, %347, %cst_203 {dimension_numbers = #tpu.dot_dimension_numbers<[1], [0], [0], [1], [0, 0, 1, 1], [], []>} : vector<16x16xf32>, vector<16x128xf32>, vector<16x128xf32> -> vector<16x128xf32>
    %350 = arith.addf %329, %349 : vector<16x128xf32>
    %cst_204 = arith.constant 0.000000e+00 : f32
    %351 = vector.broadcast %cst_204 : f32 to vector<16x128xf32>
    %352 = arith.maximumf %350, %351 : vector<16x128xf32>
    %353 = vector.broadcast %242 : f32 to vector<16x128xf32>
    %354 = arith.mulf %352, %353 : vector<16x128xf32>
    %c2_i32 = arith.constant 2 : i32
    %355 = arith.addi %0, %c2_i32 : i32
    %c0_i32_205 = arith.constant 0 : i32
    %356 = arith.cmpi sge, %355, %c0_i32_205 : i32
    %c16_i32_206 = arith.constant 16 : i32
    %357 = arith.cmpi slt, %355, %c16_i32_206 : i32
    %358 = arith.andi %356, %357 : i1
    %359 = arith.extui %358 : i1 to i32
    %360 = arith.sitofp %359 : i32 to f32
    %c0_i32_207 = arith.constant 0 : i32
    %c15_i32_208 = arith.constant 15 : i32
    %361 = arith.maxsi %c0_i32_207, %355 : i32
    %362 = arith.minsi %c15_i32_208, %361 : i32
    %cst_209 = arith.constant 0.000000e+00 : f32
    %363 = vector.broadcast %cst_209 : f32 to vector<16x128xf32>
    %c0_210 = arith.constant 0 : index
    %364 = arith.index_cast %362 : i32 to index
    %365 = memref.load %arg2[%c0_210, %364] : memref<5x16xi32, #tpu.memory_space<smem>>
    %c0_211 = arith.constant 0 : index
    %366 = arith.index_cast %362 : i32 to index
    %367 = memref.load %arg3[%c0_211, %366] : memref<5x16xi32, #tpu.memory_space<smem>>
    %c0_212 = arith.constant 0 : index
    %368 = arith.index_cast %362 : i32 to index
    %369 = memref.load %arg4[%c0_212, %368] : memref<5x16xf32, #tpu.memory_space<smem>>
    %c0_213 = arith.constant 0 : index
    %370 = arith.index_cast %365 : i32 to index
    %c0_214 = arith.constant 0 : index
    %c0_215 = arith.constant 0 : index
    %371 = vector.load %arg5[%c0_213, %370, %c0_214, %c0_215] : memref<1x8x8x128xf32, #tpu.memory_space<vmem>>, vector<1x1x8x128xf32>
    %372 = vector.shape_cast %371 : vector<1x1x8x128xf32> to vector<8x128xf32>
    %cst_216 = arith.constant 1.000000e+00 : f32
    %373 = arith.subf %cst_216, %369 : f32
    %374 = vector.broadcast %373 : f32 to vector<8x128xf32>
    %375 = arith.mulf %372, %374 : vector<8x128xf32>
    %c0_217 = arith.constant 0 : index
    %376 = arith.index_cast %367 : i32 to index
    %c0_218 = arith.constant 0 : index
    %c0_219 = arith.constant 0 : index
    %377 = vector.load %arg5[%c0_217, %376, %c0_218, %c0_219] : memref<1x8x8x128xf32, #tpu.memory_space<vmem>>, vector<1x1x8x128xf32>
    %378 = vector.shape_cast %377 : vector<1x1x8x128xf32> to vector<8x128xf32>
    %379 = vector.broadcast %369 : f32 to vector<8x128xf32>
    %380 = arith.mulf %378, %379 : vector<8x128xf32>
    %381 = arith.addf %375, %380 : vector<8x128xf32>
    %c0_220 = arith.constant 0 : index
    %c0_221 = arith.constant 0 : index
    %382 = vector.load %arg10[%c0_220, %c0_221] : memref<16x8xf32, #tpu.memory_space<vmem>>, vector<16x8xf32>
    %cst_222 = arith.constant dense<0.000000e+00> : vector<16x128xf32>
    %383 = tpu.matmul %382, %381, %cst_222 {dimension_numbers = #tpu.dot_dimension_numbers<[1], [0], [0], [1], [0, 0, 1, 1], [], []>} : vector<16x8xf32>, vector<8x128xf32>, vector<16x128xf32> -> vector<16x128xf32>
    %384 = arith.addf %363, %383 : vector<16x128xf32>
    %c1_223 = arith.constant 1 : index
    %385 = arith.index_cast %362 : i32 to index
    %386 = memref.load %arg2[%c1_223, %385] : memref<5x16xi32, #tpu.memory_space<smem>>
    %c1_224 = arith.constant 1 : index
    %387 = arith.index_cast %362 : i32 to index
    %388 = memref.load %arg3[%c1_224, %387] : memref<5x16xi32, #tpu.memory_space<smem>>
    %c1_225 = arith.constant 1 : index
    %389 = arith.index_cast %362 : i32 to index
    %390 = memref.load %arg4[%c1_225, %389] : memref<5x16xf32, #tpu.memory_space<smem>>
    %c0_226 = arith.constant 0 : index
    %391 = arith.index_cast %386 : i32 to index
    %c0_227 = arith.constant 0 : index
    %c0_228 = arith.constant 0 : index
    %392 = vector.load %arg6[%c0_226, %391, %c0_227, %c0_228] : memref<1x4x4x128xf32, #tpu.memory_space<vmem>>, vector<1x1x4x128xf32>
    %393 = vector.shape_cast %392 : vector<1x1x4x128xf32> to vector<4x128xf32>
    %cst_229 = arith.constant 1.000000e+00 : f32
    %394 = arith.subf %cst_229, %390 : f32
    %395 = vector.broadcast %394 : f32 to vector<4x128xf32>
    %396 = arith.mulf %393, %395 : vector<4x128xf32>
    %c0_230 = arith.constant 0 : index
    %397 = arith.index_cast %388 : i32 to index
    %c0_231 = arith.constant 0 : index
    %c0_232 = arith.constant 0 : index
    %398 = vector.load %arg6[%c0_230, %397, %c0_231, %c0_232] : memref<1x4x4x128xf32, #tpu.memory_space<vmem>>, vector<1x1x4x128xf32>
    %399 = vector.shape_cast %398 : vector<1x1x4x128xf32> to vector<4x128xf32>
    %400 = vector.broadcast %390 : f32 to vector<4x128xf32>
    %401 = arith.mulf %399, %400 : vector<4x128xf32>
    %402 = arith.addf %396, %401 : vector<4x128xf32>
    %c0_233 = arith.constant 0 : index
    %c0_234 = arith.constant 0 : index
    %403 = vector.load %arg11[%c0_233, %c0_234] : memref<16x4xf32, #tpu.memory_space<vmem>>, vector<16x4xf32>
    %cst_235 = arith.constant dense<0.000000e+00> : vector<16x128xf32>
    %404 = tpu.matmul %403, %402, %cst_235 {dimension_numbers = #tpu.dot_dimension_numbers<[1], [0], [0], [1], [0, 0, 1, 1], [], []>} : vector<16x4xf32>, vector<4x128xf32>, vector<16x128xf32> -> vector<16x128xf32>
    %405 = arith.addf %384, %404 : vector<16x128xf32>
    %c2_236 = arith.constant 2 : index
    %406 = arith.index_cast %362 : i32 to index
    %407 = memref.load %arg2[%c2_236, %406] : memref<5x16xi32, #tpu.memory_space<smem>>
    %c2_237 = arith.constant 2 : index
    %408 = arith.index_cast %362 : i32 to index
    %409 = memref.load %arg3[%c2_237, %408] : memref<5x16xi32, #tpu.memory_space<smem>>
    %c2_238 = arith.constant 2 : index
    %410 = arith.index_cast %362 : i32 to index
    %411 = memref.load %arg4[%c2_238, %410] : memref<5x16xf32, #tpu.memory_space<smem>>
    %c0_239 = arith.constant 0 : index
    %412 = arith.index_cast %407 : i32 to index
    %c0_240 = arith.constant 0 : index
    %c0_241 = arith.constant 0 : index
    %413 = vector.load %arg7[%c0_239, %412, %c0_240, %c0_241] : memref<1x2x2x128xf32, #tpu.memory_space<vmem>>, vector<1x1x2x128xf32>
    %414 = vector.shape_cast %413 : vector<1x1x2x128xf32> to vector<2x128xf32>
    %cst_242 = arith.constant 1.000000e+00 : f32
    %415 = arith.subf %cst_242, %411 : f32
    %416 = vector.broadcast %415 : f32 to vector<2x128xf32>
    %417 = arith.mulf %414, %416 : vector<2x128xf32>
    %c0_243 = arith.constant 0 : index
    %418 = arith.index_cast %409 : i32 to index
    %c0_244 = arith.constant 0 : index
    %c0_245 = arith.constant 0 : index
    %419 = vector.load %arg7[%c0_243, %418, %c0_244, %c0_245] : memref<1x2x2x128xf32, #tpu.memory_space<vmem>>, vector<1x1x2x128xf32>
    %420 = vector.shape_cast %419 : vector<1x1x2x128xf32> to vector<2x128xf32>
    %421 = vector.broadcast %411 : f32 to vector<2x128xf32>
    %422 = arith.mulf %420, %421 : vector<2x128xf32>
    %423 = arith.addf %417, %422 : vector<2x128xf32>
    %c0_246 = arith.constant 0 : index
    %c0_247 = arith.constant 0 : index
    %424 = vector.load %arg12[%c0_246, %c0_247] : memref<16x2xf32, #tpu.memory_space<vmem>>, vector<16x2xf32>
    %cst_248 = arith.constant dense<0.000000e+00> : vector<16x128xf32>
    %425 = tpu.matmul %424, %423, %cst_248 {dimension_numbers = #tpu.dot_dimension_numbers<[1], [0], [0], [1], [0, 0, 1, 1], [], []>} : vector<16x2xf32>, vector<2x128xf32>, vector<16x128xf32> -> vector<16x128xf32>
    %426 = arith.addf %405, %425 : vector<16x128xf32>
    %c3_249 = arith.constant 3 : index
    %427 = arith.index_cast %362 : i32 to index
    %428 = memref.load %arg2[%c3_249, %427] : memref<5x16xi32, #tpu.memory_space<smem>>
    %c3_250 = arith.constant 3 : index
    %429 = arith.index_cast %362 : i32 to index
    %430 = memref.load %arg3[%c3_250, %429] : memref<5x16xi32, #tpu.memory_space<smem>>
    %c3_251 = arith.constant 3 : index
    %431 = arith.index_cast %362 : i32 to index
    %432 = memref.load %arg4[%c3_251, %431] : memref<5x16xf32, #tpu.memory_space<smem>>
    %c0_252 = arith.constant 0 : index
    %433 = arith.index_cast %428 : i32 to index
    %c0_253 = arith.constant 0 : index
    %c0_254 = arith.constant 0 : index
    %434 = vector.load %arg8[%c0_252, %433, %c0_253, %c0_254] : memref<1x2x2x128xf32, #tpu.memory_space<vmem>>, vector<1x1x2x128xf32>
    %435 = vector.shape_cast %434 : vector<1x1x2x128xf32> to vector<2x128xf32>
    %cst_255 = arith.constant 1.000000e+00 : f32
    %436 = arith.subf %cst_255, %432 : f32
    %437 = vector.broadcast %436 : f32 to vector<2x128xf32>
    %438 = arith.mulf %435, %437 : vector<2x128xf32>
    %c0_256 = arith.constant 0 : index
    %439 = arith.index_cast %430 : i32 to index
    %c0_257 = arith.constant 0 : index
    %c0_258 = arith.constant 0 : index
    %440 = vector.load %arg8[%c0_256, %439, %c0_257, %c0_258] : memref<1x2x2x128xf32, #tpu.memory_space<vmem>>, vector<1x1x2x128xf32>
    %441 = vector.shape_cast %440 : vector<1x1x2x128xf32> to vector<2x128xf32>
    %442 = vector.broadcast %432 : f32 to vector<2x128xf32>
    %443 = arith.mulf %441, %442 : vector<2x128xf32>
    %444 = arith.addf %438, %443 : vector<2x128xf32>
    %c0_259 = arith.constant 0 : index
    %c0_260 = arith.constant 0 : index
    %445 = vector.load %arg13[%c0_259, %c0_260] : memref<16x2xf32, #tpu.memory_space<vmem>>, vector<16x2xf32>
    %cst_261 = arith.constant dense<0.000000e+00> : vector<16x128xf32>
    %446 = tpu.matmul %445, %444, %cst_261 {dimension_numbers = #tpu.dot_dimension_numbers<[1], [0], [0], [1], [0, 0, 1, 1], [], []>} : vector<16x2xf32>, vector<2x128xf32>, vector<16x128xf32> -> vector<16x128xf32>
    %447 = arith.addf %426, %446 : vector<16x128xf32>
    %c4_262 = arith.constant 4 : index
    %448 = arith.index_cast %362 : i32 to index
    %449 = memref.load %arg2[%c4_262, %448] : memref<5x16xi32, #tpu.memory_space<smem>>
    %c4_263 = arith.constant 4 : index
    %450 = arith.index_cast %362 : i32 to index
    %451 = memref.load %arg3[%c4_263, %450] : memref<5x16xi32, #tpu.memory_space<smem>>
    %c4_264 = arith.constant 4 : index
    %452 = arith.index_cast %362 : i32 to index
    %453 = memref.load %arg4[%c4_264, %452] : memref<5x16xf32, #tpu.memory_space<smem>>
    %c0_265 = arith.constant 0 : index
    %454 = arith.index_cast %449 : i32 to index
    %c0_266 = arith.constant 0 : index
    %c0_267 = arith.constant 0 : index
    %455 = vector.load %arg9[%c0_265, %454, %c0_266, %c0_267] : memref<1x16x16x128xf32, #tpu.memory_space<vmem>>, vector<1x1x16x128xf32>
    %456 = vector.shape_cast %455 : vector<1x1x16x128xf32> to vector<16x128xf32>
    %cst_268 = arith.constant 1.000000e+00 : f32
    %457 = arith.subf %cst_268, %453 : f32
    %458 = vector.broadcast %457 : f32 to vector<16x128xf32>
    %459 = arith.mulf %456, %458 : vector<16x128xf32>
    %c0_269 = arith.constant 0 : index
    %460 = arith.index_cast %451 : i32 to index
    %c0_270 = arith.constant 0 : index
    %c0_271 = arith.constant 0 : index
    %461 = vector.load %arg9[%c0_269, %460, %c0_270, %c0_271] : memref<1x16x16x128xf32, #tpu.memory_space<vmem>>, vector<1x1x16x128xf32>
    %462 = vector.shape_cast %461 : vector<1x1x16x128xf32> to vector<16x128xf32>
    %463 = vector.broadcast %453 : f32 to vector<16x128xf32>
    %464 = arith.mulf %462, %463 : vector<16x128xf32>
    %465 = arith.addf %459, %464 : vector<16x128xf32>
    %c0_272 = arith.constant 0 : index
    %c0_273 = arith.constant 0 : index
    %466 = vector.load %arg14[%c0_272, %c0_273] : memref<16x16xf32, #tpu.memory_space<vmem>>, vector<16x16xf32>
    %cst_274 = arith.constant dense<0.000000e+00> : vector<16x128xf32>
    %467 = tpu.matmul %466, %465, %cst_274 {dimension_numbers = #tpu.dot_dimension_numbers<[1], [0], [0], [1], [0, 0, 1, 1], [], []>} : vector<16x16xf32>, vector<16x128xf32>, vector<16x128xf32> -> vector<16x128xf32>
    %468 = arith.addf %447, %467 : vector<16x128xf32>
    %cst_275 = arith.constant 0.000000e+00 : f32
    %469 = vector.broadcast %cst_275 : f32 to vector<16x128xf32>
    %470 = arith.maximumf %468, %469 : vector<16x128xf32>
    %471 = vector.broadcast %360 : f32 to vector<16x128xf32>
    %472 = arith.mulf %470, %471 : vector<16x128xf32>
    %c3_i32 = arith.constant 3 : i32
    %473 = arith.addi %0, %c3_i32 : i32
    %c0_i32_276 = arith.constant 0 : i32
    %474 = arith.cmpi sge, %473, %c0_i32_276 : i32
    %c16_i32_277 = arith.constant 16 : i32
    %475 = arith.cmpi slt, %473, %c16_i32_277 : i32
    %476 = arith.andi %474, %475 : i1
    %477 = arith.extui %476 : i1 to i32
    %478 = arith.sitofp %477 : i32 to f32
    %c0_i32_278 = arith.constant 0 : i32
    %c15_i32_279 = arith.constant 15 : i32
    %479 = arith.maxsi %c0_i32_278, %473 : i32
    %480 = arith.minsi %c15_i32_279, %479 : i32
    %cst_280 = arith.constant 0.000000e+00 : f32
    %481 = vector.broadcast %cst_280 : f32 to vector<16x128xf32>
    %c0_281 = arith.constant 0 : index
    %482 = arith.index_cast %480 : i32 to index
    %483 = memref.load %arg2[%c0_281, %482] : memref<5x16xi32, #tpu.memory_space<smem>>
    %c0_282 = arith.constant 0 : index
    %484 = arith.index_cast %480 : i32 to index
    %485 = memref.load %arg3[%c0_282, %484] : memref<5x16xi32, #tpu.memory_space<smem>>
    %c0_283 = arith.constant 0 : index
    %486 = arith.index_cast %480 : i32 to index
    %487 = memref.load %arg4[%c0_283, %486] : memref<5x16xf32, #tpu.memory_space<smem>>
    %c0_284 = arith.constant 0 : index
    %488 = arith.index_cast %483 : i32 to index
    %c0_285 = arith.constant 0 : index
    %c0_286 = arith.constant 0 : index
    %489 = vector.load %arg5[%c0_284, %488, %c0_285, %c0_286] : memref<1x8x8x128xf32, #tpu.memory_space<vmem>>, vector<1x1x8x128xf32>
    %490 = vector.shape_cast %489 : vector<1x1x8x128xf32> to vector<8x128xf32>
    %cst_287 = arith.constant 1.000000e+00 : f32
    %491 = arith.subf %cst_287, %487 : f32
    %492 = vector.broadcast %491 : f32 to vector<8x128xf32>
    %493 = arith.mulf %490, %492 : vector<8x128xf32>
    %c0_288 = arith.constant 0 : index
    %494 = arith.index_cast %485 : i32 to index
    %c0_289 = arith.constant 0 : index
    %c0_290 = arith.constant 0 : index
    %495 = vector.load %arg5[%c0_288, %494, %c0_289, %c0_290] : memref<1x8x8x128xf32, #tpu.memory_space<vmem>>, vector<1x1x8x128xf32>
    %496 = vector.shape_cast %495 : vector<1x1x8x128xf32> to vector<8x128xf32>
    %497 = vector.broadcast %487 : f32 to vector<8x128xf32>
    %498 = arith.mulf %496, %497 : vector<8x128xf32>
    %499 = arith.addf %493, %498 : vector<8x128xf32>
    %c0_291 = arith.constant 0 : index
    %c0_292 = arith.constant 0 : index
    %500 = vector.load %arg10[%c0_291, %c0_292] : memref<16x8xf32, #tpu.memory_space<vmem>>, vector<16x8xf32>
    %cst_293 = arith.constant dense<0.000000e+00> : vector<16x128xf32>
    %501 = tpu.matmul %500, %499, %cst_293 {dimension_numbers = #tpu.dot_dimension_numbers<[1], [0], [0], [1], [0, 0, 1, 1], [], []>} : vector<16x8xf32>, vector<8x128xf32>, vector<16x128xf32> -> vector<16x128xf32>
    %502 = arith.addf %481, %501 : vector<16x128xf32>
    %c1_294 = arith.constant 1 : index
    %503 = arith.index_cast %480 : i32 to index
    %504 = memref.load %arg2[%c1_294, %503] : memref<5x16xi32, #tpu.memory_space<smem>>
    %c1_295 = arith.constant 1 : index
    %505 = arith.index_cast %480 : i32 to index
    %506 = memref.load %arg3[%c1_295, %505] : memref<5x16xi32, #tpu.memory_space<smem>>
    %c1_296 = arith.constant 1 : index
    %507 = arith.index_cast %480 : i32 to index
    %508 = memref.load %arg4[%c1_296, %507] : memref<5x16xf32, #tpu.memory_space<smem>>
    %c0_297 = arith.constant 0 : index
    %509 = arith.index_cast %504 : i32 to index
    %c0_298 = arith.constant 0 : index
    %c0_299 = arith.constant 0 : index
    %510 = vector.load %arg6[%c0_297, %509, %c0_298, %c0_299] : memref<1x4x4x128xf32, #tpu.memory_space<vmem>>, vector<1x1x4x128xf32>
    %511 = vector.shape_cast %510 : vector<1x1x4x128xf32> to vector<4x128xf32>
    %cst_300 = arith.constant 1.000000e+00 : f32
    %512 = arith.subf %cst_300, %508 : f32
    %513 = vector.broadcast %512 : f32 to vector<4x128xf32>
    %514 = arith.mulf %511, %513 : vector<4x128xf32>
    %c0_301 = arith.constant 0 : index
    %515 = arith.index_cast %506 : i32 to index
    %c0_302 = arith.constant 0 : index
    %c0_303 = arith.constant 0 : index
    %516 = vector.load %arg6[%c0_301, %515, %c0_302, %c0_303] : memref<1x4x4x128xf32, #tpu.memory_space<vmem>>, vector<1x1x4x128xf32>
    %517 = vector.shape_cast %516 : vector<1x1x4x128xf32> to vector<4x128xf32>
    %518 = vector.broadcast %508 : f32 to vector<4x128xf32>
    %519 = arith.mulf %517, %518 : vector<4x128xf32>
    %520 = arith.addf %514, %519 : vector<4x128xf32>
    %c0_304 = arith.constant 0 : index
    %c0_305 = arith.constant 0 : index
    %521 = vector.load %arg11[%c0_304, %c0_305] : memref<16x4xf32, #tpu.memory_space<vmem>>, vector<16x4xf32>
    %cst_306 = arith.constant dense<0.000000e+00> : vector<16x128xf32>
    %522 = tpu.matmul %521, %520, %cst_306 {dimension_numbers = #tpu.dot_dimension_numbers<[1], [0], [0], [1], [0, 0, 1, 1], [], []>} : vector<16x4xf32>, vector<4x128xf32>, vector<16x128xf32> -> vector<16x128xf32>
    %523 = arith.addf %502, %522 : vector<16x128xf32>
    %c2_307 = arith.constant 2 : index
    %524 = arith.index_cast %480 : i32 to index
    %525 = memref.load %arg2[%c2_307, %524] : memref<5x16xi32, #tpu.memory_space<smem>>
    %c2_308 = arith.constant 2 : index
    %526 = arith.index_cast %480 : i32 to index
    %527 = memref.load %arg3[%c2_308, %526] : memref<5x16xi32, #tpu.memory_space<smem>>
    %c2_309 = arith.constant 2 : index
    %528 = arith.index_cast %480 : i32 to index
    %529 = memref.load %arg4[%c2_309, %528] : memref<5x16xf32, #tpu.memory_space<smem>>
    %c0_310 = arith.constant 0 : index
    %530 = arith.index_cast %525 : i32 to index
    %c0_311 = arith.constant 0 : index
    %c0_312 = arith.constant 0 : index
    %531 = vector.load %arg7[%c0_310, %530, %c0_311, %c0_312] : memref<1x2x2x128xf32, #tpu.memory_space<vmem>>, vector<1x1x2x128xf32>
    %532 = vector.shape_cast %531 : vector<1x1x2x128xf32> to vector<2x128xf32>
    %cst_313 = arith.constant 1.000000e+00 : f32
    %533 = arith.subf %cst_313, %529 : f32
    %534 = vector.broadcast %533 : f32 to vector<2x128xf32>
    %535 = arith.mulf %532, %534 : vector<2x128xf32>
    %c0_314 = arith.constant 0 : index
    %536 = arith.index_cast %527 : i32 to index
    %c0_315 = arith.constant 0 : index
    %c0_316 = arith.constant 0 : index
    %537 = vector.load %arg7[%c0_314, %536, %c0_315, %c0_316] : memref<1x2x2x128xf32, #tpu.memory_space<vmem>>, vector<1x1x2x128xf32>
    %538 = vector.shape_cast %537 : vector<1x1x2x128xf32> to vector<2x128xf32>
    %539 = vector.broadcast %529 : f32 to vector<2x128xf32>
    %540 = arith.mulf %538, %539 : vector<2x128xf32>
    %541 = arith.addf %535, %540 : vector<2x128xf32>
    %c0_317 = arith.constant 0 : index
    %c0_318 = arith.constant 0 : index
    %542 = vector.load %arg12[%c0_317, %c0_318] : memref<16x2xf32, #tpu.memory_space<vmem>>, vector<16x2xf32>
    %cst_319 = arith.constant dense<0.000000e+00> : vector<16x128xf32>
    %543 = tpu.matmul %542, %541, %cst_319 {dimension_numbers = #tpu.dot_dimension_numbers<[1], [0], [0], [1], [0, 0, 1, 1], [], []>} : vector<16x2xf32>, vector<2x128xf32>, vector<16x128xf32> -> vector<16x128xf32>
    %544 = arith.addf %523, %543 : vector<16x128xf32>
    %c3_320 = arith.constant 3 : index
    %545 = arith.index_cast %480 : i32 to index
    %546 = memref.load %arg2[%c3_320, %545] : memref<5x16xi32, #tpu.memory_space<smem>>
    %c3_321 = arith.constant 3 : index
    %547 = arith.index_cast %480 : i32 to index
    %548 = memref.load %arg3[%c3_321, %547] : memref<5x16xi32, #tpu.memory_space<smem>>
    %c3_322 = arith.constant 3 : index
    %549 = arith.index_cast %480 : i32 to index
    %550 = memref.load %arg4[%c3_322, %549] : memref<5x16xf32, #tpu.memory_space<smem>>
    %c0_323 = arith.constant 0 : index
    %551 = arith.index_cast %546 : i32 to index
    %c0_324 = arith.constant 0 : index
    %c0_325 = arith.constant 0 : index
    %552 = vector.load %arg8[%c0_323, %551, %c0_324, %c0_325] : memref<1x2x2x128xf32, #tpu.memory_space<vmem>>, vector<1x1x2x128xf32>
    %553 = vector.shape_cast %552 : vector<1x1x2x128xf32> to vector<2x128xf32>
    %cst_326 = arith.constant 1.000000e+00 : f32
    %554 = arith.subf %cst_326, %550 : f32
    %555 = vector.broadcast %554 : f32 to vector<2x128xf32>
    %556 = arith.mulf %553, %555 : vector<2x128xf32>
    %c0_327 = arith.constant 0 : index
    %557 = arith.index_cast %548 : i32 to index
    %c0_328 = arith.constant 0 : index
    %c0_329 = arith.constant 0 : index
    %558 = vector.load %arg8[%c0_327, %557, %c0_328, %c0_329] : memref<1x2x2x128xf32, #tpu.memory_space<vmem>>, vector<1x1x2x128xf32>
    %559 = vector.shape_cast %558 : vector<1x1x2x128xf32> to vector<2x128xf32>
    %560 = vector.broadcast %550 : f32 to vector<2x128xf32>
    %561 = arith.mulf %559, %560 : vector<2x128xf32>
    %562 = arith.addf %556, %561 : vector<2x128xf32>
    %c0_330 = arith.constant 0 : index
    %c0_331 = arith.constant 0 : index
    %563 = vector.load %arg13[%c0_330, %c0_331] : memref<16x2xf32, #tpu.memory_space<vmem>>, vector<16x2xf32>
    %cst_332 = arith.constant dense<0.000000e+00> : vector<16x128xf32>
    %564 = tpu.matmul %563, %562, %cst_332 {dimension_numbers = #tpu.dot_dimension_numbers<[1], [0], [0], [1], [0, 0, 1, 1], [], []>} : vector<16x2xf32>, vector<2x128xf32>, vector<16x128xf32> -> vector<16x128xf32>
    %565 = arith.addf %544, %564 : vector<16x128xf32>
    %c4_333 = arith.constant 4 : index
    %566 = arith.index_cast %480 : i32 to index
    %567 = memref.load %arg2[%c4_333, %566] : memref<5x16xi32, #tpu.memory_space<smem>>
    %c4_334 = arith.constant 4 : index
    %568 = arith.index_cast %480 : i32 to index
    %569 = memref.load %arg3[%c4_334, %568] : memref<5x16xi32, #tpu.memory_space<smem>>
    %c4_335 = arith.constant 4 : index
    %570 = arith.index_cast %480 : i32 to index
    %571 = memref.load %arg4[%c4_335, %570] : memref<5x16xf32, #tpu.memory_space<smem>>
    %c0_336 = arith.constant 0 : index
    %572 = arith.index_cast %567 : i32 to index
    %c0_337 = arith.constant 0 : index
    %c0_338 = arith.constant 0 : index
    %573 = vector.load %arg9[%c0_336, %572, %c0_337, %c0_338] : memref<1x16x16x128xf32, #tpu.memory_space<vmem>>, vector<1x1x16x128xf32>
    %574 = vector.shape_cast %573 : vector<1x1x16x128xf32> to vector<16x128xf32>
    %cst_339 = arith.constant 1.000000e+00 : f32
    %575 = arith.subf %cst_339, %571 : f32
    %576 = vector.broadcast %575 : f32 to vector<16x128xf32>
    %577 = arith.mulf %574, %576 : vector<16x128xf32>
    %c0_340 = arith.constant 0 : index
    %578 = arith.index_cast %569 : i32 to index
    %c0_341 = arith.constant 0 : index
    %c0_342 = arith.constant 0 : index
    %579 = vector.load %arg9[%c0_340, %578, %c0_341, %c0_342] : memref<1x16x16x128xf32, #tpu.memory_space<vmem>>, vector<1x1x16x128xf32>
    %580 = vector.shape_cast %579 : vector<1x1x16x128xf32> to vector<16x128xf32>
    %581 = vector.broadcast %571 : f32 to vector<16x128xf32>
    %582 = arith.mulf %580, %581 : vector<16x128xf32>
    %583 = arith.addf %577, %582 : vector<16x128xf32>
    %c0_343 = arith.constant 0 : index
    %c0_344 = arith.constant 0 : index
    %584 = vector.load %arg14[%c0_343, %c0_344] : memref<16x16xf32, #tpu.memory_space<vmem>>, vector<16x16xf32>
    %cst_345 = arith.constant dense<0.000000e+00> : vector<16x128xf32>
    %585 = tpu.matmul %584, %583, %cst_345 {dimension_numbers = #tpu.dot_dimension_numbers<[1], [0], [0], [1], [0, 0, 1, 1], [], []>} : vector<16x16xf32>, vector<16x128xf32>, vector<16x128xf32> -> vector<16x128xf32>
    %586 = arith.addf %565, %585 : vector<16x128xf32>
    %cst_346 = arith.constant 0.000000e+00 : f32
    %587 = vector.broadcast %cst_346 : f32 to vector<16x128xf32>
    %588 = arith.maximumf %586, %587 : vector<16x128xf32>
    %589 = vector.broadcast %478 : f32 to vector<16x128xf32>
    %590 = arith.mulf %588, %589 : vector<16x128xf32>
    %c4_i32 = arith.constant 4 : i32
    %591 = arith.addi %0, %c4_i32 : i32
    %c0_i32_347 = arith.constant 0 : i32
    %592 = arith.cmpi sge, %591, %c0_i32_347 : i32
    %c16_i32_348 = arith.constant 16 : i32
    %593 = arith.cmpi slt, %591, %c16_i32_348 : i32
    %594 = arith.andi %592, %593 : i1
    %595 = arith.extui %594 : i1 to i32
    %596 = arith.sitofp %595 : i32 to f32
    %c0_i32_349 = arith.constant 0 : i32
    %c15_i32_350 = arith.constant 15 : i32
    %597 = arith.maxsi %c0_i32_349, %591 : i32
    %598 = arith.minsi %c15_i32_350, %597 : i32
    %cst_351 = arith.constant 0.000000e+00 : f32
    %599 = vector.broadcast %cst_351 : f32 to vector<16x128xf32>
    %c0_352 = arith.constant 0 : index
    %600 = arith.index_cast %598 : i32 to index
    %601 = memref.load %arg2[%c0_352, %600] : memref<5x16xi32, #tpu.memory_space<smem>>
    %c0_353 = arith.constant 0 : index
    %602 = arith.index_cast %598 : i32 to index
    %603 = memref.load %arg3[%c0_353, %602] : memref<5x16xi32, #tpu.memory_space<smem>>
    %c0_354 = arith.constant 0 : index
    %604 = arith.index_cast %598 : i32 to index
    %605 = memref.load %arg4[%c0_354, %604] : memref<5x16xf32, #tpu.memory_space<smem>>
    %c0_355 = arith.constant 0 : index
    %606 = arith.index_cast %601 : i32 to index
    %c0_356 = arith.constant 0 : index
    %c0_357 = arith.constant 0 : index
    %607 = vector.load %arg5[%c0_355, %606, %c0_356, %c0_357] : memref<1x8x8x128xf32, #tpu.memory_space<vmem>>, vector<1x1x8x128xf32>
    %608 = vector.shape_cast %607 : vector<1x1x8x128xf32> to vector<8x128xf32>
    %cst_358 = arith.constant 1.000000e+00 : f32
    %609 = arith.subf %cst_358, %605 : f32
    %610 = vector.broadcast %609 : f32 to vector<8x128xf32>
    %611 = arith.mulf %608, %610 : vector<8x128xf32>
    %c0_359 = arith.constant 0 : index
    %612 = arith.index_cast %603 : i32 to index
    %c0_360 = arith.constant 0 : index
    %c0_361 = arith.constant 0 : index
    %613 = vector.load %arg5[%c0_359, %612, %c0_360, %c0_361] : memref<1x8x8x128xf32, #tpu.memory_space<vmem>>, vector<1x1x8x128xf32>
    %614 = vector.shape_cast %613 : vector<1x1x8x128xf32> to vector<8x128xf32>
    %615 = vector.broadcast %605 : f32 to vector<8x128xf32>
    %616 = arith.mulf %614, %615 : vector<8x128xf32>
    %617 = arith.addf %611, %616 : vector<8x128xf32>
    %c0_362 = arith.constant 0 : index
    %c0_363 = arith.constant 0 : index
    %618 = vector.load %arg10[%c0_362, %c0_363] : memref<16x8xf32, #tpu.memory_space<vmem>>, vector<16x8xf32>
    %cst_364 = arith.constant dense<0.000000e+00> : vector<16x128xf32>
    %619 = tpu.matmul %618, %617, %cst_364 {dimension_numbers = #tpu.dot_dimension_numbers<[1], [0], [0], [1], [0, 0, 1, 1], [], []>} : vector<16x8xf32>, vector<8x128xf32>, vector<16x128xf32> -> vector<16x128xf32>
    %620 = arith.addf %599, %619 : vector<16x128xf32>
    %c1_365 = arith.constant 1 : index
    %621 = arith.index_cast %598 : i32 to index
    %622 = memref.load %arg2[%c1_365, %621] : memref<5x16xi32, #tpu.memory_space<smem>>
    %c1_366 = arith.constant 1 : index
    %623 = arith.index_cast %598 : i32 to index
    %624 = memref.load %arg3[%c1_366, %623] : memref<5x16xi32, #tpu.memory_space<smem>>
    %c1_367 = arith.constant 1 : index
    %625 = arith.index_cast %598 : i32 to index
    %626 = memref.load %arg4[%c1_367, %625] : memref<5x16xf32, #tpu.memory_space<smem>>
    %c0_368 = arith.constant 0 : index
    %627 = arith.index_cast %622 : i32 to index
    %c0_369 = arith.constant 0 : index
    %c0_370 = arith.constant 0 : index
    %628 = vector.load %arg6[%c0_368, %627, %c0_369, %c0_370] : memref<1x4x4x128xf32, #tpu.memory_space<vmem>>, vector<1x1x4x128xf32>
    %629 = vector.shape_cast %628 : vector<1x1x4x128xf32> to vector<4x128xf32>
    %cst_371 = arith.constant 1.000000e+00 : f32
    %630 = arith.subf %cst_371, %626 : f32
    %631 = vector.broadcast %630 : f32 to vector<4x128xf32>
    %632 = arith.mulf %629, %631 : vector<4x128xf32>
    %c0_372 = arith.constant 0 : index
    %633 = arith.index_cast %624 : i32 to index
    %c0_373 = arith.constant 0 : index
    %c0_374 = arith.constant 0 : index
    %634 = vector.load %arg6[%c0_372, %633, %c0_373, %c0_374] : memref<1x4x4x128xf32, #tpu.memory_space<vmem>>, vector<1x1x4x128xf32>
    %635 = vector.shape_cast %634 : vector<1x1x4x128xf32> to vector<4x128xf32>
    %636 = vector.broadcast %626 : f32 to vector<4x128xf32>
    %637 = arith.mulf %635, %636 : vector<4x128xf32>
    %638 = arith.addf %632, %637 : vector<4x128xf32>
    %c0_375 = arith.constant 0 : index
    %c0_376 = arith.constant 0 : index
    %639 = vector.load %arg11[%c0_375, %c0_376] : memref<16x4xf32, #tpu.memory_space<vmem>>, vector<16x4xf32>
    %cst_377 = arith.constant dense<0.000000e+00> : vector<16x128xf32>
    %640 = tpu.matmul %639, %638, %cst_377 {dimension_numbers = #tpu.dot_dimension_numbers<[1], [0], [0], [1], [0, 0, 1, 1], [], []>} : vector<16x4xf32>, vector<4x128xf32>, vector<16x128xf32> -> vector<16x128xf32>
    %641 = arith.addf %620, %640 : vector<16x128xf32>
    %c2_378 = arith.constant 2 : index
    %642 = arith.index_cast %598 : i32 to index
    %643 = memref.load %arg2[%c2_378, %642] : memref<5x16xi32, #tpu.memory_space<smem>>
    %c2_379 = arith.constant 2 : index
    %644 = arith.index_cast %598 : i32 to index
    %645 = memref.load %arg3[%c2_379, %644] : memref<5x16xi32, #tpu.memory_space<smem>>
    %c2_380 = arith.constant 2 : index
    %646 = arith.index_cast %598 : i32 to index
    %647 = memref.load %arg4[%c2_380, %646] : memref<5x16xf32, #tpu.memory_space<smem>>
    %c0_381 = arith.constant 0 : index
    %648 = arith.index_cast %643 : i32 to index
    %c0_382 = arith.constant 0 : index
    %c0_383 = arith.constant 0 : index
    %649 = vector.load %arg7[%c0_381, %648, %c0_382, %c0_383] : memref<1x2x2x128xf32, #tpu.memory_space<vmem>>, vector<1x1x2x128xf32>
    %650 = vector.shape_cast %649 : vector<1x1x2x128xf32> to vector<2x128xf32>
    %cst_384 = arith.constant 1.000000e+00 : f32
    %651 = arith.subf %cst_384, %647 : f32
    %652 = vector.broadcast %651 : f32 to vector<2x128xf32>
    %653 = arith.mulf %650, %652 : vector<2x128xf32>
    %c0_385 = arith.constant 0 : index
    %654 = arith.index_cast %645 : i32 to index
    %c0_386 = arith.constant 0 : index
    %c0_387 = arith.constant 0 : index
    %655 = vector.load %arg7[%c0_385, %654, %c0_386, %c0_387] : memref<1x2x2x128xf32, #tpu.memory_space<vmem>>, vector<1x1x2x128xf32>
    %656 = vector.shape_cast %655 : vector<1x1x2x128xf32> to vector<2x128xf32>
    %657 = vector.broadcast %647 : f32 to vector<2x128xf32>
    %658 = arith.mulf %656, %657 : vector<2x128xf32>
    %659 = arith.addf %653, %658 : vector<2x128xf32>
    %c0_388 = arith.constant 0 : index
    %c0_389 = arith.constant 0 : index
    %660 = vector.load %arg12[%c0_388, %c0_389] : memref<16x2xf32, #tpu.memory_space<vmem>>, vector<16x2xf32>
    %cst_390 = arith.constant dense<0.000000e+00> : vector<16x128xf32>
    %661 = tpu.matmul %660, %659, %cst_390 {dimension_numbers = #tpu.dot_dimension_numbers<[1], [0], [0], [1], [0, 0, 1, 1], [], []>} : vector<16x2xf32>, vector<2x128xf32>, vector<16x128xf32> -> vector<16x128xf32>
    %662 = arith.addf %641, %661 : vector<16x128xf32>
    %c3_391 = arith.constant 3 : index
    %663 = arith.index_cast %598 : i32 to index
    %664 = memref.load %arg2[%c3_391, %663] : memref<5x16xi32, #tpu.memory_space<smem>>
    %c3_392 = arith.constant 3 : index
    %665 = arith.index_cast %598 : i32 to index
    %666 = memref.load %arg3[%c3_392, %665] : memref<5x16xi32, #tpu.memory_space<smem>>
    %c3_393 = arith.constant 3 : index
    %667 = arith.index_cast %598 : i32 to index
    %668 = memref.load %arg4[%c3_393, %667] : memref<5x16xf32, #tpu.memory_space<smem>>
    %c0_394 = arith.constant 0 : index
    %669 = arith.index_cast %664 : i32 to index
    %c0_395 = arith.constant 0 : index
    %c0_396 = arith.constant 0 : index
    %670 = vector.load %arg8[%c0_394, %669, %c0_395, %c0_396] : memref<1x2x2x128xf32, #tpu.memory_space<vmem>>, vector<1x1x2x128xf32>
    %671 = vector.shape_cast %670 : vector<1x1x2x128xf32> to vector<2x128xf32>
    %cst_397 = arith.constant 1.000000e+00 : f32
    %672 = arith.subf %cst_397, %668 : f32
    %673 = vector.broadcast %672 : f32 to vector<2x128xf32>
    %674 = arith.mulf %671, %673 : vector<2x128xf32>
    %c0_398 = arith.constant 0 : index
    %675 = arith.index_cast %666 : i32 to index
    %c0_399 = arith.constant 0 : index
    %c0_400 = arith.constant 0 : index
    %676 = vector.load %arg8[%c0_398, %675, %c0_399, %c0_400] : memref<1x2x2x128xf32, #tpu.memory_space<vmem>>, vector<1x1x2x128xf32>
    %677 = vector.shape_cast %676 : vector<1x1x2x128xf32> to vector<2x128xf32>
    %678 = vector.broadcast %668 : f32 to vector<2x128xf32>
    %679 = arith.mulf %677, %678 : vector<2x128xf32>
    %680 = arith.addf %674, %679 : vector<2x128xf32>
    %c0_401 = arith.constant 0 : index
    %c0_402 = arith.constant 0 : index
    %681 = vector.load %arg13[%c0_401, %c0_402] : memref<16x2xf32, #tpu.memory_space<vmem>>, vector<16x2xf32>
    %cst_403 = arith.constant dense<0.000000e+00> : vector<16x128xf32>
    %682 = tpu.matmul %681, %680, %cst_403 {dimension_numbers = #tpu.dot_dimension_numbers<[1], [0], [0], [1], [0, 0, 1, 1], [], []>} : vector<16x2xf32>, vector<2x128xf32>, vector<16x128xf32> -> vector<16x128xf32>
    %683 = arith.addf %662, %682 : vector<16x128xf32>
    %c4_404 = arith.constant 4 : index
    %684 = arith.index_cast %598 : i32 to index
    %685 = memref.load %arg2[%c4_404, %684] : memref<5x16xi32, #tpu.memory_space<smem>>
    %c4_405 = arith.constant 4 : index
    %686 = arith.index_cast %598 : i32 to index
    %687 = memref.load %arg3[%c4_405, %686] : memref<5x16xi32, #tpu.memory_space<smem>>
    %c4_406 = arith.constant 4 : index
    %688 = arith.index_cast %598 : i32 to index
    %689 = memref.load %arg4[%c4_406, %688] : memref<5x16xf32, #tpu.memory_space<smem>>
    %c0_407 = arith.constant 0 : index
    %690 = arith.index_cast %685 : i32 to index
    %c0_408 = arith.constant 0 : index
    %c0_409 = arith.constant 0 : index
    %691 = vector.load %arg9[%c0_407, %690, %c0_408, %c0_409] : memref<1x16x16x128xf32, #tpu.memory_space<vmem>>, vector<1x1x16x128xf32>
    %692 = vector.shape_cast %691 : vector<1x1x16x128xf32> to vector<16x128xf32>
    %cst_410 = arith.constant 1.000000e+00 : f32
    %693 = arith.subf %cst_410, %689 : f32
    %694 = vector.broadcast %693 : f32 to vector<16x128xf32>
    %695 = arith.mulf %692, %694 : vector<16x128xf32>
    %c0_411 = arith.constant 0 : index
    %696 = arith.index_cast %687 : i32 to index
    %c0_412 = arith.constant 0 : index
    %c0_413 = arith.constant 0 : index
    %697 = vector.load %arg9[%c0_411, %696, %c0_412, %c0_413] : memref<1x16x16x128xf32, #tpu.memory_space<vmem>>, vector<1x1x16x128xf32>
    %698 = vector.shape_cast %697 : vector<1x1x16x128xf32> to vector<16x128xf32>
    %699 = vector.broadcast %689 : f32 to vector<16x128xf32>
    %700 = arith.mulf %698, %699 : vector<16x128xf32>
    %701 = arith.addf %695, %700 : vector<16x128xf32>
    %c0_414 = arith.constant 0 : index
    %c0_415 = arith.constant 0 : index
    %702 = vector.load %arg14[%c0_414, %c0_415] : memref<16x16xf32, #tpu.memory_space<vmem>>, vector<16x16xf32>
    %cst_416 = arith.constant dense<0.000000e+00> : vector<16x128xf32>
    %703 = tpu.matmul %702, %701, %cst_416 {dimension_numbers = #tpu.dot_dimension_numbers<[1], [0], [0], [1], [0, 0, 1, 1], [], []>} : vector<16x16xf32>, vector<16x128xf32>, vector<16x128xf32> -> vector<16x128xf32>
    %704 = arith.addf %683, %703 : vector<16x128xf32>
    %cst_417 = arith.constant 0.000000e+00 : f32
    %705 = vector.broadcast %cst_417 : f32 to vector<16x128xf32>
    %706 = arith.maximumf %704, %705 : vector<16x128xf32>
    %707 = vector.broadcast %596 : f32 to vector<16x128xf32>
    %708 = arith.mulf %706, %707 : vector<16x128xf32>
    %c5_i32 = arith.constant 5 : i32
    %709 = arith.addi %0, %c5_i32 : i32
    %c0_i32_418 = arith.constant 0 : i32
    %710 = arith.cmpi sge, %709, %c0_i32_418 : i32
    %c16_i32_419 = arith.constant 16 : i32
    %711 = arith.cmpi slt, %709, %c16_i32_419 : i32
    %712 = arith.andi %710, %711 : i1
    %713 = arith.extui %712 : i1 to i32
    %714 = arith.sitofp %713 : i32 to f32
    %c0_i32_420 = arith.constant 0 : i32
    %c15_i32_421 = arith.constant 15 : i32
    %715 = arith.maxsi %c0_i32_420, %709 : i32
    %716 = arith.minsi %c15_i32_421, %715 : i32
    %cst_422 = arith.constant 0.000000e+00 : f32
    %717 = vector.broadcast %cst_422 : f32 to vector<16x128xf32>
    %c0_423 = arith.constant 0 : index
    %718 = arith.index_cast %716 : i32 to index
    %719 = memref.load %arg2[%c0_423, %718] : memref<5x16xi32, #tpu.memory_space<smem>>
    %c0_424 = arith.constant 0 : index
    %720 = arith.index_cast %716 : i32 to index
    %721 = memref.load %arg3[%c0_424, %720] : memref<5x16xi32, #tpu.memory_space<smem>>
    %c0_425 = arith.constant 0 : index
    %722 = arith.index_cast %716 : i32 to index
    %723 = memref.load %arg4[%c0_425, %722] : memref<5x16xf32, #tpu.memory_space<smem>>
    %c0_426 = arith.constant 0 : index
    %724 = arith.index_cast %719 : i32 to index
    %c0_427 = arith.constant 0 : index
    %c0_428 = arith.constant 0 : index
    %725 = vector.load %arg5[%c0_426, %724, %c0_427, %c0_428] : memref<1x8x8x128xf32, #tpu.memory_space<vmem>>, vector<1x1x8x128xf32>
    %726 = vector.shape_cast %725 : vector<1x1x8x128xf32> to vector<8x128xf32>
    %cst_429 = arith.constant 1.000000e+00 : f32
    %727 = arith.subf %cst_429, %723 : f32
    %728 = vector.broadcast %727 : f32 to vector<8x128xf32>
    %729 = arith.mulf %726, %728 : vector<8x128xf32>
    %c0_430 = arith.constant 0 : index
    %730 = arith.index_cast %721 : i32 to index
    %c0_431 = arith.constant 0 : index
    %c0_432 = arith.constant 0 : index
    %731 = vector.load %arg5[%c0_430, %730, %c0_431, %c0_432] : memref<1x8x8x128xf32, #tpu.memory_space<vmem>>, vector<1x1x8x128xf32>
    %732 = vector.shape_cast %731 : vector<1x1x8x128xf32> to vector<8x128xf32>
    %733 = vector.broadcast %723 : f32 to vector<8x128xf32>
    %734 = arith.mulf %732, %733 : vector<8x128xf32>
    %735 = arith.addf %729, %734 : vector<8x128xf32>
    %c0_433 = arith.constant 0 : index
    %c0_434 = arith.constant 0 : index
    %736 = vector.load %arg10[%c0_433, %c0_434] : memref<16x8xf32, #tpu.memory_space<vmem>>, vector<16x8xf32>
    %cst_435 = arith.constant dense<0.000000e+00> : vector<16x128xf32>
    %737 = tpu.matmul %736, %735, %cst_435 {dimension_numbers = #tpu.dot_dimension_numbers<[1], [0], [0], [1], [0, 0, 1, 1], [], []>} : vector<16x8xf32>, vector<8x128xf32>, vector<16x128xf32> -> vector<16x128xf32>
    %738 = arith.addf %717, %737 : vector<16x128xf32>
    %c1_436 = arith.constant 1 : index
    %739 = arith.index_cast %716 : i32 to index
    %740 = memref.load %arg2[%c1_436, %739] : memref<5x16xi32, #tpu.memory_space<smem>>
    %c1_437 = arith.constant 1 : index
    %741 = arith.index_cast %716 : i32 to index
    %742 = memref.load %arg3[%c1_437, %741] : memref<5x16xi32, #tpu.memory_space<smem>>
    %c1_438 = arith.constant 1 : index
    %743 = arith.index_cast %716 : i32 to index
    %744 = memref.load %arg4[%c1_438, %743] : memref<5x16xf32, #tpu.memory_space<smem>>
    %c0_439 = arith.constant 0 : index
    %745 = arith.index_cast %740 : i32 to index
    %c0_440 = arith.constant 0 : index
    %c0_441 = arith.constant 0 : index
    %746 = vector.load %arg6[%c0_439, %745, %c0_440, %c0_441] : memref<1x4x4x128xf32, #tpu.memory_space<vmem>>, vector<1x1x4x128xf32>
    %747 = vector.shape_cast %746 : vector<1x1x4x128xf32> to vector<4x128xf32>
    %cst_442 = arith.constant 1.000000e+00 : f32
    %748 = arith.subf %cst_442, %744 : f32
    %749 = vector.broadcast %748 : f32 to vector<4x128xf32>
    %750 = arith.mulf %747, %749 : vector<4x128xf32>
    %c0_443 = arith.constant 0 : index
    %751 = arith.index_cast %742 : i32 to index
    %c0_444 = arith.constant 0 : index
    %c0_445 = arith.constant 0 : index
    %752 = vector.load %arg6[%c0_443, %751, %c0_444, %c0_445] : memref<1x4x4x128xf32, #tpu.memory_space<vmem>>, vector<1x1x4x128xf32>
    %753 = vector.shape_cast %752 : vector<1x1x4x128xf32> to vector<4x128xf32>
    %754 = vector.broadcast %744 : f32 to vector<4x128xf32>
    %755 = arith.mulf %753, %754 : vector<4x128xf32>
    %756 = arith.addf %750, %755 : vector<4x128xf32>
    %c0_446 = arith.constant 0 : index
    %c0_447 = arith.constant 0 : index
    %757 = vector.load %arg11[%c0_446, %c0_447] : memref<16x4xf32, #tpu.memory_space<vmem>>, vector<16x4xf32>
    %cst_448 = arith.constant dense<0.000000e+00> : vector<16x128xf32>
    %758 = tpu.matmul %757, %756, %cst_448 {dimension_numbers = #tpu.dot_dimension_numbers<[1], [0], [0], [1], [0, 0, 1, 1], [], []>} : vector<16x4xf32>, vector<4x128xf32>, vector<16x128xf32> -> vector<16x128xf32>
    %759 = arith.addf %738, %758 : vector<16x128xf32>
    %c2_449 = arith.constant 2 : index
    %760 = arith.index_cast %716 : i32 to index
    %761 = memref.load %arg2[%c2_449, %760] : memref<5x16xi32, #tpu.memory_space<smem>>
    %c2_450 = arith.constant 2 : index
    %762 = arith.index_cast %716 : i32 to index
    %763 = memref.load %arg3[%c2_450, %762] : memref<5x16xi32, #tpu.memory_space<smem>>
    %c2_451 = arith.constant 2 : index
    %764 = arith.index_cast %716 : i32 to index
    %765 = memref.load %arg4[%c2_451, %764] : memref<5x16xf32, #tpu.memory_space<smem>>
    %c0_452 = arith.constant 0 : index
    %766 = arith.index_cast %761 : i32 to index
    %c0_453 = arith.constant 0 : index
    %c0_454 = arith.constant 0 : index
    %767 = vector.load %arg7[%c0_452, %766, %c0_453, %c0_454] : memref<1x2x2x128xf32, #tpu.memory_space<vmem>>, vector<1x1x2x128xf32>
    %768 = vector.shape_cast %767 : vector<1x1x2x128xf32> to vector<2x128xf32>
    %cst_455 = arith.constant 1.000000e+00 : f32
    %769 = arith.subf %cst_455, %765 : f32
    %770 = vector.broadcast %769 : f32 to vector<2x128xf32>
    %771 = arith.mulf %768, %770 : vector<2x128xf32>
    %c0_456 = arith.constant 0 : index
    %772 = arith.index_cast %763 : i32 to index
    %c0_457 = arith.constant 0 : index
    %c0_458 = arith.constant 0 : index
    %773 = vector.load %arg7[%c0_456, %772, %c0_457, %c0_458] : memref<1x2x2x128xf32, #tpu.memory_space<vmem>>, vector<1x1x2x128xf32>
    %774 = vector.shape_cast %773 : vector<1x1x2x128xf32> to vector<2x128xf32>
    %775 = vector.broadcast %765 : f32 to vector<2x128xf32>
    %776 = arith.mulf %774, %775 : vector<2x128xf32>
    %777 = arith.addf %771, %776 : vector<2x128xf32>
    %c0_459 = arith.constant 0 : index
    %c0_460 = arith.constant 0 : index
    %778 = vector.load %arg12[%c0_459, %c0_460] : memref<16x2xf32, #tpu.memory_space<vmem>>, vector<16x2xf32>
    %cst_461 = arith.constant dense<0.000000e+00> : vector<16x128xf32>
    %779 = tpu.matmul %778, %777, %cst_461 {dimension_numbers = #tpu.dot_dimension_numbers<[1], [0], [0], [1], [0, 0, 1, 1], [], []>} : vector<16x2xf32>, vector<2x128xf32>, vector<16x128xf32> -> vector<16x128xf32>
    %780 = arith.addf %759, %779 : vector<16x128xf32>
    %c3_462 = arith.constant 3 : index
    %781 = arith.index_cast %716 : i32 to index
    %782 = memref.load %arg2[%c3_462, %781] : memref<5x16xi32, #tpu.memory_space<smem>>
    %c3_463 = arith.constant 3 : index
    %783 = arith.index_cast %716 : i32 to index
    %784 = memref.load %arg3[%c3_463, %783] : memref<5x16xi32, #tpu.memory_space<smem>>
    %c3_464 = arith.constant 3 : index
    %785 = arith.index_cast %716 : i32 to index
    %786 = memref.load %arg4[%c3_464, %785] : memref<5x16xf32, #tpu.memory_space<smem>>
    %c0_465 = arith.constant 0 : index
    %787 = arith.index_cast %782 : i32 to index
    %c0_466 = arith.constant 0 : index
    %c0_467 = arith.constant 0 : index
    %788 = vector.load %arg8[%c0_465, %787, %c0_466, %c0_467] : memref<1x2x2x128xf32, #tpu.memory_space<vmem>>, vector<1x1x2x128xf32>
    %789 = vector.shape_cast %788 : vector<1x1x2x128xf32> to vector<2x128xf32>
    %cst_468 = arith.constant 1.000000e+00 : f32
    %790 = arith.subf %cst_468, %786 : f32
    %791 = vector.broadcast %790 : f32 to vector<2x128xf32>
    %792 = arith.mulf %789, %791 : vector<2x128xf32>
    %c0_469 = arith.constant 0 : index
    %793 = arith.index_cast %784 : i32 to index
    %c0_470 = arith.constant 0 : index
    %c0_471 = arith.constant 0 : index
    %794 = vector.load %arg8[%c0_469, %793, %c0_470, %c0_471] : memref<1x2x2x128xf32, #tpu.memory_space<vmem>>, vector<1x1x2x128xf32>
    %795 = vector.shape_cast %794 : vector<1x1x2x128xf32> to vector<2x128xf32>
    %796 = vector.broadcast %786 : f32 to vector<2x128xf32>
    %797 = arith.mulf %795, %796 : vector<2x128xf32>
    %798 = arith.addf %792, %797 : vector<2x128xf32>
    %c0_472 = arith.constant 0 : index
    %c0_473 = arith.constant 0 : index
    %799 = vector.load %arg13[%c0_472, %c0_473] : memref<16x2xf32, #tpu.memory_space<vmem>>, vector<16x2xf32>
    %cst_474 = arith.constant dense<0.000000e+00> : vector<16x128xf32>
    %800 = tpu.matmul %799, %798, %cst_474 {dimension_numbers = #tpu.dot_dimension_numbers<[1], [0], [0], [1], [0, 0, 1, 1], [], []>} : vector<16x2xf32>, vector<2x128xf32>, vector<16x128xf32> -> vector<16x128xf32>
    %801 = arith.addf %780, %800 : vector<16x128xf32>
    %c4_475 = arith.constant 4 : index
    %802 = arith.index_cast %716 : i32 to index
    %803 = memref.load %arg2[%c4_475, %802] : memref<5x16xi32, #tpu.memory_space<smem>>
    %c4_476 = arith.constant 4 : index
    %804 = arith.index_cast %716 : i32 to index
    %805 = memref.load %arg3[%c4_476, %804] : memref<5x16xi32, #tpu.memory_space<smem>>
    %c4_477 = arith.constant 4 : index
    %806 = arith.index_cast %716 : i32 to index
    %807 = memref.load %arg4[%c4_477, %806] : memref<5x16xf32, #tpu.memory_space<smem>>
    %c0_478 = arith.constant 0 : index
    %808 = arith.index_cast %803 : i32 to index
    %c0_479 = arith.constant 0 : index
    %c0_480 = arith.constant 0 : index
    %809 = vector.load %arg9[%c0_478, %808, %c0_479, %c0_480] : memref<1x16x16x128xf32, #tpu.memory_space<vmem>>, vector<1x1x16x128xf32>
    %810 = vector.shape_cast %809 : vector<1x1x16x128xf32> to vector<16x128xf32>
    %cst_481 = arith.constant 1.000000e+00 : f32
    %811 = arith.subf %cst_481, %807 : f32
    %812 = vector.broadcast %811 : f32 to vector<16x128xf32>
    %813 = arith.mulf %810, %812 : vector<16x128xf32>
    %c0_482 = arith.constant 0 : index
    %814 = arith.index_cast %805 : i32 to index
    %c0_483 = arith.constant 0 : index
    %c0_484 = arith.constant 0 : index
    %815 = vector.load %arg9[%c0_482, %814, %c0_483, %c0_484] : memref<1x16x16x128xf32, #tpu.memory_space<vmem>>, vector<1x1x16x128xf32>
    %816 = vector.shape_cast %815 : vector<1x1x16x128xf32> to vector<16x128xf32>
    %817 = vector.broadcast %807 : f32 to vector<16x128xf32>
    %818 = arith.mulf %816, %817 : vector<16x128xf32>
    %819 = arith.addf %813, %818 : vector<16x128xf32>
    %c0_485 = arith.constant 0 : index
    %c0_486 = arith.constant 0 : index
    %820 = vector.load %arg14[%c0_485, %c0_486] : memref<16x16xf32, #tpu.memory_space<vmem>>, vector<16x16xf32>
    %cst_487 = arith.constant dense<0.000000e+00> : vector<16x128xf32>
    %821 = tpu.matmul %820, %819, %cst_487 {dimension_numbers = #tpu.dot_dimension_numbers<[1], [0], [0], [1], [0, 0, 1, 1], [], []>} : vector<16x16xf32>, vector<16x128xf32>, vector<16x128xf32> -> vector<16x128xf32>
    %822 = arith.addf %801, %821 : vector<16x128xf32>
    %cst_488 = arith.constant 0.000000e+00 : f32
    %823 = vector.broadcast %cst_488 : f32 to vector<16x128xf32>
    %824 = arith.maximumf %822, %823 : vector<16x128xf32>
    %825 = vector.broadcast %714 : f32 to vector<16x128xf32>
    %826 = arith.mulf %824, %825 : vector<16x128xf32>
    %c6_i32 = arith.constant 6 : i32
    %827 = arith.addi %0, %c6_i32 : i32
    %c0_i32_489 = arith.constant 0 : i32
    %828 = arith.cmpi sge, %827, %c0_i32_489 : i32
    %c16_i32_490 = arith.constant 16 : i32
    %829 = arith.cmpi slt, %827, %c16_i32_490 : i32
    %830 = arith.andi %828, %829 : i1
    %831 = arith.extui %830 : i1 to i32
    %832 = arith.sitofp %831 : i32 to f32
    %c0_i32_491 = arith.constant 0 : i32
    %c15_i32_492 = arith.constant 15 : i32
    %833 = arith.maxsi %c0_i32_491, %827 : i32
    %834 = arith.minsi %c15_i32_492, %833 : i32
    %cst_493 = arith.constant 0.000000e+00 : f32
    %835 = vector.broadcast %cst_493 : f32 to vector<16x128xf32>
    %c0_494 = arith.constant 0 : index
    %836 = arith.index_cast %834 : i32 to index
    %837 = memref.load %arg2[%c0_494, %836] : memref<5x16xi32, #tpu.memory_space<smem>>
    %c0_495 = arith.constant 0 : index
    %838 = arith.index_cast %834 : i32 to index
    %839 = memref.load %arg3[%c0_495, %838] : memref<5x16xi32, #tpu.memory_space<smem>>
    %c0_496 = arith.constant 0 : index
    %840 = arith.index_cast %834 : i32 to index
    %841 = memref.load %arg4[%c0_496, %840] : memref<5x16xf32, #tpu.memory_space<smem>>
    %c0_497 = arith.constant 0 : index
    %842 = arith.index_cast %837 : i32 to index
    %c0_498 = arith.constant 0 : index
    %c0_499 = arith.constant 0 : index
    %843 = vector.load %arg5[%c0_497, %842, %c0_498, %c0_499] : memref<1x8x8x128xf32, #tpu.memory_space<vmem>>, vector<1x1x8x128xf32>
    %844 = vector.shape_cast %843 : vector<1x1x8x128xf32> to vector<8x128xf32>
    %cst_500 = arith.constant 1.000000e+00 : f32
    %845 = arith.subf %cst_500, %841 : f32
    %846 = vector.broadcast %845 : f32 to vector<8x128xf32>
    %847 = arith.mulf %844, %846 : vector<8x128xf32>
    %c0_501 = arith.constant 0 : index
    %848 = arith.index_cast %839 : i32 to index
    %c0_502 = arith.constant 0 : index
    %c0_503 = arith.constant 0 : index
    %849 = vector.load %arg5[%c0_501, %848, %c0_502, %c0_503] : memref<1x8x8x128xf32, #tpu.memory_space<vmem>>, vector<1x1x8x128xf32>
    %850 = vector.shape_cast %849 : vector<1x1x8x128xf32> to vector<8x128xf32>
    %851 = vector.broadcast %841 : f32 to vector<8x128xf32>
    %852 = arith.mulf %850, %851 : vector<8x128xf32>
    %853 = arith.addf %847, %852 : vector<8x128xf32>
    %c0_504 = arith.constant 0 : index
    %c0_505 = arith.constant 0 : index
    %854 = vector.load %arg10[%c0_504, %c0_505] : memref<16x8xf32, #tpu.memory_space<vmem>>, vector<16x8xf32>
    %cst_506 = arith.constant dense<0.000000e+00> : vector<16x128xf32>
    %855 = tpu.matmul %854, %853, %cst_506 {dimension_numbers = #tpu.dot_dimension_numbers<[1], [0], [0], [1], [0, 0, 1, 1], [], []>} : vector<16x8xf32>, vector<8x128xf32>, vector<16x128xf32> -> vector<16x128xf32>
    %856 = arith.addf %835, %855 : vector<16x128xf32>
    %c1_507 = arith.constant 1 : index
    %857 = arith.index_cast %834 : i32 to index
    %858 = memref.load %arg2[%c1_507, %857] : memref<5x16xi32, #tpu.memory_space<smem>>
    %c1_508 = arith.constant 1 : index
    %859 = arith.index_cast %834 : i32 to index
    %860 = memref.load %arg3[%c1_508, %859] : memref<5x16xi32, #tpu.memory_space<smem>>
    %c1_509 = arith.constant 1 : index
    %861 = arith.index_cast %834 : i32 to index
    %862 = memref.load %arg4[%c1_509, %861] : memref<5x16xf32, #tpu.memory_space<smem>>
    %c0_510 = arith.constant 0 : index
    %863 = arith.index_cast %858 : i32 to index
    %c0_511 = arith.constant 0 : index
    %c0_512 = arith.constant 0 : index
    %864 = vector.load %arg6[%c0_510, %863, %c0_511, %c0_512] : memref<1x4x4x128xf32, #tpu.memory_space<vmem>>, vector<1x1x4x128xf32>
    %865 = vector.shape_cast %864 : vector<1x1x4x128xf32> to vector<4x128xf32>
    %cst_513 = arith.constant 1.000000e+00 : f32
    %866 = arith.subf %cst_513, %862 : f32
    %867 = vector.broadcast %866 : f32 to vector<4x128xf32>
    %868 = arith.mulf %865, %867 : vector<4x128xf32>
    %c0_514 = arith.constant 0 : index
    %869 = arith.index_cast %860 : i32 to index
    %c0_515 = arith.constant 0 : index
    %c0_516 = arith.constant 0 : index
    %870 = vector.load %arg6[%c0_514, %869, %c0_515, %c0_516] : memref<1x4x4x128xf32, #tpu.memory_space<vmem>>, vector<1x1x4x128xf32>
    %871 = vector.shape_cast %870 : vector<1x1x4x128xf32> to vector<4x128xf32>
    %872 = vector.broadcast %862 : f32 to vector<4x128xf32>
    %873 = arith.mulf %871, %872 : vector<4x128xf32>
    %874 = arith.addf %868, %873 : vector<4x128xf32>
    %c0_517 = arith.constant 0 : index
    %c0_518 = arith.constant 0 : index
    %875 = vector.load %arg11[%c0_517, %c0_518] : memref<16x4xf32, #tpu.memory_space<vmem>>, vector<16x4xf32>
    %cst_519 = arith.constant dense<0.000000e+00> : vector<16x128xf32>
    %876 = tpu.matmul %875, %874, %cst_519 {dimension_numbers = #tpu.dot_dimension_numbers<[1], [0], [0], [1], [0, 0, 1, 1], [], []>} : vector<16x4xf32>, vector<4x128xf32>, vector<16x128xf32> -> vector<16x128xf32>
    %877 = arith.addf %856, %876 : vector<16x128xf32>
    %c2_520 = arith.constant 2 : index
    %878 = arith.index_cast %834 : i32 to index
    %879 = memref.load %arg2[%c2_520, %878] : memref<5x16xi32, #tpu.memory_space<smem>>
    %c2_521 = arith.constant 2 : index
    %880 = arith.index_cast %834 : i32 to index
    %881 = memref.load %arg3[%c2_521, %880] : memref<5x16xi32, #tpu.memory_space<smem>>
    %c2_522 = arith.constant 2 : index
    %882 = arith.index_cast %834 : i32 to index
    %883 = memref.load %arg4[%c2_522, %882] : memref<5x16xf32, #tpu.memory_space<smem>>
    %c0_523 = arith.constant 0 : index
    %884 = arith.index_cast %879 : i32 to index
    %c0_524 = arith.constant 0 : index
    %c0_525 = arith.constant 0 : index
    %885 = vector.load %arg7[%c0_523, %884, %c0_524, %c0_525] : memref<1x2x2x128xf32, #tpu.memory_space<vmem>>, vector<1x1x2x128xf32>
    %886 = vector.shape_cast %885 : vector<1x1x2x128xf32> to vector<2x128xf32>
    %cst_526 = arith.constant 1.000000e+00 : f32
    %887 = arith.subf %cst_526, %883 : f32
    %888 = vector.broadcast %887 : f32 to vector<2x128xf32>
    %889 = arith.mulf %886, %888 : vector<2x128xf32>
    %c0_527 = arith.constant 0 : index
    %890 = arith.index_cast %881 : i32 to index
    %c0_528 = arith.constant 0 : index
    %c0_529 = arith.constant 0 : index
    %891 = vector.load %arg7[%c0_527, %890, %c0_528, %c0_529] : memref<1x2x2x128xf32, #tpu.memory_space<vmem>>, vector<1x1x2x128xf32>
    %892 = vector.shape_cast %891 : vector<1x1x2x128xf32> to vector<2x128xf32>
    %893 = vector.broadcast %883 : f32 to vector<2x128xf32>
    %894 = arith.mulf %892, %893 : vector<2x128xf32>
    %895 = arith.addf %889, %894 : vector<2x128xf32>
    %c0_530 = arith.constant 0 : index
    %c0_531 = arith.constant 0 : index
    %896 = vector.load %arg12[%c0_530, %c0_531] : memref<16x2xf32, #tpu.memory_space<vmem>>, vector<16x2xf32>
    %cst_532 = arith.constant dense<0.000000e+00> : vector<16x128xf32>
    %897 = tpu.matmul %896, %895, %cst_532 {dimension_numbers = #tpu.dot_dimension_numbers<[1], [0], [0], [1], [0, 0, 1, 1], [], []>} : vector<16x2xf32>, vector<2x128xf32>, vector<16x128xf32> -> vector<16x128xf32>
    %898 = arith.addf %877, %897 : vector<16x128xf32>
    %c3_533 = arith.constant 3 : index
    %899 = arith.index_cast %834 : i32 to index
    %900 = memref.load %arg2[%c3_533, %899] : memref<5x16xi32, #tpu.memory_space<smem>>
    %c3_534 = arith.constant 3 : index
    %901 = arith.index_cast %834 : i32 to index
    %902 = memref.load %arg3[%c3_534, %901] : memref<5x16xi32, #tpu.memory_space<smem>>
    %c3_535 = arith.constant 3 : index
    %903 = arith.index_cast %834 : i32 to index
    %904 = memref.load %arg4[%c3_535, %903] : memref<5x16xf32, #tpu.memory_space<smem>>
    %c0_536 = arith.constant 0 : index
    %905 = arith.index_cast %900 : i32 to index
    %c0_537 = arith.constant 0 : index
    %c0_538 = arith.constant 0 : index
    %906 = vector.load %arg8[%c0_536, %905, %c0_537, %c0_538] : memref<1x2x2x128xf32, #tpu.memory_space<vmem>>, vector<1x1x2x128xf32>
    %907 = vector.shape_cast %906 : vector<1x1x2x128xf32> to vector<2x128xf32>
    %cst_539 = arith.constant 1.000000e+00 : f32
    %908 = arith.subf %cst_539, %904 : f32
    %909 = vector.broadcast %908 : f32 to vector<2x128xf32>
    %910 = arith.mulf %907, %909 : vector<2x128xf32>
    %c0_540 = arith.constant 0 : index
    %911 = arith.index_cast %902 : i32 to index
    %c0_541 = arith.constant 0 : index
    %c0_542 = arith.constant 0 : index
    %912 = vector.load %arg8[%c0_540, %911, %c0_541, %c0_542] : memref<1x2x2x128xf32, #tpu.memory_space<vmem>>, vector<1x1x2x128xf32>
    %913 = vector.shape_cast %912 : vector<1x1x2x128xf32> to vector<2x128xf32>
    %914 = vector.broadcast %904 : f32 to vector<2x128xf32>
    %915 = arith.mulf %913, %914 : vector<2x128xf32>
    %916 = arith.addf %910, %915 : vector<2x128xf32>
    %c0_543 = arith.constant 0 : index
    %c0_544 = arith.constant 0 : index
    %917 = vector.load %arg13[%c0_543, %c0_544] : memref<16x2xf32, #tpu.memory_space<vmem>>, vector<16x2xf32>
    %cst_545 = arith.constant dense<0.000000e+00> : vector<16x128xf32>
    %918 = tpu.matmul %917, %916, %cst_545 {dimension_numbers = #tpu.dot_dimension_numbers<[1], [0], [0], [1], [0, 0, 1, 1], [], []>} : vector<16x2xf32>, vector<2x128xf32>, vector<16x128xf32> -> vector<16x128xf32>
    %919 = arith.addf %898, %918 : vector<16x128xf32>
    %c4_546 = arith.constant 4 : index
    %920 = arith.index_cast %834 : i32 to index
    %921 = memref.load %arg2[%c4_546, %920] : memref<5x16xi32, #tpu.memory_space<smem>>
    %c4_547 = arith.constant 4 : index
    %922 = arith.index_cast %834 : i32 to index
    %923 = memref.load %arg3[%c4_547, %922] : memref<5x16xi32, #tpu.memory_space<smem>>
    %c4_548 = arith.constant 4 : index
    %924 = arith.index_cast %834 : i32 to index
    %925 = memref.load %arg4[%c4_548, %924] : memref<5x16xf32, #tpu.memory_space<smem>>
    %c0_549 = arith.constant 0 : index
    %926 = arith.index_cast %921 : i32 to index
    %c0_550 = arith.constant 0 : index
    %c0_551 = arith.constant 0 : index
    %927 = vector.load %arg9[%c0_549, %926, %c0_550, %c0_551] : memref<1x16x16x128xf32, #tpu.memory_space<vmem>>, vector<1x1x16x128xf32>
    %928 = vector.shape_cast %927 : vector<1x1x16x128xf32> to vector<16x128xf32>
    %cst_552 = arith.constant 1.000000e+00 : f32
    %929 = arith.subf %cst_552, %925 : f32
    %930 = vector.broadcast %929 : f32 to vector<16x128xf32>
    %931 = arith.mulf %928, %930 : vector<16x128xf32>
    %c0_553 = arith.constant 0 : index
    %932 = arith.index_cast %923 : i32 to index
    %c0_554 = arith.constant 0 : index
    %c0_555 = arith.constant 0 : index
    %933 = vector.load %arg9[%c0_553, %932, %c0_554, %c0_555] : memref<1x16x16x128xf32, #tpu.memory_space<vmem>>, vector<1x1x16x128xf32>
    %934 = vector.shape_cast %933 : vector<1x1x16x128xf32> to vector<16x128xf32>
    %935 = vector.broadcast %925 : f32 to vector<16x128xf32>
    %936 = arith.mulf %934, %935 : vector<16x128xf32>
    %937 = arith.addf %931, %936 : vector<16x128xf32>
    %c0_556 = arith.constant 0 : index
    %c0_557 = arith.constant 0 : index
    %938 = vector.load %arg14[%c0_556, %c0_557] : memref<16x16xf32, #tpu.memory_space<vmem>>, vector<16x16xf32>
    %cst_558 = arith.constant dense<0.000000e+00> : vector<16x128xf32>
    %939 = tpu.matmul %938, %937, %cst_558 {dimension_numbers = #tpu.dot_dimension_numbers<[1], [0], [0], [1], [0, 0, 1, 1], [], []>} : vector<16x16xf32>, vector<16x128xf32>, vector<16x128xf32> -> vector<16x128xf32>
    %940 = arith.addf %919, %939 : vector<16x128xf32>
    %cst_559 = arith.constant 0.000000e+00 : f32
    %941 = vector.broadcast %cst_559 : f32 to vector<16x128xf32>
    %942 = arith.maximumf %940, %941 : vector<16x128xf32>
    %943 = vector.broadcast %832 : f32 to vector<16x128xf32>
    %944 = arith.mulf %942, %943 : vector<16x128xf32>
    %c7_i32 = arith.constant 7 : i32
    %945 = arith.addi %0, %c7_i32 : i32
    %c0_i32_560 = arith.constant 0 : i32
    %946 = arith.cmpi sge, %945, %c0_i32_560 : i32
    %c16_i32_561 = arith.constant 16 : i32
    %947 = arith.cmpi slt, %945, %c16_i32_561 : i32
    %948 = arith.andi %946, %947 : i1
    %949 = arith.extui %948 : i1 to i32
    %950 = arith.sitofp %949 : i32 to f32
    %c0_i32_562 = arith.constant 0 : i32
    %c15_i32_563 = arith.constant 15 : i32
    %951 = arith.maxsi %c0_i32_562, %945 : i32
    %952 = arith.minsi %c15_i32_563, %951 : i32
    %cst_564 = arith.constant 0.000000e+00 : f32
    %953 = vector.broadcast %cst_564 : f32 to vector<16x128xf32>
    %c0_565 = arith.constant 0 : index
    %954 = arith.index_cast %952 : i32 to index
    %955 = memref.load %arg2[%c0_565, %954] : memref<5x16xi32, #tpu.memory_space<smem>>
    %c0_566 = arith.constant 0 : index
    %956 = arith.index_cast %952 : i32 to index
    %957 = memref.load %arg3[%c0_566, %956] : memref<5x16xi32, #tpu.memory_space<smem>>
    %c0_567 = arith.constant 0 : index
    %958 = arith.index_cast %952 : i32 to index
    %959 = memref.load %arg4[%c0_567, %958] : memref<5x16xf32, #tpu.memory_space<smem>>
    %c0_568 = arith.constant 0 : index
    %960 = arith.index_cast %955 : i32 to index
    %c0_569 = arith.constant 0 : index
    %c0_570 = arith.constant 0 : index
    %961 = vector.load %arg5[%c0_568, %960, %c0_569, %c0_570] : memref<1x8x8x128xf32, #tpu.memory_space<vmem>>, vector<1x1x8x128xf32>
    %962 = vector.shape_cast %961 : vector<1x1x8x128xf32> to vector<8x128xf32>
    %cst_571 = arith.constant 1.000000e+00 : f32
    %963 = arith.subf %cst_571, %959 : f32
    %964 = vector.broadcast %963 : f32 to vector<8x128xf32>
    %965 = arith.mulf %962, %964 : vector<8x128xf32>
    %c0_572 = arith.constant 0 : index
    %966 = arith.index_cast %957 : i32 to index
    %c0_573 = arith.constant 0 : index
    %c0_574 = arith.constant 0 : index
    %967 = vector.load %arg5[%c0_572, %966, %c0_573, %c0_574] : memref<1x8x8x128xf32, #tpu.memory_space<vmem>>, vector<1x1x8x128xf32>
    %968 = vector.shape_cast %967 : vector<1x1x8x128xf32> to vector<8x128xf32>
    %969 = vector.broadcast %959 : f32 to vector<8x128xf32>
    %970 = arith.mulf %968, %969 : vector<8x128xf32>
    %971 = arith.addf %965, %970 : vector<8x128xf32>
    %c0_575 = arith.constant 0 : index
    %c0_576 = arith.constant 0 : index
    %972 = vector.load %arg10[%c0_575, %c0_576] : memref<16x8xf32, #tpu.memory_space<vmem>>, vector<16x8xf32>
    %cst_577 = arith.constant dense<0.000000e+00> : vector<16x128xf32>
    %973 = tpu.matmul %972, %971, %cst_577 {dimension_numbers = #tpu.dot_dimension_numbers<[1], [0], [0], [1], [0, 0, 1, 1], [], []>} : vector<16x8xf32>, vector<8x128xf32>, vector<16x128xf32> -> vector<16x128xf32>
    %974 = arith.addf %953, %973 : vector<16x128xf32>
    %c1_578 = arith.constant 1 : index
    %975 = arith.index_cast %952 : i32 to index
    %976 = memref.load %arg2[%c1_578, %975] : memref<5x16xi32, #tpu.memory_space<smem>>
    %c1_579 = arith.constant 1 : index
    %977 = arith.index_cast %952 : i32 to index
    %978 = memref.load %arg3[%c1_579, %977] : memref<5x16xi32, #tpu.memory_space<smem>>
    %c1_580 = arith.constant 1 : index
    %979 = arith.index_cast %952 : i32 to index
    %980 = memref.load %arg4[%c1_580, %979] : memref<5x16xf32, #tpu.memory_space<smem>>
    %c0_581 = arith.constant 0 : index
    %981 = arith.index_cast %976 : i32 to index
    %c0_582 = arith.constant 0 : index
    %c0_583 = arith.constant 0 : index
    %982 = vector.load %arg6[%c0_581, %981, %c0_582, %c0_583] : memref<1x4x4x128xf32, #tpu.memory_space<vmem>>, vector<1x1x4x128xf32>
    %983 = vector.shape_cast %982 : vector<1x1x4x128xf32> to vector<4x128xf32>
    %cst_584 = arith.constant 1.000000e+00 : f32
    %984 = arith.subf %cst_584, %980 : f32
    %985 = vector.broadcast %984 : f32 to vector<4x128xf32>
    %986 = arith.mulf %983, %985 : vector<4x128xf32>
    %c0_585 = arith.constant 0 : index
    %987 = arith.index_cast %978 : i32 to index
    %c0_586 = arith.constant 0 : index
    %c0_587 = arith.constant 0 : index
    %988 = vector.load %arg6[%c0_585, %987, %c0_586, %c0_587] : memref<1x4x4x128xf32, #tpu.memory_space<vmem>>, vector<1x1x4x128xf32>
    %989 = vector.shape_cast %988 : vector<1x1x4x128xf32> to vector<4x128xf32>
    %990 = vector.broadcast %980 : f32 to vector<4x128xf32>
    %991 = arith.mulf %989, %990 : vector<4x128xf32>
    %992 = arith.addf %986, %991 : vector<4x128xf32>
    %c0_588 = arith.constant 0 : index
    %c0_589 = arith.constant 0 : index
    %993 = vector.load %arg11[%c0_588, %c0_589] : memref<16x4xf32, #tpu.memory_space<vmem>>, vector<16x4xf32>
    %cst_590 = arith.constant dense<0.000000e+00> : vector<16x128xf32>
    %994 = tpu.matmul %993, %992, %cst_590 {dimension_numbers = #tpu.dot_dimension_numbers<[1], [0], [0], [1], [0, 0, 1, 1], [], []>} : vector<16x4xf32>, vector<4x128xf32>, vector<16x128xf32> -> vector<16x128xf32>
    %995 = arith.addf %974, %994 : vector<16x128xf32>
    %c2_591 = arith.constant 2 : index
    %996 = arith.index_cast %952 : i32 to index
    %997 = memref.load %arg2[%c2_591, %996] : memref<5x16xi32, #tpu.memory_space<smem>>
    %c2_592 = arith.constant 2 : index
    %998 = arith.index_cast %952 : i32 to index
    %999 = memref.load %arg3[%c2_592, %998] : memref<5x16xi32, #tpu.memory_space<smem>>
    %c2_593 = arith.constant 2 : index
    %1000 = arith.index_cast %952 : i32 to index
    %1001 = memref.load %arg4[%c2_593, %1000] : memref<5x16xf32, #tpu.memory_space<smem>>
    %c0_594 = arith.constant 0 : index
    %1002 = arith.index_cast %997 : i32 to index
    %c0_595 = arith.constant 0 : index
    %c0_596 = arith.constant 0 : index
    %1003 = vector.load %arg7[%c0_594, %1002, %c0_595, %c0_596] : memref<1x2x2x128xf32, #tpu.memory_space<vmem>>, vector<1x1x2x128xf32>
    %1004 = vector.shape_cast %1003 : vector<1x1x2x128xf32> to vector<2x128xf32>
    %cst_597 = arith.constant 1.000000e+00 : f32
    %1005 = arith.subf %cst_597, %1001 : f32
    %1006 = vector.broadcast %1005 : f32 to vector<2x128xf32>
    %1007 = arith.mulf %1004, %1006 : vector<2x128xf32>
    %c0_598 = arith.constant 0 : index
    %1008 = arith.index_cast %999 : i32 to index
    %c0_599 = arith.constant 0 : index
    %c0_600 = arith.constant 0 : index
    %1009 = vector.load %arg7[%c0_598, %1008, %c0_599, %c0_600] : memref<1x2x2x128xf32, #tpu.memory_space<vmem>>, vector<1x1x2x128xf32>
    %1010 = vector.shape_cast %1009 : vector<1x1x2x128xf32> to vector<2x128xf32>
    %1011 = vector.broadcast %1001 : f32 to vector<2x128xf32>
    %1012 = arith.mulf %1010, %1011 : vector<2x128xf32>
    %1013 = arith.addf %1007, %1012 : vector<2x128xf32>
    %c0_601 = arith.constant 0 : index
    %c0_602 = arith.constant 0 : index
    %1014 = vector.load %arg12[%c0_601, %c0_602] : memref<16x2xf32, #tpu.memory_space<vmem>>, vector<16x2xf32>
    %cst_603 = arith.constant dense<0.000000e+00> : vector<16x128xf32>
    %1015 = tpu.matmul %1014, %1013, %cst_603 {dimension_numbers = #tpu.dot_dimension_numbers<[1], [0], [0], [1], [0, 0, 1, 1], [], []>} : vector<16x2xf32>, vector<2x128xf32>, vector<16x128xf32> -> vector<16x128xf32>
    %1016 = arith.addf %995, %1015 : vector<16x128xf32>
    %c3_604 = arith.constant 3 : index
    %1017 = arith.index_cast %952 : i32 to index
    %1018 = memref.load %arg2[%c3_604, %1017] : memref<5x16xi32, #tpu.memory_space<smem>>
    %c3_605 = arith.constant 3 : index
    %1019 = arith.index_cast %952 : i32 to index
    %1020 = memref.load %arg3[%c3_605, %1019] : memref<5x16xi32, #tpu.memory_space<smem>>
    %c3_606 = arith.constant 3 : index
    %1021 = arith.index_cast %952 : i32 to index
    %1022 = memref.load %arg4[%c3_606, %1021] : memref<5x16xf32, #tpu.memory_space<smem>>
    %c0_607 = arith.constant 0 : index
    %1023 = arith.index_cast %1018 : i32 to index
    %c0_608 = arith.constant 0 : index
    %c0_609 = arith.constant 0 : index
    %1024 = vector.load %arg8[%c0_607, %1023, %c0_608, %c0_609] : memref<1x2x2x128xf32, #tpu.memory_space<vmem>>, vector<1x1x2x128xf32>
    %1025 = vector.shape_cast %1024 : vector<1x1x2x128xf32> to vector<2x128xf32>
    %cst_610 = arith.constant 1.000000e+00 : f32
    %1026 = arith.subf %cst_610, %1022 : f32
    %1027 = vector.broadcast %1026 : f32 to vector<2x128xf32>
    %1028 = arith.mulf %1025, %1027 : vector<2x128xf32>
    %c0_611 = arith.constant 0 : index
    %1029 = arith.index_cast %1020 : i32 to index
    %c0_612 = arith.constant 0 : index
    %c0_613 = arith.constant 0 : index
    %1030 = vector.load %arg8[%c0_611, %1029, %c0_612, %c0_613] : memref<1x2x2x128xf32, #tpu.memory_space<vmem>>, vector<1x1x2x128xf32>
    %1031 = vector.shape_cast %1030 : vector<1x1x2x128xf32> to vector<2x128xf32>
    %1032 = vector.broadcast %1022 : f32 to vector<2x128xf32>
    %1033 = arith.mulf %1031, %1032 : vector<2x128xf32>
    %1034 = arith.addf %1028, %1033 : vector<2x128xf32>
    %c0_614 = arith.constant 0 : index
    %c0_615 = arith.constant 0 : index
    %1035 = vector.load %arg13[%c0_614, %c0_615] : memref<16x2xf32, #tpu.memory_space<vmem>>, vector<16x2xf32>
    %cst_616 = arith.constant dense<0.000000e+00> : vector<16x128xf32>
    %1036 = tpu.matmul %1035, %1034, %cst_616 {dimension_numbers = #tpu.dot_dimension_numbers<[1], [0], [0], [1], [0, 0, 1, 1], [], []>} : vector<16x2xf32>, vector<2x128xf32>, vector<16x128xf32> -> vector<16x128xf32>
    %1037 = arith.addf %1016, %1036 : vector<16x128xf32>
    %c4_617 = arith.constant 4 : index
    %1038 = arith.index_cast %952 : i32 to index
    %1039 = memref.load %arg2[%c4_617, %1038] : memref<5x16xi32, #tpu.memory_space<smem>>
    %c4_618 = arith.constant 4 : index
    %1040 = arith.index_cast %952 : i32 to index
    %1041 = memref.load %arg3[%c4_618, %1040] : memref<5x16xi32, #tpu.memory_space<smem>>
    %c4_619 = arith.constant 4 : index
    %1042 = arith.index_cast %952 : i32 to index
    %1043 = memref.load %arg4[%c4_619, %1042] : memref<5x16xf32, #tpu.memory_space<smem>>
    %c0_620 = arith.constant 0 : index
    %1044 = arith.index_cast %1039 : i32 to index
    %c0_621 = arith.constant 0 : index
    %c0_622 = arith.constant 0 : index
    %1045 = vector.load %arg9[%c0_620, %1044, %c0_621, %c0_622] : memref<1x16x16x128xf32, #tpu.memory_space<vmem>>, vector<1x1x16x128xf32>
    %1046 = vector.shape_cast %1045 : vector<1x1x16x128xf32> to vector<16x128xf32>
    %cst_623 = arith.constant 1.000000e+00 : f32
    %1047 = arith.subf %cst_623, %1043 : f32
    %1048 = vector.broadcast %1047 : f32 to vector<16x128xf32>
    %1049 = arith.mulf %1046, %1048 : vector<16x128xf32>
    %c0_624 = arith.constant 0 : index
    %1050 = arith.index_cast %1041 : i32 to index
    %c0_625 = arith.constant 0 : index
    %c0_626 = arith.constant 0 : index
    %1051 = vector.load %arg9[%c0_624, %1050, %c0_625, %c0_626] : memref<1x16x16x128xf32, #tpu.memory_space<vmem>>, vector<1x1x16x128xf32>
    %1052 = vector.shape_cast %1051 : vector<1x1x16x128xf32> to vector<16x128xf32>
    %1053 = vector.broadcast %1043 : f32 to vector<16x128xf32>
    %1054 = arith.mulf %1052, %1053 : vector<16x128xf32>
    %1055 = arith.addf %1049, %1054 : vector<16x128xf32>
    %c0_627 = arith.constant 0 : index
    %c0_628 = arith.constant 0 : index
    %1056 = vector.load %arg14[%c0_627, %c0_628] : memref<16x16xf32, #tpu.memory_space<vmem>>, vector<16x16xf32>
    %cst_629 = arith.constant dense<0.000000e+00> : vector<16x128xf32>
    %1057 = tpu.matmul %1056, %1055, %cst_629 {dimension_numbers = #tpu.dot_dimension_numbers<[1], [0], [0], [1], [0, 0, 1, 1], [], []>} : vector<16x16xf32>, vector<16x128xf32>, vector<16x128xf32> -> vector<16x128xf32>
    %1058 = arith.addf %1037, %1057 : vector<16x128xf32>
    %cst_630 = arith.constant 0.000000e+00 : f32
    %1059 = vector.broadcast %cst_630 : f32 to vector<16x128xf32>
    %1060 = arith.maximumf %1058, %1059 : vector<16x128xf32>
    %1061 = vector.broadcast %950 : f32 to vector<16x128xf32>
    %1062 = arith.mulf %1060, %1061 : vector<16x128xf32>
    %c8_i32_631 = arith.constant 8 : i32
    %1063 = arith.addi %0, %c8_i32_631 : i32
    %c0_i32_632 = arith.constant 0 : i32
    %1064 = arith.cmpi sge, %1063, %c0_i32_632 : i32
    %c16_i32_633 = arith.constant 16 : i32
    %1065 = arith.cmpi slt, %1063, %c16_i32_633 : i32
    %1066 = arith.andi %1064, %1065 : i1
    %1067 = arith.extui %1066 : i1 to i32
    %1068 = arith.sitofp %1067 : i32 to f32
    %c0_i32_634 = arith.constant 0 : i32
    %c15_i32_635 = arith.constant 15 : i32
    %1069 = arith.maxsi %c0_i32_634, %1063 : i32
    %1070 = arith.minsi %c15_i32_635, %1069 : i32
    %cst_636 = arith.constant 0.000000e+00 : f32
    %1071 = vector.broadcast %cst_636 : f32 to vector<16x128xf32>
    %c0_637 = arith.constant 0 : index
    %1072 = arith.index_cast %1070 : i32 to index
    %1073 = memref.load %arg2[%c0_637, %1072] : memref<5x16xi32, #tpu.memory_space<smem>>
    %c0_638 = arith.constant 0 : index
    %1074 = arith.index_cast %1070 : i32 to index
    %1075 = memref.load %arg3[%c0_638, %1074] : memref<5x16xi32, #tpu.memory_space<smem>>
    %c0_639 = arith.constant 0 : index
    %1076 = arith.index_cast %1070 : i32 to index
    %1077 = memref.load %arg4[%c0_639, %1076] : memref<5x16xf32, #tpu.memory_space<smem>>
    %c0_640 = arith.constant 0 : index
    %1078 = arith.index_cast %1073 : i32 to index
    %c0_641 = arith.constant 0 : index
    %c0_642 = arith.constant 0 : index
    %1079 = vector.load %arg5[%c0_640, %1078, %c0_641, %c0_642] : memref<1x8x8x128xf32, #tpu.memory_space<vmem>>, vector<1x1x8x128xf32>
    %1080 = vector.shape_cast %1079 : vector<1x1x8x128xf32> to vector<8x128xf32>
    %cst_643 = arith.constant 1.000000e+00 : f32
    %1081 = arith.subf %cst_643, %1077 : f32
    %1082 = vector.broadcast %1081 : f32 to vector<8x128xf32>
    %1083 = arith.mulf %1080, %1082 : vector<8x128xf32>
    %c0_644 = arith.constant 0 : index
    %1084 = arith.index_cast %1075 : i32 to index
    %c0_645 = arith.constant 0 : index
    %c0_646 = arith.constant 0 : index
    %1085 = vector.load %arg5[%c0_644, %1084, %c0_645, %c0_646] : memref<1x8x8x128xf32, #tpu.memory_space<vmem>>, vector<1x1x8x128xf32>
    %1086 = vector.shape_cast %1085 : vector<1x1x8x128xf32> to vector<8x128xf32>
    %1087 = vector.broadcast %1077 : f32 to vector<8x128xf32>
    %1088 = arith.mulf %1086, %1087 : vector<8x128xf32>
    %1089 = arith.addf %1083, %1088 : vector<8x128xf32>
    %c0_647 = arith.constant 0 : index
    %c0_648 = arith.constant 0 : index
    %1090 = vector.load %arg10[%c0_647, %c0_648] : memref<16x8xf32, #tpu.memory_space<vmem>>, vector<16x8xf32>
    %cst_649 = arith.constant dense<0.000000e+00> : vector<16x128xf32>
    %1091 = tpu.matmul %1090, %1089, %cst_649 {dimension_numbers = #tpu.dot_dimension_numbers<[1], [0], [0], [1], [0, 0, 1, 1], [], []>} : vector<16x8xf32>, vector<8x128xf32>, vector<16x128xf32> -> vector<16x128xf32>
    %1092 = arith.addf %1071, %1091 : vector<16x128xf32>
    %c1_650 = arith.constant 1 : index
    %1093 = arith.index_cast %1070 : i32 to index
    %1094 = memref.load %arg2[%c1_650, %1093] : memref<5x16xi32, #tpu.memory_space<smem>>
    %c1_651 = arith.constant 1 : index
    %1095 = arith.index_cast %1070 : i32 to index
    %1096 = memref.load %arg3[%c1_651, %1095] : memref<5x16xi32, #tpu.memory_space<smem>>
    %c1_652 = arith.constant 1 : index
    %1097 = arith.index_cast %1070 : i32 to index
    %1098 = memref.load %arg4[%c1_652, %1097] : memref<5x16xf32, #tpu.memory_space<smem>>
    %c0_653 = arith.constant 0 : index
    %1099 = arith.index_cast %1094 : i32 to index
    %c0_654 = arith.constant 0 : index
    %c0_655 = arith.constant 0 : index
    %1100 = vector.load %arg6[%c0_653, %1099, %c0_654, %c0_655] : memref<1x4x4x128xf32, #tpu.memory_space<vmem>>, vector<1x1x4x128xf32>
    %1101 = vector.shape_cast %1100 : vector<1x1x4x128xf32> to vector<4x128xf32>
    %cst_656 = arith.constant 1.000000e+00 : f32
    %1102 = arith.subf %cst_656, %1098 : f32
    %1103 = vector.broadcast %1102 : f32 to vector<4x128xf32>
    %1104 = arith.mulf %1101, %1103 : vector<4x128xf32>
    %c0_657 = arith.constant 0 : index
    %1105 = arith.index_cast %1096 : i32 to index
    %c0_658 = arith.constant 0 : index
    %c0_659 = arith.constant 0 : index
    %1106 = vector.load %arg6[%c0_657, %1105, %c0_658, %c0_659] : memref<1x4x4x128xf32, #tpu.memory_space<vmem>>, vector<1x1x4x128xf32>
    %1107 = vector.shape_cast %1106 : vector<1x1x4x128xf32> to vector<4x128xf32>
    %1108 = vector.broadcast %1098 : f32 to vector<4x128xf32>
    %1109 = arith.mulf %1107, %1108 : vector<4x128xf32>
    %1110 = arith.addf %1104, %1109 : vector<4x128xf32>
    %c0_660 = arith.constant 0 : index
    %c0_661 = arith.constant 0 : index
    %1111 = vector.load %arg11[%c0_660, %c0_661] : memref<16x4xf32, #tpu.memory_space<vmem>>, vector<16x4xf32>
    %cst_662 = arith.constant dense<0.000000e+00> : vector<16x128xf32>
    %1112 = tpu.matmul %1111, %1110, %cst_662 {dimension_numbers = #tpu.dot_dimension_numbers<[1], [0], [0], [1], [0, 0, 1, 1], [], []>} : vector<16x4xf32>, vector<4x128xf32>, vector<16x128xf32> -> vector<16x128xf32>
    %1113 = arith.addf %1092, %1112 : vector<16x128xf32>
    %c2_663 = arith.constant 2 : index
    %1114 = arith.index_cast %1070 : i32 to index
    %1115 = memref.load %arg2[%c2_663, %1114] : memref<5x16xi32, #tpu.memory_space<smem>>
    %c2_664 = arith.constant 2 : index
    %1116 = arith.index_cast %1070 : i32 to index
    %1117 = memref.load %arg3[%c2_664, %1116] : memref<5x16xi32, #tpu.memory_space<smem>>
    %c2_665 = arith.constant 2 : index
    %1118 = arith.index_cast %1070 : i32 to index
    %1119 = memref.load %arg4[%c2_665, %1118] : memref<5x16xf32, #tpu.memory_space<smem>>
    %c0_666 = arith.constant 0 : index
    %1120 = arith.index_cast %1115 : i32 to index
    %c0_667 = arith.constant 0 : index
    %c0_668 = arith.constant 0 : index
    %1121 = vector.load %arg7[%c0_666, %1120, %c0_667, %c0_668] : memref<1x2x2x128xf32, #tpu.memory_space<vmem>>, vector<1x1x2x128xf32>
    %1122 = vector.shape_cast %1121 : vector<1x1x2x128xf32> to vector<2x128xf32>
    %cst_669 = arith.constant 1.000000e+00 : f32
    %1123 = arith.subf %cst_669, %1119 : f32
    %1124 = vector.broadcast %1123 : f32 to vector<2x128xf32>
    %1125 = arith.mulf %1122, %1124 : vector<2x128xf32>
    %c0_670 = arith.constant 0 : index
    %1126 = arith.index_cast %1117 : i32 to index
    %c0_671 = arith.constant 0 : index
    %c0_672 = arith.constant 0 : index
    %1127 = vector.load %arg7[%c0_670, %1126, %c0_671, %c0_672] : memref<1x2x2x128xf32, #tpu.memory_space<vmem>>, vector<1x1x2x128xf32>
    %1128 = vector.shape_cast %1127 : vector<1x1x2x128xf32> to vector<2x128xf32>
    %1129 = vector.broadcast %1119 : f32 to vector<2x128xf32>
    %1130 = arith.mulf %1128, %1129 : vector<2x128xf32>
    %1131 = arith.addf %1125, %1130 : vector<2x128xf32>
    %c0_673 = arith.constant 0 : index
    %c0_674 = arith.constant 0 : index
    %1132 = vector.load %arg12[%c0_673, %c0_674] : memref<16x2xf32, #tpu.memory_space<vmem>>, vector<16x2xf32>
    %cst_675 = arith.constant dense<0.000000e+00> : vector<16x128xf32>
    %1133 = tpu.matmul %1132, %1131, %cst_675 {dimension_numbers = #tpu.dot_dimension_numbers<[1], [0], [0], [1], [0, 0, 1, 1], [], []>} : vector<16x2xf32>, vector<2x128xf32>, vector<16x128xf32> -> vector<16x128xf32>
    %1134 = arith.addf %1113, %1133 : vector<16x128xf32>
    %c3_676 = arith.constant 3 : index
    %1135 = arith.index_cast %1070 : i32 to index
    %1136 = memref.load %arg2[%c3_676, %1135] : memref<5x16xi32, #tpu.memory_space<smem>>
    %c3_677 = arith.constant 3 : index
    %1137 = arith.index_cast %1070 : i32 to index
    %1138 = memref.load %arg3[%c3_677, %1137] : memref<5x16xi32, #tpu.memory_space<smem>>
    %c3_678 = arith.constant 3 : index
    %1139 = arith.index_cast %1070 : i32 to index
    %1140 = memref.load %arg4[%c3_678, %1139] : memref<5x16xf32, #tpu.memory_space<smem>>
    %c0_679 = arith.constant 0 : index
    %1141 = arith.index_cast %1136 : i32 to index
    %c0_680 = arith.constant 0 : index
    %c0_681 = arith.constant 0 : index
    %1142 = vector.load %arg8[%c0_679, %1141, %c0_680, %c0_681] : memref<1x2x2x128xf32, #tpu.memory_space<vmem>>, vector<1x1x2x128xf32>
    %1143 = vector.shape_cast %1142 : vector<1x1x2x128xf32> to vector<2x128xf32>
    %cst_682 = arith.constant 1.000000e+00 : f32
    %1144 = arith.subf %cst_682, %1140 : f32
    %1145 = vector.broadcast %1144 : f32 to vector<2x128xf32>
    %1146 = arith.mulf %1143, %1145 : vector<2x128xf32>
    %c0_683 = arith.constant 0 : index
    %1147 = arith.index_cast %1138 : i32 to index
    %c0_684 = arith.constant 0 : index
    %c0_685 = arith.constant 0 : index
    %1148 = vector.load %arg8[%c0_683, %1147, %c0_684, %c0_685] : memref<1x2x2x128xf32, #tpu.memory_space<vmem>>, vector<1x1x2x128xf32>
    %1149 = vector.shape_cast %1148 : vector<1x1x2x128xf32> to vector<2x128xf32>
    %1150 = vector.broadcast %1140 : f32 to vector<2x128xf32>
    %1151 = arith.mulf %1149, %1150 : vector<2x128xf32>
    %1152 = arith.addf %1146, %1151 : vector<2x128xf32>
    %c0_686 = arith.constant 0 : index
    %c0_687 = arith.constant 0 : index
    %1153 = vector.load %arg13[%c0_686, %c0_687] : memref<16x2xf32, #tpu.memory_space<vmem>>, vector<16x2xf32>
    %cst_688 = arith.constant dense<0.000000e+00> : vector<16x128xf32>
    %1154 = tpu.matmul %1153, %1152, %cst_688 {dimension_numbers = #tpu.dot_dimension_numbers<[1], [0], [0], [1], [0, 0, 1, 1], [], []>} : vector<16x2xf32>, vector<2x128xf32>, vector<16x128xf32> -> vector<16x128xf32>
    %1155 = arith.addf %1134, %1154 : vector<16x128xf32>
    %c4_689 = arith.constant 4 : index
    %1156 = arith.index_cast %1070 : i32 to index
    %1157 = memref.load %arg2[%c4_689, %1156] : memref<5x16xi32, #tpu.memory_space<smem>>
    %c4_690 = arith.constant 4 : index
    %1158 = arith.index_cast %1070 : i32 to index
    %1159 = memref.load %arg3[%c4_690, %1158] : memref<5x16xi32, #tpu.memory_space<smem>>
    %c4_691 = arith.constant 4 : index
    %1160 = arith.index_cast %1070 : i32 to index
    %1161 = memref.load %arg4[%c4_691, %1160] : memref<5x16xf32, #tpu.memory_space<smem>>
    %c0_692 = arith.constant 0 : index
    %1162 = arith.index_cast %1157 : i32 to index
    %c0_693 = arith.constant 0 : index
    %c0_694 = arith.constant 0 : index
    %1163 = vector.load %arg9[%c0_692, %1162, %c0_693, %c0_694] : memref<1x16x16x128xf32, #tpu.memory_space<vmem>>, vector<1x1x16x128xf32>
    %1164 = vector.shape_cast %1163 : vector<1x1x16x128xf32> to vector<16x128xf32>
    %cst_695 = arith.constant 1.000000e+00 : f32
    %1165 = arith.subf %cst_695, %1161 : f32
    %1166 = vector.broadcast %1165 : f32 to vector<16x128xf32>
    %1167 = arith.mulf %1164, %1166 : vector<16x128xf32>
    %c0_696 = arith.constant 0 : index
    %1168 = arith.index_cast %1159 : i32 to index
    %c0_697 = arith.constant 0 : index
    %c0_698 = arith.constant 0 : index
    %1169 = vector.load %arg9[%c0_696, %1168, %c0_697, %c0_698] : memref<1x16x16x128xf32, #tpu.memory_space<vmem>>, vector<1x1x16x128xf32>
    %1170 = vector.shape_cast %1169 : vector<1x1x16x128xf32> to vector<16x128xf32>
    %1171 = vector.broadcast %1161 : f32 to vector<16x128xf32>
    %1172 = arith.mulf %1170, %1171 : vector<16x128xf32>
    %1173 = arith.addf %1167, %1172 : vector<16x128xf32>
    %c0_699 = arith.constant 0 : index
    %c0_700 = arith.constant 0 : index
    %1174 = vector.load %arg14[%c0_699, %c0_700] : memref<16x16xf32, #tpu.memory_space<vmem>>, vector<16x16xf32>
    %cst_701 = arith.constant dense<0.000000e+00> : vector<16x128xf32>
    %1175 = tpu.matmul %1174, %1173, %cst_701 {dimension_numbers = #tpu.dot_dimension_numbers<[1], [0], [0], [1], [0, 0, 1, 1], [], []>} : vector<16x16xf32>, vector<16x128xf32>, vector<16x128xf32> -> vector<16x128xf32>
    %1176 = arith.addf %1155, %1175 : vector<16x128xf32>
    %cst_702 = arith.constant 0.000000e+00 : f32
    %1177 = vector.broadcast %cst_702 : f32 to vector<16x128xf32>
    %1178 = arith.maximumf %1176, %1177 : vector<16x128xf32>
    %1179 = vector.broadcast %1068 : f32 to vector<16x128xf32>
    %1180 = arith.mulf %1178, %1179 : vector<16x128xf32>
    %1181 = vector.shape_cast %118 : vector<16x128xf32> to vector<1x16x128xf32>
    %1182 = vector.shape_cast %236 : vector<16x128xf32> to vector<1x16x128xf32>
    %1183 = vector.shape_cast %354 : vector<16x128xf32> to vector<1x16x128xf32>
    %1184 = vector.shape_cast %472 : vector<16x128xf32> to vector<1x16x128xf32>
    %1185 = vector.shape_cast %590 : vector<16x128xf32> to vector<1x16x128xf32>
    %1186 = vector.shape_cast %708 : vector<16x128xf32> to vector<1x16x128xf32>
    %1187 = vector.shape_cast %826 : vector<16x128xf32> to vector<1x16x128xf32>
    %1188 = vector.shape_cast %944 : vector<16x128xf32> to vector<1x16x128xf32>
    %1189 = vector.shape_cast %1062 : vector<16x128xf32> to vector<1x16x128xf32>
    %1190 = vector.shape_cast %1180 : vector<16x128xf32> to vector<1x16x128xf32>
    %1191 = tpu.concatenate %1181, %1182, %1183, %1184, %1185, %1186, %1187, %1188, %1189, %1190 in 0 : vector<1x16x128xf32>, vector<1x16x128xf32>, vector<1x16x128xf32>, vector<1x16x128xf32>, vector<1x16x128xf32>, vector<1x16x128xf32>, vector<1x16x128xf32>, vector<1x16x128xf32>, vector<1x16x128xf32>, vector<1x16x128xf32> -> vector<10x16x128xf32>
    %cst_703 = arith.constant 0.000000e+00 : f32
    %1192 = vector.broadcast %cst_703 : f32 to vector<10x1x128xf32>
    %1193 = tpu.concatenate %1192, %1191, %1192 in 1 : vector<10x1x128xf32>, vector<10x16x128xf32>, vector<10x1x128xf32> -> vector<10x18x128xf32>
    %1194 = vector.extract_strided_slice %1193 {offsets = [0, 0, 0], sizes = [8, 16, 128], strides = [1, 1, 1]} : vector<10x18x128xf32> to vector<8x16x128xf32>
    %1195 = vector.shape_cast %1194 : vector<8x16x128xf32> to vector<128x128xf32>
    %1196 = vector.extract_strided_slice %1193 {offsets = [0, 1, 0], sizes = [8, 16, 128], strides = [1, 1, 1]} : vector<10x18x128xf32> to vector<8x16x128xf32>
    %1197 = vector.shape_cast %1196 : vector<8x16x128xf32> to vector<128x128xf32>
    %1198 = vector.extract_strided_slice %1193 {offsets = [0, 2, 0], sizes = [8, 16, 128], strides = [1, 1, 1]} : vector<10x18x128xf32> to vector<8x16x128xf32>
    %1199 = vector.shape_cast %1198 : vector<8x16x128xf32> to vector<128x128xf32>
    %1200 = vector.extract_strided_slice %1193 {offsets = [1, 0, 0], sizes = [8, 16, 128], strides = [1, 1, 1]} : vector<10x18x128xf32> to vector<8x16x128xf32>
    %1201 = vector.shape_cast %1200 : vector<8x16x128xf32> to vector<128x128xf32>
    %1202 = vector.extract_strided_slice %1193 {offsets = [1, 1, 0], sizes = [8, 16, 128], strides = [1, 1, 1]} : vector<10x18x128xf32> to vector<8x16x128xf32>
    %1203 = vector.shape_cast %1202 : vector<8x16x128xf32> to vector<128x128xf32>
    %1204 = vector.extract_strided_slice %1193 {offsets = [1, 2, 0], sizes = [8, 16, 128], strides = [1, 1, 1]} : vector<10x18x128xf32> to vector<8x16x128xf32>
    %1205 = vector.shape_cast %1204 : vector<8x16x128xf32> to vector<128x128xf32>
    %1206 = vector.extract_strided_slice %1193 {offsets = [2, 0, 0], sizes = [8, 16, 128], strides = [1, 1, 1]} : vector<10x18x128xf32> to vector<8x16x128xf32>
    %1207 = vector.shape_cast %1206 : vector<8x16x128xf32> to vector<128x128xf32>
    %1208 = vector.extract_strided_slice %1193 {offsets = [2, 1, 0], sizes = [8, 16, 128], strides = [1, 1, 1]} : vector<10x18x128xf32> to vector<8x16x128xf32>
    %1209 = vector.shape_cast %1208 : vector<8x16x128xf32> to vector<128x128xf32>
    %1210 = vector.extract_strided_slice %1193 {offsets = [2, 2, 0], sizes = [8, 16, 128], strides = [1, 1, 1]} : vector<10x18x128xf32> to vector<8x16x128xf32>
    %1211 = vector.shape_cast %1210 : vector<8x16x128xf32> to vector<128x128xf32>
    %1212 = tpu.concatenate %1195, %1197, %1199, %1201, %1203, %1205, %1207, %1209, %1211 in 1 : vector<128x128xf32>, vector<128x128xf32>, vector<128x128xf32>, vector<128x128xf32>, vector<128x128xf32>, vector<128x128xf32>, vector<128x128xf32>, vector<128x128xf32>, vector<128x128xf32> -> vector<128x1152xf32>
    %1213 = arith.truncf %1212 : vector<128x1152xf32> to vector<128x1152xbf16>
    %c0_704 = arith.constant 0 : index
    %c0_705 = arith.constant 0 : index
    %1214 = vector.load %arg15[%c0_704, %c0_705] : memref<64x1152xbf16, #tpu.memory_space<vmem>>, vector<64x1152xbf16>
    %cst_706 = arith.constant dense<0.000000e+00> : vector<64x128xf32>
    %1215 = tpu.matmul %1214, %1213, %cst_706 {dimension_numbers = #tpu.dot_dimension_numbers<[1], [1], [0], [0], [0, 0, 1, 0], [], []>} : vector<64x1152xbf16>, vector<128x1152xbf16>, vector<64x128xf32> -> vector<64x128xf32>
    %c0_707 = arith.constant 0 : index
    %c0_708 = arith.constant 0 : index
    %c0_709 = arith.constant 0 : index
    %1216 = vector.load %arg16[%c0_707, %c0_708, %c0_709] : memref<1x64x128xf32, #tpu.memory_space<vmem>>, vector<1x64x128xf32>
    %1217 = vector.shape_cast %1216 : vector<1x64x128xf32> to vector<64x128xf32>
    %1218 = vector.shape_cast %1215 : vector<64x128xf32> to vector<1x64x128xf32>
    tpu.vector_store %arg16[%c0_707, %c0_708, %c0_709], %1218 {strides = array<i32>} : memref<1x64x128xf32, #tpu.memory_space<vmem>>, vector<1x64x128xf32>,
    %c0_i32_710 = arith.constant 0 : i32
    %1219 = arith.cmpi eq, %arg1, %c0_i32_710 : i32
    %1220 = arith.extui %1219 : i1 to i32
    %c0_i32_711 = arith.constant 0 : i32
    %1221 = arith.cmpi ne, %1220, %c0_i32_711 : i32
    scf.if %1221 {
      %cst_720 = arith.constant 0.000000e+00 : f32
      %1234 = vector.broadcast %cst_720 : f32 to vector<64x2xf32>
      %c0_721 = arith.constant 0 : index
      %c0_722 = arith.constant 0 : index
      %c0_723 = arith.constant 0 : index
      %1235 = vector.load %arg17[%c0_721, %c0_722, %c0_723] : memref<1x64x2xf32, #tpu.memory_space<vmem>>, vector<1x64x2xf32>
      %1236 = vector.shape_cast %1235 : vector<1x64x2xf32> to vector<64x2xf32>
      %1237 = vector.shape_cast %1234 : vector<64x2xf32> to vector<1x64x2xf32>
      tpu.vector_store %arg17[%c0_721, %c0_722, %c0_723], %1237 {strides = array<i32>} : memref<1x64x2xf32, #tpu.memory_space<vmem>>, vector<1x64x2xf32>,
    } else {
    }
    %cst_712 = arith.constant dense<0.000000e+00> : vector<64xf32>
    %1222 = vector.multi_reduction <add>, %1215, %cst_712 [1] : vector<64x128xf32> to vector<64xf32>
    %1223 = vector.shape_cast %1222 : vector<64xf32> to vector<64x1xf32>
    %1224 = arith.mulf %1215, %1215 : vector<64x128xf32>
    %cst_713 = arith.constant dense<0.000000e+00> : vector<64xf32>
    %1225 = vector.multi_reduction <add>, %1224, %cst_713 [1] : vector<64x128xf32> to vector<64xf32>
    %1226 = vector.shape_cast %1225 : vector<64xf32> to vector<64x1xf32>
    %c0_714 = arith.constant 0 : index
    %c0_715 = arith.constant 0 : index
    %c0_716 = arith.constant 0 : index
    %1227 = vector.load %arg17[%c0_714, %c0_715, %c0_716] : memref<1x64x2xf32, #tpu.memory_space<vmem>>, vector<1x64x2xf32>
    %1228 = vector.shape_cast %1227 : vector<1x64x2xf32> to vector<64x2xf32>
    %1229 = tpu.concatenate %1223, %1226 in 1 : vector<64x1xf32>, vector<64x1xf32> -> vector<64x2xf32>
    %1230 = arith.addf %1228, %1229 : vector<64x2xf32>
    %c0_717 = arith.constant 0 : index
    %c0_718 = arith.constant 0 : index
    %c0_719 = arith.constant 0 : index
    %1231 = vector.load %arg17[%c0_717, %c0_718, %c0_719] : memref<1x64x2xf32, #tpu.memory_space<vmem>>, vector<1x64x2xf32>
    %1232 = vector.shape_cast %1231 : vector<1x64x2xf32> to vector<64x2xf32>
    %1233 = vector.shape_cast %1230 : vector<64x2xf32> to vector<1x64x2xf32>
    tpu.vector_store %arg17[%c0_717, %c0_718, %c0_719], %1233 {strides = array<i32>} : memref<1x64x2xf32, #tpu.memory_space<vmem>>, vector<1x64x2xf32>,
    return
  }
  func.func @transform_0(%arg0: i32, %arg1: i32, %arg2: memref<5x16xi32, #tpu.memory_space<smem>>, %arg3: memref<5x16xi32, #tpu.memory_space<smem>>, %arg4: memref<5x16xf32, #tpu.memory_space<smem>>) -> (i32, i32, i32, i32) {
    %c0_i32 = arith.constant 0 : i32
    %c0_i32_0 = arith.constant 0 : i32
    %c0_i32_1 = arith.constant 0 : i32
    %c0_i32_2 = arith.constant 0 : i32
    return %arg0, %c0_i32, %c0_i32_0, %c0_i32_1 : i32, i32, i32, i32
  }
  func.func @transform_1(%arg0: i32, %arg1: i32, %arg2: memref<5x16xi32, #tpu.memory_space<smem>>, %arg3: memref<5x16xi32, #tpu.memory_space<smem>>, %arg4: memref<5x16xf32, #tpu.memory_space<smem>>) -> (i32, i32, i32, i32) {
    %c0_i32 = arith.constant 0 : i32
    %c0_i32_0 = arith.constant 0 : i32
    %c0_i32_1 = arith.constant 0 : i32
    %c0_i32_2 = arith.constant 0 : i32
    return %arg0, %c0_i32, %c0_i32_0, %c0_i32_1 : i32, i32, i32, i32
  }
  func.func @transform_2(%arg0: i32, %arg1: i32, %arg2: memref<5x16xi32, #tpu.memory_space<smem>>, %arg3: memref<5x16xi32, #tpu.memory_space<smem>>, %arg4: memref<5x16xf32, #tpu.memory_space<smem>>) -> (i32, i32, i32, i32) {
    %c0_i32 = arith.constant 0 : i32
    %c0_i32_0 = arith.constant 0 : i32
    %c0_i32_1 = arith.constant 0 : i32
    %c0_i32_2 = arith.constant 0 : i32
    return %arg0, %c0_i32, %c0_i32_0, %c0_i32_1 : i32, i32, i32, i32
  }
  func.func @transform_3(%arg0: i32, %arg1: i32, %arg2: memref<5x16xi32, #tpu.memory_space<smem>>, %arg3: memref<5x16xi32, #tpu.memory_space<smem>>, %arg4: memref<5x16xf32, #tpu.memory_space<smem>>) -> (i32, i32, i32, i32) {
    %c0_i32 = arith.constant 0 : i32
    %c0_i32_0 = arith.constant 0 : i32
    %c0_i32_1 = arith.constant 0 : i32
    %c0_i32_2 = arith.constant 0 : i32
    return %arg0, %c0_i32, %c0_i32_0, %c0_i32_1 : i32, i32, i32, i32
  }
  func.func @transform_4(%arg0: i32, %arg1: i32, %arg2: memref<5x16xi32, #tpu.memory_space<smem>>, %arg3: memref<5x16xi32, #tpu.memory_space<smem>>, %arg4: memref<5x16xf32, #tpu.memory_space<smem>>) -> (i32, i32, i32, i32) {
    %c0_i32 = arith.constant 0 : i32
    %c0_i32_0 = arith.constant 0 : i32
    %c0_i32_1 = arith.constant 0 : i32
    %c0_i32_2 = arith.constant 0 : i32
    return %arg0, %c0_i32, %c0_i32_0, %c0_i32_1 : i32, i32, i32, i32
  }
  func.func @transform_5(%arg0: i32, %arg1: i32, %arg2: memref<5x16xi32, #tpu.memory_space<smem>>, %arg3: memref<5x16xi32, #tpu.memory_space<smem>>, %arg4: memref<5x16xf32, #tpu.memory_space<smem>>) -> (i32, i32) {
    %c0_i32 = arith.constant 0 : i32
    %c0_i32_0 = arith.constant 0 : i32
    %c0_i32_1 = arith.constant 0 : i32
    return %c0_i32, %c0_i32_0 : i32, i32
  }
  func.func @transform_6(%arg0: i32, %arg1: i32, %arg2: memref<5x16xi32, #tpu.memory_space<smem>>, %arg3: memref<5x16xi32, #tpu.memory_space<smem>>, %arg4: memref<5x16xf32, #tpu.memory_space<smem>>) -> (i32, i32) {
    %c0_i32 = arith.constant 0 : i32
    %c0_i32_0 = arith.constant 0 : i32
    %c0_i32_1 = arith.constant 0 : i32
    return %c0_i32, %c0_i32_0 : i32, i32
  }
  func.func @transform_7(%arg0: i32, %arg1: i32, %arg2: memref<5x16xi32, #tpu.memory_space<smem>>, %arg3: memref<5x16xi32, #tpu.memory_space<smem>>, %arg4: memref<5x16xf32, #tpu.memory_space<smem>>) -> (i32, i32) {
    %c0_i32 = arith.constant 0 : i32
    %c0_i32_0 = arith.constant 0 : i32
    %c0_i32_1 = arith.constant 0 : i32
    return %c0_i32, %c0_i32_0 : i32, i32
  }
  func.func @transform_8(%arg0: i32, %arg1: i32, %arg2: memref<5x16xi32, #tpu.memory_space<smem>>, %arg3: memref<5x16xi32, #tpu.memory_space<smem>>, %arg4: memref<5x16xf32, #tpu.memory_space<smem>>) -> (i32, i32) {
    %c0_i32 = arith.constant 0 : i32
    %c0_i32_0 = arith.constant 0 : i32
    %c0_i32_1 = arith.constant 0 : i32
    return %c0_i32, %c0_i32_0 : i32, i32
  }
  func.func @transform_9(%arg0: i32, %arg1: i32, %arg2: memref<5x16xi32, #tpu.memory_space<smem>>, %arg3: memref<5x16xi32, #tpu.memory_space<smem>>, %arg4: memref<5x16xf32, #tpu.memory_space<smem>>) -> (i32, i32) {
    %c0_i32 = arith.constant 0 : i32
    %c0_i32_0 = arith.constant 0 : i32
    %c0_i32_1 = arith.constant 0 : i32
    return %c0_i32, %c0_i32_0 : i32, i32
  }
  func.func @transform_10(%arg0: i32, %arg1: i32, %arg2: memref<5x16xi32, #tpu.memory_space<smem>>, %arg3: memref<5x16xi32, #tpu.memory_space<smem>>, %arg4: memref<5x16xf32, #tpu.memory_space<smem>>) -> (i32, i32) {
    %c0_i32 = arith.constant 0 : i32
    %c0_i32_0 = arith.constant 0 : i32
    %c0_i32_1 = arith.constant 0 : i32
    return %c0_i32, %c0_i32_0 : i32, i32
  }
  func.func @transform_11(%arg0: i32, %arg1: i32, %arg2: memref<5x16xi32, #tpu.memory_space<smem>>, %arg3: memref<5x16xi32, #tpu.memory_space<smem>>, %arg4: memref<5x16xf32, #tpu.memory_space<smem>>) -> (i32, i32, i32) {
    %c0_i32 = arith.constant 0 : i32
    %c0_i32_0 = arith.constant 0 : i32
    return %arg0, %c0_i32, %arg1 : i32, i32, i32
  }
  func.func @transform_12(%arg0: i32, %arg1: i32, %arg2: memref<5x16xi32, #tpu.memory_space<smem>>, %arg3: memref<5x16xi32, #tpu.memory_space<smem>>, %arg4: memref<5x16xf32, #tpu.memory_space<smem>>) -> (i32, i32, i32) {
    %c0_i32 = arith.constant 0 : i32
    %c0_i32_0 = arith.constant 0 : i32
    %c0_i32_1 = arith.constant 0 : i32
    return %arg0, %c0_i32, %c0_i32_0 : i32, i32, i32
  }
}

module attributes {stable_mosaic.version = 11 : i64} {
  func.func @_pass2_kernel(%arg0: i32, %arg1: i32, %arg2: memref<1x64x128xf32, #tpu.memory_space<vmem>>, %arg3: memref<64x1xf32, #tpu.memory_space<vmem>>, %arg4: memref<64x1xf32, #tpu.memory_space<vmem>>, %arg5: memref<32x64xf32, #tpu.memory_space<vmem>>, %arg6: memref<32x1xf32, #tpu.memory_space<vmem>>, %arg7: memref<8x32xf32, #tpu.memory_space<vmem>>, %arg8: memref<8x1xf32, #tpu.memory_space<vmem>>, %arg9: memref<1x32x128xf32, #tpu.memory_space<vmem>>, %arg10: memref<1x8x128xf32, #tpu.memory_space<vmem>>) attributes {dimension_semantics = [#tpu.dimension_semantics<parallel>, #tpu.dimension_semantics<parallel>], iteration_bounds = array<i64: 2, 2>, scalar_prefetch = 0 : i64, scratch_operands = 0 : i64, tpu.core_type = #tpu.core_type<tc>, window_params = [{transform_indices = @transform_0, window_bounds = array<i64: 1, 64, 128>}, {pipeline_mode = #tpu.pipeline_mode<synchronous>, transform_indices = @transform_1, window_bounds = array<i64: 64, 1>}, {pipeline_mode = #tpu.pipeline_mode<synchronous>, transform_indices = @transform_2, window_bounds = array<i64: 64, 1>}, {pipeline_mode = #tpu.pipeline_mode<synchronous>, transform_indices = @transform_3, window_bounds = array<i64: 32, 64>}, {pipeline_mode = #tpu.pipeline_mode<synchronous>, transform_indices = @transform_4, window_bounds = array<i64: 32, 1>}, {pipeline_mode = #tpu.pipeline_mode<synchronous>, transform_indices = @transform_5, window_bounds = array<i64: 8, 32>}, {pipeline_mode = #tpu.pipeline_mode<synchronous>, transform_indices = @transform_6, window_bounds = array<i64: 8, 1>}, {transform_indices = @transform_7, window_bounds = array<i64: 1, 32, 128>}, {transform_indices = @transform_8, window_bounds = array<i64: 1, 8, 128>}]} {
    %c0 = arith.constant 0 : index
    %c0_0 = arith.constant 0 : index
    %c0_1 = arith.constant 0 : index
    %0 = vector.load %arg2[%c0, %c0_0, %c0_1] : memref<1x64x128xf32, #tpu.memory_space<vmem>>, vector<1x64x128xf32>
    %1 = vector.shape_cast %0 : vector<1x64x128xf32> to vector<64x128xf32>
    %c0_2 = arith.constant 0 : index
    %c0_3 = arith.constant 0 : index
    %2 = vector.load %arg3[%c0_2, %c0_3] : memref<64x1xf32, #tpu.memory_space<vmem>>, vector<64x1xf32>
    %3 = vector.broadcast %2 : vector<64x1xf32> to vector<64x128xf32>
    %4 = arith.mulf %1, %3 : vector<64x128xf32>
    %c0_4 = arith.constant 0 : index
    %c0_5 = arith.constant 0 : index
    %5 = vector.load %arg4[%c0_4, %c0_5] : memref<64x1xf32, #tpu.memory_space<vmem>>, vector<64x1xf32>
    %6 = vector.broadcast %5 : vector<64x1xf32> to vector<64x128xf32>
    %7 = arith.addf %4, %6 : vector<64x128xf32>
    %cst = arith.constant 0.000000e+00 : f32
    %8 = vector.broadcast %cst : f32 to vector<64x128xf32>
    %9 = arith.maximumf %7, %8 : vector<64x128xf32>
    %c0_6 = arith.constant 0 : index
    %c0_7 = arith.constant 0 : index
    %10 = vector.load %arg5[%c0_6, %c0_7] : memref<32x64xf32, #tpu.memory_space<vmem>>, vector<32x64xf32>
    %cst_8 = arith.constant dense<0.000000e+00> : vector<32x128xf32>
    %11 = tpu.matmul %10, %9, %cst_8 {dimension_numbers = #tpu.dot_dimension_numbers<[1], [0], [0], [1], [0, 0, 1, 1], [], []>} : vector<32x64xf32>, vector<64x128xf32>, vector<32x128xf32> -> vector<32x128xf32>
    %c0_9 = arith.constant 0 : index
    %c0_10 = arith.constant 0 : index
    %12 = vector.load %arg6[%c0_9, %c0_10] : memref<32x1xf32, #tpu.memory_space<vmem>>, vector<32x1xf32>
    %13 = vector.broadcast %12 : vector<32x1xf32> to vector<32x128xf32>
    %14 = arith.addf %11, %13 : vector<32x128xf32>
    %c0_11 = arith.constant 0 : index
    %c0_12 = arith.constant 0 : index
    %15 = vector.load %arg7[%c0_11, %c0_12] : memref<8x32xf32, #tpu.memory_space<vmem>>, vector<8x32xf32>
    %cst_13 = arith.constant dense<0.000000e+00> : vector<8x128xf32>
    %16 = tpu.matmul %15, %14, %cst_13 {dimension_numbers = #tpu.dot_dimension_numbers<[1], [0], [0], [1], [0, 0, 1, 1], [], []>} : vector<8x32xf32>, vector<32x128xf32>, vector<8x128xf32> -> vector<8x128xf32>
    %c0_14 = arith.constant 0 : index
    %c0_15 = arith.constant 0 : index
    %17 = vector.load %arg8[%c0_14, %c0_15] : memref<8x1xf32, #tpu.memory_space<vmem>>, vector<8x1xf32>
    %18 = vector.broadcast %17 : vector<8x1xf32> to vector<8x128xf32>
    %19 = arith.addf %16, %18 : vector<8x128xf32>
    %c0_16 = arith.constant 0 : index
    %c0_17 = arith.constant 0 : index
    %c0_18 = arith.constant 0 : index
    %20 = vector.load %arg9[%c0_16, %c0_17, %c0_18] : memref<1x32x128xf32, #tpu.memory_space<vmem>>, vector<1x32x128xf32>
    %21 = vector.shape_cast %20 : vector<1x32x128xf32> to vector<32x128xf32>
    %22 = vector.shape_cast %14 : vector<32x128xf32> to vector<1x32x128xf32>
    tpu.vector_store %arg9[%c0_16, %c0_17, %c0_18], %22 {strides = array<i32>} : memref<1x32x128xf32, #tpu.memory_space<vmem>>, vector<1x32x128xf32>,
    %c0_19 = arith.constant 0 : index
    %c0_20 = arith.constant 0 : index
    %c0_21 = arith.constant 0 : index
    %23 = vector.load %arg10[%c0_19, %c0_20, %c0_21] : memref<1x8x128xf32, #tpu.memory_space<vmem>>, vector<1x8x128xf32>
    %24 = vector.shape_cast %23 : vector<1x8x128xf32> to vector<8x128xf32>
    %25 = vector.shape_cast %19 : vector<8x128xf32> to vector<1x8x128xf32>
    tpu.vector_store %arg10[%c0_19, %c0_20, %c0_21], %25 {strides = array<i32>} : memref<1x8x128xf32, #tpu.memory_space<vmem>>, vector<1x8x128xf32>,
    return
  }
  func.func @transform_0(%arg0: i32, %arg1: i32) -> (i32, i32, i32) {
    %c0_i32 = arith.constant 0 : i32
    %c0_i32_0 = arith.constant 0 : i32
    return %arg0, %c0_i32, %arg1 : i32, i32, i32
  }
  func.func @transform_1(%arg0: i32, %arg1: i32) -> (i32, i32) {
    %c0_i32 = arith.constant 0 : i32
    %c0_i32_0 = arith.constant 0 : i32
    %c0_i32_1 = arith.constant 0 : i32
    return %c0_i32, %c0_i32_0 : i32, i32
  }
  func.func @transform_2(%arg0: i32, %arg1: i32) -> (i32, i32) {
    %c0_i32 = arith.constant 0 : i32
    %c0_i32_0 = arith.constant 0 : i32
    %c0_i32_1 = arith.constant 0 : i32
    return %c0_i32, %c0_i32_0 : i32, i32
  }
  func.func @transform_3(%arg0: i32, %arg1: i32) -> (i32, i32) {
    %c0_i32 = arith.constant 0 : i32
    %c0_i32_0 = arith.constant 0 : i32
    %c0_i32_1 = arith.constant 0 : i32
    return %c0_i32, %c0_i32_0 : i32, i32
  }
  func.func @transform_4(%arg0: i32, %arg1: i32) -> (i32, i32) {
    %c0_i32 = arith.constant 0 : i32
    %c0_i32_0 = arith.constant 0 : i32
    %c0_i32_1 = arith.constant 0 : i32
    return %c0_i32, %c0_i32_0 : i32, i32
  }
  func.func @transform_5(%arg0: i32, %arg1: i32) -> (i32, i32) {
    %c0_i32 = arith.constant 0 : i32
    %c0_i32_0 = arith.constant 0 : i32
    %c0_i32_1 = arith.constant 0 : i32
    return %c0_i32, %c0_i32_0 : i32, i32
  }
  func.func @transform_6(%arg0: i32, %arg1: i32) -> (i32, i32) {
    %c0_i32 = arith.constant 0 : i32
    %c0_i32_0 = arith.constant 0 : i32
    %c0_i32_1 = arith.constant 0 : i32
    return %c0_i32, %c0_i32_0 : i32, i32
  }
  func.func @transform_7(%arg0: i32, %arg1: i32) -> (i32, i32, i32) {
    %c0_i32 = arith.constant 0 : i32
    %c0_i32_0 = arith.constant 0 : i32
    return %arg0, %c0_i32, %arg1 : i32, i32, i32
  }
  func.func @transform_8(%arg0: i32, %arg1: i32) -> (i32, i32, i32) {
    %c0_i32 = arith.constant 0 : i32
    %c0_i32_0 = arith.constant 0 : i32
    return %arg0, %c0_i32, %arg1 : i32, i32, i32
  }
}

</mosaic_0001>

<bundles_post_ra>
// kernel: textnet_forward.3
= control target key start
LH: loop header
LB: loop body
LE: loop exit
PB: predicated region body
PF: predicated region fallthrough
CT: control target
= control target key end

     0   :  { %s1176_s27 = smov 0   ;;  %s1178_s28 = smov 0   ;;  %s1385_s0 = inlined_call_operand.vmem [shape: f32[2,64,256], index: 0, kind: input, shape index: {}]   ;;  %s1386_s1 = inlined_call_operand.vmem [shape: f32[64,1], index: 1, kind: input, shape index: {}]   ;;  %s1387_s2 = inlined_call_operand.vmem [shape: f32[64,1], index: 2, kind: input, shape index: {}]   ;;  %s1388_s3 = inlined_call_operand.vmem [shape: f32[32,64], index: 3, kind: input, shape index: {}]   ;;  %s1389_s4 = inlined_call_operand.vmem [shape: f32[32,1], index: 4, kind: input, shape index: {}]   ;;  %s1390_s5 = inlined_call_operand.vmem [shape: f32[8,32], index: 5, kind: input, shape index: {}]   ;;  %s1391_s6 = inlined_call_operand.vmem [shape: f32[8,1], index: 6, kind: input, shape index: {}]   ;;  %s1392_s7 = inlined_call_operand.vmem [shape: f32[2,32,256], index: 7, kind: output, shape index: {0}]   ;;  %s1393_s8 = inlined_call_operand.vmem [shape: f32[2,8,256], index: 8, kind: output, shape index: {1}]  }
   0x1   :  { %s1180_s29 = smov 0   ;;  %s1182_s30 = smov 0  }
   0x2   :  { %s1184_s9 = smov 0   ;;  %s1186_s10 = smov 0  }
   0x3   :  { %s1188_s11 = smov 0  }
   0x4 LB: > { %s28_s12 = sadd.s32 1, %s1117_s9  ;;  %s31_s13 = sadd.s32 1, %s1121_s10  ;;  %s1125_s11 = sphi %s1188_s11, %s19_s11   ;;  %s1121_s10 = sphi %s1186_s10, %s1400_s10   ;;  %s1117_s9 = sphi %s1184_s9, %s1399_s9   ;;  %s1113_s30 = sphi %s1182_s30, %s1398_s30   ;;  %s1109_s29 = sphi %s1180_s29, %s1397_s29   ;;  %s1105_s28 = sphi %s1178_s28, %s1396_s28   ;;  %s1101_s27 = sphi %s1176_s27, %s1395_s27  }
   0x5   : > { %p29_p0 = scmp.ge.s32.totalorder %s28_s12, 2  ;;  %s915_s14 = sadd.s32 4294967295, %s1125_s11  }
   0x6   : > { %p47_p1 = scmp.ne.s32.totalorder %s1105_s28, %s1101_s27  ;;  %p48_p2 = scmp.eq.s32.totalorder %s1125_s11, 0 }
   0x7   : > { %s1402_s12 = smov (%p29_p0, %s28_s12), 0  ;;  %s1404_s13 = smov (!%p29_p0, %s31_s13), %s1121_s10 }
   0x8   : > { %p33_p3 = scmp.ge.s32.totalorder %s1404_s13, 2  ;;  %p205_p4 = scmp.eq.s32.totalorder %s915_s14, 3 }
   0x9   : > { %s36_s15 = ssub.s32 %s1117_s9, %s1402_s12  ;;  %p49_p5 = por %p48_p2, %p47_p1 }
   0xa   : > { %s1406_s13 = smov (%p33_p3, %s1404_s13), 0  ;;  %p1224_p6 = por %p205_p4, %p47_p1 }
   0xb   : > { %s35_s17 = ssub.s32 %s1121_s10, %s1406_s13  ;;  %s40_s19 = sadd.s32 1, %s1105_s28 }
   0xc   : > { %s37_s18 = sor.u32 %s36_s15, %s35_s17  ;;  %p918_p8 = scmp.ge.s32.totalorder %s1125_s11, 4 }
   0xd   : > { %p38_p7 = scmp.eq.s32.totalorder %s37_s18, 0 }
   0xe   : > { %273 = sbr.rel (%p918_p8) target bundleno = 31 (0x1f), region = 40 }
   0xf   : > { %s1232_s20 = scalar_select %p38_p7, %s1105_s28, %s40_s19  }
  0x15   : > { %276 = sbr.rel (!%p49_p5) target bundleno = 31 (0x1f), region = 44  ;;  %s278_s21 = sand.u32 (%p49_p5), 1, %s1105_s28  }
  0x16   : > { %s920_s22 = sshll.u32 (%p49_p5), %s1121_s10, 4  ;;  %s919_s23 = sshll.u32 (%p49_p5), %s278_s21, 6 }
  0x17   : > { %s282_s24 = sadd.s32 (%p49_p5), %s1117_s9, %s920_s22  ;;  %s280_s17 = scalar_lea.vmem (%p49_p5), [#allocation2], %s919_s23 }
  0x18   : > { %s921_s25 = sshll.u32 (%p49_p5), %s282_s24, 3 }
  0x19   : > { %s284_s15 = scalar_lea.vmem (%p49_p5), %s1385_s0, %s921_s25 }
  0x1a   : > { %v326_v0 = vld [vmem:[%s284_s15] sm:$0xff] (%p49_p5)  ;;  %v328_v1 = vld [vmem:[%s284_s15 + $0x10] sm:$0xff] (%p49_p5) }
  0x1b   : > { %v330_v2 = vld [vmem:[%s284_s15 + $0x20] sm:$0xff] (%p49_p5)  ;;  %327 = vst [vmem:[%s280_s17] sm:$0xff] (%p49_p5), %v326_v0  ;;  %329 = vst [vmem:[%s280_s17 + $0x8] sm:$0xff] (%p49_p5), %v328_v1  ;;  %v332_v3 = vld [vmem:[%s284_s15 + $0x30] sm:$0xff] (%p49_p5) }
  0x1c   : > { %331 = vst [vmem:[%s280_s17 + $0x10] sm:$0xff] %v330_v2  ;;  %v334_v4 = vld [vmem:[%s284_s15 + $0x40] sm:$0xff]  ;;  %v336_v5 = vld [vmem:[%s284_s15 + $0x50] sm:$0xff]  ;;  %333 = vst [vmem:[%s280_s17 + $0x18] sm:$0xff] %v332_v3 }
  0x1d   : > { %335 = vst [vmem:[%s280_s17 + $0x20] sm:$0xff] %v334_v4  ;;  %337 = vst [vmem:[%s280_s17 + $0x28] sm:$0xff] %v336_v5  ;;  %v338_v6 = vld [vmem:[%s284_s15 + $0x60] sm:$0xff]  ;;  %v340_v7 = vld [vmem:[%s284_s15 + $0x70] sm:$0xff] }
  0x1e   : > { %339 = vst [vmem:[%s280_s17 + $0x30] sm:$0xff] %v338_v6  ;;  %341 = vst [vmem:[%s280_s17 + $0x38] sm:$0xff] %v340_v7 }
  0x1f PF: > { %p922_p9 = scmp.ge.s32.totalorder %s1125_s11, 1  ;;  %p346_p10 = scmp.lt.s32.totalorder %s1125_s11, 5 }
  0x21   : > { %p347_p11 = pnand %p922_p9, %p346_p10 }
  0x22   : > { %v465_v8 = vld [vmem:[%s1387_s2] sm:$0xff] (!%p347_p11)  ;;  %v1127_v10 = vmov (!%p347_p11), 0   ;;  %v466_v11 = vld [vmem:[%s1387_s2 + $0x8] sm:$0xff] (!%p347_p11)  ;;  %v412_v13 = vld [vmem:[%s1386_s1 + $0x18] sm:$0xff] (!%p347_p11)  ;;  %vm557_vm0 = vcmask (!%p347_p11), 523264   ;;  %s353_s18 = sand.u32 (!%p347_p11), 1, %s1101_s27  }
  0x23   : > { %350 = sbr.rel (%p347_p11) target bundleno = 641 (0x281), region = 82  ;;  %v409_v9 = vld [vmem:[%s1386_s1] sm:$0xff] (!%p347_p11)  ;;  %1070 = vset.pattern.permute.xlu1 (!%p347_p11), %v1127_v10  ;;  %1069 = vset.pattern.permute.xlu0 (!%p347_p11), %v1127_v10  ;;  %v410_v12 = vld [vmem:[%s1386_s1 + $0x8] sm:$0xff] (!%p347_p11)  ;;  %v411_v14 = vld [vmem:[%s1386_s1 + $0x10] sm:$0xff] (!%p347_p11)  ;;  %s923_s19 = sshll.u32 (!%p347_p11), %s353_s18, 6  ;;  %vm1129_vm1 = vmmov (!%p347_p11), 0  }
  0x24   : > { %475 = vperm.xlu1 (!%p347_p11), %1070, %v465_v8   ;;  %419 = vperm.xlu0 (!%p347_p11), %1069, %v409_v9   ;;  %v468_v15 = vld [vmem:[%s1387_s2 + $0x18] sm:$0xff] (!%p347_p11)  ;;  %v467_v16 = vld [vmem:[%s1387_s2 + $0x10] sm:$0xff] (!%p347_p11)  ;;  %v414_v17 = vld [vmem:[%s1386_s1 + $0x28] sm:$0xff] (!%p347_p11)  ;;  %s1313_s21 = scalar_lea.vmem (!%p347_p11), [#allocation2], %s923_s19  ;;  %s924_s15 = sshll.u32 (!%p347_p11), %s353_s18, 5  ;;  %vm662_vm2 = vcmask (!%p347_p11), 261120  }
  0x25   : > { %v413_v18 = vld [vmem:[%s1386_s1 + $0x20] sm:$0xff] (!%p347_p11)  ;;  %v470_v19 = vld [vmem:[%s1387_s2 + $0x28] sm:$0xff] (!%p347_p11)  ;;  %v416_v21 = vld [vmem:[%s1386_s1 + $0x38] sm:$0xff] (!%p347_p11)  ;;  %s1337_s17 = scalar_lea.vmem (!%p347_p11), [#allocation3], %s924_s15  ;;  %p393_p12 = scmp.lt.s32.totalorder (!%p347_p11), %s1113_s30, 1 }
  0x26   : > { %v469_v20 = vld [vmem:[%s1387_s2 + $0x20] sm:$0xff] (!%p347_p11)  ;;  %v415_v22 = vld [vmem:[%s1386_s1 + $0x30] sm:$0xff] (!%p347_p11)  ;;  %v472_v23 = vld [vmem:[%s1387_s2 + $0x38] sm:$0xff] (!%p347_p11)  ;;  %p395_p13 = scmp.lt.s32.totalorder (!%p347_p11), %s1109_s29, 1 }
  0x27   : > { %v471_v24 = vld [vmem:[%s1387_s2 + $0x30] sm:$0xff] (!%p347_p11)  ;;  %v534_v25 = vld [vmem:[%s1389_s4 + $0x8] sm:$0xff] (!%p347_p11)  ;;  %v533_v26 = vld [vmem:[%s1389_s4] sm:$0xff] (!%p347_p11) }
  0x28   : > { %480 = vperm.xlu1 (!%p347_p11), %1070, %v466_v11   ;;  %424 = vperm.xlu0 (!%p347_p11), %1069, %v410_v12   ;;  %v536_v27 = vld [vmem:[%s1389_s4 + $0x18] sm:$0xff] (!%p347_p11)  ;;  %v535_v28 = vld [vmem:[%s1389_s4 + $0x10] sm:$0xff] (!%p347_p11)  ;;  %v529_v29 = vld [vmem:[%s1388_s3] sm:$0xff] (!%p347_p11) }
  0x29   : > { %v656_v30 = vld [vmem:[%s1391_s6] sm:$0xff] (!%p347_p11)  ;;  %970 = vmatprep.mubr.msk.f32.mxu0 (!%p347_p11), %vm557_vm0, %v529_v29  ;;  %v402_v35 = vld [vmem:[%s1313_s21 + $0x8] sm:$0xff] (!%p347_p11)  ;;  %v404_v42 = vld [vmem:[%s1313_s21 + $0x18] sm:$0xff] (!%p347_p11) }
  0x2a   : > { %v401_v31 = vld [vmem:[%s1313_s21] sm:$0xff]  ;;  %v403_v44 = vld [vmem:[%s1313_s21 + $0x10] sm:$0xff]  ;;  %v406_v57 = vld [vmem:[%s1313_s21 + $0x28] sm:$0xff]  ;;  %s394_s19 = scalar_select %p393_p12, %s1113_s30, 1 }
  0x2b   : > { %v405_v59 = vld [vmem:[%s1313_s21 + $0x20] sm:$0xff]  ;;  %v408_v6 = vld [vmem:[%s1313_s21 + $0x38] sm:$0xff]  ;;  %v407_v8 = vld [vmem:[%s1313_s21 + $0x30] sm:$0xff]  ;;  %s396_s21 = scalar_select %p395_p13, %s1109_s29, 1 }
  0x2c   : > { %434 = vperm.xlu1 %1070, %v412_v13   ;;  %429 = vperm.xlu0 %1069, %v411_v14   ;;  %s925_s22 = sshll.u32 %s394_s19, 1  ;;  %s933_s15 = sshll.u32 (%p1224_p6), %s1113_s30, 3 }
  0x2d   : > { %s398_s23 = sadd.s32 %s925_s22, %s396_s21  ;;  %s757_s27 = sadd.s32 (%p1224_p6), %s1109_s29, %s933_s15 }
  0x2e   : > { %s926_s24 = sshll.u32 %s398_s23, 3  ;;  %s934_s18 = sshll.u32 (%p1224_p6), %s757_s27, 3 }
  0x2f   : > { %s400_s14 = scalar_lea.vmem %s1393_s8, %s926_s24  ;;  %s759_s22 = scalar_lea.vmem (%p1224_p6), %s1392_s7, %s934_s18 }
  0x30   : > { %490 = vperm.xlu1 %1070, %v468_v15   ;;  %485 = vperm.xlu0 %1069, %v467_v16  }
  0x34   : > { %444 = vperm.xlu1 %1070, %v414_v17   ;;  %439 = vperm.xlu0 %1069, %v413_v18  }
  0x38   : > { %500 = vperm.xlu1 %1070, %v470_v19   ;;  %495 = vperm.xlu0 %1069, %v469_v20   ;;  %v530_v19 = vld [vmem:[%s1388_s3 + $0x8] sm:$0xff]  ;;  %v531_v20 = vld [vmem:[%s1388_s3 + $0x10] sm:$0xff] }
  0x3c   : > { %454 = vperm.xlu1 %1070, %v416_v21   ;;  %449 = vperm.xlu0 %1069, %v415_v22   ;;  %v532_v21 = vld [vmem:[%s1388_s3 + $0x18] sm:$0xff]  ;;  %v1128_v22 = vmov 0.0|0.0  }
  0x3d   : > { %1003 = vmatprep.subr.bf16.mxu1 %v1128_v22 }
  0x40   : > { %510 = vperm.xlu1 %1070, %v472_v23   ;;  %505 = vperm.xlu0 %1069, %v471_v24   ;;  %v1130_v23 = vmov 0.0  }
  0x41   : > { %984 = vmatprep.mubr.msk.f32.mxu1 %vm1129_vm1, %v1130_v23 }
  0x44   : > { %544 = vperm.xlu1 %1070, %v534_v25   ;;  %539 = vperm.xlu0 %1069, %v533_v26  }
  0x48   : > { %554 = vperm.xlu1 %1070, %v536_v27   ;;  %549 = vperm.xlu0 %1069, %v535_v28  }
  0x4c   : > { %659 = vperm.xlu0 %1069, %v656_v30  }
  0xa3   : > { %v476_v32 = vpop.permute.xlu1 %475  ;;  %v420_v33 = vpop.permute.xlu0 %419 }
  0xa4   : > { %v457_v34 = vmul.f32 %v420_v33, %v401_v31 }
  0xa6   : > { %v513_v38 = vadd.f32 %v476_v32, %v457_v34 }
  0xa7   : > { %v481_v36 = vpop.permute.xlu1 %480  ;;  %v425_v37 = vpop.permute.xlu0 %424 }
  0xa8   : > { %v458_v39 = vmul.f32 %v425_v37, %v402_v35  ;;  %v521_v45 = vmax.f32 %v513_v38, 0.0  ;;  %v655_v38 = vld [vmem:[%s1390_s5] sm:$0xff] }
  0xaa   : > { %v514_v40 = vadd.f32 %v481_v36, %v458_v39 }
  0xab   : > { %v435_v41 = vpop.permute.xlu1 %434  ;;  %v430_v43 = vpop.permute.xlu0 %429 }
  0xac   : > { %v522_v46 = vmax.f32 %v514_v40, 0.0  ;;  %v460_v47 = vmul.f32 %v435_v41, %v404_v42  ;;  %v459_v48 = vmul.f32 %v430_v43, %v403_v44 }
  0xae   : > { %v987_v49 = vpack.c.bf16 %v522_v46, %v521_v45 }
  0xaf   : > { %v491_v50 = vpop.permute.xlu1 %490  ;;  %v486_v51 = vpop.permute.xlu0 %485 }
  0xb0   : > { %v516_v52 = vadd.f32 %v491_v50, %v460_v47  ;;  %v515_v53 = vadd.f32 %v486_v51, %v459_v48  ;;  %988 = vmatprep.subr.bf16.mxu0 %v987_v49 }
  0xb1   : > { %990 = vmatpush3.bf16.msra.mxu0 %v987_v49 }
  0xb2   : > { %v524_v54 = vmax.f32 %v516_v52, 0.0  ;;  %v523_v55 = vmax.f32 %v515_v53, 0.0 }
  0xb3   : > { %v445_v56 = vpop.permute.xlu1 %444  ;;  %v440_v58 = vpop.permute.xlu0 %439 }
  0xb4   : > { %v991_v60 = vpack.c.bf16 %v524_v54, %v523_v55  ;;  %v462_v61 = vmul.f32 %v445_v56, %v406_v57  ;;  %v461_v62 = vmul.f32 %v440_v58, %v405_v59 }
  0xb6   : > { %992 = vmatprep.subr.bf16.mxu0 %v991_v60 }
  0xb7   : > { %v501_v63 = vpop.permute.xlu1 %500  ;;  %v496_v0 = vpop.permute.xlu0 %495  ;;  %994 = vmatpush3.bf16.msra.mxu0 %v991_v60 }
  0xb8   : > { %v518_v1 = vadd.f32 %v501_v63, %v462_v61  ;;  %v517_v2 = vadd.f32 %v496_v0, %v461_v62 }
  0xba   : > { %v526_v3 = vmax.f32 %v518_v1, 0.0  ;;  %v525_v4 = vmax.f32 %v517_v2, 0.0 }
  0xbb   : > { %v455_v5 = vpop.permute.xlu1 %454  ;;  %v450_v7 = vpop.permute.xlu0 %449 }
  0xbc   : > { %v995_v9 = vpack.c.bf16 %v526_v3, %v525_v4  ;;  %v464_v10 = vmul.f32 %v455_v5, %v408_v6  ;;  %v463_v11 = vmul.f32 %v450_v7, %v407_v8 }
  0xbe   : > { %996 = vmatprep.subr.bf16.mxu0 %v995_v9 }
  0xbf   : > { %v511_v12 = vpop.permute.xlu1 %510  ;;  %v506_v13 = vpop.permute.xlu0 %505  ;;  %998 = vmatpush3.bf16.msra.mxu0 %v995_v9 }
  0xc0   : > { %v520_v14 = vadd.f32 %v511_v12, %v464_v10  ;;  %v519_v15 = vadd.f32 %v506_v13, %v463_v11 }
  0xc2   : > { %v528_v16 = vmax.f32 %v520_v14, 0.0  ;;  %v527_v17 = vmax.f32 %v519_v15, 0.0 }
  0xc3   : > { %v545_v24 = vpop.permute.xlu1 %544  ;;  %v540_v25 = vpop.permute.xlu0 %539 }
  0xc4   : > { %v999_v18 = vpack.c.bf16 %v528_v16, %v527_v17 }
  0xc6   : > { %1000 = vmatprep.subr.bf16.mxu0 %v999_v18 }
  0xc7   : > { %1002 = vmatpush3.bf16.msra.mxu0 %v999_v18  ;;  %v555_v30 = vpop.permute.xlu1 %554  ;;  %v550_v33 = vpop.permute.xlu0 %549 }
  0xca   : > { %971 = vmatmul.mubr.msk.f32.vlgmr.msra.gmra.mrb[0].mxu0 %vm557_vm0, %v530_v19 }
  0xcb   : > { %973 = vmatprep.mubr.msk.f32.mxu0 %vm557_vm0, %v531_v20  ;;  %v660_v39 = vpop.permute.xlu0 %659 }
  0xce   : > { %974 = vmatmul.mubr.msk.f32.gmra.mrb[2].mxu0 %vm557_vm0, %v532_v21 }
 0x19d   : > { %v972_v26 = vpop.f32.mrb[0].mxu0 }
 0x19e   : > { %v642_v27 = vadd.f32 %v972_v26, %v545_v24  ;;  %v636_v28 = vpop.f32.mrb[1].mxu0 }
 0x19f   : > { %v637_v29 = vadd.f32 %v636_v28, %v540_v25 }
 0x1a0   : > { %737 = vst [vmem:[%s1337_s17 + $0x8] sm:$0xff] %v642_v27 }
 0x1a1   : > { %736 = vst [vmem:[%s1337_s17] sm:$0xff] %v637_v29  ;;  %v975_v31 = vpop.f32.mrb[2].mxu0  ;;  %v1004_v32 = vpack.c.bf16 %v642_v27, %v637_v29 }
 0x1a2   : > { %v652_v34 = vadd.f32 %v975_v31, %v555_v30  ;;  %v646_v35 = vpop.f32.mrb[3].mxu0 }
 0x1a3   : > { %v647_v36 = vadd.f32 %v646_v35, %v550_v33  ;;  %1005 = vmatpush3.bf16.msra.mxu1 %v1004_v32 }
 0x1a4   : > { %739 = vst [vmem:[%s1337_s17 + $0x18] sm:$0xff] %v652_v34  ;;  %1006 = vmatprep.subr.bf16.mxu1 %v1128_v22 }
 0x1a5   : > { %v1007_v37 = vpack.c.bf16 %v652_v34, %v647_v36  ;;  %738 = vst [vmem:[%s1337_s17 + $0x10] sm:$0xff] %v647_v36 }
 0x1a7   : > { %1008 = vmatpush3.bf16.msra.mxu1 %v1007_v37  ;;  %v795_v44 = vld [vmem:[%s1337_s17 + $0x8] sm:$0xff] (%p1224_p6) }
 0x1a8   : > { %v793_v43 = vld [vmem:[%s1337_s17] sm:$0xff] (%p1224_p6)  ;;  %796 = vst [vmem:[%s759_s22 + $0x10] sm:$0xff] (%p1224_p6), %v795_v44 }
 0x1a9   : > { %794 = vst [vmem:[%s759_s22] sm:$0xff] (%p1224_p6), %v793_v43 }
 0x1aa   : > { %985 = vmatmul.mubr.msk.f32.vlgmr.msra.gmra.mrb[0].mxu1 %vm662_vm2, %v655_v38 }
 0x1ab   : > { %v799_v46 = vld [vmem:[%s1337_s17 + $0x18] sm:$0xff] (%p1224_p6) }
 0x1ac   : > { %v797_v45 = vld [vmem:[%s1337_s17 + $0x10] sm:$0xff] (%p1224_p6)  ;;  %800 = vst [vmem:[%s759_s22 + $0x30] sm:$0xff] (%p1224_p6), %v799_v46 }
 0x1ad   : > { %798 = vst [vmem:[%s759_s22 + $0x20] sm:$0xff] (%p1224_p6), %v797_v45 }
 0x27a   : > { %755 = sbr.rel (!%p1224_p6) target bundleno = 641 (0x281), region = 90 }
 0x27d   : > { %v732_v40 = vpop.f32.mrb[0].mxu1 }
 0x27e   : > { %v733_v41 = vadd.f32 %v732_v40, %v660_v39  ;;  %v986_v42 = vpop.f32.mrb[1].mxu1 }
 0x280   : > { %740 = vst [vmem:[%s400_s14] sm:$0xff] %v733_v41 }
 0x281 PF: > { %s19_s11 = sadd.s32 1, %s1125_s11   ;;  %s1395_s27 = smov %s1105_s28 }
 0x282   : > { %p16_p0 = scmp.ge.s32.totalorder %s19_s11, 6   ;;  %s1396_s28 = smov %s1232_s20 }
 0x283   : > { %s1397_s29 = smov %s1117_s9  ;;  %s1398_s30 = smov %s1121_s10 }
 0x284   : > { %s1399_s9 = smov %s1402_s12  ;;  %s1400_s10 = smov %s1406_s13 }
 0x285   :  { %18 = sbr.rel (!%p16_p0) target bundleno = 4 (0x4), region = 171 }

// kernel: textnet_forward.2
= control target key start
LH: loop header
LB: loop body
LE: loop exit
PB: predicated region body
PF: predicated region fallthrough
CT: control target
= control target key end

     0   :  { %s10246_s0 = inlined_call_operand.vmem [shape: s32[5,16], index: 0, kind: input, shape index: {}]   ;;  %s10247_s3 = inlined_call_operand.vmem [shape: f32[2,8,8,128], index: 3, kind: input, shape index: {}]   ;;  %s10248_s4 = inlined_call_operand.vmem [shape: f32[2,4,4,128], index: 4, kind: input, shape index: {}]   ;;  %s10249_s5 = inlined_call_operand.vmem [shape: f32[2,2,2,128], index: 5, kind: input, shape index: {}]   ;;  %s10250_s6 = inlined_call_operand.vmem [shape: f32[2,2,2,128], index: 6, kind: input, shape index: {}]   ;;  %s10251_s7 = inlined_call_operand.vmem [shape: f32[2,16,16,128], index: 7, kind: input, shape index: {}]   ;;  %s10252_s8 = inlined_call_operand.vmem [shape: f32[16,8], index: 8, kind: input, shape index: {}]   ;;  %s10253_s9 = inlined_call_operand.vmem [shape: f32[16,4], index: 9, kind: input, shape index: {}]   ;;  %s10254_s10 = inlined_call_operand.vmem [shape: f32[16,2], index: 10, kind: input, shape index: {}]   ;;  %s10255_s11 = inlined_call_operand.vmem [shape: f32[16,2], index: 11, kind: input, shape index: {}]   ;;  %s10256_s12 = inlined_call_operand.vmem [shape: f32[16,16], index: 12, kind: input, shape index: {}]   ;;  %s10257_s13 = inlined_call_operand.vmem [shape: bf16[64,1152], index: 13, kind: input, shape index: {}]   ;;  %s10258_s14 = inlined_call_operand.vmem [shape: f32[2,64,256], index: 14, kind: output, shape index: {0}]   ;;  %s10259_s15 = inlined_call_operand.vmem [shape: f32[2,64,2], index: 15, kind: output, shape index: {1}]   ;;  %s10260_s1 = inlined_call_operand.vmem [shape: s32[5,16], index: 1, kind: input, shape index: {}]   ;;  %s10261_s2 = inlined_call_operand.vmem [shape: f32[5,16], index: 2, kind: input, shape index: {}]  }
   0x1   :  { %10299 = sst [smem:[#allocation27_spill]] %s10247_s3  ;;  %s21_s20 = sshll.u32 %s10246_s0, 4  ;;  %s22_s20 = int_to_ptr.vmem [resolvable:$true] %s21_s20 }
   0x2   :  { %10300 = sst [smem:[#allocation28_spill]] %s10248_s4  ;;  %s25_s23 = sshll.u32 %s10260_s1, 4  ;;  %s26_s23 = int_to_ptr.vmem [resolvable:$true] %s25_s23 }
   0x3   :  { %10301 = sst [smem:[#allocation29_spill]] %s10249_s5  ;;  %s8313_s24 = scalar_lea.vmem %s22_s20, 128 }
   0x4   :  { %10302 = sst [smem:[#allocation30_spill]] %s10250_s6  ;;  %p8314_p0 = scmp.ne.s32.totalorder %s22_s20, %s8313_s24 }
   0x5   :  { %10303 = sst [smem:[#allocation31_spill]] %s10251_s7  ;;  %p8318_p1 = scmp.lt.s32.totalorder %s22_s20, %s22_s20 }
   0x6   :  { %10304 = sst [smem:[#allocation32_spill]] %s10252_s8  ;;  %p8319_p2 = scmp.lt.s32.totalorder %s8313_s24, %s8313_s24 }
   0x7   :  { %10305 = sst [smem:[#allocation33_spill]] %s10254_s10 }
   0x8   :  { %10306 = sst [smem:[#allocation34_spill]] %s10255_s11  ;;  %p8320_p3 = por %p8319_p2, %p8318_p1 }
   0x9   :  { %10307 = sst [smem:[#allocation35_spill]] %s10256_s12 }
   0xa   :  { %10308 = sst [smem:[#allocation36_spill]] %s10257_s13  ;;  %p8321_p4 = pnand %p8320_p3, %p8314_p0 }
   0xb   :  { %10309 = sst [smem:[#allocation37_spill]] %s10258_s14 }
   0xc   :  { %10310 = sst [smem:[#allocation38_spill]] %s10259_s15 }
   0xd   :  { %8324 = shalt.err (!%p8321_p4)  }
   0xe   :  { %s8407_s25 = smov [#allocation3]   ;;  %s8325_s26 = scalar_lea.vmem %s26_s23, 128 }
   0xf   :  { %24 = dma.vmem_to_smem %s22_s20, 128, %s8407_s25, [#allocation2] }
  0x10   :  { %p8326_p5 = scmp.ne.s32.totalorder %s26_s23, %s8325_s26  ;;  %p8330_p6 = scmp.lt.s32.totalorder %s26_s23, %s26_s23 }
  0x11   :  { %p8331_p7 = scmp.lt.s32.totalorder %s8325_s26, %s8325_s26 }
  0x13   :  { %p8332_p8 = por %p8331_p7, %p8330_p6 }
  0x15   :  { %p8333_p9 = pnand %p8332_p8, %p8326_p5 }
  0x17   :  { %8336 = shalt.err (!%p8333_p9)  }
  0x18   :  { %s8408_s0 = smov [#allocation4]   ;;  %s29_s28 = sshll.u32 %s10261_s2, 4  ;;  %s30_s28 = int_to_ptr.vmem [resolvable:$true] %s29_s28 }
  0x19   :  { %28 = dma.vmem_to_smem %s26_s23, 128, %s8408_s0, [#allocation2] }
  0x1a   :  { %s8337_s29 = scalar_lea.vmem %s30_s28, 128  ;;  %p8342_p11 = scmp.lt.s32.totalorder %s30_s28, %s30_s28 }
  0x1b   :  { %p8338_p10 = scmp.ne.s32.totalorder %s30_s28, %s8337_s29  ;;  %p8343_p12 = scmp.lt.s32.totalorder %s8337_s29, %s8337_s29 }
  0x1d   :  { %p8344_p13 = por %p8343_p12, %p8342_p11 }
  0x1f   :  { %p8345_p0 = pnand %p8344_p13, %p8338_p10 }
  0x21   :  { %8348 = shalt.err (!%p8345_p0)  }
  0x22   :  { %s8409_s30 = smov [#allocation5]  }
  0x23   :  { %32 = dma.vmem_to_smem %s30_s28, 128, %s8409_s30, [#allocation2] }
  0x24   :  { %8377 = dma.done.wait [#allocation2], 384 }
  0x25   :  { %8378 = vsyncadd [#allocation2], 4294966912 }
  0x26   :  { %34 = sfence }
  0x27   :  { %s8501_s16 = smov 0   ;;  %s8503_s17 = smov 0  }
  0x28   :  { %s8505_s18 = smov 0   ;;  %s8507_s2 = smov 0  }
  0x29   :  { %s8509_s19 = smov 0   ;;  %s8511_s20 = smov 0  }
  0x2a   :  { %s8513_s21 = smov 0  }
  0x2b LB: > { %10311 = sst [smem:[#allocation8_spill]] %s8381_s16  ;;  %s49_s22 = sadd.s32 1, %s8397_s19  ;;  %s8405_s21 = sphi %s8513_s21, %s40_s21   ;;  %s8401_s20 = sphi %s8511_s20, %s10378_s20   ;;  %s8397_s19 = sphi %s8509_s19, %s10377_s19   ;;  %s8393_s2 = sphi %s8507_s2, %s10376_s2   ;;  %s8389_s18 = sphi %s8505_s18, %s10375_s18   ;;  %s8385_s17 = sphi %s8503_s17, %s10374_s17   ;;  %s8381_s16 = sphi %s8501_s16, %s10373_s16  }
  0x2c   : > { %10312 = sst [smem:[#allocation9_spill]] %s8385_s17  ;;  %p50_p1 = scmp.ge.s32.totalorder %s49_s22, 2 }
  0x2d   : > { %10313 = sst [smem:[#allocation10_spill]] %s8389_s18  ;;  %s52_s23 = sadd.s32 1, %s8401_s20 }
  0x2e   : > { %10314 = sst [smem:[#allocation11_spill]] %s8393_s2  ;;  %s6950_s24 = sadd.s32 4294967295, %s8405_s21  }
  0x2f   : > { %10315 = sst [smem:[#allocation12_spill]] %s8397_s19  ;;  %p327_p2 = scmp.ne.s32.totalorder %s8385_s17, %s8381_s16 }
  0x30   : > { %10316 = sst [smem:[#allocation13_spill]] %s8401_s20  ;;  %s10380_s22 = smov (%p50_p1, %s49_s22), 0 }
  0x31   : > { %10317 = sst [smem:[#allocation14_spill]] %s8405_s21  ;;  %s10382_s23 = smov (!%p50_p1, %s52_s23), %s8401_s20 }
  0x32   : > { %10318 = sst [smem:[#allocation15_spill]] %s10380_s22  ;;  %s313_s25 = ssub.s32 %s8397_s19, %s10380_s22 }
  0x33   : > { %p328_p3 = scmp.eq.s32.totalorder %s6950_s24, 3  ;;  %p54_p4 = scmp.ge.s32.totalorder %s10382_s23, 2 }
  0x34   : > { %p6954_p5 = scmp.ge.s32.totalorder %s8405_s21, 1  ;;  %p436_p7 = scmp.lt.s32.totalorder %s8405_s21, 5 }
  0x35   : > { %p8547_p6 = por %p328_p3, %p327_p2  ;;  %s10384_s23 = smov (%p54_p4, %s10382_s23), 0 }
  0x36   : > { %10321 = sst [smem:[#allocation17_spill]] %s10384_s23  ;;  %p437_p8 = pnand %p6954_p5, %p436_p7 }
  0x37   : > { %s10319_s26 = scalar_select %p8547_p6, 1, 0 }
  0x38   : > { %s312_s0 = ssub.s32 %s8401_s20, %s10384_s23  ;;  %s317_s27 = sadd.s32 1, %s8385_s17 }
  0x39   : > { %10320 = sst [smem:[#allocation16_spill]] %s10319_s26  ;;  %s314_s1 = sor.u32 %s313_s25, %s312_s0 }
  0x3a   : > { %p315_p9 = scmp.eq.s32.totalorder %s314_s1, 0  ;;  %440 = sbr.rel (%p437_p8) target bundleno = 1133 (0x46d), region = 64 }
  0x3c   : > { %s8558_s28 = scalar_select %p315_p9, %s8385_s17, %s317_s27  }
  0x3e   : > { %10322 = sst [smem:[#allocation18_spill]] %s8558_s28 }
  0x41   : > { %p502_p10 = scmp.lt.s32.totalorder %s8393_s2, 1  ;;  %s8562_s29 = sshll.u32 %s8389_s18, 3  ;;  %v8567_v0 = vld [vmem:[%s10253_s9] sm:$0xff]  ;;  %vm586_vm0 = vcmask 31744   ;;  %vm593_vm1 = vcmask 1043456   ;;  %v8638_v8 = vld [vmem:[%s10253_s9 + $0x8] sm:$0xff] }
  0x42   : > { %10323 = sst [smem:[#allocation19_spill]] %s8562_s29  ;;  %p1088_p11 = scmp.gt.s32.totalorder %s8562_s29, 0  ;;  %7744 = vmatprep.mubr.msk.f32.mxu1 %vm586_vm0, %v8567_v0  ;;  %7717 = vmatprep.mubr.msk.f32.mxu0 %vm586_vm0, %v8567_v0  ;;  %vm672_vm2 = vcmask 64512   ;;  %vm774_vm3 = vcmask 15360   ;;  %vm781_vm4 = vcmask 1041408   ;;  %vm993_vm5 = vcmask 130048  }
  0x43   : > { %p7003_p12 = scmp.lt.s32.totalorder %s8562_s29, 15  ;;  %s8581_s27 = sadd.s32 4294967295, %s8562_s29  ;;  %vm5619_vm6 = vcmask 1040384   ;;  %vm5773_vm7 = vcmask 1045504   ;;  %vm5716_vm8 = vcmask 1046528   ;;  %vm8410_vm10 = vmmov 1  }
  0x44   : > { %s8576_s25 = scalar_select %p502_p10, %s8393_s2, 1  ;;  %vm7335_vm9 = vmneg %vm5619_vm6 }
  0x45   : > { %s1089_s0 = scalar_select %p1088_p11, %s8562_s29, 0  ;;  %vm9781_vm11 = vmpackc.low %vm8410_vm10, %vm7335_vm9 }
  0x46   : > { %s7438_s1 = sshll.u32 %s8576_s25, 4  ;;  %10324 = sst [smem:[#allocation20_spill]] %s8581_s27 }
  0x47   : > { %s10325_s4 = sld [smem:[#allocation28_spill]]  ;;  %p541_p13 = scmp.gt.s32.totalorder %s8581_s27, 0 }
  0x48   : > { %s10386_s0 = smov (!%p7003_p12, %s1089_s0), 15  ;;  %p6970_p0 = scmp.lt.s32.totalorder %s8581_s27, 15 }
  0x49   : > { %s542_s22 = scalar_select %p541_p13, %s8581_s27, 0 }
  0x4a   : > { %s1107_s20 = sshra.s32 %s10386_s0, 7  ;;  %s8594_s19 = sand.u32 127, %s10386_s0 }
  0x4b   : > { %s8596_s28 = sshll.u32 %s1107_s20, 7  ;;  %s7437_s24 = sshll.u32 %s8576_s25, 6 }
  0x4c   : > { %s7456_s30 = sadd.s32 128, %s8596_s28  ;;  %s10326_s3 = sld [smem:[#allocation27_spill]] }
  0x4d   : > { %s8586_s23 = scalar_lea.vmem %s10325_s4, %s7438_s1  ;;  %s1113_s1 = sadd.s32 %s7456_s30, %s8594_s19 }
  0x4e   : > { %s1114_s14 = sld [smem:[#allocation3 + %s1113_s1]]  ;;  %s10388_s22 = smov (!%p6970_p0, %s542_s22), 15 }
  0x4f   : > { %s1115_s2 = sld [smem:[#allocation4 + %s1113_s1]]  ;;  %s562_s30 = sshra.s32 %s10388_s22, 7 }
  0x50   : > { %s1116_s26 = sld [smem:[#allocation5 + %s1113_s1]]  ;;  %s8618_s12 = sand.u32 127, %s10388_s22 }
  0x51   : > { %s10327_s15 = sld [smem:[#allocation38_spill]]  ;;  %s8620_s4 = sshll.u32 %s562_s30, 7 }
  0x52   : > { %s8605_s21 = scalar_lea.vmem %s10326_s3, %s7437_s24  ;;  %s8613_s13 = sld [smem:[#allocation3 + %s10386_s0]] }
  0x53   : > { %s8616_s27 = sld [smem:[#allocation4 + %s10386_s0]]  ;;  %s7446_s18 = sadd.s32 128, %s8620_s4 }
  0x54   : > { %s545_s17 = sld [smem:[#allocation3 + %s10388_s22]]  ;;  %s7011_s3 = sshll.u32 %s1114_s14, 2 }
  0x55   : > { %s7012_s1 = sshll.u32 %s1115_s2, 2  ;;  %s1118_s29 = scalar_lea.vmem %s8586_s23, %s7011_s3 }
  0x56   : > { %s1120_s11 = ssub.f32 1.0, %s1116_s26  ;;  %v1126_v1 = vstv %s1116_s26  ;;  %v1119_v2 = vld [vmem:[%s1118_s29] sm:$0xf]  ;;  %s1124_s16 = scalar_lea.vmem %s8586_s23, %s7012_s1 }
  0x57   : > { %s8610_s20 = scalar_lea.vmem %s10327_s15, %s7437_s24  ;;  %v1125_v4 = vld [vmem:[%s1124_s16] sm:$0xf]  ;;  %s568_s24 = sadd.s32 %s7446_s18, %s8618_s12 }
  0x58   : > { %10328 = sst [smem:[#allocation21_spill]] %s8610_s20  ;;  %v1121_v3 = vstv %s1120_s11  ;;  %v1127_v6 = vmul.f32 %v1126_v1, %v1125_v4  ;;  %s7008_s18 = sshll.u32 %s8613_s13, 3 }
  0x59   : > { %s8626_s15 = sld [smem:[#allocation4 + %s10388_s22]]  ;;  %v1122_v5 = vmul.f32 %v1121_v3, %v1119_v2 }
  0x5a   : > { %s569_s14 = sld [smem:[#allocation3 + %s568_s24]]  ;;  %s6975_s11 = sshll.u32 %s545_s17, 3 }
  0x5b   : > { %s570_s2 = sld [smem:[#allocation4 + %s568_s24]]  ;;  %v1128_v7 = vadd.f32 %v1127_v6, %v1122_v5  ;;  %s549_s16 = scalar_lea.vmem %s8605_s21, %s6975_s11 }
  0x5c   : > { %s8628_s3 = sld [smem:[#allocation5 + %s568_s24]]  ;;  %s1096_s24 = scalar_lea.vmem %s8605_s21, %s7008_s18  ;;  %v550_v13 = vld [vmem:[%s549_s16] sm:$0xff] }
  0x5d   : > { %s8630_s26 = sld [smem:[#allocation5 + %s10388_s22]]  ;;  %7742 = vmatprep.subr.msk.mxu1 %vm593_vm1, %v1128_v7  ;;  %s7009_s22 = sshll.u32 %s8616_s27, 3  ;;  %v1097_v18 = vld [vmem:[%s1096_s24] sm:$0xff] }
  0x5e   : > { %s8633_s29 = sld [smem:[#allocation5 + %s10386_s0]]  ;;  %7743 = vmatpush3.msk.msra.mxu1 %vm593_vm1, %v1128_v7  ;;  %s1102_s17 = scalar_lea.vmem %s8605_s21, %s7009_s22 }
  0x5f   : > { %s10329_s8 = sld [smem:[#allocation32_spill]]  ;;  %s6976_s0 = sshll.u32 %s8626_s15, 3  ;;  %7745 = vmatmul.mubr.msk.f32.vlgmr.msra.gmra.mrb[0].mxu1 %vm586_vm0, %v8638_v8  ;;  %v1103_v11 = vld [vmem:[%s1102_s17] sm:$0xff] }
  0x60   : > { %s6978_s11 = sshll.u32 %s569_s14, 2  ;;  %s555_s20 = scalar_lea.vmem %s8605_s21, %s6976_s0 }
  0x61   : > { %s6979_s13 = sshll.u32 %s570_s2, 2  ;;  %s573_s27 = scalar_lea.vmem %s8586_s23, %s6978_s11  ;;  %v556_v22 = vld [vmem:[%s555_s20] sm:$0xff] }
  0x62   : > { %s575_s30 = ssub.f32 1.0, %s8628_s3  ;;  %v581_v10 = vstv %s8628_s3  ;;  %v574_v12 = vld [vmem:[%s573_s27] sm:$0xf]  ;;  %s579_s7 = scalar_lea.vmem %s8586_s23, %s6979_s13 }
  0x63   : > { %s551_s15 = ssub.f32 1.0, %s8630_s26  ;;  %v557_v14 = vstv %s8630_s26  ;;  %v580_v17 = vld [vmem:[%s579_s7] sm:$0xf]  ;;  %s7439_s2 = sshll.u32 %s8576_s25, 2 }
  0x64   : > { %v1104_v15 = vstv %s8633_s29  ;;  %v576_v16 = vstv %s575_s30  ;;  %s1098_s14 = ssub.f32 1.0, %s8633_s29  ;;  %v582_v20 = vmul.f32 %v581_v10, %v580_v17  ;;  %s7448_s3 = sadd.s32 256, %s8620_s4  ;;  %v558_v25 = vmul.f32 %v557_v14, %v556_v22 }
  0x65   : > { %v8648_v9 = vld [vmem:[%s10329_s8] sm:$0xff]  ;;  %v577_v19 = vmul.f32 %v576_v16, %v574_v12  ;;  %v552_v21 = vstv %s551_s15  ;;  %v1105_v23 = vmul.f32 %v1104_v15, %v1103_v11  ;;  %s10330_s5 = sld [smem:[#allocation29_spill]]  ;;  %s756_s18 = sadd.s32 %s7448_s3, %s8618_s12  ;;  %v8698_v31 = vld [vmem:[%s10329_s8 + $0x8] sm:$0xff] }
  0x66   : > { %7749 = vmatprep.mubr.msk.f32.mxu1 %vm672_vm2, %v8648_v9  ;;  %v553_v24 = vmul.f32 %v552_v21, %v550_v13  ;;  %v1099_v26 = vstv %s1098_s14  ;;  %s8674_s29 = sld [smem:[#allocation3 + %s756_s18]]  ;;  %s7458_s0 = sadd.s32 256, %s8596_s28 }
  0x67   : > { %v583_v27 = vadd.f32 %v582_v20, %v577_v19  ;;  %v1100_v28 = vmul.f32 %v1099_v26, %v1097_v18  ;;  %s8676_s24 = sld [smem:[#allocation4 + %s756_s18]]  ;;  %s1284_s17 = sadd.s32 %s7458_s0, %s8594_s19 }
  0x68   : > { %v559_v29 = vadd.f32 %v558_v25, %v553_v24  ;;  %s8678_s22 = sld [smem:[#allocation5 + %s756_s18]]  ;;  %s7460_s18 = sadd.s32 384, %s8596_s28 }
  0x69   : > { %7715 = vmatprep.subr.msk.mxu0 %vm593_vm1, %v583_v27  ;;  %v1106_v30 = vadd.f32 %v1105_v23, %v1100_v28  ;;  %s10331_s6 = sld [smem:[#allocation30_spill]]  ;;  %s10332_s10 = sld [smem:[#allocation33_spill]] }
  0x6a   : > { %7716 = vmatpush3.msk.msra.mxu0 %vm593_vm1, %v583_v27  ;;  %s8689_s30 = sld [smem:[#allocation3 + %s1284_s17]] }
  0x6b   : > { %s8671_s16 = scalar_lea.vmem %s10330_s5, %s7439_s2  ;;  %s8691_s7 = sld [smem:[#allocation4 + %s1284_s17]]  ;;  %7718 = vmatmul.mubr.msk.f32.vlgmr.msra.gmra.mrb[0].mxu0 %vm586_vm0, %v8638_v8  ;;  %7720 = vmatprep.subr.mxu0 %v559_v29 }
  0x6c   : > { %s8700_s14 = sld [smem:[#allocation5 + %s1284_s17]]  ;;  %7721 = vmatpush3.msra.mxu0 %v559_v29  ;;  %7747 = vmatprep.subr.mxu1 %v1106_v30  ;;  %s6986_s0 = sshll.u32 %s8674_s29, 1 }
  0x6d   : > { %7748 = vmatpush3.msra.mxu1 %v1106_v30  ;;  %7722 = vmatprep.mubr.msk.f32.mxu0 %vm672_vm2, %v8648_v9  ;;  %s6987_s17 = sshll.u32 %s8676_s24, 1  ;;  %s761_s11 = scalar_lea.vmem %s8671_s16, %s6986_s0 }
  0x6e   : > { %7750 = vmatmul.mubr.msk.f32.vlgmr.msra.gmra.mrb[0].mxu1 %vm672_vm2, %v8698_v31  ;;  %s763_s13 = ssub.f32 1.0, %s8678_s22  ;;  %v769_v33 = vstv %s8678_s22  ;;  %v762_v34 = vld [vmem:[%s761_s11] sm:$0x3]  ;;  %s767_s15 = scalar_lea.vmem %s8671_s16, %s6987_s17 }
  0x6f   : > { %s8686_s27 = scalar_lea.vmem %s10331_s6, %s7439_s2  ;;  %s7450_s2 = sadd.s32 384, %s8620_s4  ;;  %v8706_v32 = vld [vmem:[%s10332_s10] sm:$0xff]  ;;  %v8760_v47 = vld [vmem:[%s10332_s10 + $0x8] sm:$0xff] }
  0x70   : > { %s8709_s1 = sadd.s32 %s7450_s2, %s8618_s12  ;;  %7754 = vmatprep.mubr.msk.f32.mxu1 %vm774_vm3, %v8706_v32  ;;  %v764_v35 = vstv %s763_s13  ;;  %v768_v36 = vld [vmem:[%s767_s15] sm:$0x3]  ;;  %s7019_s29 = sshll.u32 %s8689_s30, 1 }
  0x71   : > { %s8725_s20 = sld [smem:[#allocation3 + %s8709_s1]]  ;;  %s7020_s24 = sshll.u32 %s8691_s7, 1  ;;  %v765_v37 = vmul.f32 %v764_v35, %v762_v34  ;;  %v770_v38 = vmul.f32 %v769_v33, %v768_v36 }
  0x72   : > { %s1289_s2 = scalar_lea.vmem %s8671_s16, %s7019_s29  ;;  %s1291_s22 = ssub.f32 1.0, %s8700_s14  ;;  %v1297_v39 = vstv %s8700_s14 }
  0x73   : > { %v1290_v40 = vld [vmem:[%s1289_s2] sm:$0x3]  ;;  %s1295_s3 = scalar_lea.vmem %s8671_s16, %s7020_s24  ;;  %s8734_s26 = sld [smem:[#allocation4 + %s8709_s1]]  ;;  %7723 = vmatmul.mubr.msk.f32.vlgmr.msra.gmra.mrb[0].mxu0 %vm672_vm2, %v8698_v31  ;;  %v771_v41 = vadd.f32 %v770_v38, %v765_v37 }
  0x74   : > { %v1292_v42 = vstv %s1291_s22  ;;  %v1296_v43 = vld [vmem:[%s1295_s3] sm:$0x3]  ;;  %s8739_s30 = sld [smem:[#allocation5 + %s8709_s1]]  ;;  %s1382_s7 = sadd.s32 %s7460_s18, %s8594_s19  ;;  %7727 = vmatprep.mubr.msk.f32.mxu0 %vm774_vm3, %v8706_v32 }
  0x75   : > { %v1293_v44 = vmul.f32 %v1292_v42, %v1290_v40  ;;  %v1298_v45 = vmul.f32 %v1297_v39, %v1296_v43  ;;  %s8746_s14 = sld [smem:[#allocation3 + %s1382_s7]]  ;;  %7725 = vmatprep.subr.msk.mxu0 %vm781_vm4, %v771_v41  ;;  %s7441_s11 = sshll.u32 %s8576_s25, 8 }
  0x76   : > { %s8748_s0 = sld [smem:[#allocation4 + %s1382_s7]]  ;;  %7726 = vmatpush3.msk.msra.mxu0 %vm781_vm4, %v771_v41  ;;  %s7452_s22 = sadd.s32 512, %s8620_s4 }
  0x77   : > { %s6992_s17 = sshll.u32 %s8725_s20, 1  ;;  %s8752_s1 = sld [smem:[#allocation5 + %s1382_s7]]  ;;  %v1299_v46 = vadd.f32 %v1298_v45, %v1293_v44 }
  0x78   : > { %s869_s18 = scalar_lea.vmem %s8686_s27, %s6992_s17  ;;  %s10333_s2 = sld [smem:[#allocation31_spill]] }
  0x79   : > { %7752 = vmatprep.subr.msk.mxu1 %vm781_vm4, %v1299_v46  ;;  %s6993_s3 = sshll.u32 %s8734_s26, 1  ;;  %s10334_s5 = sld [smem:[#allocation34_spill]]  ;;  %v870_v49 = vld [vmem:[%s869_s18] sm:$0x3] }
  0x7a   : > { %s970_s25 = sadd.s32 %s7452_s22, %s8618_s12  ;;  %7753 = vmatpush3.msk.msra.mxu1 %vm781_vm4, %v1299_v46  ;;  %s871_s13 = ssub.f32 1.0, %s8739_s30  ;;  %v877_v50 = vstv %s8739_s30 }
  0x7b   : > { %7755 = vmatmul.mubr.msk.f32.vlgmr.msra.gmra.mrb[0].mxu1 %vm774_vm3, %v8760_v47  ;;  %s7025_s4 = sshll.u32 %s8746_s14, 1  ;;  %7728 = vmatmul.mubr.msk.f32.vlgmr.msra.gmra.mrb[0].mxu0 %vm774_vm3, %v8760_v47  ;;  %s10335_s29 = sld [smem:[#allocation19_spill]] }
  0x7c   : > { %s7026_s26 = sshll.u32 %s8748_s0, 1  ;;  %v872_v52 = vstv %s871_s13  ;;  %s1387_s15 = scalar_lea.vmem %s8686_s27, %s7025_s4 }
  0x7d   : > { %s1389_s12 = ssub.f32 1.0, %s8752_s1  ;;  %v1395_v54 = vstv %s8752_s1  ;;  %v873_v55 = vmul.f32 %v872_v52, %v870_v49  ;;  %v1388_v56 = vld [vmem:[%s1387_s15] sm:$0x3]  ;;  %s1393_s30 = scalar_lea.vmem %s8686_s27, %s7026_s26 }
  0x7e   : > { %s8765_s20 = scalar_lea.vmem %s10333_s2, %s7441_s11  ;;  %s875_s11 = scalar_lea.vmem %s8686_s27, %s6993_s3  ;;  %v1394_v58 = vld [vmem:[%s1393_s30] sm:$0x3] }
  0x7f   : > { %v8773_v48 = vld [vmem:[%s10334_s5] sm:$0xff]  ;;  %s971_s14 = sld [smem:[#allocation3 + %s970_s25]]  ;;  %v1390_v57 = vstv %s1389_s12  ;;  %v1396_v61 = vmul.f32 %v1395_v54, %v1394_v58  ;;  %s7462_s1 = sadd.s32 512, %s8596_s28  ;;  %v8808_v63 = vld [vmem:[%s10334_s5 + $0x8] sm:$0xff] }
  0x80   : > { %v876_v51 = vld [vmem:[%s875_s11] sm:$0x3]  ;;  %7759 = vmatprep.mubr.msk.f32.mxu1 %vm774_vm3, %v8773_v48  ;;  %7732 = vmatprep.mubr.msk.f32.mxu0 %vm774_vm3, %v8773_v48  ;;  %s8794_s0 = sld [smem:[#allocation4 + %s970_s25]]  ;;  %v1391_v60 = vmul.f32 %v1390_v57, %v1388_v56  ;;  %s1480_s2 = sadd.s32 %s7462_s1, %s8594_s19 }
  0x81   : > { %v878_v53 = vmul.f32 %v877_v50, %v876_v51  ;;  %s8796_s18 = sld [smem:[#allocation5 + %s970_s25]]  ;;  %s8800_s24 = sadd.s32 1, %s10335_s29 }
  0x82   : > { %10336 = sst [smem:[#allocation19_spill]] %s8800_s24  ;;  %p1590_p1 = scmp.gt.s32.totalorder %s8800_s24, 0  ;;  %v1397_v62 = vadd.f32 %v1396_v61, %v1391_v60 }
  0x83   : > { %v879_v59 = vadd.f32 %v878_v53, %v873_v55  ;;  %s8810_s7 = sld [smem:[#allocation3 + %s1480_s2]]  ;;  %p7036_p2 = scmp.lt.s32.totalorder %s8800_s24, 15 }
  0x84   : > { %s8812_s28 = sld [smem:[#allocation4 + %s1480_s2]]  ;;  %7757 = vmatprep.subr.msk.mxu1 %vm781_vm4, %v1397_v62  ;;  %s8825_s4 = sadd.s32 2, %s10335_s29 }
  0x85   : > { %7730 = vmatprep.subr.msk.mxu0 %vm781_vm4, %v879_v59  ;;  %s8815_s19 = sld [smem:[#allocation5 + %s1480_s2]]  ;;  %s6998_s11 = sshll.u32 %s971_s14, 4  ;;  %7758 = vmatpush3.msk.msra.mxu1 %vm781_vm4, %v1397_v62 }
  0x86   : > { %7731 = vmatpush3.msk.msra.mxu0 %vm781_vm4, %v879_v59  ;;  %s10337_s13 = sld [smem:[#allocation35_spill]]  ;;  %10338 = sst [smem:[#allocation22_spill]] %s8825_s4  ;;  %7760 = vmatmul.mubr.msk.f32.vlgmr.msra.gmra.mrb[0].mxu1 %vm774_vm3, %v8808_v63 }
  0x87   : > { %7733 = vmatmul.mubr.msk.f32.vlgmr.msra.gmra.mrb[0].mxu0 %vm774_vm3, %v8808_v63  ;;  %s975_s26 = scalar_lea.vmem %s8765_s20, %s6998_s11  ;;  %s978_s15 = ssub.f32 1.0, %s8796_s18  ;;  %v986_v4 = vstv %s8796_s18 }
  0x88   : > { %v976_v2 = vld [vmem:[%s975_s26] sm:$0xff]  ;;  %v977_v3 = vld [vmem:[%s975_s26 + $0x8] sm:$0xff]  ;;  %s6999_s12 = sshll.u32 %s8794_s0, 4  ;;  %p2092_p3 = scmp.gt.s32.totalorder %s8825_s4, 0 }
  0x89   : > { %v979_v5 = vstv %s978_s15  ;;  %s983_s30 = scalar_lea.vmem %s8765_s20, %s6999_s12  ;;  %p7069_p4 = scmp.lt.s32.totalorder %s8825_s4, 15 }
  0x8a   : > { %v980_v6 = vmul.f32 %v979_v5, %v976_v2  ;;  %v981_v7 = vmul.f32 %v979_v5, %v977_v3  ;;  %v984_v10 = vld [vmem:[%s983_s30] sm:$0xff]  ;;  %v985_v11 = vld [vmem:[%s983_s30 + $0x8] sm:$0xff]  ;;  %s7031_s14 = sshll.u32 %s8810_s7, 4  ;;  %s7032_s0 = sshll.u32 %s8812_s28, 4 }
  0x8b   : > { %v987_v12 = vmul.f32 %v986_v4, %v984_v10  ;;  %v988_v13 = vmul.f32 %v986_v4, %v985_v11  ;;  %s1485_s18 = scalar_lea.vmem %s8765_s20, %s7031_s14  ;;  %s1488_s1 = ssub.f32 1.0, %s8815_s19  ;;  %v1496_v14 = vstv %s8815_s19 }
  0x8c   : > { %v8820_v1 = vld [vmem:[%s10337_s13] sm:$0xff]  ;;  %v1487_v16 = vld [vmem:[%s1485_s18 + $0x8] sm:$0xff]  ;;  %s1493_s2 = scalar_lea.vmem %s8765_s20, %s7032_s0  ;;  %s8850_s22 = sadd.s32 3, %s10335_s29 }
  0x8d   : > { %7739 = vmatprep.mubr.msk.f32.mxu0 %vm993_vm5, %v8820_v1  ;;  %7766 = vmatprep.mubr.msk.f32.mxu1 %vm993_vm5, %v8820_v1  ;;  %v1486_v15 = vld [vmem:[%s1485_s18] sm:$0xff]  ;;  %10339 = sst [smem:[#allocation23_spill]] %s8850_s22  ;;  %v989_v17 = vadd.f32 %v987_v12, %v980_v6  ;;  %v990_v18 = vadd.f32 %v988_v13, %v981_v7  ;;  %v1489_v19 = vstv %s1488_s1  ;;  %v1495_v21 = vld [vmem:[%s1493_s2 + $0x8] sm:$0xff]  ;;  %p2594_p5 = scmp.gt.s32.totalorder %s8850_s22, 0 }
  0x8e   : > { %v1494_v20 = vld [vmem:[%s1493_s2] sm:$0xff]  ;;  %s1591_s3 = scalar_select %p1590_p1, %s8800_s24, 0  ;;  %v1490_v22 = vmul.f32 %v1489_v19, %v1486_v15  ;;  %v1491_v23 = vmul.f32 %v1489_v19, %v1487_v16  ;;  %v1498_v25 = vmul.f32 %v1496_v14, %v1495_v21  ;;  %v8873_v30 = vld [vmem:[%s10337_s13 + $0x8] sm:$0xff] }
  0x8f   : > { %v1497_v24 = vmul.f32 %v1496_v14, %v1494_v20  ;;  %s2093_s7 = scalar_select %p2092_p3, %s8825_s4, 0  ;;  %v8009_v26 = vpack.c.bf16 %v990_v18, %v989_v17 }
  0x90   : > { %s10390_s3 = smov (!%p7036_p2, %s1591_s3), 15  ;;  %v1500_v28 = vadd.f32 %v1498_v25, %v1491_v23  ;;  %p7102_p7 = scmp.lt.s32.totalorder %s8850_s22, 15 }
  0x91   : > { %v1499_v27 = vadd.f32 %v1497_v24, %v1490_v22  ;;  %s10392_s7 = smov (!%p7069_p4, %s2093_s7), 15  ;;  %8010 = vmatprep.subr.bf16.mxu0 %v8009_v26  ;;  %s1609_s28 = sshra.s32 %s10390_s3, 7 }
  0x92   : > { %s8868_s19 = sand.u32 127, %s10390_s3  ;;  %8012 = vmatpush3.bf16.msra.mxu0 %v8009_v26  ;;  %s8875_s11 = sshll.u32 %s1609_s28, 7 }
  0x93   : > { %v8013_v29 = vpack.c.bf16 %v1500_v28, %v1499_v27  ;;  %s2111_s26 = sshra.s32 %s10392_s7, 7  ;;  %s7466_s15 = sadd.s32 128, %s8875_s11 }
  0x94   : > { %s8879_s12 = sshll.u32 %s2111_s26, 7  ;;  %s1615_s30 = sadd.s32 %s7466_s15, %s8868_s19 }
  0x95   : > { %8014 = vmatprep.subr.bf16.mxu1 %v8013_v29  ;;  %s7476_s14 = sadd.s32 128, %s8879_s12  ;;  %7740 = vmatmul.mubr.msk.f32.vlgmr.msra.gmra.mrb[0].mxu0 %vm993_vm5, %v8873_v30  ;;  %s1616_s0 = sld [smem:[#allocation3 + %s1615_s30]] }
  0x96   : > { %8016 = vmatpush3.bf16.msra.mxu1 %v8013_v29  ;;  %s1617_s18 = sld [smem:[#allocation4 + %s1615_s30]]  ;;  %s8886_s2 = sand.u32 127, %s10392_s7  ;;  %7771 = vmatprep.mubr.msk.f32.mxu0 %vm586_vm0, %v8567_v0 }
  0x97   : > { %s1618_s1 = sld [smem:[#allocation5 + %s1615_s30]]  ;;  %s2117_s28 = sadd.s32 %s7476_s14, %s8886_s2 }
  0x98   : > { %s8892_s17 = sld [smem:[#allocation3 + %s10390_s3]]  ;;  %p1082_p4 = scmp.ge.s32.totalorder %s10335_s29, 0 }
  0x99   : > { %7767 = vmatmul.mubr.msk.f32.vlgmr.msra.gmra.mrb[0].mxu1 %vm993_vm5, %v8873_v30  ;;  %s2118_s25 = sld [smem:[#allocation3 + %s2117_s28]] }
  0x9a   : > { %s2119_s26 = sld [smem:[#allocation4 + %s2117_s28]]  ;;  %7798 = vmatprep.mubr.msk.f32.mxu1 %vm586_vm0, %v8567_v0 }
  0x9b   : > { %s8896_s15 = sld [smem:[#allocation5 + %s2117_s28]]  ;;  %s7044_s4 = sshll.u32 %s1616_s0, 2 }
  0x9c   : > { %s8901_s30 = sld [smem:[#allocation4 + %s10390_s3]]  ;;  %s7045_s24 = sshll.u32 %s1617_s18, 2 }
  0x9d   : > { %s8904_s6 = sld [smem:[#allocation5 + %s10390_s3]]  ;;  %s1620_s5 = scalar_lea.vmem %s8586_s23, %s7044_s4  ;;  %v1628_v33 = vstv %s1618_s1 }
  0x9e   : > { %s8907_s14 = sld [smem:[#allocation3 + %s10392_s7]]  ;;  %s1622_s13 = ssub.f32 1.0, %s1618_s1  ;;  %v1621_v34 = vld [vmem:[%s1620_s5] sm:$0xf] }
  0x9f   : > { %s1626_s28 = scalar_lea.vmem %s8586_s23, %s7045_s24  ;;  %s7041_s10 = sshll.u32 %s8892_s17, 3 }
  0xa0   : > { %v1623_v0 = vstv %s1622_s13  ;;  %v1627_v35 = vld [vmem:[%s1626_s28] sm:$0xf]  ;;  %s7077_s3 = sshll.u32 %s2118_s25, 2  ;;  %s7078_s8 = sshll.u32 %s2119_s26, 2 }
  0xa1   : > { %v1624_v36 = vmul.f32 %v1623_v0, %v1621_v34  ;;  %v1629_v37 = vmul.f32 %v1628_v33, %v1627_v35  ;;  %s2122_s0 = scalar_lea.vmem %s8586_s23, %s7077_s3  ;;  %s2124_s4 = ssub.f32 1.0, %s8896_s15  ;;  %v2130_v38 = vstv %s8896_s15 }
  0xa2   : > { %v2123_v39 = vld [vmem:[%s2122_s0] sm:$0xf]  ;;  %s2128_s18 = scalar_lea.vmem %s8586_s23, %s7078_s8  ;;  %s1598_s5 = scalar_lea.vmem %s8605_s21, %s7041_s10 }
  0xa3   : > { %v1630_v40 = vadd.f32 %v1629_v37, %v1624_v36  ;;  %v2125_v41 = vstv %s2124_s4  ;;  %v2129_v42 = vld [vmem:[%s2128_s18] sm:$0xf]  ;;  %s1600_s24 = ssub.f32 1.0, %s8904_s6  ;;  %s7042_s13 = sshll.u32 %s8901_s30, 3  ;;  %v1606_v44 = vstv %s8904_s6 }
  0xa4   : > { %v1599_v43 = vld [vmem:[%s1598_s5] sm:$0xff]  ;;  %v2126_v45 = vmul.f32 %v2125_v41, %v2123_v39  ;;  %v2131_v46 = vmul.f32 %v2130_v38, %v2129_v42  ;;  %s1604_s1 = scalar_lea.vmem %s8605_s21, %s7042_s13  ;;  %s8922_s17 = sld [smem:[#allocation4 + %s10392_s7]] }
  0xa5   : > { %7769 = vmatprep.subr.msk.mxu0 %vm593_vm1, %v1630_v40  ;;  %v1601_v49 = vstv %s1600_s24  ;;  %v1605_v50 = vld [vmem:[%s1604_s1] sm:$0xff]  ;;  %s8926_s8 = sld [smem:[#allocation5 + %s10392_s7]]  ;;  %s7074_s10 = sshll.u32 %s8907_s14, 3 }
  0xa6   : > { %7770 = vmatpush3.msk.msra.mxu0 %vm593_vm1, %v1630_v40  ;;  %v2132_v51 = vadd.f32 %v2131_v46, %v2126_v45  ;;  %v1602_v52 = vmul.f32 %v1601_v49, %v1599_v43  ;;  %v1607_v53 = vmul.f32 %v1606_v44, %v1605_v50  ;;  %s2100_s6 = scalar_lea.vmem %s8605_s21, %s7074_s10  ;;  %s7468_s25 = sadd.s32 256, %s8875_s11 }
  0xa7   : > { %7772 = vmatmul.mubr.msk.f32.vlgmr.msra.gmra.mrb[2].mxu0 %vm586_vm0, %v8638_v8  ;;  %s1786_s26 = sadd.s32 %s7468_s25, %s8868_s19  ;;  %s7478_s15 = sadd.s32 256, %s8879_s12  ;;  %v2101_v55 = vld [vmem:[%s2100_s6] sm:$0xff] }
  0xa8   : > { %7796 = vmatprep.subr.msk.mxu1 %vm593_vm1, %v2132_v51  ;;  %v1608_v54 = vadd.f32 %v1607_v53, %v1602_v52  ;;  %7776 = vmatprep.mubr.msk.f32.mxu0 %vm672_vm2, %v8648_v9  ;;  %s1787_s7 = sld [smem:[#allocation3 + %s1786_s26]]  ;;  %s2288_s28 = sadd.s32 %s7478_s15, %s8886_s2 }
  0xa9   : > { %s8939_s30 = sld [smem:[#allocation4 + %s1786_s26]]  ;;  %7797 = vmatpush3.msk.msra.mxu1 %vm593_vm1, %v2132_v51  ;;  %s7470_s13 = sadd.s32 384, %s8875_s11 }
  0xaa   : > { %s8942_s14 = sld [smem:[#allocation5 + %s1786_s26]]  ;;  %7799 = vmatmul.mubr.msk.f32.vlgmr.msra.gmra.mrb[2].mxu1 %vm586_vm0, %v8638_v8  ;;  %7774 = vmatprep.subr.mxu0 %v1608_v54  ;;  %s7075_s3 = sshll.u32 %s8922_s17, 3 }
  0xab   : > { %s8948_s0 = sld [smem:[#allocation3 + %s2288_s28]]  ;;  %7775 = vmatpush3.msra.mxu0 %v1608_v54  ;;  %s2102_s4 = ssub.f32 1.0, %s8926_s8  ;;  %v2108_v56 = vstv %s8926_s8  ;;  %7803 = vmatprep.mubr.msk.f32.mxu1 %vm672_vm2, %v8648_v9 }
  0xac   : > { %s2106_s18 = scalar_lea.vmem %s8605_s21, %s7075_s3  ;;  %s8955_s5 = sld [smem:[#allocation4 + %s2288_s28]] }
  0xad   : > { %v2107_v57 = vld [vmem:[%s2106_s18] sm:$0xff]  ;;  %s8957_s24 = sld [smem:[#allocation5 + %s2288_s28]]  ;;  %v2103_v58 = vstv %s2102_s4  ;;  %s7480_s1 = sadd.s32 384, %s8879_s12 }
  0xae   : > { %v2109_v59 = vmul.f32 %v2108_v56, %v2107_v57  ;;  %v2104_v60 = vmul.f32 %v2103_v58, %v2101_v55  ;;  %s7052_s17 = sshll.u32 %s1787_s7, 1  ;;  %s1884_s7 = sadd.s32 %s7470_s13, %s8868_s19 }
  0xaf   : > { %s7053_s10 = sshll.u32 %s8939_s30, 1  ;;  %7777 = vmatmul.mubr.msk.f32.vlgmr.msra.gmra.mrb[2].mxu0 %vm672_vm2, %v8698_v31  ;;  %s1791_s8 = scalar_lea.vmem %s8671_s16, %s7052_s17 }
  0xb0   : > { %s1793_s6 = ssub.f32 1.0, %s8942_s14  ;;  %v1799_v61 = vstv %s8942_s14  ;;  %v2110_v62 = vadd.f32 %v2109_v59, %v2104_v60  ;;  %v1792_v2 = vld [vmem:[%s1791_s8] sm:$0x3]  ;;  %s1797_s25 = scalar_lea.vmem %s8671_s16, %s7053_s10  ;;  %7781 = vmatprep.mubr.msk.f32.mxu0 %vm774_vm3, %v8706_v32 }
  0xb1   : > { %s7085_s26 = sshll.u32 %s8948_s0, 1  ;;  %v1798_v4 = vld [vmem:[%s1797_s25] sm:$0x3]  ;;  %s1885_s3 = sld [smem:[#allocation3 + %s1884_s7]] }
  0xb2   : > { %v1794_v3 = vstv %s1793_s6  ;;  %s2293_s15 = scalar_lea.vmem %s8671_s16, %s7085_s26  ;;  %7801 = vmatprep.subr.mxu1 %v2110_v62  ;;  %v1800_v6 = vmul.f32 %v1799_v61, %v1798_v4  ;;  %s7086_s14 = sshll.u32 %s8955_s5, 1  ;;  %v9080_v60 = vld [vmem:[%s10253_s9] sm:$0xff] }
  0xb3   : > { %v1795_v5 = vmul.f32 %v1794_v3, %v1792_v2  ;;  %v2294_v7 = vld [vmem:[%s2293_s15] sm:$0x3]  ;;  %s2295_s30 = ssub.f32 1.0, %s8957_s24  ;;  %v2301_v10 = vstv %s8957_s24  ;;  %7802 = vmatpush3.msra.mxu1 %v2110_v62  ;;  %s2299_s28 = scalar_lea.vmem %s8671_s16, %s7086_s14 }
  0xb4   : > { %7804 = vmatmul.mubr.msk.f32.vlgmr.msra.gmra.mrb[2].mxu1 %vm672_vm2, %v8698_v31  ;;  %v2300_v13 = vld [vmem:[%s2299_s28] sm:$0x3]  ;;  %s8979_s0 = sld [smem:[#allocation4 + %s1884_s7]]  ;;  %s2386_s18 = sadd.s32 %s7480_s1, %s8886_s2 }
  0xb5   : > { %v1801_v11 = vadd.f32 %v1800_v6, %v1795_v5  ;;  %v2296_v12 = vstv %s2295_s30  ;;  %s8981_s4 = sld [smem:[#allocation5 + %s1884_s7]]  ;;  %v2302_v15 = vmul.f32 %v2301_v10, %v2300_v13  ;;  %7808 = vmatprep.mubr.msk.f32.mxu1 %vm774_vm3, %v8706_v32  ;;  %s7472_s5 = sadd.s32 512, %s8875_s11 }
  0xb6   : > { %v2297_v14 = vmul.f32 %v2296_v12, %v2294_v7  ;;  %s2387_s24 = sld [smem:[#allocation3 + %s2386_s18]]  ;;  %s1982_s10 = sadd.s32 %s7472_s5, %s8868_s19 }
  0xb7   : > { %7779 = vmatprep.subr.msk.mxu0 %vm781_vm4, %v1801_v11  ;;  %s8990_s13 = sld [smem:[#allocation4 + %s2386_s18]]  ;;  %s7058_s8 = sshll.u32 %s1885_s3, 1 }
  0xb8   : > { %7780 = vmatpush3.msk.msra.mxu0 %vm781_vm4, %v1801_v11  ;;  %v2303_v16 = vadd.f32 %v2302_v15, %v2297_v14  ;;  %s8993_s17 = sld [smem:[#allocation5 + %s2386_s18]]  ;;  %s1889_s19 = scalar_lea.vmem %s8686_s27, %s7058_s8 }
  0xb9   : > { %7782 = vmatmul.mubr.msk.f32.vlgmr.msra.gmra.mrb[2].mxu0 %vm774_vm3, %v8760_v47  ;;  %s8998_s11 = sld [smem:[#allocation3 + %s1982_s10]]  ;;  %v1890_v17 = vld [vmem:[%s1889_s19] sm:$0x3]  ;;  %s7482_s15 = sadd.s32 512, %s8879_s12 }
  0xba   : > { %s9000_s1 = sld [smem:[#allocation4 + %s1982_s10]]  ;;  %7806 = vmatprep.subr.msk.mxu1 %vm781_vm4, %v2303_v16  ;;  %7786 = vmatprep.mubr.msk.f32.mxu0 %vm774_vm3, %v8773_v48  ;;  %s7059_s26 = sshll.u32 %s8979_s0, 1 }
  0xbb   : > { %s9005_s6 = sld [smem:[#allocation5 + %s1982_s10]]  ;;  %7807 = vmatpush3.msk.msra.mxu1 %vm781_vm4, %v2303_v16  ;;  %s1891_s25 = ssub.f32 1.0, %s8981_s4  ;;  %v1897_v18 = vstv %s8981_s4 }
  0xbc   : > { %7809 = vmatmul.mubr.msk.f32.vlgmr.msra.gmra.mrb[2].mxu1 %vm774_vm3, %v8760_v47  ;;  %s1895_s7 = scalar_lea.vmem %s8686_s27, %s7059_s26  ;;  %s7091_s30 = sshll.u32 %s2387_s24, 1 }
  0xbd   : > { %v1892_v19 = vstv %s1891_s25  ;;  %v1896_v21 = vld [vmem:[%s1895_s7] sm:$0x3]  ;;  %s2391_s14 = scalar_lea.vmem %s8686_s27, %s7091_s30  ;;  %7813 = vmatprep.mubr.msk.f32.mxu1 %vm774_vm3, %v8773_v48  ;;  %s7092_s12 = sshll.u32 %s8990_s13, 1 }
  0xbe   : > { %v1893_v20 = vmul.f32 %v1892_v19, %v1890_v17  ;;  %s2393_s28 = ssub.f32 1.0, %s8993_s17  ;;  %v1898_v22 = vmul.f32 %v1897_v18, %v1896_v21  ;;  %v2392_v23 = vld [vmem:[%s2391_s14] sm:$0x3]  ;;  %v2399_v24 = vstv %s8993_s17  ;;  %s2397_s0 = scalar_lea.vmem %s8686_s27, %s7092_s12 }
  0xbf   : > { %s7064_s3 = sshll.u32 %s8998_s11, 4  ;;  %v2398_v28 = vld [vmem:[%s2397_s0] sm:$0x3]  ;;  %s2484_s10 = sadd.s32 %s7482_s15, %s8886_s2 }
  0xc0   : > { %v2394_v25 = vstv %s2393_s28  ;;  %s1987_s4 = scalar_lea.vmem %s8765_s20, %s7064_s3  ;;  %v1899_v26 = vadd.f32 %v1898_v22, %v1893_v20  ;;  %s7065_s5 = sshll.u32 %s9000_s1, 4  ;;  %v2400_v0 = vmul.f32 %v2399_v24, %v2398_v28 }
  0xc1   : > { %v2395_v27 = vmul.f32 %v2394_v25, %v2392_v23  ;;  %v1988_v29 = vld [vmem:[%s1987_s4] sm:$0xff]  ;;  %v1989_v33 = vld [vmem:[%s1987_s4 + $0x8] sm:$0xff]  ;;  %s1990_s18 = ssub.f32 1.0, %s9005_s6  ;;  %v1998_v34 = vstv %s9005_s6  ;;  %s1995_s24 = scalar_lea.vmem %s8765_s20, %s7065_s5 }
  0xc2   : > { %7784 = vmatprep.subr.msk.mxu0 %vm781_vm4, %v1899_v26  ;;  %v1996_v36 = vld [vmem:[%s1995_s24] sm:$0xff]  ;;  %v1997_v37 = vld [vmem:[%s1995_s24 + $0x8] sm:$0xff]  ;;  %s2485_s13 = sld [smem:[#allocation3 + %s2484_s10]]  ;;  %s9041_s2 = sadd.s32 4, %s10335_s29 }
  0xc3   : > { %v1991_v35 = vstv %s1990_s18  ;;  %s9031_s17 = sld [smem:[#allocation4 + %s2484_s10]]  ;;  %7785 = vmatpush3.msk.msra.mxu0 %vm781_vm4, %v1899_v26  ;;  %v2401_v38 = vadd.f32 %v2400_v0, %v2395_v27  ;;  %v1999_v41 = vmul.f32 %v1998_v34, %v1996_v36  ;;  %v2000_v42 = vmul.f32 %v1998_v34, %v1997_v37  ;;  %p3096_p8 = scmp.gt.s32.totalorder %s9041_s2, 0 }
  0xc4   : > { %v1992_v39 = vmul.f32 %v1991_v35, %v1988_v29  ;;  %v1993_v40 = vmul.f32 %v1991_v35, %v1989_v33  ;;  %s9034_s11 = sld [smem:[#allocation5 + %s2484_s10]]  ;;  %7787 = vmatmul.mubr.msk.f32.vlgmr.msra.gmra.mrb[2].mxu0 %vm774_vm3, %v8808_v63  ;;  %p7135_p9 = scmp.lt.s32.totalorder %s9041_s2, 15 }
  0xc5   : > { %10340 = sst [smem:[#allocation24_spill]] %s9041_s2  ;;  %7811 = vmatprep.subr.msk.mxu1 %vm781_vm4, %v2401_v38  ;;  %7793 = vmatprep.mubr.msk.f32.mxu0 %vm993_vm5, %v8820_v1 }
  0xc6   : > { %v2001_v43 = vadd.f32 %v1999_v41, %v1992_v39  ;;  %s2595_s1 = scalar_select %p2594_p5, %s8850_s22, 0  ;;  %7812 = vmatpush3.msk.msra.mxu1 %vm781_vm4, %v2401_v38  ;;  %v2002_v44 = vadd.f32 %v2000_v42, %v1993_v40 }
  0xc7   : > { %7814 = vmatmul.mubr.msk.f32.vlgmr.msra.gmra.mrb[2].mxu1 %vm774_vm3, %v8808_v63  ;;  %p1083_p5 = scmp.lt.s32.totalorder %s10335_s29, 16 }
  0xc8   : > { %s10394_s1 = smov (!%p7102_p7, %s2595_s1), 15  ;;  %v8017_v45 = vpack.c.bf16 %v2002_v44, %v2001_v43  ;;  %s7097_s8 = sshll.u32 %s2485_s13, 4  ;;  %7820 = vmatprep.mubr.msk.f32.mxu1 %vm993_vm5, %v8820_v1 }
  0xc9   : > { %s7098_s6 = sshll.u32 %s9031_s17, 4  ;;  %s2489_s19 = scalar_lea.vmem %s8765_s20, %s7097_s8 }
  0xca   : > { %s2492_s25 = ssub.f32 1.0, %s9034_s11  ;;  %v2500_v46 = vstv %s9034_s11  ;;  %8018 = vmatprep.subr.bf16.mxu0 %v8017_v45  ;;  %v2490_v49 = vld [vmem:[%s2489_s19] sm:$0xff]  ;;  %v2491_v50 = vld [vmem:[%s2489_s19 + $0x8] sm:$0xff]  ;;  %s2497_s26 = scalar_lea.vmem %s8765_s20, %s7098_s6 }
  0xcb   : > { %s2613_s15 = sshra.s32 %s10394_s1, 7  ;;  %8020 = vmatpush3.bf16.msra.mxu0 %v8017_v45  ;;  %v2498_v52 = vld [vmem:[%s2497_s26] sm:$0xff]  ;;  %v2499_v53 = vld [vmem:[%s2497_s26 + $0x8] sm:$0xff]  ;;  %s9065_s30 = sand.u32 127, %s10394_s1 }
  0xcc   : > { %v2493_v51 = vstv %s2492_s25  ;;  %s9062_s7 = sshll.u32 %s2613_s15, 7  ;;  %v2501_v56 = vmul.f32 %v2500_v46, %v2498_v52  ;;  %v2502_v57 = vmul.f32 %v2500_v46, %v2499_v53  ;;  %s9069_s28 = sld [smem:[#allocation3 + %s10394_s1]] }
  0xcd   : > { %v2494_v54 = vmul.f32 %v2493_v51, %v2490_v49  ;;  %v2495_v55 = vmul.f32 %v2493_v51, %v2491_v50  ;;  %s7486_s14 = sadd.s32 128, %s9062_s7  ;;  %s9073_s3 = sld [smem:[#allocation4 + %s10394_s1]] }
  0xce   : > { %s2619_s12 = sadd.s32 %s7486_s14, %s9065_s30  ;;  %7794 = vmatmul.mubr.msk.f32.vlgmr.msra.gmra.mrb[2].mxu0 %vm993_vm5, %v8873_v30  ;;  %s9085_s10 = sld [smem:[#allocation5 + %s10394_s1]] }
  0xcf   : > { %v2503_v58 = vadd.f32 %v2501_v56, %v2494_v54  ;;  %v2504_v59 = vadd.f32 %v2502_v57, %v2495_v55  ;;  %s2620_s0 = sld [smem:[#allocation3 + %s2619_s12]]  ;;  %7825 = vmatprep.mubr.msk.f32.mxu0 %vm586_vm0, %v9080_v60  ;;  %s7488_s17 = sadd.s32 256, %s9062_s7 }
  0xd0   : > { %s2621_s4 = sld [smem:[#allocation4 + %s2619_s12]] }
  0xd1   : > { %s2622_s18 = sld [smem:[#allocation5 + %s2619_s12]]  ;;  %v8021_v61 = vpack.c.bf16 %v2504_v59, %v2503_v58 }
  0xd2   : > { %s3097_s13 = scalar_select %p3096_p8, %s9041_s2, 0 }
  0xd3   : > { %8022 = vmatprep.subr.bf16.mxu1 %v8021_v61  ;;  %s7107_s8 = sshll.u32 %s9069_s28, 3  ;;  %s7108_s6 = sshll.u32 %s9073_s3, 3 }
  0xd4   : > { %s10396_s13 = smov (!%p7135_p9, %s3097_s13), 15  ;;  %8024 = vmatpush3.bf16.msra.mxu1 %v8021_v61  ;;  %v2610_v11 = vstv %s9085_s10  ;;  %p9615_p8 = pnand %p1083_p5, %p1082_p4 }
  0xd5   : > { %s7110_s19 = sshll.u32 %s2620_s0, 2  ;;  %s3115_s14 = sshra.s32 %s10396_s13, 7 }
  0xd6   : > { %s7111_s25 = sshll.u32 %s2621_s4, 2  ;;  %s2624_s1 = scalar_lea.vmem %s8586_s23, %s7110_s19 }
  0xd7   : > { %s2626_s26 = ssub.f32 1.0, %s2622_s18  ;;  %v2632_v62 = vstv %s2622_s18  ;;  %7821 = vmatmul.mubr.msk.f32.vlgmr.msra.gmra.mrb[2].mxu1 %vm993_vm5, %v8873_v30  ;;  %v2625_v2 = vld [vmem:[%s2624_s1] sm:$0xf]  ;;  %s2630_s15 = scalar_lea.vmem %s8586_s23, %s7111_s25 }
  0xd8   : > { %v2631_v4 = vld [vmem:[%s2630_s15] sm:$0xf]  ;;  %s9103_s12 = sshll.u32 %s3115_s14, 7  ;;  %s9106_s28 = sand.u32 127, %s10396_s13  ;;  %7852 = vmatprep.mubr.msk.f32.mxu1 %vm586_vm0, %v9080_v60 }
  0xd9   : > { %v2627_v3 = vstv %s2626_s26  ;;  %v2633_v6 = vmul.f32 %v2632_v62, %v2631_v4  ;;  %s7496_s3 = sadd.s32 128, %s9103_s12  ;;  %s2602_s0 = scalar_lea.vmem %s8605_s21, %s7107_s8 }
  0xda   : > { %v2628_v5 = vmul.f32 %v2627_v3, %v2625_v2  ;;  %s3121_s4 = sadd.s32 %s7496_s3, %s9106_s28  ;;  %v2603_v7 = vld [vmem:[%s2602_s0] sm:$0xff]  ;;  %s2604_s18 = ssub.f32 1.0, %s9085_s10 }
  0xdb   : > { %s3122_s5 = sld [smem:[#allocation3 + %s3121_s4]]  ;;  %s2608_s25 = scalar_lea.vmem %s8605_s21, %s7108_s6 }
  0xdc   : > { %v2634_v10 = vadd.f32 %v2633_v6, %v2628_v5  ;;  %s9114_s24 = sld [smem:[#allocation4 + %s3121_s4]]  ;;  %v2605_v12 = vstv %s2604_s18  ;;  %v2609_v14 = vld [vmem:[%s2608_s25] sm:$0xff]  ;;  %s2790_s6 = sadd.s32 %s7488_s17, %s9065_s30 }
  0xdd   : > { %s9117_s19 = sld [smem:[#allocation5 + %s3121_s4]]  ;;  %v2606_v13 = vmul.f32 %v2605_v12, %v2603_v7  ;;  %v2611_v15 = vmul.f32 %v2610_v11, %v2609_v14 }
  0xde   : > { %7823 = vmatprep.subr.msk.mxu0 %vm593_vm1, %v2634_v10  ;;  %s3100_s8 = sld [smem:[#allocation3 + %s10396_s13]] }
  0xdf   : > { %s9123_s1 = sld [smem:[#allocation4 + %s10396_s13]]  ;;  %7824 = vmatpush3.msk.msra.mxu0 %vm593_vm1, %v2634_v10  ;;  %v2612_v16 = vadd.f32 %v2611_v15, %v2606_v13 }
  0xe0   : > { %s9127_s10 = sld [smem:[#allocation5 + %s10396_s13]]  ;;  %7826 = vmatmul.mubr.msk.f32.vlgmr.msra.gmra.mrb[4].mxu0 %vm586_vm0, %v8638_v8  ;;  %s7498_s13 = sadd.s32 256, %s9103_s12 }
  0xe1   : > { %s9134_s26 = sld [smem:[#allocation3 + %s2790_s6]]  ;;  %7830 = vmatprep.mubr.msk.f32.mxu0 %vm672_vm2, %v8648_v9  ;;  %s7143_s3 = sshll.u32 %s3122_s5, 2  ;;  %7828 = vmatprep.subr.mxu0 %v2612_v16 }
  0xe2   : > { %s9136_s15 = sld [smem:[#allocation4 + %s2790_s6]]  ;;  %s7144_s0 = sshll.u32 %s9114_s24, 2  ;;  %7829 = vmatpush3.msra.mxu0 %v2612_v16 }
  0xe3   : > { %s9140_s14 = sld [smem:[#allocation5 + %s2790_s6]]  ;;  %s3126_s17 = scalar_lea.vmem %s8586_s23, %s7143_s3  ;;  %v3134_v8 = vstv %s9117_s19 }
  0xe4   : > { %s3128_s4 = ssub.f32 1.0, %s9117_s19  ;;  %v3127_v17 = vld [vmem:[%s3126_s17] sm:$0xf]  ;;  %s3132_s18 = scalar_lea.vmem %s8586_s23, %s7144_s0 }
  0xe5   : > { %s7140_s25 = sshll.u32 %s3100_s8, 3  ;;  %v3133_v18 = vld [vmem:[%s3132_s18] sm:$0xf]  ;;  %s7141_s5 = sshll.u32 %s9123_s1, 3 }
  0xe6   : > { %v3129_v9 = vstv %s3128_s4  ;;  %s3104_s6 = scalar_lea.vmem %s8605_s21, %s7140_s25  ;;  %s3106_s11 = ssub.f32 1.0, %s9127_s10  ;;  %v3135_v20 = vmul.f32 %v3134_v8, %v3133_v18  ;;  %v3112_v22 = vstv %s9127_s10 }
  0xe7   : > { %v3130_v19 = vmul.f32 %v3129_v9, %v3127_v17  ;;  %v3105_v21 = vld [vmem:[%s3104_s6] sm:$0xff]  ;;  %s7118_s24 = sshll.u32 %s9134_s26, 1  ;;  %s3110_s19 = scalar_lea.vmem %s8605_s21, %s7141_s5 }
  0xe8   : > { %v3107_v23 = vstv %s3106_s11  ;;  %s2795_s3 = scalar_lea.vmem %s8671_s16, %s7118_s24  ;;  %v3111_v26 = vld [vmem:[%s3110_s19] sm:$0xff]  ;;  %7831 = vmatmul.mubr.msk.f32.vlgmr.msra.gmra.mrb[4].mxu0 %vm672_vm2, %v8698_v31  ;;  %s7119_s0 = sshll.u32 %s9136_s15, 1 }
  0xe9   : > { %v3136_v24 = vadd.f32 %v3135_v20, %v3130_v19  ;;  %v3108_v25 = vmul.f32 %v3107_v23, %v3105_v21  ;;  %v2796_v27 = vld [vmem:[%s2795_s3] sm:$0x3]  ;;  %s2797_s8 = ssub.f32 1.0, %s9140_s14  ;;  %v2803_v28 = vstv %s9140_s14  ;;  %v3113_v29 = vmul.f32 %v3112_v22, %v3111_v26  ;;  %s2801_s1 = scalar_lea.vmem %s8671_s16, %s7119_s0  ;;  %7835 = vmatprep.mubr.msk.f32.mxu0 %vm774_vm3, %v8706_v32  ;;  %v9178_v32 = vld [vmem:[%s10253_s9 + $0x8] sm:$0xff] }
  0xea   : > { %s3292_s10 = sadd.s32 %s7498_s13, %s9106_s28  ;;  %v2802_v34 = vld [vmem:[%s2801_s1] sm:$0x3]  ;;  %s10341_s14 = sadd.s32 384, %s9062_s7 }
  0xeb   : > { %7850 = vmatprep.subr.msk.mxu1 %vm593_vm1, %v3136_v24  ;;  %v2798_v33 = vstv %s2797_s8  ;;  %s3293_s11 = sld [smem:[#allocation3 + %s3292_s10]]  ;;  %v3114_v31 = vadd.f32 %v3113_v29, %v3108_v25  ;;  %v2804_v35 = vmul.f32 %v2803_v28, %v2802_v34  ;;  %s2888_s13 = sadd.s32 %s10341_s14, %s9065_s30 }
  0xec   : > { %s9167_s26 = sld [smem:[#allocation4 + %s3292_s10]]  ;;  %7851 = vmatpush3.msk.msra.mxu1 %vm593_vm1, %v3136_v24  ;;  %v2799_v0 = vmul.f32 %v2798_v33, %v2796_v27  ;;  %s7500_s3 = sadd.s32 384, %s9103_s12 }
  0xed   : > { %s9170_s15 = sld [smem:[#allocation5 + %s3292_s10]]  ;;  %7853 = vmatmul.mubr.msk.f32.vlgmr.msra.gmra.mrb[4].mxu1 %vm586_vm0, %v9178_v32  ;;  %7855 = vmatprep.subr.mxu1 %v3114_v31  ;;  %s3390_s8 = sadd.s32 %s7500_s3, %s9106_s28 }
  0xee   : > { %s2889_s18 = sld [smem:[#allocation3 + %s2888_s13]]  ;;  %v2805_v37 = vadd.f32 %v2804_v35, %v2799_v0  ;;  %7856 = vmatpush3.msra.mxu1 %v3114_v31  ;;  %s7492_s0 = sadd.s32 512, %s9062_s7 }
  0xef   : > { %s9182_s25 = sld [smem:[#allocation4 + %s2888_s13]] }
  0xf0   : > { %s10342_s24 = sld [smem:[#allocation32_spill]]  ;;  %7833 = vmatprep.subr.msk.mxu0 %vm781_vm4, %v2805_v37 }
  0xf1   : > { %s9191_s19 = sld [smem:[#allocation5 + %s2888_s13]]  ;;  %7834 = vmatpush3.msk.msra.mxu0 %vm781_vm4, %v2805_v37  ;;  %s7151_s14 = sshll.u32 %s3293_s11, 1 }
  0xf2   : > { %s9197_s1 = sld [smem:[#allocation3 + %s3390_s8]]  ;;  %s7152_s17 = sshll.u32 %s9167_s26, 1  ;;  %7836 = vmatmul.mubr.msk.f32.vlgmr.msra.gmra.mrb[4].mxu0 %vm774_vm3, %v8760_v47 }
  0xf3   : > { %s9199_s10 = sld [smem:[#allocation4 + %s3390_s8]]  ;;  %s3297_s4 = scalar_lea.vmem %s8671_s16, %s7151_s14  ;;  %v3305_v38 = vstv %s9170_s15  ;;  %7840 = vmatprep.mubr.msk.f32.mxu0 %vm774_vm3, %v8773_v48 }
  0xf4   : > { %s3299_s13 = ssub.f32 1.0, %s9170_s15  ;;  %v3298_v39 = vld [vmem:[%s3297_s4] sm:$0x3]  ;;  %s3303_s6 = scalar_lea.vmem %s8671_s16, %s7152_s17 }
  0xf5   : > { %s7124_s5 = sshll.u32 %s2889_s18, 1  ;;  %v3304_v41 = vld [vmem:[%s3303_s6] sm:$0x3]  ;;  %s7125_s15 = sshll.u32 %s9182_s25, 1 }
  0xf6   : > { %v9187_v36 = vld [vmem:[%s10342_s24] sm:$0xff]  ;;  %v3300_v40 = vstv %s3299_s13  ;;  %s2893_s11 = scalar_lea.vmem %s8686_s27, %s7124_s5  ;;  %v9216_v42 = vld [vmem:[%s10342_s24 + $0x8] sm:$0xff]  ;;  %v3306_v44 = vmul.f32 %v3305_v38, %v3304_v41  ;;  %s9222_s18 = sld [smem:[#allocation5 + %s3390_s8]] }
  0xf7   : > { %7857 = vmatprep.mubr.msk.f32.mxu1 %vm672_vm2, %v9187_v36  ;;  %s2895_s26 = ssub.f32 1.0, %s9191_s19  ;;  %v3301_v43 = vmul.f32 %v3300_v40, %v3298_v39  ;;  %v2894_v45 = vld [vmem:[%s2893_s11] sm:$0x3]  ;;  %v2901_v46 = vstv %s9191_s19  ;;  %s10343_s13 = sld [smem:[#allocation33_spill]] }
  0xf8   : > { %7858 = vmatmul.mubr.msk.f32.vlgmr.msra.gmra.mrb[4].mxu1 %vm672_vm2, %v9216_v42  ;;  %s2899_s6 = scalar_lea.vmem %s8686_s27, %s7125_s15  ;;  %s7157_s5 = sshll.u32 %s9197_s1, 1 }
  0xf9   : > { %v2896_v50 = vstv %s2895_s26  ;;  %v3307_v51 = vadd.f32 %v3306_v44, %v3301_v43  ;;  %v2900_v53 = vld [vmem:[%s2899_s6] sm:$0x3]  ;;  %s3395_s25 = scalar_lea.vmem %s8686_s27, %s7157_s5  ;;  %s7158_s19 = sshll.u32 %s9199_s10, 1 }
  0xfa   : > { %v2897_v52 = vmul.f32 %v2896_v50, %v2894_v45  ;;  %v2902_v54 = vmul.f32 %v2901_v46, %v2900_v53  ;;  %s3401_s8 = scalar_lea.vmem %s8686_s27, %s7158_s19  ;;  %s2986_s11 = sadd.s32 %s7492_s0, %s9065_s30  ;;  %v3396_v57 = vld [vmem:[%s3395_s25] sm:$0x3] }
  0xfb   : > { %7860 = vmatprep.subr.msk.mxu1 %vm781_vm4, %v3307_v51  ;;  %v3402_v55 = vld [vmem:[%s3401_s8] sm:$0x3]  ;;  %s9240_s3 = sld [smem:[#allocation3 + %s2986_s11]]  ;;  %s7502_s14 = sadd.s32 512, %s9103_s12 }
  0xfc   : > { %s9242_s26 = sld [smem:[#allocation4 + %s2986_s11]]  ;;  %7861 = vmatpush3.msk.msra.mxu1 %vm781_vm4, %v3307_v51  ;;  %v2903_v56 = vadd.f32 %v2902_v54, %v2897_v52  ;;  %s3397_s10 = ssub.f32 1.0, %s9222_s18  ;;  %v3403_v58 = vstv %s9222_s18 }
  0xfd   : > { %v9227_v49 = vld [vmem:[%s10343_s13] sm:$0xff]  ;;  %s9245_s1 = sld [smem:[#allocation5 + %s2986_s11]]  ;;  %s3488_s7 = sadd.s32 %s7502_s14, %s9106_s28  ;;  %v3404_v59 = vmul.f32 %v3403_v58, %v3402_v55 }
  0xfe   : > { %7862 = vmatprep.mubr.msk.f32.mxu1 %vm774_vm3, %v9227_v49  ;;  %7838 = vmatprep.subr.msk.mxu0 %vm781_vm4, %v2903_v56  ;;  %s9252_s30 = sld [smem:[#allocation3 + %s3488_s7]]  ;;  %v3398_v61 = vstv %s3397_s10  ;;  %s9262_s28 = sadd.s32 5, %s10335_s29 }
  0xff   : > { %s9254_s0 = sld [smem:[#allocation4 + %s3488_s7]]  ;;  %7839 = vmatpush3.msk.msra.mxu0 %vm781_vm4, %v2903_v56  ;;  %v3399_v62 = vmul.f32 %v3398_v61, %v3396_v57  ;;  %p3598_p10 = scmp.gt.s32.totalorder %s9262_s28, 0 }
 0x100   : > { %7863 = vmatmul.mubr.msk.f32.vlgmr.msra.gmra.mrb[4].mxu1 %vm774_vm3, %v8760_v47  ;;  %s9259_s12 = sld [smem:[#allocation5 + %s3488_s7]]  ;;  %7841 = vmatmul.mubr.msk.f32.vlgmr.msra.gmra.mrb[4].mxu0 %vm774_vm3, %v8808_v63  ;;  %p7168_p11 = scmp.lt.s32.totalorder %s9262_s28, 15 }
 0x101   : > { %10344 = sst [smem:[#allocation25_spill]] %s9262_s28  ;;  %7867 = vmatprep.mubr.msk.f32.mxu1 %vm774_vm3, %v8773_v48  ;;  %s7130_s15 = sshll.u32 %s9240_s3, 4  ;;  %7847 = vmatprep.mubr.msk.f32.mxu0 %vm993_vm5, %v8820_v1  ;;  %v3405_v47 = vadd.f32 %v3404_v59, %v3399_v62 }
 0x102   : > { %s7131_s18 = sshll.u32 %s9242_s26, 4  ;;  %s2991_s17 = scalar_lea.vmem %s8765_s20, %s7130_s15 }
 0x103   : > { %s2994_s4 = ssub.f32 1.0, %s9245_s1  ;;  %v3002_v2 = vstv %s9245_s1  ;;  %v2992_v3 = vld [vmem:[%s2991_s17] sm:$0xff]  ;;  %v2993_v48 = vld [vmem:[%s2991_s17 + $0x8] sm:$0xff]  ;;  %s2999_s6 = scalar_lea.vmem %s8765_s20, %s7131_s18  ;;  %7865 = vmatprep.subr.msk.mxu1 %vm781_vm4, %v3405_v47 }
 0x104   : > { %s9279_s5 = sadd.s32 6, %s10335_s29  ;;  %v3000_v5 = vld [vmem:[%s2999_s6] sm:$0xff]  ;;  %v3001_v6 = vld [vmem:[%s2999_s6 + $0x8] sm:$0xff]  ;;  %s7163_s25 = sshll.u32 %s9252_s30, 4  ;;  %7866 = vmatpush3.msk.msra.mxu1 %vm781_vm4, %v3405_v47 }
 0x105   : > { %10345 = sst [smem:[#allocation26_spill]] %s9279_s5  ;;  %v2995_v4 = vstv %s2994_s4  ;;  %s7164_s19 = sshll.u32 %s9254_s0, 4  ;;  %v3003_v10 = vmul.f32 %v3002_v2, %v3000_v5  ;;  %v3004_v11 = vmul.f32 %v3002_v2, %v3001_v6  ;;  %v9436_v6 = vld [vmem:[%s10343_s13 + $0x8] sm:$0xff] }
 0x106   : > { %v2996_v1 = vmul.f32 %v2995_v4, %v2992_v3  ;;  %v2997_v7 = vmul.f32 %v2995_v4, %v2993_v48  ;;  %s3493_s8 = scalar_lea.vmem %s8765_s20, %s7163_s25  ;;  %s3496_s11 = ssub.f32 1.0, %s9259_s12  ;;  %v3504_v14 = vstv %s9259_s12 }
 0x107   : > { %v3494_v12 = vld [vmem:[%s3493_s8] sm:$0xff]  ;;  %v3495_v13 = vld [vmem:[%s3493_s8 + $0x8] sm:$0xff]  ;;  %s3501_s3 = scalar_lea.vmem %s8765_s20, %s7164_s19  ;;  %p4100_p12 = scmp.gt.s32.totalorder %s9279_s5, 0 }
 0x108   : > { %7868 = vmatmul.mubr.msk.f32.vlgmr.msra.gmra.mrb[4].mxu1 %vm774_vm3, %v8808_v63  ;;  %v3005_v15 = vadd.f32 %v3003_v10, %v2996_v1  ;;  %v3006_v16 = vadd.f32 %v3004_v11, %v2997_v7  ;;  %v3497_v8 = vstv %s3496_s11  ;;  %v3502_v17 = vld [vmem:[%s3501_s3] sm:$0xff]  ;;  %v3503_v9 = vld [vmem:[%s3501_s3 + $0x8] sm:$0xff]  ;;  %s3599_s26 = scalar_select %p3598_p10, %s9262_s28, 0 }
 0x109   : > { %v3498_v18 = vmul.f32 %v3497_v8, %v3494_v12  ;;  %v3499_v19 = vmul.f32 %v3497_v8, %v3495_v13  ;;  %v3505_v20 = vmul.f32 %v3504_v14, %v3502_v17  ;;  %v3506_v21 = vmul.f32 %v3504_v14, %v3503_v9  ;;  %s10346_s10 = sld [smem:[#allocation35_spill]]  ;;  %p7201_p13 = scmp.lt.s32.totalorder %s9279_s5, 15 }
 0x10a   : > { %s4101_s7 = scalar_select %p4100_p12, %s9279_s5, 0  ;;  %v8025_v63 = vpack.c.bf16 %v3006_v16, %v3005_v15 }
 0x10b   : > { %s10398_s26 = smov (!%p7168_p11, %s3599_s26), 15  ;;  %v3507_v23 = vadd.f32 %v3505_v20, %v3498_v18  ;;  %v3508_v24 = vadd.f32 %v3506_v21, %v3499_v19  ;;  %s9309_s30 = sadd.s32 7, %s10335_s29 }
 0x10c   : > { %8026 = vmatprep.subr.bf16.mxu0 %v8025_v63  ;;  %s3617_s0 = sshra.s32 %s10398_s26, 7  ;;  %s9311_s12 = sand.u32 127, %s10398_s26 }
 0x10d   : > { %8028 = vmatpush3.bf16.msra.mxu0 %v8025_v63  ;;  %v8029_v25 = vpack.c.bf16 %v3508_v24, %v3507_v23  ;;  %s9313_s15 = sshll.u32 %s3617_s0, 7  ;;  %s3602_s18 = sld [smem:[#allocation3 + %s10398_s26]] }
 0x10e   : > { %s7506_s17 = sadd.s32 128, %s9313_s15  ;;  %s9316_s4 = sld [smem:[#allocation4 + %s10398_s26]] }
 0x10f   : > { %v9298_v22 = vld [vmem:[%s10346_s10] sm:$0xff]  ;;  %8030 = vmatprep.subr.bf16.mxu1 %v8029_v25  ;;  %s3623_s6 = sadd.s32 %s7506_s17, %s9311_s12  ;;  %s9319_s25 = sld [smem:[#allocation5 + %s10398_s26]] }
 0x110   : > { %7874 = vmatprep.mubr.msk.f32.mxu1 %vm993_vm5, %v9298_v22  ;;  %8032 = vmatpush3.bf16.msra.mxu1 %v8029_v25  ;;  %s3624_s19 = sld [smem:[#allocation3 + %s3623_s6]]  ;;  %s7508_s3 = sadd.s32 256, %s9313_s15 }
 0x111   : > { %7848 = vmatmul.mubr.msk.f32.vlgmr.msra.gmra.mrb[4].mxu0 %vm993_vm5, %v8873_v30  ;;  %s3625_s8 = sld [smem:[#allocation4 + %s3623_s6]]  ;;  %s10400_s7 = smov (!%p7201_p13, %s4101_s7), 15 }
 0x112   : > { %s3626_s11 = sld [smem:[#allocation5 + %s3623_s6]]  ;;  %7879 = vmatprep.mubr.msk.f32.mxu0 %vm586_vm0, %v9080_v60  ;;  %s9333_s1 = sadd.s32 %s7508_s3, %s9311_s12 }
 0x113   : > { %7875 = vmatmul.mubr.msk.f32.vlgmr.msra.gmra.mrb[4].mxu1 %vm993_vm5, %v8873_v30  ;;  %s7173_s26 = sshll.u32 %s3602_s18, 3  ;;  %s4119_s14 = sshra.s32 %s10400_s7, 7 }
 0x114   : > { %s9337_s0 = sand.u32 127, %s10400_s7  ;;  %7906 = vmatprep.mubr.msk.f32.mxu1 %vm586_vm0, %v9080_v60  ;;  %s9341_s17 = sshll.u32 %s4119_s14, 7 }
 0x115   : > { %s3606_s6 = scalar_lea.vmem %s8605_s21, %s7173_s26  ;;  %s7516_s3 = sadd.s32 128, %s9341_s17  ;;  %v3614_v0 = vstv %s9319_s25 }
 0x116   : > { %s7176_s5 = sshll.u32 %s3624_s19, 2  ;;  %s4125_s24 = sadd.s32 %s7516_s3, %s9337_s0  ;;  %v3607_v29 = vld [vmem:[%s3606_s6] sm:$0xff] }
 0x117   : > { %s7177_s28 = sshll.u32 %s3625_s8, 2  ;;  %s3628_s2 = scalar_lea.vmem %s8586_s23, %s7176_s5 }
 0x118   : > { %s3630_s22 = ssub.f32 1.0, %s3626_s11  ;;  %v3636_v30 = vstv %s3626_s11  ;;  %v3629_v26 = vld [vmem:[%s3628_s2] sm:$0xf]  ;;  %s3634_s18 = scalar_lea.vmem %s8586_s23, %s7177_s28 }
 0x119   : > { %v3635_v28 = vld [vmem:[%s3634_s18] sm:$0xf]  ;;  %s3608_s14 = ssub.f32 1.0, %s9319_s25  ;;  %s4126_s5 = sld [smem:[#allocation3 + %s4125_s24]] }
 0x11a   : > { %v3631_v27 = vstv %s3630_s22  ;;  %v3637_v34 = vmul.f32 %v3636_v30, %v3635_v28  ;;  %s9349_s19 = sld [smem:[#allocation4 + %s4125_s24]]  ;;  %s7174_s22 = sshll.u32 %s9316_s4, 3 }
 0x11b   : > { %v3632_v33 = vmul.f32 %v3631_v27, %v3629_v26  ;;  %s9351_s8 = sld [smem:[#allocation5 + %s4125_s24]]  ;;  %v3609_v31 = vstv %s3608_s14  ;;  %s3612_s2 = scalar_lea.vmem %s8605_s21, %s7174_s22 }
 0x11c   : > { %v3610_v37 = vmul.f32 %v3609_v31, %v3607_v29  ;;  %s4104_s28 = sld [smem:[#allocation3 + %s10400_s7]]  ;;  %v3613_v38 = vld [vmem:[%s3612_s2] sm:$0xff]  ;;  %s7518_s6 = sadd.s32 256, %s9341_s17 }
 0x11d   : > { %v3638_v35 = vadd.f32 %v3637_v34, %v3632_v33  ;;  %s9358_s11 = sld [smem:[#allocation4 + %s10400_s7]]  ;;  %v3615_v39 = vmul.f32 %v3614_v0, %v3613_v38  ;;  %p4602_p0 = scmp.gt.s32.totalorder %s9309_s30, 0 }
 0x11e   : > { %s9361_s26 = sld [smem:[#allocation5 + %s10400_s7]]  ;;  %p7234_p1 = scmp.lt.s32.totalorder %s9309_s30, 15 }
 0x11f   : > { %7877 = vmatprep.subr.msk.mxu0 %vm593_vm1, %v3638_v35  ;;  %s9365_s24 = sld [smem:[#allocation3 + %s9333_s1]]  ;;  %s7209_s18 = sshll.u32 %s4126_s5, 2  ;;  %v3616_v40 = vadd.f32 %v3615_v39, %v3610_v37 }
 0x120   : > { %s9368_s4 = sld [smem:[#allocation4 + %s9333_s1]]  ;;  %7878 = vmatpush3.msk.msra.mxu0 %vm593_vm1, %v3638_v35  ;;  %s7210_s3 = sshll.u32 %s9349_s19, 2 }
 0x121   : > { %s9372_s25 = sld [smem:[#allocation5 + %s9333_s1]]  ;;  %7880 = vmatmul.mubr.msk.f32.vlgmr.msra.gmra.mrb[6].mxu0 %vm586_vm0, %v9178_v32  ;;  %s4130_s7 = scalar_lea.vmem %s8586_s23, %s7209_s18  ;;  %v4138_v41 = vstv %s9351_s8  ;;  %7882 = vmatprep.subr.mxu0 %v3616_v40 }
 0x122   : > { %s4132_s14 = ssub.f32 1.0, %s9351_s8  ;;  %7884 = vmatprep.mubr.msk.f32.mxu0 %vm672_vm2, %v9187_v36  ;;  %v4131_v43 = vld [vmem:[%s4130_s7] sm:$0xf]  ;;  %s4136_s1 = scalar_lea.vmem %s8586_s23, %s7210_s3  ;;  %7883 = vmatpush3.msra.mxu0 %v3616_v40 }
 0x123   : > { %s7206_s5 = sshll.u32 %s4104_s28, 3  ;;  %v4137_v45 = vld [vmem:[%s4136_s1] sm:$0xf]  ;;  %s7207_s8 = sshll.u32 %s9358_s11, 3 }
 0x124   : > { %v4133_v44 = vstv %s4132_s14  ;;  %s4108_s19 = scalar_lea.vmem %s8605_s21, %s7206_s5  ;;  %s4110_s22 = ssub.f32 1.0, %s9361_s26  ;;  %v4139_v50 = vmul.f32 %v4138_v41, %v4137_v45  ;;  %v4116_v52 = vstv %s9361_s26 }
 0x125   : > { %v4134_v46 = vmul.f32 %v4133_v44, %v4131_v43  ;;  %v4109_v51 = vld [vmem:[%s4108_s19] sm:$0xff]  ;;  %s7184_s2 = sshll.u32 %s9365_s24, 1  ;;  %s4114_s18 = scalar_lea.vmem %s8605_s21, %s7207_s8 }
 0x126   : > { %v4111_v53 = vstv %s4110_s22  ;;  %s3799_s28 = scalar_lea.vmem %s8671_s16, %s7184_s2  ;;  %v4115_v56 = vld [vmem:[%s4114_s18] sm:$0xff]  ;;  %s7185_s7 = sshll.u32 %s9368_s4, 1 }
 0x127   : > { %v4140_v54 = vadd.f32 %v4139_v50, %v4134_v46  ;;  %v4112_v55 = vmul.f32 %v4111_v53, %v4109_v51  ;;  %v3800_v57 = vld [vmem:[%s3799_s28] sm:$0x3]  ;;  %s3801_s3 = ssub.f32 1.0, %s9372_s25  ;;  %v3807_v58 = vstv %s9372_s25  ;;  %v4117_v59 = vmul.f32 %v4116_v52, %v4115_v56  ;;  %s3805_s14 = scalar_lea.vmem %s8671_s16, %s7185_s7 }
 0x128   : > { %s4296_s1 = sadd.s32 %s7518_s6, %s9337_s0  ;;  %v3806_v62 = vld [vmem:[%s3805_s14] sm:$0x3]  ;;  %s7510_s4 = sadd.s32 384, %s9313_s15 }
 0x129   : > { %7904 = vmatprep.subr.msk.mxu1 %vm593_vm1, %v4140_v54  ;;  %7885 = vmatmul.mubr.msk.f32.vlgmr.msra.gmra.mrb[6].mxu0 %vm672_vm2, %v9216_v42  ;;  %v3802_v61 = vstv %s3801_s3  ;;  %s4297_s11 = sld [smem:[#allocation3 + %s4296_s1]]  ;;  %v4118_v47 = vadd.f32 %v4117_v59, %v4112_v55  ;;  %v3808_v3 = vmul.f32 %v3807_v58, %v3806_v62  ;;  %s3892_s25 = sadd.s32 %s7510_s4, %s9311_s12  ;;  %v9544_v58 = vld [vmem:[%s10346_s10 + $0x8] sm:$0xff] }
 0x12a   : > { %s9401_s26 = sld [smem:[#allocation4 + %s4296_s1]]  ;;  %7905 = vmatpush3.msk.msra.mxu1 %vm593_vm1, %v4140_v54  ;;  %v3803_v2 = vmul.f32 %v3802_v61, %v3800_v57  ;;  %7889 = vmatprep.mubr.msk.f32.mxu0 %vm774_vm3, %v9227_v49  ;;  %s7520_s6 = sadd.s32 384, %s9341_s17 }
 0x12b   : > { %s9404_s24 = sld [smem:[#allocation5 + %s4296_s1]]  ;;  %7907 = vmatmul.mubr.msk.f32.vlgmr.msra.gmra.mrb[6].mxu1 %vm586_vm0, %v9178_v32  ;;  %7909 = vmatprep.subr.mxu1 %v4118_v47  ;;  %s4394_s8 = sadd.s32 %s7520_s6, %s9337_s0 }
 0x12c   : > { %7911 = vmatprep.mubr.msk.f32.mxu1 %vm672_vm2, %v9187_v36  ;;  %v3809_v48 = vadd.f32 %v3808_v3, %v3803_v2  ;;  %s9415_s5 = sld [smem:[#allocation3 + %s3892_s25]]  ;;  %7910 = vmatpush3.msra.mxu1 %v4118_v47 }
 0x12d   : > { %s9417_s19 = sld [smem:[#allocation4 + %s3892_s25]] }
 0x12e   : > { %s9419_s22 = sld [smem:[#allocation5 + %s3892_s25]]  ;;  %7887 = vmatprep.subr.msk.mxu0 %vm781_vm4, %v3809_v48  ;;  %s7512_s25 = sadd.s32 512, %s9313_s15 }
 0x12f   : > { %s9423_s2 = sld [smem:[#allocation3 + %s4394_s8]]  ;;  %7888 = vmatpush3.msk.msra.mxu0 %vm781_vm4, %v3809_v48  ;;  %s7217_s28 = sshll.u32 %s4297_s11, 1 }
 0x130   : > { %s9425_s18 = sld [smem:[#allocation4 + %s4394_s8]]  ;;  %s7218_s3 = sshll.u32 %s9401_s26, 1 }
 0x131   : > { %s4301_s7 = scalar_lea.vmem %s8671_s16, %s7217_s28  ;;  %s4303_s14 = ssub.f32 1.0, %s9404_s24  ;;  %v4309_v4 = vstv %s9404_s24  ;;  %7890 = vmatmul.mubr.msk.f32.vlgmr.msra.gmra.mrb[6].mxu0 %vm774_vm3, %v9436_v6 }
 0x132   : > { %v4302_v5 = vld [vmem:[%s4301_s7] sm:$0x3]  ;;  %s4307_s1 = scalar_lea.vmem %s8671_s16, %s7218_s3  ;;  %s9440_s6 = sld [smem:[#allocation5 + %s4394_s8]] }
 0x133   : > { %v4304_v1 = vstv %s4303_s14  ;;  %v4308_v7 = vld [vmem:[%s4307_s1] sm:$0x3]  ;;  %s7190_s11 = sshll.u32 %s9415_s5, 1  ;;  %s7191_s26 = sshll.u32 %s9417_s19, 1  ;;  %7912 = vmatmul.mubr.msk.f32.vlgmr.msra.gmra.mrb[6].mxu1 %vm672_vm2, %v9216_v42 }
 0x134   : > { %s10347_s7 = sld [smem:[#allocation34_spill]]  ;;  %v4305_v11 = vmul.f32 %v4304_v1, %v4302_v5  ;;  %v4310_v12 = vmul.f32 %v4309_v4, %v4308_v7  ;;  %s3897_s8 = scalar_lea.vmem %s8686_s27, %s7190_s11  ;;  %v3905_v13 = vstv %s9419_s22  ;;  %7916 = vmatprep.mubr.msk.f32.mxu1 %vm774_vm3, %v9227_v49 }
 0x135   : > { %s3899_s5 = ssub.f32 1.0, %s9419_s22  ;;  %v3898_v14 = vld [vmem:[%s3897_s8] sm:$0x3]  ;;  %s3903_s19 = scalar_lea.vmem %s8686_s27, %s7191_s26 }
 0x136   : > { %s7223_s3 = sshll.u32 %s9423_s2, 1  ;;  %v4311_v15 = vadd.f32 %v4310_v12, %v4305_v11  ;;  %v3904_v8 = vld [vmem:[%s3903_s19] sm:$0x3]  ;;  %s7224_s1 = sshll.u32 %s9425_s18, 1 }
 0x137   : > { %v3900_v16 = vstv %s3899_s5  ;;  %s4399_s14 = scalar_lea.vmem %s8686_s27, %s7223_s3  ;;  %v3906_v9 = vmul.f32 %v3905_v13, %v3904_v8  ;;  %s4405_s4 = scalar_lea.vmem %s8686_s27, %s7224_s1 }
 0x138   : > { %v3901_v17 = vmul.f32 %v3900_v16, %v3898_v14  ;;  %7914 = vmatprep.subr.msk.mxu1 %vm781_vm4, %v4311_v15  ;;  %v4400_v18 = vld [vmem:[%s4399_s14] sm:$0x3]  ;;  %s4401_s22 = ssub.f32 1.0, %s9440_s6  ;;  %v4407_v20 = vstv %s9440_s6  ;;  %s3990_s11 = sadd.s32 %s7512_s25, %s9311_s12 }
 0x139   : > { %v4406_v19 = vld [vmem:[%s4405_s4] sm:$0x3]  ;;  %7915 = vmatpush3.msk.msra.mxu1 %vm781_vm4, %v4311_v15  ;;  %s3991_s2 = sld [smem:[#allocation3 + %s3990_s11]]  ;;  %s7522_s15 = sadd.s32 512, %s9341_s17 }
 0x13a   : > { %v9447_v10 = vld [vmem:[%s10347_s7] sm:$0xff]  ;;  %v3907_v21 = vadd.f32 %v3906_v9, %v3901_v17  ;;  %v4408_v63 = vmul.f32 %v4407_v20, %v4406_v19  ;;  %s9469_s18 = sld [smem:[#allocation4 + %s3990_s11]]  ;;  %v4402_v23 = vstv %s4401_s22  ;;  %s4492_s24 = sadd.s32 %s7522_s15, %s9337_s0  ;;  %v9489_v30 = vld [vmem:[%s10347_s7 + $0x8] sm:$0xff] }
 0x13b   : > { %7894 = vmatprep.mubr.msk.f32.mxu0 %vm774_vm3, %v9447_v10  ;;  %s9471_s26 = sld [smem:[#allocation5 + %s3990_s11]]  ;;  %v4403_v24 = vmul.f32 %v4402_v23, %v4400_v18  ;;  %7917 = vmatmul.mubr.msk.f32.vlgmr.msra.gmra.mrb[6].mxu1 %vm774_vm3, %v9436_v6  ;;  %s9509_s4 = sadd.s32 8, %s10335_s29 }
 0x13c   : > { %7892 = vmatprep.subr.msk.mxu0 %vm781_vm4, %v3907_v21  ;;  %s9480_s12 = sld [smem:[#allocation3 + %s4492_s24]]  ;;  %7921 = vmatprep.mubr.msk.f32.mxu1 %vm774_vm3, %v9447_v10  ;;  %p5104_p2 = scmp.gt.s32.totalorder %s9509_s4, 0 }
 0x13d   : > { %7893 = vmatpush3.msk.msra.mxu0 %vm781_vm4, %v3907_v21  ;;  %s9482_s6 = sld [smem:[#allocation4 + %s4492_s24]]  ;;  %v4409_v25 = vadd.f32 %v4408_v63, %v4403_v24  ;;  %p7267_p3 = scmp.lt.s32.totalorder %s9509_s4, 15 }
 0x13e   : > { %7895 = vmatmul.mubr.msk.f32.vlgmr.msra.gmra.mrb[6].mxu0 %vm774_vm3, %v9489_v30  ;;  %s9493_s28 = sld [smem:[#allocation5 + %s4492_s24]] }
 0x13f   : > { %7901 = vmatprep.mubr.msk.f32.mxu0 %vm993_vm5, %v9298_v22  ;;  %s9499_s8 = scalar_select %p4602_p0, %s9309_s30, 0  ;;  %7919 = vmatprep.subr.msk.mxu1 %vm781_vm4, %v4409_v25 }
 0x140   : > { %s7196_s5 = sshll.u32 %s3991_s2, 4  ;;  %s7197_s19 = sshll.u32 %s9469_s18, 4  ;;  %7920 = vmatpush3.msk.msra.mxu1 %vm781_vm4, %v4409_v25 }
 0x141   : > { %s3995_s3 = scalar_lea.vmem %s8765_s20, %s7196_s5  ;;  %s3998_s14 = ssub.f32 1.0, %s9471_s26  ;;  %v4006_v26 = vstv %s9471_s26 }
 0x142   : > { %v3996_v27 = vld [vmem:[%s3995_s3] sm:$0xff]  ;;  %v3997_v28 = vld [vmem:[%s3995_s3 + $0x8] sm:$0xff]  ;;  %s4003_s1 = scalar_lea.vmem %s8765_s20, %s7197_s19  ;;  %s7229_s25 = sshll.u32 %s9480_s12, 4 }
 0x143   : > { %v3999_v29 = vstv %s3998_s14  ;;  %v4004_v33 = vld [vmem:[%s4003_s1] sm:$0xff]  ;;  %v4005_v34 = vld [vmem:[%s4003_s1 + $0x8] sm:$0xff]  ;;  %s7230_s22 = sshll.u32 %s9482_s6, 4  ;;  %s4497_s11 = scalar_lea.vmem %s8765_s20, %s7229_s25  ;;  %7922 = vmatmul.mubr.msk.f32.vlgmr.msra.gmra.mrb[6].mxu1 %vm774_vm3, %v9489_v30 }
 0x144   : > { %v4000_v31 = vmul.f32 %v3999_v29, %v3996_v27  ;;  %v4001_v0 = vmul.f32 %v3999_v29, %v3997_v28  ;;  %v4007_v35 = vmul.f32 %v4006_v26, %v4004_v33  ;;  %v4008_v37 = vmul.f32 %v4006_v26, %v4005_v34  ;;  %s4500_s2 = ssub.f32 1.0, %s9493_s28  ;;  %v4498_v38 = vld [vmem:[%s4497_s11] sm:$0xff]  ;;  %v4499_v39 = vld [vmem:[%s4497_s11 + $0x8] sm:$0xff]  ;;  %s4505_s18 = scalar_lea.vmem %s8765_s20, %s7230_s22  ;;  %7928 = vmatprep.mubr.msk.f32.mxu1 %vm993_vm5, %v9298_v22 }
 0x145   : > { %v4508_v40 = vstv %s9493_s28  ;;  %v4506_v45 = vld [vmem:[%s4505_s18] sm:$0xff]  ;;  %v4507_v46 = vld [vmem:[%s4505_s18 + $0x8] sm:$0xff]  ;;  %s10402_s8 = smov (!%p7234_p1, %s9499_s8), 15 }
 0x146   : > { %v4009_v41 = vadd.f32 %v4007_v35, %v4000_v31  ;;  %v4010_v43 = vadd.f32 %v4008_v37, %v4001_v0  ;;  %v4501_v44 = vstv %s4500_s2  ;;  %v4509_v52 = vmul.f32 %v4508_v40, %v4506_v45  ;;  %s9526_s26 = scalar_select %p5104_p2, %s9509_s4, 0 }
 0x147   : > { %v4502_v50 = vmul.f32 %v4501_v44, %v4498_v38  ;;  %v4503_v51 = vmul.f32 %v4501_v44, %v4499_v39  ;;  %v4510_v53 = vmul.f32 %v4508_v40, %v4507_v46  ;;  %s4621_s15 = sshra.s32 %s10402_s8, 7  ;;  %s9528_s24 = sand.u32 127, %s10402_s8 }
 0x148   : > { %v8033_v54 = vpack.c.bf16 %v4010_v43, %v4009_v41  ;;  %s9530_s12 = sshll.u32 %s4621_s15, 7  ;;  %s4606_s6 = sld [smem:[#allocation3 + %s10402_s8]] }
 0x149   : > { %v4511_v55 = vadd.f32 %v4509_v52, %v4502_v50  ;;  %v4512_v56 = vadd.f32 %v4510_v53, %v4503_v51  ;;  %s7526_s17 = sadd.s32 128, %s9530_s12  ;;  %s4607_s0 = sld [smem:[#allocation4 + %s10402_s8]] }
 0x14a   : > { %8034 = vmatprep.subr.bf16.mxu0 %v8033_v54  ;;  %s4627_s28 = sadd.s32 %s7526_s17, %s9528_s24  ;;  %s9534_s5 = sld [smem:[#allocation5 + %s10402_s8]] }
 0x14b   : > { %8036 = vmatpush3.bf16.msra.mxu0 %v8033_v54  ;;  %v8037_v57 = vpack.c.bf16 %v4512_v56, %v4511_v55  ;;  %s4628_s19 = sld [smem:[#allocation3 + %s4627_s28]]  ;;  %s7528_s1 = sadd.s32 256, %s9530_s12 }
 0x14c   : > { %s9536_s3 = sld [smem:[#allocation4 + %s4627_s28]]  ;;  %s4798_s8 = sadd.s32 %s7528_s1, %s9528_s24 }
 0x14d   : > { %8038 = vmatprep.subr.bf16.mxu1 %v8037_v57  ;;  %s9538_s14 = sld [smem:[#allocation5 + %s4627_s28]]  ;;  %s10404_s26 = smov (!%p7267_p3, %s9526_s26), 15 }
 0x14e   : > { %8040 = vmatpush3.bf16.msra.mxu1 %v8037_v57  ;;  %7902 = vmatmul.mubr.msk.f32.vlgmr.msra.gmra.mrb[6].mxu0 %vm993_vm5, %v9544_v58  ;;  %s7239_s2 = sshll.u32 %s4606_s6, 3  ;;  %s4799_s18 = sld [smem:[#allocation3 + %s4798_s8]] }
 0x14f   : > { %7933 = vmatprep.mubr.msk.f32.mxu0 %vm586_vm0, %v9080_v60  ;;  %s4610_s15 = scalar_lea.vmem %s8605_s21, %s7239_s2  ;;  %s7240_s17 = sshll.u32 %s4607_s0, 3 }
 0x150   : > { %v4611_v59 = vld [vmem:[%s4610_s15] sm:$0xff]  ;;  %s4612_s28 = ssub.f32 1.0, %s9534_s5  ;;  %s4616_s25 = scalar_lea.vmem %s8605_s21, %s7240_s17  ;;  %v4618_v61 = vstv %s9534_s5 }
 0x151   : > { %7929 = vmatmul.mubr.msk.f32.vlgmr.msra.gmra.mrb[6].mxu1 %vm993_vm5, %v9544_v58  ;;  %s7242_s1 = sshll.u32 %s4628_s19, 2  ;;  %v4617_v62 = vld [vmem:[%s4616_s25] sm:$0xff]  ;;  %s4800_s5 = sld [smem:[#allocation4 + %s4798_s8]] }
 0x152   : > { %s7243_s22 = sshll.u32 %s9536_s3, 2  ;;  %7960 = vmatprep.mubr.msk.f32.mxu1 %vm586_vm0, %v9080_v60  ;;  %s4632_s11 = scalar_lea.vmem %s8586_s23, %s7242_s1  ;;  %v4613_v2 = vstv %s4612_s28  ;;  %v4619_v4 = vmul.f32 %v4618_v61, %v4617_v62 }
 0x153   : > { %s4634_s6 = ssub.f32 1.0, %s9538_s14  ;;  %v4640_v47 = vstv %s9538_s14  ;;  %v4633_v3 = vld [vmem:[%s4632_s11] sm:$0xf]  ;;  %s4638_s0 = scalar_lea.vmem %s8586_s23, %s7243_s22  ;;  %v4614_v48 = vmul.f32 %v4613_v2, %v4611_v59  ;;  %v8308_v2 = vld [vmem:[%s10253_s9 + $0x8] sm:$0xff] }
 0x154   : > { %v4639_v1 = vld [vmem:[%s4638_s0] sm:$0xf]  ;;  %s9565_s19 = sld [smem:[#allocation5 + %s4798_s8]]  ;;  %s7250_s3 = sshll.u32 %s4799_s18, 1 }
 0x155   : > { %v4635_v5 = vstv %s4634_s6  ;;  %v4641_v7 = vmul.f32 %v4640_v47, %v4639_v1  ;;  %s4803_s2 = scalar_lea.vmem %s8671_s16, %s7250_s3  ;;  %s10348_s15 = sadd.s32 384, %s9530_s12  ;;  %v4620_v12 = vadd.f32 %v4619_v4, %v4614_v48 }
 0x156   : > { %v4636_v60 = vmul.f32 %v4635_v5, %v4633_v3  ;;  %s4896_s14 = sadd.s32 %s10348_s15, %s9528_s24  ;;  %s7532_s25 = sadd.s32 512, %s9530_s12  ;;  %v4804_v13 = vld [vmem:[%s4803_s2] sm:$0x3] }
 0x157   : > { %s9571_s11 = sld [smem:[#allocation3 + %s4896_s14]]  ;;  %s4994_s8 = sadd.s32 %s7532_s25, %s9528_s24 }
 0x158   : > { %s9573_s17 = sld [smem:[#allocation4 + %s4896_s14]]  ;;  %v4642_v11 = vadd.f32 %v4641_v7, %v4636_v60  ;;  %s7251_s18 = sshll.u32 %s4800_s5, 1 }
 0x159   : > { %s9575_s28 = sld [smem:[#allocation5 + %s4896_s14]]  ;;  %s4809_s6 = scalar_lea.vmem %s8671_s16, %s7251_s18 }
 0x15a   : > { %7931 = vmatprep.subr.msk.mxu0 %vm593_vm1, %v4642_v11  ;;  %s9581_s1 = sld [smem:[#allocation3 + %s4994_s8]]  ;;  %s4805_s22 = ssub.f32 1.0, %s9565_s19  ;;  %v4811_v14 = vstv %s9565_s19  ;;  %v4810_v15 = vld [vmem:[%s4809_s6] sm:$0x3] }
 0x15b   : > { %7932 = vmatpush3.msk.msra.mxu0 %vm593_vm1, %v4642_v11  ;;  %s9589_s24 = sld [smem:[#allocation4 + %s4994_s8]]  ;;  %v4812_v8 = vmul.f32 %v4811_v14, %v4810_v15  ;;  %s5123_s18 = sshra.s32 %s10404_s26, 7 }
 0x15c   : > { %7934 = vmatmul.mubr.msk.f32.vlgmr.msra.gmra.mrb[8].mxu0 %vm586_vm0, %v9178_v32  ;;  %7936 = vmatprep.subr.mxu0 %v4620_v12  ;;  %s9591_s12 = sld [smem:[#allocation5 + %s4994_s8]]  ;;  %v4806_v16 = vstv %s4805_s22  ;;  %s9632_s22 = sshll.u32 %s5123_s18, 7 }
 0x15d   : > { %7937 = vmatpush3.msra.mxu0 %v4620_v12  ;;  %7938 = vmatprep.mubr.msk.f32.mxu0 %vm672_vm2, %v9187_v36  ;;  %s7256_s0 = sshll.u32 %s9571_s11, 1  ;;  %s10349_s19 = sld [smem:[#allocation20_spill]]  ;;  %v4807_v32 = vmul.f32 %v4806_v16, %v4804_v13 }
 0x15e   : > { %s7257_s5 = sshll.u32 %s9573_s17, 1  ;;  %s4901_s3 = scalar_lea.vmem %s8686_s27, %s7256_s0 }
 0x15f   : > { %s4903_s2 = ssub.f32 1.0, %s9575_s28  ;;  %v4909_v17 = vstv %s9575_s28  ;;  %v4902_v9 = vld [vmem:[%s4901_s3] sm:$0x3]  ;;  %s4907_s15 = scalar_lea.vmem %s8686_s27, %s7257_s5  ;;  %v4813_v18 = vadd.f32 %v4812_v8, %v4807_v32 }
 0x160   : > { %v4908_v19 = vld [vmem:[%s4907_s15] sm:$0x3]  ;;  %s7262_s14 = sshll.u32 %s9581_s1, 4  ;;  %s9630_s1 = sand.u32 127, %s10404_s26 }
 0x161   : > { %v4904_v36 = vstv %s4903_s2  ;;  %v4910_v21 = vmul.f32 %v4909_v17, %v4908_v19  ;;  %s4999_s11 = scalar_lea.vmem %s8765_s20, %s7262_s14  ;;  %7941 = vmatprep.subr.msk.mxu0 %vm781_vm4, %v4813_v18  ;;  %s7263_s28 = sshll.u32 %s9589_s24, 4 }
 0x162   : > { %v4905_v20 = vmul.f32 %v4904_v36, %v4902_v9  ;;  %v5000_v63 = vld [vmem:[%s4999_s11] sm:$0xff]  ;;  %v5001_v23 = vld [vmem:[%s4999_s11 + $0x8] sm:$0xff]  ;;  %s5002_s17 = ssub.f32 1.0, %s9591_s12  ;;  %v5010_v24 = vstv %s9591_s12  ;;  %s5007_s25 = scalar_lea.vmem %s8765_s20, %s7263_s28 }
 0x163   : > { %p535_p7 = scmp.ge.s32.totalorder %s10349_s19, 0  ;;  %v5008_v27 = vld [vmem:[%s5007_s25] sm:$0xff]  ;;  %v5009_v28 = vld [vmem:[%s5007_s25 + $0x8] sm:$0xff]  ;;  %s5108_s6 = sld [smem:[#allocation3 + %s10404_s26]] }
 0x164   : > { %v4911_v25 = vadd.f32 %v4910_v21, %v4905_v20  ;;  %7939 = vmatmul.mubr.msk.f32.vlgmr.msra.gmra.mrb[8].mxu0 %vm672_vm2, %v9216_v42  ;;  %v5003_v26 = vstv %s5002_s17  ;;  %v5011_v34 = vmul.f32 %v5010_v24, %v5008_v27  ;;  %v5012_v31 = vmul.f32 %v5010_v24, %v5009_v28  ;;  %s7536_s24 = sadd.s32 128, %s9632_s22  ;;  %s5109_s12 = sld [smem:[#allocation4 + %s10404_s26]] }
 0x165   : > { %7942 = vmatpush3.msk.msra.mxu0 %vm781_vm4, %v4813_v18  ;;  %7943 = vmatprep.mubr.msk.f32.mxu0 %vm774_vm3, %v9227_v49  ;;  %v5004_v29 = vmul.f32 %v5003_v26, %v5000_v63  ;;  %v5005_v33 = vmul.f32 %v5003_v26, %v5001_v23  ;;  %s5129_s0 = sadd.s32 %s7536_s24, %s9630_s1  ;;  %s9636_s5 = sld [smem:[#allocation5 + %s10404_s26]] }
 0x166   : > { %7946 = vmatprep.subr.msk.mxu0 %vm781_vm4, %v4911_v25  ;;  %s5130_s3 = sld [smem:[#allocation3 + %s5129_s0]]  ;;  %s7538_s14 = sadd.s32 256, %s9632_s22 }
 0x167   : > { %v5013_v42 = vadd.f32 %v5011_v34, %v5004_v29  ;;  %v5014_v49 = vadd.f32 %v5012_v31, %v5005_v33  ;;  %s5131_s2 = sld [smem:[#allocation4 + %s5129_s0]]  ;;  %s5300_s11 = sadd.s32 %s7538_s14, %s9630_s1 }
 0x168   : > { %s9638_s15 = sld [smem:[#allocation5 + %s5129_s0]]  ;;  %v9663_v50 = vpop.f32.mrb[0].mxu0  ;;  %p536_p9 = scmp.lt.s32.totalorder %s10349_s19, 16 }
 0x169   : > { %v8041_v0 = vpack.c.bf16 %v5014_v49, %v5013_v42  ;;  %s7272_s26 = sshll.u32 %s5108_s6, 3  ;;  %s9648_s28 = sld [smem:[#allocation3 + %s5300_s11]]  ;;  %v9671_v53 = vpop.f32.mrb[1].mxu0  ;;  %v1078_v49 = vmax.f32 %v9663_v50, 0.0 }
 0x16a   : > { %s5112_s25 = scalar_lea.vmem %s8605_s21, %s7272_s26  ;;  %s7273_s18 = sshll.u32 %s5109_s12, 3 }
 0x16b   : > { %v5113_v35 = vld [vmem:[%s5112_s25] sm:$0xff]  ;;  %s5114_s24 = ssub.f32 1.0, %s9636_s5  ;;  %s5118_s0 = scalar_lea.vmem %s8605_s21, %s7273_s18  ;;  %v5120_v37 = vstv %s9636_s5 }
 0x16c   : > { %7944 = vmatmul.mubr.msk.f32.vlgmr.msra.gmra.mrb[8].mxu0 %vm774_vm3, %v9436_v6  ;;  %s7275_s14 = sshll.u32 %s5130_s3, 2  ;;  %v5119_v38 = vld [vmem:[%s5118_s0] sm:$0xff]  ;;  %s9658_s12 = sld [smem:[#allocation4 + %s5300_s11]]  ;;  %v7768_v56 = vpop.f32.mrb[0].mxu1 }
 0x16d   : > { %7947 = vmatpush3.msk.msra.mxu0 %vm781_vm4, %v4911_v25  ;;  %7948 = vmatprep.mubr.msk.f32.mxu0 %vm774_vm3, %v9447_v10  ;;  %s7276_s29 = sshll.u32 %s5131_s2, 2  ;;  %s5134_s17 = scalar_lea.vmem %s8586_s23, %s7275_s14  ;;  %v5115_v40 = vstv %s5114_s24  ;;  %v5121_v44 = vmul.f32 %v5120_v37, %v5119_v38  ;;  %v1579_v57 = vmax.f32 %v7768_v56, 0.0  ;;  %v1567_v59 = vpop.f32.mrb[1].mxu1 }
 0x16e   : > { %8042 = vmatprep.subr.bf16.mxu0 %v8041_v0  ;;  %s5136_s7 = ssub.f32 1.0, %s9638_s15  ;;  %v5142_v39 = vstv %s9638_s15  ;;  %v5135_v41 = vld [vmem:[%s5134_s17] sm:$0xf]  ;;  %s5140_s6 = scalar_lea.vmem %s8586_s23, %s7276_s29  ;;  %v5116_v43 = vmul.f32 %v5115_v40, %v5113_v35  ;;  %v1077_v40 = vmax.f32 %v9671_v53, 0.0 }
 0x16f   : > { %v5141_v46 = vld [vmem:[%s5140_s6] sm:$0xf]  ;;  %s9660_s21 = sld [smem:[#allocation5 + %s5300_s11]]  ;;  %s7283_s5 = sshll.u32 %s9648_s28, 1 }
 0x170   : > { %v5137_v45 = vstv %s5136_s7  ;;  %v5143_v52 = vmul.f32 %v5142_v39, %v5141_v46  ;;  %s5305_s23 = scalar_lea.vmem %s8671_s16, %s7283_s5  ;;  %s10351_s29 = sadd.s32 384, %s9632_s22  ;;  %v5122_v55 = vadd.f32 %v5121_v44, %v5116_v43  ;;  %v8311_v35 = vld [vmem:[%s10343_s13] sm:$0xff] }
 0x171   : > { %v5138_v51 = vmul.f32 %v5137_v45, %v5135_v41  ;;  %s5398_s3 = sadd.s32 %s10351_s29, %s9630_s1  ;;  %s7542_s11 = sadd.s32 512, %s9632_s22  ;;  %v5306_v61 = vld [vmem:[%s5305_s23] sm:$0x3] }
 0x172   : > { %s9675_s7 = sld [smem:[#allocation3 + %s5398_s3]]  ;;  %s5496_s17 = sadd.s32 %s7542_s11, %s9630_s1 }
 0x173   : > { %s9677_s2 = sld [smem:[#allocation4 + %s5398_s3]]  ;;  %v5144_v54 = vadd.f32 %v5143_v52, %v5138_v51  ;;  %s7284_s25 = sshll.u32 %s9658_s12, 1 }
 0x174   : > { %7949 = vmatmul.mubr.msk.f32.vlgmr.msra.gmra.mrb[8].mxu0 %vm774_vm3, %v9489_v30  ;;  %s9679_s15 = sld [smem:[#allocation5 + %s5398_s3]]  ;;  %s5311_s0 = scalar_lea.vmem %s8671_s16, %s7284_s25 }
 0x175   : > { %8044 = vmatpush3.bf16.msra.mxu0 %v8041_v0  ;;  %7955 = vmatprep.mubr.msk.f32.mxu0 %vm993_vm5, %v9298_v22  ;;  %s10352_s26 = scalar_select %p9615_p8, 0, 1  ;;  %v1578_v22 = vmax.f32 %v1567_v59, 0.0  ;;  %v5313_v62 = vstv %s9660_s21  ;;  %v5312_v3 = vld [vmem:[%s5311_s0] sm:$0x3] }
 0x176   : > { %7958 = vmatprep.subr.msk.mxu1 %vm593_vm1, %v5144_v54  ;;  %s9688_s18 = sld [smem:[#allocation3 + %s5496_s17]]  ;;  %s5307_s24 = ssub.f32 1.0, %s9660_s21  ;;  %v5314_v60 = vmul.f32 %v5313_v62, %v5312_v3 }
 0x177   : > { %s1087_s28 = scvt.s32.f32 %s10352_s26  ;;  %7959 = vmatpush3.msk.msra.mxu1 %vm593_vm1, %v5144_v54  ;;  %s9698_s22 = sld [smem:[#allocation4 + %s5496_s17]] }
 0x178   : > { %7961 = vmatmul.mubr.msk.f32.vlgmr.msra.gmra.mrb[8].mxu1 %vm586_vm0, %v8308_v2  ;;  %7963 = vmatprep.subr.mxu1 %v5122_v55  ;;  %s9700_s14 = sld [smem:[#allocation5 + %s5496_s17]]  ;;  %v5308_v1 = vstv %s5307_s24  ;;  %s7289_s21 = sshll.u32 %s9675_s7, 1 }
 0x179   : > { %v1580_v47 = vstv %s1087_s28  ;;  %7964 = vmatpush3.msra.mxu1 %v5122_v55  ;;  %s10353_s12 = sld [smem:[#allocation32_spill]]  ;;  %s7290_s5 = sshll.u32 %s9677_s2, 1  ;;  %v5309_v7 = vmul.f32 %v5308_v1, %v5306_v61 }
 0x17a   : > { %v1582_v48 = vmul.f32 %v1580_v47, %v1579_v57  ;;  %v1581_v4 = vmul.f32 %v1580_v47, %v1578_v22  ;;  %s5403_s23 = scalar_lea.vmem %s8686_s27, %s7289_s21  ;;  %s5405_s29 = ssub.f32 1.0, %s9679_s15  ;;  %v5411_v11 = vstv %s9679_s15 }
 0x17b   : > { %v5404_v14 = vld [vmem:[%s5403_s23] sm:$0x3]  ;;  %s5409_s3 = scalar_lea.vmem %s8686_s27, %s7290_s5  ;;  %v5315_v15 = vadd.f32 %v5314_v60, %v5309_v7  ;;  %p9723_p10 = pnand %p536_p9, %p535_p7 }
 0x17c   : > { %7956 = vmatmul.mubr.msk.f32.vlgmr.msra.gmra.mrb[8].mxu0 %vm993_vm5, %v9544_v58  ;;  %v5624_v12 = vrot.slane %v1582_v48, 7  ;;  %v5623_v13 = vrot.slane %v1581_v4, 7  ;;  %v5406_v16 = vstv %s5405_s29  ;;  %v5410_v8 = vld [vmem:[%s5409_s3] sm:$0x3]  ;;  %s7295_s7 = sshll.u32 %s9688_s18, 4  ;;  %s10355_s13 = sld [smem:[#allocation19_spill]] }
 0x17d   : > { %v5407_v9 = vmul.f32 %v5406_v16, %v5404_v14  ;;  %v5412_v18 = vmul.f32 %v5411_v11, %v5410_v8  ;;  %s5501_s2 = scalar_lea.vmem %s8765_s20, %s7295_s7  ;;  %7968 = vmatprep.subr.msk.mxu1 %vm781_vm4, %v5315_v15  ;;  %s7296_s11 = sshll.u32 %s9698_s22, 4 }
 0x17e   : > { %v5691_v32 = vsel %vm5619_vm6, %v5624_v12, 0.0  ;;  %v5625_v17 = vsel %vm5619_vm6, %v5623_v13, %v5624_v12  ;;  %v5502_v20 = vld [vmem:[%s5501_s2] sm:$0xff]  ;;  %v5503_v21 = vld [vmem:[%s5501_s2 + $0x8] sm:$0xff]  ;;  %s5504_s15 = ssub.f32 1.0, %s9700_s14  ;;  %v5512_v63 = vstv %s9700_s14  ;;  %v5681_v23 = vsel %vm5619_vm6, 0.0, %v5623_v13  ;;  %s5509_s17 = scalar_lea.vmem %s8765_s20, %s7296_s11 }
 0x17f   : > { %v8309_v5 = vld [vmem:[%s10353_s12] sm:$0xff]  ;;  %v5725_v36 = vrot.slane %v5691_v32, 1  ;;  %v5782_v19 = vrot.slane %v5691_v32, 2  ;;  %v5723_v24 = vrot.slane %v5625_v17, 1  ;;  %v9732_v25 = vpack.c.bf16 %v5625_v17, %v5623_v13  ;;  %v8310_v33 = vld [vmem:[%s10353_s12 + $0x8] sm:$0xff]  ;;  %s10356_s24 = sld [smem:[#allocation22_spill]] }
 0x180   : > { %7965 = vmatprep.mubr.msk.f32.mxu1 %vm672_vm2, %v8309_v5  ;;  %v5413_v26 = vadd.f32 %v5412_v18, %v5407_v9  ;;  %v5722_v27 = vrot.slane %v5681_v23, 1  ;;  %v5779_v28 = vrot.slane %v5681_v23, 2  ;;  %v5780_v29 = vrot.slane %v5625_v17, 2  ;;  %v5510_v31 = vld [vmem:[%s5509_s17] sm:$0xff]  ;;  %v5511_v42 = vld [vmem:[%s5509_s17 + $0x8] sm:$0xff]  ;;  %s10359_s6 = sld [smem:[#allocation23_spill]] }
 0x181   : > { %7966 = vmatmul.mubr.msk.f32.vlgmr.msra.gmra.mrb[8].mxu1 %vm672_vm2, %v8310_v33  ;;  %v5505_v34 = vstv %s5504_s15  ;;  %s6969_s28 = scalar_select %p9723_p10, 0, 1  ;;  %v5726_v0 = vsel %vm5716_vm8, %v5723_v24, %v5725_v36  ;;  %v5513_v39 = vmul.f32 %v5512_v63, %v5510_v31  ;;  %v5514_v41 = vmul.f32 %v5512_v63, %v5511_v42  ;;  %v8312_v13 = vld [vmem:[%s10346_s10] sm:$0xff] }
 0x182   : > { %7969 = vmatpush3.msk.msra.mxu1 %vm781_vm4, %v5315_v15  ;;  %7970 = vmatprep.mubr.msk.f32.mxu1 %vm774_vm3, %v8311_v35  ;;  %v5506_v37 = vmul.f32 %v5505_v34, %v5502_v20  ;;  %v5507_v38 = vmul.f32 %v5505_v34, %v5503_v21  ;;  %v5781_v43 = vsel %vm5773_vm7, %v5779_v28, %v5780_v29  ;;  %p1584_p11 = scmp.ge.s32.totalorder %s10355_s13, 0  ;;  %p1585_p12 = scmp.lt.s32.totalorder %s10355_s13, 16 }
 0x183   : > { %7973 = vmatprep.subr.msk.mxu1 %vm781_vm4, %v5413_v26  ;;  %s540_s18 = scvt.s32.f32 %s6969_s28  ;;  %v5783_v44 = vsel %vm5773_vm7, %v5780_v29, %v5782_v19  ;;  %v5724_v45 = vsel %vm5716_vm8, %v5722_v27, %v5723_v24  ;;  %s10360_s12 = sld [smem:[#allocation24_spill]] }
 0x184   : > { %v5515_v46 = vadd.f32 %v5513_v39, %v5506_v37  ;;  %v9753_v50 = vpack.c.bf16 %v5783_v44, %v5781_v43  ;;  %v5866_v51 = vpack.c.bf16 %v5726_v0, %v5724_v45  ;;  %v5516_v52 = vadd.f32 %v5514_v41, %v5507_v38  ;;  %p1586_p13 = pnand %p1585_p12, %p1584_p11  ;;  %s10361_s23 = sld [smem:[#allocation36_spill]] }
 0x185   : > { %v1079_v54 = vstv %s540_s18  ;;  %p2086_p0 = scmp.ge.s32.totalorder %s10356_s24, 0  ;;  %p2087_p1 = scmp.lt.s32.totalorder %s10356_s24, 16 }
 0x186   : > { %v1081_v55 = vmul.f32 %v1079_v54, %v1078_v49  ;;  %v1080_v56 = vmul.f32 %v1079_v54, %v1077_v40  ;;  %6246 = vmatprep.subr.bf16.mxu0 %v9753_v50  ;;  %v8045_v53 = vpack.c.bf16 %v5516_v52, %v5515_v46  ;;  %s7035_s1 = scalar_select %p1586_p13, 0, 1 }
 0x187   : > { %6247 = vmatpush1.bf16.xpose.msra.mxu0 %v5866_v51  ;;  %p2088_p2 = pnand %p2087_p1, %p2086_p0  ;;  %p2588_p3 = scmp.ge.s32.totalorder %s10359_s6, 0 }
 0x188   : > { %v5621_v57 = vrot.slane %v1081_v55, 7  ;;  %v5620_v59 = vrot.slane %v1080_v56, 7  ;;  %s1589_s22 = scvt.s32.f32 %s7035_s1  ;;  %p2589_p4 = scmp.lt.s32.totalorder %s10359_s6, 16 }
 0x189   : > { %7971 = vmatmul.mubr.msk.f32.vlgmr.msra.gmra.mrb[8].mxu1 %vm774_vm3, %v9436_v6  ;;  %s7068_s14 = scalar_select %p2088_p2, 0, 1 }
 0x18a   : > { %7974 = vmatpush3.msk.msra.mxu1 %vm781_vm4, %v5413_v26  ;;  %7975 = vmatprep.mubr.msk.f32.mxu1 %vm774_vm3, %v9447_v10  ;;  %v5690_v22 = vsel %vm5619_vm6, %v5621_v57, 0.0  ;;  %v5622_v61 = vsel %vm5619_vm6, %v5620_v59, %v5621_v57  ;;  %v5680_v62 = vsel %vm5619_vm6, 0.0, %v5620_v59  ;;  %v2082_v15 = vstv %s1589_s22  ;;  %p3090_p5 = scmp.ge.s32.totalorder %s10360_s12, 0  ;;  %p3091_p7 = scmp.lt.s32.totalorder %s10360_s12, 16  ;;  %v8287_v14 = vld [vmem:[%s10361_s23 + $0x60] ss:$36 sps:$4 sm:$0xff]  }
 0x18b   : > { %8046 = vmatprep.subr.bf16.mxu1 %v8045_v53  ;;  %v5720_v47 = vrot.slane %v5690_v22, 1  ;;  %v5777_v2 = vrot.slane %v5690_v22, 2  ;;  %v5717_v3 = vrot.slane %v5680_v62, 1  ;;  %v5774_v48 = vrot.slane %v5680_v62, 2  ;;  %s2091_s16 = scvt.s32.f32 %s7068_s14  ;;  %v8248_v22 = vld [vmem:[%s10361_s23 + $0x4] ss:$36 sps:$4 sm:$0xff]   ;;  %p2590_p8 = pnand %p2589_p4, %p2588_p3 }
 0x18c   : > { %v5775_v4 = vrot.slane %v5622_v61, 2  ;;  %v7337_v5 = vpack.c.bf16 %v5622_v61, %v5620_v59  ;;  %v5718_v1 = vrot.slane %v5622_v61, 1  ;;  %p3092_p9 = pnand %p3091_p7, %p3090_p5  ;;  %s10362_s11 = sld [smem:[#allocation25_spill]] }
 0x18d   : > { %v2584_v36 = vstv %s2091_s16  ;;  %s7101_s29 = scalar_select %p2590_p8, 0, 1 }
 0x18e   : > { %v5719_v6 = vsel %vm5716_vm8, %v5717_v3, %v5718_v1  ;;  %v5721_v10 = vsel %vm5716_vm8, %v5718_v1, %v5720_v47  ;;  %v9767_v60 = vsel %vm5773_vm7, %v5774_v48, %v5775_v4  ;;  %v9770_v11 = vsel %vm5773_vm7, %v5775_v4, %v5777_v2  ;;  %v8251_v4 = vld [vmem:[%s10361_s23 + $0x14] ss:$36 sps:$4 sm:$0xff]   ;;  %s7134_s2 = scalar_select %p3092_p9, 0, 1 }
 0x18f   : > { %v5863_v7 = vpack.c.bf16 %v5721_v10, %v5719_v6  ;;  %v5864_v12 = vpack.c.bf16 %v9770_v11, %v9767_v60  ;;  %6278 = vmatprep.mubr.bf16.mxu0 %v8251_v4  ;;  %s2593_s27 = scvt.s32.f32 %s7101_s29  ;;  %s10363_s17 = sld [smem:[#allocation26_spill]]  ;;  %v8257_v60 = vld [vmem:[%s10361_s23 + $0x90] ss:$36 sps:$4 sm:$0xff]   ;;  %v8258_v11 = vld [vmem:[%s10361_s23 + $0xdc] ss:$36 sps:$4 sm:$0xff]  }
 0x190   : > { %s3095_s15 = scvt.s32.f32 %s7134_s2  ;;  %p4596_p2 = scmp.ge.s32.totalorder %s9309_s30, 0 }
 0x191   : > { %7976 = vmatmul.mubr.msk.f32.vlgmr.msra.gmra.mrb[8].mxu1 %vm774_vm3, %v9489_v30  ;;  %v3086_v1 = vstv %s2593_s27  ;;  %p4597_p3 = scmp.lt.s32.totalorder %s9309_s30, 16  ;;  %p5098_p5 = scmp.ge.s32.totalorder %s9509_s4, 0 }
 0x192   : > { %8048 = vmatpush3.bf16.msra.mxu1 %v8045_v53  ;;  %7982 = vmatprep.mubr.msk.f32.mxu1 %vm993_vm5, %v8312_v13  ;;  %p3592_p10 = scmp.ge.s32.totalorder %s10362_s11, 0  ;;  %p3593_p11 = scmp.lt.s32.totalorder %s10362_s11, 16 }
 0x193   : > { %6116 = vmatprep.subr.bf16.mxu1 %v5863_v7  ;;  %p4598_p4 = pnand %p4597_p3, %p4596_p2  ;;  %p5099_p7 = scmp.lt.s32.totalorder %s9509_s4, 16 }
 0x194   : > { %p3594_p0 = pnand %p3593_p11, %p3592_p10  ;;  %s10364_s3 = sld [smem:[#allocation8_spill]] }
 0x195   : > { %p4094_p12 = scmp.ge.s32.totalorder %s10363_s17, 0  ;;  %p4095_p13 = scmp.lt.s32.totalorder %s10363_s17, 16 }
 0x196   : > { %s7167_s19 = scalar_select %p3594_p0, 0, 1 }
 0x197   : > { %p4096_p1 = pnand %p4095_p13, %p4094_p12  ;;  %p5100_p8 = pnand %p5099_p7, %p5098_p5 }
 0x198   : > { %s3597_s28 = scvt.s32.f32 %s7167_s19 }
 0x199   : > { %7983 = vmatmul.mubr.msk.f32.vlgmr.msra.gmra.mrb[8].mxu1 %vm993_vm5, %v9544_v58  ;;  %s7200_s26 = scalar_select %p4096_p1, 0, 1 }
 0x19a   : > { %6148 = vmatprep.mubr.bf16.mxu1 %v8248_v22  ;;  %v4090_v4 = vstv %s3597_s28  ;;  %s7233_s30 = scalar_select %p4598_p4, 0, 1 }
 0x19b   : > { %7338 = vmatpush1.bf16.xpose.msk.msra.mxu1 %vm9781_vm11, %v7337_v5  ;;  %s4099_s20 = scvt.s32.f32 %s7200_s26  ;;  %s492_s7 = sand.u32 1, %s10364_s3  }
 0x19c   : > { %6118 = vmatprep.subr.bf16.mxu1 %v5866_v51  ;;  %s4601_s14 = scvt.s32.f32 %s7233_s30  ;;  %s6955_s2 = sshll.u32 %s492_s7, 6 }
 0x19d   : > { %s7266_s4 = scalar_select %p5100_p8, 0, 1 }
 0x19e   : > { %s10151_s27 = scalar_lea.vmem [#allocation6], %s6955_s2 }
 0x19f   : > { %s5103_s17 = scvt.s32.f32 %s7266_s4 }
 0x1a1   : > { %v7795_v30 = vpop.f32.mrb[2].mxu0 }
 0x1a2   : > { %v2081_v58 = vmax.f32 %v7795_v30, 0.0  ;;  %v2069_v16 = vpop.f32.mrb[3].mxu0  ;;  %v3588_v30 = vstv %s3095_s15  ;;  %s10365_s15 = sld [smem:[#allocation10_spill]] }
 0x1a3   : > { %7342 = vmatpush1.bf16.xpose.msk.msra.mxu1 %vm9781_vm11, %v9732_v25  ;;  %v2080_v8 = vmax.f32 %v2069_v16, 0.0 }
 0x1a4   : > { %v2084_v32 = vmul.f32 %v2082_v15, %v2081_v58 }
 0x1a5   : > { %v2083_v17 = vmul.f32 %v2082_v15, %v2080_v8 }
 0x1a6   : > { %v5627_v9 = vrot.slane %v2084_v32, 7 }
 0x1a7   : > { %v5626_v18 = vrot.slane %v2083_v17, 7 }
 0x1a8   : > { %v5692_v19 = vsel %vm5619_vm6, %v5627_v9, 0.0  ;;  %p7431_p9 = scmp.ne.s32.totalorder %s10365_s15, 0 }
 0x1a9   : > { %v5730_v21 = vrot.slane %v5692_v19, 1  ;;  %v5787_v63 = vrot.slane %v5692_v19, 2  ;;  %v5628_v23 = vsel %vm5619_vm6, %v5626_v18, %v5627_v9  ;;  %v5682_v24 = vsel %vm5619_vm6, 0.0, %v5626_v18  ;;  %s10366_s11 = sld [smem:[#allocation21_spill]] (!%p7431_p9) }
 0x1aa   : > { %v7822_v20 = vpop.f32.mrb[2].mxu1  ;;  %v5727_v28 = vrot.slane %v5682_v24, 1  ;;  %v5784_v29 = vrot.slane %v5682_v24, 2  ;;  %v5785_v33 = vrot.slane %v5628_v23, 2  ;;  %v9799_v31 = vpack.c.bf16 %v5628_v23, %v5626_v18 }
 0x1ab   : > { %v2583_v26 = vmax.f32 %v7822_v20, 0.0  ;;  %v2571_v27 = vpop.f32.mrb[3].mxu1  ;;  %v5728_v42 = vrot.slane %v5628_v23, 1 }
 0x1ac   : > { %v2582_v34 = vmax.f32 %v2571_v27, 0.0  ;;  %v5786_v0 = vsel %vm5773_vm7, %v5784_v29, %v5785_v33  ;;  %v5788_v35 = vsel %vm5773_vm7, %v5785_v33, %v5787_v63 }
 0x1ad   : > { %v2586_v49 = vmul.f32 %v2584_v36, %v2583_v26  ;;  %v9803_v38 = vpack.c.bf16 %v5788_v35, %v5786_v0  ;;  %v5729_v39 = vsel %vm5716_vm8, %v5727_v28, %v5728_v42  ;;  %v5731_v40 = vsel %vm5716_vm8, %v5728_v42, %v5730_v21 }
 0x1ae   : > { %v2585_v37 = vmul.f32 %v2584_v36, %v2582_v34  ;;  %v9807_v43 = vpack.c.bf16 %v5731_v40, %v5729_v39 }
 0x1af   : > { %v5630_v41 = vrot.slane %v2586_v49, 7  ;;  %6248 = vmatprep.subr.bf16.mxu0 %v9803_v38 }
 0x1b0   : > { %v5629_v44 = vrot.slane %v2585_v37, 7  ;;  %6120 = vmatprep.subr.bf16.mxu1 %v9807_v43  ;;  %6249 = vmatpush1.bf16.xpose.msra.mxu0 %v9807_v43 }
 0x1b1   : > { %v5693_v45 = vsel %vm5619_vm6, %v5630_v41, 0.0  ;;  %7346 = vmatpush1.bf16.xpose.msk.msra.mxu1 %vm9781_vm11, %v9799_v31 }
 0x1b2   : > { %v5735_v46 = vrot.slane %v5693_v45, 1  ;;  %v5792_v51 = vrot.slane %v5693_v45, 2  ;;  %v5631_v52 = vsel %vm5619_vm6, %v5629_v44, %v5630_v41  ;;  %v5683_v54 = vsel %vm5619_vm6, 0.0, %v5629_v44 }
 0x1b3   : > { %v5732_v55 = vrot.slane %v5683_v54, 1  ;;  %v5789_v56 = vrot.slane %v5683_v54, 2  ;;  %v5790_v53 = vrot.slane %v5631_v52, 2  ;;  %v9818_v57 = vpack.c.bf16 %v5631_v52, %v5629_v44 }
 0x1b4   : > { %v5733_v59 = vrot.slane %v5631_v52, 1 }
 0x1b5   : > { %v5791_v61 = vsel %vm5773_vm7, %v5789_v56, %v5790_v53  ;;  %v5793_v62 = vsel %vm5773_vm7, %v5790_v53, %v5792_v51 }
 0x1b6   : > { %v9825_v47 = vpack.c.bf16 %v5793_v62, %v5791_v61  ;;  %v5734_v2 = vsel %vm5716_vm8, %v5732_v55, %v5733_v59  ;;  %v5736_v3 = vsel %vm5716_vm8, %v5733_v59, %v5735_v46 }
 0x1b7   : > { %v9829_v48 = vpack.c.bf16 %v5736_v3, %v5734_v2 }
 0x1b8   : > { %6250 = vmatprep.subr.bf16.mxu0 %v9825_v47 }
 0x1b9   : > { %6122 = vmatprep.subr.bf16.mxu1 %v9829_v48  ;;  %6251 = vmatpush1.bf16.xpose.msra.mxu0 %v9829_v48 }
 0x1ba   : > { %7350 = vmatpush1.bf16.xpose.msk.msra.mxu1 %vm9781_vm11, %v9818_v57 }
 0x1e4   : > { %v7849_v5 = vpop.f32.mrb[4].mxu0 }
 0x1e5   : > { %v3085_v6 = vmax.f32 %v7849_v5, 0.0  ;;  %v3073_v10 = vpop.f32.mrb[5].mxu0 }
 0x1e6   : > { %v3084_v7 = vmax.f32 %v3073_v10, 0.0  ;;  %v7876_v13 = vpop.f32.mrb[4].mxu1 }
 0x1e7   : > { %v3088_v15 = vmul.f32 %v3086_v1, %v3085_v6  ;;  %v3587_v58 = vmax.f32 %v7876_v13, 0.0  ;;  %v3575_v16 = vpop.f32.mrb[5].mxu1 }
 0x1e8   : > { %v3087_v8 = vmul.f32 %v3086_v1, %v3084_v7  ;;  %v3586_v17 = vmax.f32 %v3575_v16, 0.0  ;;  %v4592_v7 = vstv %s4099_s20 }
 0x1e9   : > { %v5633_v32 = vrot.slane %v3088_v15, 7  ;;  %v3590_v9 = vmul.f32 %v3588_v30, %v3587_v58 }
 0x1ea   : > { %v5632_v18 = vrot.slane %v3087_v8, 7  ;;  %v3589_v19 = vmul.f32 %v3588_v30, %v3586_v17 }
 0x1eb   : > { %v5694_v36 = vsel %vm5619_vm6, %v5633_v32, 0.0  ;;  %v5636_v20 = vrot.slane %v3590_v9, 7 }
 0x1ec   : > { %v5740_v21 = vrot.slane %v5694_v36, 1  ;;  %v5797_v63 = vrot.slane %v5694_v36, 2  ;;  %v5634_v23 = vsel %vm5619_vm6, %v5632_v18, %v5633_v32  ;;  %v5635_v24 = vrot.slane %v3589_v19, 7 }
 0x1ed   : > { %v5684_v26 = vsel %vm5619_vm6, 0.0, %v5632_v18  ;;  %v5795_v27 = vrot.slane %v5634_v23, 2  ;;  %v9847_v28 = vpack.c.bf16 %v5634_v23, %v5632_v18  ;;  %v5695_v29 = vsel %vm5619_vm6, %v5636_v20, 0.0 }
 0x1ee   : > { %v5737_v33 = vrot.slane %v5684_v26, 1  ;;  %v5794_v34 = vrot.slane %v5684_v26, 2  ;;  %v5738_v42 = vrot.slane %v5634_v23, 1  ;;  %v5745_v49 = vrot.slane %v5695_v29, 1 }
 0x1ef   : > { %v5802_v0 = vrot.slane %v5695_v29, 2  ;;  %v5637_v35 = vsel %vm5619_vm6, %v5635_v24, %v5636_v20  ;;  %v5685_v37 = vsel %vm5619_vm6, 0.0, %v5635_v24  ;;  %v5798_v46 = vsel %vm5773_vm7, %v5795_v27, %v5797_v63 }
 0x1f0   : > { %v5742_v39 = vrot.slane %v5685_v37, 1  ;;  %v5799_v40 = vrot.slane %v5685_v37, 2  ;;  %v5800_v41 = vrot.slane %v5637_v35, 2  ;;  %v9852_v44 = vpack.c.bf16 %v5637_v35, %v5635_v24 }
 0x1f1   : > { %v5796_v45 = vsel %vm5773_vm7, %v5794_v34, %v5795_v27  ;;  %v5739_v51 = vsel %vm5716_vm8, %v5737_v33, %v5738_v42  ;;  %v5741_v52 = vsel %vm5716_vm8, %v5738_v42, %v5740_v21  ;;  %v5743_v22 = vrot.slane %v5637_v35, 1 }
 0x1f2   : > { %v5801_v54 = vsel %vm5773_vm7, %v5799_v40, %v5800_v41  ;;  %v5803_v55 = vsel %vm5773_vm7, %v5800_v41, %v5802_v0  ;;  %v9860_v56 = vpack.c.bf16 %v5798_v46, %v5796_v45  ;;  %v9862_v53 = vpack.c.bf16 %v5741_v52, %v5739_v51 }
 0x1f3   : > { %v9864_v59 = vpack.c.bf16 %v5803_v55, %v5801_v54  ;;  %v5744_v61 = vsel %vm5716_vm8, %v5742_v39, %v5743_v22  ;;  %v5746_v62 = vsel %vm5716_vm8, %v5743_v22, %v5745_v49 }
 0x1f4   : > { %6124 = vmatprep.subr.bf16.mxu1 %v9862_v53  ;;  %6252 = vmatprep.subr.bf16.mxu0 %v9860_v56  ;;  %v9874_v2 = vpack.c.bf16 %v5746_v62, %v5744_v61 }
 0x1f5   : > { %7354 = vmatpush1.bf16.xpose.msk.msra.mxu1 %vm9781_vm11, %v9847_v28  ;;  %6253 = vmatpush1.bf16.xpose.msra.mxu0 %v9862_v53 }
 0x1f6   : > { %6254 = vmatprep.subr.bf16.mxu0 %v9864_v59  ;;  %6126 = vmatprep.subr.bf16.mxu1 %v9874_v2 }
 0x1fd   : > { %7358 = vmatpush1.bf16.xpose.msk.msra.mxu1 %vm9781_vm11, %v9852_v44  ;;  %6255 = vmatpush1.bf16.xpose.msra.mxu0 %v9874_v2 }
 0x221   : > { %v7903_v3 = vpop.f32.mrb[6].mxu0 }
 0x222   : > { %v4089_v5 = vmax.f32 %v7903_v3, 0.0  ;;  %v4077_v1 = vpop.f32.mrb[7].mxu0 }
 0x223   : > { %v4088_v6 = vmax.f32 %v4077_v1, 0.0 }
 0x224   : > { %v7930_v10 = vpop.f32.mrb[6].mxu1  ;;  %v4092_v13 = vmul.f32 %v4090_v4, %v4089_v5 }
 0x225   : > { %v4591_v30 = vmax.f32 %v7930_v10, 0.0  ;;  %v4579_v15 = vpop.f32.mrb[7].mxu1  ;;  %v4091_v58 = vmul.f32 %v4090_v4, %v4088_v6  ;;  %v8246_v6 = vld [vmem:[%s10361_s23] ss:$36 sps:$4 sm:$0xff]   ;;  %v8252_v10 = vld [vmem:[%s10361_s23 + $0x4c] ss:$36 sps:$4 sm:$0xff]  }
 0x226   : > { %v5639_v16 = vrot.slane %v4092_v13, 7  ;;  %v4590_v8 = vmax.f32 %v4579_v15, 0.0  ;;  %v5094_v13 = vstv %s4601_s14 }
 0x227   : > { %v4594_v32 = vmul.f32 %v4592_v7, %v4591_v30  ;;  %v5638_v17 = vrot.slane %v4091_v58, 7 }
 0x228   : > { %v5696_v9 = vsel %vm5619_vm6, %v5639_v16, 0.0  ;;  %v4593_v18 = vmul.f32 %v4592_v7, %v4590_v8  ;;  %v8255_v7 = vld [vmem:[%s10361_s23 + $0x94] ss:$36 sps:$4 sm:$0xff]  }
 0x229   : > { %v5642_v36 = vrot.slane %v4594_v32, 7  ;;  %v5750_v19 = vrot.slane %v5696_v9, 1  ;;  %v5807_v20 = vrot.slane %v5696_v9, 2  ;;  %v5640_v21 = vsel %vm5619_vm6, %v5638_v17, %v5639_v16 }
 0x22a   : > { %v5641_v63 = vrot.slane %v4593_v18, 7  ;;  %v5686_v23 = vsel %vm5619_vm6, 0.0, %v5638_v17  ;;  %v5805_v24 = vrot.slane %v5640_v21, 2  ;;  %v9889_v26 = vpack.c.bf16 %v5640_v21, %v5638_v17  ;;  %v8260_v17 = vld [vmem:[%s10361_s23 + $0xd8] ss:$36 sps:$4 sm:$0xff]  }
 0x22b   : > { %v5697_v27 = vsel %vm5619_vm6, %v5642_v36, 0.0  ;;  %v5747_v29 = vrot.slane %v5686_v23, 1  ;;  %v5804_v33 = vrot.slane %v5686_v23, 2  ;;  %v5748_v34 = vrot.slane %v5640_v21, 1  ;;  %v8263_v21 = vld [vmem:[%s10361_s23 + $0xc] ss:$36 sps:$4 sm:$0xff]  }
 0x22c   : > { %v5755_v42 = vrot.slane %v5697_v27, 1  ;;  %v5812_v49 = vrot.slane %v5697_v27, 2  ;;  %v5643_v0 = vsel %vm5619_vm6, %v5641_v63, %v5642_v36  ;;  %v5687_v35 = vsel %vm5619_vm6, 0.0, %v5641_v63 }
 0x22d   : > { %v5752_v37 = vrot.slane %v5687_v35, 1  ;;  %v5809_v39 = vrot.slane %v5687_v35, 2  ;;  %v5810_v40 = vrot.slane %v5643_v0, 2  ;;  %v9894_v41 = vpack.c.bf16 %v5643_v0, %v5641_v63 }
 0x22e   : > { %v5806_v45 = vsel %vm5773_vm7, %v5804_v33, %v5805_v24  ;;  %v5808_v46 = vsel %vm5773_vm7, %v5805_v24, %v5807_v20  ;;  %v5749_v51 = vsel %vm5716_vm8, %v5747_v29, %v5748_v34  ;;  %v5751_v52 = vsel %vm5716_vm8, %v5748_v34, %v5750_v19 }
 0x22f   : > { %v5811_v54 = vsel %vm5773_vm7, %v5809_v39, %v5810_v40  ;;  %v5813_v55 = vsel %vm5773_vm7, %v5810_v40, %v5812_v49  ;;  %v9902_v22 = vpack.c.bf16 %v5808_v46, %v5806_v45  ;;  %v9904_v61 = vpack.c.bf16 %v5751_v52, %v5749_v51  ;;  %v8264_v39 = vld [vmem:[%s10361_s23 + $0x5c] ss:$36 sps:$4 sm:$0xff]   ;;  %v8270_v40 = vld [vmem:[%s10361_s23 + $0xa4] ss:$36 sps:$4 sm:$0xff]  }
 0x230   : > { %v9906_v62 = vpack.c.bf16 %v5813_v55, %v5811_v54  ;;  %v5753_v3 = vrot.slane %v5643_v0, 1  ;;  %v8272_v55 = vld [vmem:[%s10361_s23 + $0xa0] ss:$36 sps:$4 sm:$0xff]  }
 0x231   : > { %6128 = vmatprep.subr.bf16.mxu1 %v9904_v61  ;;  %6256 = vmatprep.subr.bf16.mxu0 %v9902_v22 }
 0x232   : > { %7362 = vmatpush1.bf16.xpose.msk.msra.mxu1 %vm9781_vm11, %v9889_v26  ;;  %6257 = vmatpush1.bf16.xpose.msra.mxu0 %v9904_v61  ;;  %v5754_v4 = vsel %vm5716_vm8, %v5752_v37, %v5753_v3  ;;  %v5756_v5 = vsel %vm5716_vm8, %v5753_v3, %v5755_v42  ;;  %v8249_v37 = vld [vmem:[%s10361_s23 + $0x10] ss:$36 sps:$4 sm:$0xff]  }
 0x233   : > { %v9916_v1 = vpack.c.bf16 %v5756_v5, %v5754_v4  ;;  %6258 = vmatprep.subr.bf16.mxu0 %v9906_v62  ;;  %v8276_v4 = vld [vmem:[%s10361_s23 + $0xec] ss:$36 sps:$4 sm:$0xff]  }
 0x235   : > { %6130 = vmatprep.subr.bf16.mxu1 %v9916_v1 }
 0x23a   : > { %7366 = vmatpush1.bf16.xpose.msk.msra.mxu1 %vm9781_vm11, %v9894_v41  ;;  %6259 = vmatpush1.bf16.xpose.msra.mxu0 %v9916_v1 }
 0x23b   : > { %7370 = vmatprep.subr.msk.bf16.mxu1 %vm9781_vm11, %v9732_v25  ;;  %v8254_v25 = vld [vmem:[%s10361_s23 + $0x48] ss:$36 sps:$4 sm:$0xff]  }
 0x241   : > { %6149 = vmatmul.mubr.bf16.vlgmr.msra.gmra.mrb[12].mxu1 %v8246_v6 }
 0x242   : > { %6182 = vmatpush1.bf16.xpose.msra.mxu1 %v5864_v12  ;;  %6156 = vmatprep.mubr.bf16.mxu1 %v8252_v10 }
 0x243   : > { %7374 = vmatprep.subr.msk.bf16.mxu1 %vm9781_vm11, %v9799_v31 }
 0x249   : > { %6157 = vmatmul.mubr.bf16.gmra.mrb[16].mxu1 %v8254_v25 }
 0x24a   : > { %6184 = vmatpush1.bf16.xpose.msra.mxu1 %v9753_v50  ;;  %6164 = vmatprep.mubr.bf16.mxu1 %v8255_v7 }
 0x24b   : > { %7378 = vmatprep.subr.msk.bf16.mxu1 %vm9781_vm11, %v9818_v57 }
 0x24f   : > { %v7957_v12 = vpop.f32.mrb[8].mxu0 }
 0x250   : > { %v5093_v30 = vmax.f32 %v7957_v12, 0.0  ;;  %v5081_v15 = vpop.f32.mrb[9].mxu0 }
 0x251   : > { %v5092_v58 = vmax.f32 %v5081_v15, 0.0  ;;  %6165 = vmatmul.mubr.bf16.gmra.mrb[20].mxu1 %v8257_v60 }
 0x252   : > { %v5096_v50 = vmul.f32 %v5094_v13, %v5093_v30  ;;  %6186 = vmatpush1.bf16.xpose.msra.mxu1 %v9803_v38  ;;  %6172 = vmatprep.mubr.bf16.mxu1 %v8258_v11 }
 0x253   : > { %v5095_v16 = vmul.f32 %v5094_v13, %v5092_v58  ;;  %7382 = vmatprep.subr.msk.bf16.mxu1 %vm9781_vm11, %v9847_v28 }
 0x254   : > { %v5645_v8 = vrot.slane %v5096_v50, 7 }
 0x255   : > { %v5644_v32 = vrot.slane %v5095_v16, 7  ;;  %v8278_v16 = vld [vmem:[%s10361_s23 + $0xe8] ss:$36 sps:$4 sm:$0xff]  }
 0x256   : > { %v5698_v9 = vsel %vm5619_vm6, %v5645_v8, 0.0 }
 0x257   : > { %v5835_v18 = vrot.slane %v5698_v9, 1  ;;  %v5842_v36 = vrot.slane %v5698_v9, 2  ;;  %v5646_v19 = vsel %vm5619_vm6, %v5644_v32, %v5645_v8  ;;  %v5688_v20 = vsel %vm5619_vm6, 0.0, %v5644_v32  ;;  %v8269_v9 = vld [vmem:[%s10361_s23 + $0x50] ss:$36 sps:$4 sm:$0xff]  }
 0x258   : > { %v5832_v63 = vrot.slane %v5688_v20, 1  ;;  %v5833_v23 = vrot.slane %v5646_v19, 1  ;;  %v5839_v24 = vrot.slane %v5688_v20, 2  ;;  %v5840_v27 = vrot.slane %v5646_v19, 2  ;;  %v8291_v20 = vld [vmem:[%s10361_s23 + $0xf4] ss:$36 sps:$4 sm:$0xff]  }
 0x259   : > { %v9970_v29 = vpack.c.bf16 %v5646_v19, %v5644_v32  ;;  %6173 = vmatmul.mubr.bf16.gmra.mrb[24].mxu1 %v8260_v17  ;;  %v8261_v32 = vld [vmem:[%s10361_s23 + $0x8] ss:$36 sps:$4 sm:$0xff]   ;;  %v8267_v17 = vld [vmem:[%s10361_s23 + $0x54] ss:$36 sps:$4 sm:$0xff]  }
 0x25a   : > { %v5841_v33 = vsel %vm5773_vm7, %v5839_v24, %v5840_v27  ;;  %v5843_v34 = vsel %vm5773_vm7, %v5840_v27, %v5842_v36  ;;  %v5834_v42 = vsel %vm5716_vm8, %v5832_v63, %v5833_v23  ;;  %v5836_v49 = vsel %vm5716_vm8, %v5833_v23, %v5835_v18  ;;  %6188 = vmatpush1.bf16.xpose.msra.mxu1 %v9825_v47  ;;  %v8282_v18 = vld [vmem:[%s10361_s23 + $0x18] ss:$36 sps:$4 sm:$0xff]   ;;  %v8285_v36 = vld [vmem:[%s10361_s23 + $0x64] ss:$36 sps:$4 sm:$0xff]   ;;  %v8288_v19 = vld [vmem:[%s10361_s23 + $0xac] ss:$36 sps:$4 sm:$0xff]  }
 0x25b   : > { %v9977_v0 = vpack.c.bf16 %v5843_v34, %v5841_v33  ;;  %v9979_v35 = vpack.c.bf16 %v5836_v49, %v5834_v42  ;;  %7386 = vmatprep.subr.msk.bf16.mxu1 %vm9781_vm11, %v9852_v44  ;;  %6213 = vmatprep.mubr.bf16.mxu1 %v8263_v21  ;;  %v8296_v21 = vld [vmem:[%s10361_s23 + $0x20] ss:$36 sps:$4 sm:$0xff]   ;;  %v8295_v63 = vld [vmem:[%s10361_s23 + $0xf8] ss:$36 sps:$4 sm:$0xff]  }
 0x25d   : > { %6260 = vmatprep.subr.bf16.mxu0 %v9977_v0 }
 0x25e   : > { %6261 = vmatpush1.bf16.xpose.msra.mxu0 %v9979_v35 }
 0x25f   : > { %6311 = vmatprep.subr.bf16.mxu0 %v9807_v43  ;;  %v8266_v43 = vld [vmem:[%s10361_s23 + $0x58] ss:$36 sps:$4 sm:$0xff]  }
 0x262   : > { %6190 = vmatpush1.bf16.xpose.msra.mxu1 %v9860_v56 }
 0x263   : > { %7390 = vmatprep.subr.msk.bf16.mxu1 %vm9781_vm11, %v9889_v26 }
 0x265   : > { %6279 = vmatmul.mubr.bf16.vlgmr.msra.gmra.mrb[12].mxu0 %v8249_v37 }
 0x266   : > { %7402 = vmatpush1.bf16.xpose.msk.msra.mxu0 %vm9781_vm11, %v9799_v31  ;;  %6286 = vmatprep.mubr.bf16.mxu0 %v8264_v39  ;;  %v5596_v31 = vstv %s5103_s17 }
 0x267   : > { %6313 = vmatprep.subr.bf16.mxu0 %v9829_v48 }
 0x26a   : > { %6192 = vmatpush1.bf16.xpose.msra.mxu1 %v9864_v59 }
 0x26b   : > { %7394 = vmatprep.subr.msk.bf16.mxu1 %vm9781_vm11, %v9894_v41 }
 0x26c   : > { %v7984_v45 = vpop.f32.mrb[8].mxu1 }
 0x26d   : > { %6287 = vmatmul.mubr.bf16.gmra.mrb[16].mxu0 %v8266_v43  ;;  %v5595_v46 = vmax.f32 %v7984_v45, 0.0  ;;  %v5583_v48 = vpop.f32.mrb[9].mxu1 }
 0x26e   : > { %7406 = vmatpush1.bf16.xpose.msk.msra.mxu0 %vm9781_vm11, %v9818_v57  ;;  %6294 = vmatprep.mubr.bf16.mxu0 %v8270_v40  ;;  %v5594_v51 = vmax.f32 %v5583_v48, 0.0 }
 0x26f   : > { %6315 = vmatprep.subr.bf16.mxu0 %v9862_v53  ;;  %v5598_v52 = vmul.f32 %v5596_v31, %v5595_v46 }
 0x270   : > { %v5597_v54 = vmul.f32 %v5596_v31, %v5594_v51 }
 0x271   : > { %v5648_v3 = vrot.slane %v5598_v52, 7 }
 0x272   : > { %6194 = vmatpush1.bf16.xpose.msra.mxu1 %v9902_v22  ;;  %v5647_v5 = vrot.slane %v5597_v54, 7 }
 0x273   : > { %7398 = vmatprep.subr.msk.bf16.mxu1 %vm9781_vm11, %v9970_v29  ;;  %v5699_v57 = vsel %vm5619_vm6, %v5648_v3, 0.0 }
 0x274   : > { %v5851_v53 = vrot.slane %v5699_v57, 1  ;;  %v5858_v6 = vrot.slane %v5699_v57, 2  ;;  %v5649_v10 = vsel %vm5619_vm6, %v5647_v5, %v5648_v3  ;;  %v5689_v25 = vsel %vm5619_vm6, 0.0, %v5647_v5 }
 0x275   : > { %6295 = vmatmul.mubr.bf16.gmra.mrb[20].mxu0 %v8272_v55  ;;  %v5848_v7 = vrot.slane %v5689_v25, 1  ;;  %v5855_v60 = vrot.slane %v5689_v25, 2  ;;  %v5856_v11 = vrot.slane %v5649_v10, 2  ;;  %v7429_v12 = vpack.c.bf16 %v5649_v10, %v5647_v5 }
 0x276   : > { %7410 = vmatpush1.bf16.xpose.msk.msra.mxu0 %vm9781_vm11, %v9847_v28  ;;  %6302 = vmatprep.mubr.bf16.mxu0 %v8276_v4  ;;  %v5849_v13 = vrot.slane %v5649_v10, 1 }
 0x277   : > { %6317 = vmatprep.subr.bf16.mxu0 %v9874_v2  ;;  %v5857_v30 = vsel %vm5773_vm7, %v5855_v60, %v5856_v11  ;;  %v5859_v15 = vsel %vm5773_vm7, %v5856_v11, %v5858_v6  ;;  %v8284_v2 = vld [vmem:[%s10361_s23 + $0x1c] ss:$36 sps:$4 sm:$0xff]  }
 0x278   : > { %v5850_v58 = vsel %vm5716_vm8, %v5848_v7, %v5849_v13  ;;  %v5852_v50 = vsel %vm5716_vm8, %v5849_v13, %v5851_v53  ;;  %v10041_v8 = vpack.c.bf16 %v5859_v15, %v5857_v30 }
 0x279   : > { %v5890_v28 = vpack.c.bf16 %v5852_v50, %v5850_v58 }
 0x27a   : > { %6196 = vmatpush1.bf16.xpose.msra.mxu1 %v9906_v62 }
 0x27b   : > { %8049 = vmatprep.subr.bf16.mxu1 %v9803_v38 }
 0x27d   : > { %6303 = vmatmul.mubr.bf16.gmra.mrb[24].mxu0 %v8278_v16 }
 0x27e   : > { %7414 = vmatpush1.bf16.xpose.msk.msra.mxu0 %vm9781_vm11, %v9852_v44  ;;  %6343 = vmatprep.mubr.bf16.mxu0 %v8284_v2  ;;  %v8273_v44 = vld [vmem:[%s10361_s23 + $0x9c] ss:$36 sps:$4 sm:$0xff]  }
 0x27f   : > { %6319 = vmatprep.subr.bf16.mxu0 %v9904_v61  ;;  %v8275_v61 = vld [vmem:[%s10361_s23 + $0x98] ss:$36 sps:$4 sm:$0xff]  }
 0x281   : > { %6214 = vmatmul.mubr.bf16.vlgmr.msra.gmra.mrb[12].mxu1 %v8261_v32 }
 0x282   : > { %8057 = vmatpush3.bf16.xpose.msra.mxu1 %v9803_v38  ;;  %6221 = vmatprep.mubr.bf16.mxu1 %v8267_v17 }
 0x283   : > { %8050 = vmatprep.subr.bf16.mxu1 %v9825_v47 }
 0x286   : > { %7418 = vmatpush1.bf16.xpose.msk.msra.mxu0 %vm9781_vm11, %v9889_v26  ;;  %v8279_v26 = vld [vmem:[%s10361_s23 + $0xe4] ss:$36 sps:$4 sm:$0xff]  }
 0x287   : > { %6321 = vmatprep.subr.bf16.mxu0 %v9916_v1  ;;  %v8281_v1 = vld [vmem:[%s10361_s23 + $0xe0] ss:$36 sps:$4 sm:$0xff]  }
 0x289   : > { %6222 = vmatmul.mubr.bf16.gmra.mrb[16].mxu1 %v8269_v9 }
 0x28a   : > { %8058 = vmatpush3.bf16.xpose.msra.mxu1 %v9825_v47  ;;  %6229 = vmatprep.mubr.bf16.mxu1 %v8273_v44 }
 0x28b   : > { %8051 = vmatprep.subr.bf16.mxu1 %v9860_v56 }
 0x28e   : > { %7422 = vmatpush1.bf16.xpose.msk.msra.mxu0 %vm9781_vm11, %v9894_v41  ;;  %v8294_v41 = vld [vmem:[%s10361_s23 + $0xb0] ss:$36 sps:$4 sm:$0xff]  }
 0x28f   : > { %6323 = vmatprep.subr.bf16.mxu0 %v9979_v35 }
 0x291   : > { %6230 = vmatmul.mubr.bf16.gmra.mrb[20].mxu1 %v8275_v61 }
 0x292   : > { %8059 = vmatpush3.bf16.xpose.msra.mxu1 %v9860_v56  ;;  %6237 = vmatprep.mubr.bf16.mxu1 %v8279_v26 }
 0x293   : > { %8052 = vmatprep.subr.bf16.mxu1 %v9864_v59 }
 0x296   : > { %7426 = vmatpush1.bf16.xpose.msk.msra.mxu0 %vm9781_vm11, %v9970_v29 }
 0x297   : > { %6325 = vmatprep.subr.bf16.mxu0 %v5890_v28 }
 0x299   : > { %6238 = vmatmul.mubr.bf16.gmra.mrb[24].mxu1 %v8281_v1 }
 0x29a   : > { %8060 = vmatpush3.bf16.xpose.msra.mxu1 %v9864_v59  ;;  %8005 = vmatprep.mubr.bf16.mxu1 %v8294_v41 }
 0x29b   : > { %8053 = vmatprep.subr.bf16.mxu1 %v9902_v22 }
 0x29e   : > { %7430 = vmatpush1.bf16.xpose.msk.msra.mxu0 %vm9781_vm11, %v7429_v12 }
 0x29f   : > { %7985 = vmatprep.subr.bf16.mxu0 %v9803_v38 }
 0x2a2   : > { %8061 = vmatpush3.bf16.xpose.msra.mxu1 %v9902_v22 }
 0x2a3   : > { %8054 = vmatprep.subr.bf16.mxu1 %v9906_v62 }
 0x2a5   : > { %6344 = vmatmul.mubr.bf16.vlgmr.msra.gmra.mrb[12].mxu0 %v8282_v18 }
 0x2a6   : > { %7986 = vmatpush3.bf16.xpose.msra.mxu0 %v9803_v38  ;;  %6351 = vmatprep.mubr.bf16.mxu0 %v8285_v36  ;;  %v8290_v38 = vld [vmem:[%s10361_s23 + $0xa8] ss:$36 sps:$4 sm:$0xff]  }
 0x2a7   : > { %7987 = vmatprep.subr.bf16.mxu0 %v9825_v47 }
 0x2aa   : > { %8062 = vmatpush3.bf16.xpose.msra.mxu1 %v9906_v62 }
 0x2ab   : > { %8055 = vmatprep.subr.bf16.mxu1 %v9977_v0 }
 0x2ad   : > { %6352 = vmatmul.mubr.bf16.gmra.mrb[16].mxu0 %v8287_v14  ;;  %v8411_v14 = vmov (!%p7431_p9), 0.0  }
 0x2ae   : > { %7988 = vmatpush3.bf16.xpose.msra.mxu0 %v9825_v47  ;;  %6359 = vmatprep.mubr.bf16.mxu0 %v8288_v19  ;;  %v8293_v47 = vld [vmem:[%s10361_s23 + $0xf0] ss:$36 sps:$4 sm:$0xff]   ;;  %6453 = vst.msk [vmem:[%s10366_s11] sm:$0xff] (!%p7431_p9), %vm774_vm3, %v8411_v14  ;;  %6454 = vst.msk [vmem:[%s10366_s11 + $0x8] sm:$0xff] (!%p7431_p9), %vm774_vm3, %v8411_v14 }
 0x2af   : > { %7989 = vmatprep.subr.bf16.mxu0 %v9860_v56  ;;  %6455 = vst.msk [vmem:[%s10366_s11 + $0x10] sm:$0xff] (!%p7431_p9), %vm774_vm3, %v8411_v14  ;;  %6456 = vst.msk [vmem:[%s10366_s11 + $0x18] sm:$0xff] (!%p7431_p9), %vm774_vm3, %v8411_v14 }
 0x2b0   : > { %6457 = vst.msk [vmem:[%s10366_s11 + $0x20] sm:$0xff] (!%p7431_p9), %vm774_vm3, %v8411_v14  ;;  %6458 = vst.msk [vmem:[%s10366_s11 + $0x28] sm:$0xff] (!%p7431_p9), %vm774_vm3, %v8411_v14 }
 0x2b1   : > { %6459 = vst.msk [vmem:[%s10366_s11 + $0x30] sm:$0xff] (!%p7431_p9), %vm774_vm3, %v8411_v14  ;;  %6460 = vst.msk [vmem:[%s10366_s11 + $0x38] sm:$0xff] (!%p7431_p9), %vm774_vm3, %v8411_v14 }
 0x2b2   : > { %8063 = vmatpush3.bf16.xpose.msra.mxu1 %v9977_v0 }
 0x2b3   : > { %8056 = vmatprep.subr.bf16.mxu1 %v10041_v8 }
 0x2b5   : > { %6360 = vmatmul.mubr.bf16.gmra.mrb[20].mxu0 %v8290_v38 }
 0x2b6   : > { %7990 = vmatpush3.bf16.xpose.msra.mxu0 %v9860_v56  ;;  %6367 = vmatprep.mubr.bf16.mxu0 %v8291_v20  ;;  %v8297_v56 = vld [vmem:[%s10361_s23 + $0x68] ss:$36 sps:$4 sm:$0xff]  }
 0x2b7   : > { %7991 = vmatprep.subr.bf16.mxu0 %v9864_v59 }
 0x2ba   : > { %8064 = vmatpush3.bf16.xpose.msra.mxu1 %v10041_v8 }
 0x2bd   : > { %6368 = vmatmul.mubr.bf16.gmra.mrb[24].mxu0 %v8293_v47 }
 0x2be   : > { %7992 = vmatpush3.bf16.xpose.msra.mxu0 %v9864_v59  ;;  %8001 = vmatprep.mubr.bf16.mxu0 %v8296_v21 }
 0x2bf   : > { %7993 = vmatprep.subr.bf16.mxu0 %v9902_v22 }
 0x2c1   : > { %8006 = vmatmul.mubr.bf16.vlgmr.msra.gmra.mrb[28].mxu1 %v8295_v63 }
 0x2c6   : > { %7994 = vmatpush3.bf16.xpose.msra.mxu0 %v9902_v22 }
 0x2c7   : > { %7995 = vmatprep.subr.bf16.mxu0 %v9906_v62 }
 0x2ce   : > { %7996 = vmatpush3.bf16.xpose.msra.mxu0 %v9906_v62 }
 0x2cf   : > { %7997 = vmatprep.subr.bf16.mxu0 %v9977_v0 }
 0x2d6   : > { %7998 = vmatpush3.bf16.xpose.msra.mxu0 %v9977_v0 }
 0x2d7   : > { %7999 = vmatprep.subr.bf16.mxu0 %v10041_v8 }
 0x2de   : > { %8000 = vmatpush3.bf16.xpose.msra.mxu0 %v10041_v8 }
 0x2e5   : > { %8002 = vmatmul.mubr.bf16.vlgmr.msra.gmra.mrb[28].mxu0 %v8297_v56 }
 0x354   : > { %v6215_v59 = vpop.f32.mrb[12].mxu1 }
 0x355   : > { %v6217_v23 = vpop.f32.mrb[13].mxu1 }
 0x356   : > { %v6218_v22 = vpop.f32.mrb[14].mxu1 }
 0x357   : > { %v6220_v24 = vpop.f32.mrb[15].mxu1 }
 0x35c   : > { %v6223_v27 = vpop.f32.mrb[16].mxu1 }
 0x35d   : > { %v6225_v29 = vpop.f32.mrb[17].mxu1 }
 0x35e   : > { %v6226_v62 = vpop.f32.mrb[18].mxu1 }
 0x35f   : > { %v6228_v33 = vpop.f32.mrb[19].mxu1 }
 0x364   : > { %v6231_v34 = vpop.f32.mrb[20].mxu1 }
 0x365   : > { %v6233_v42 = vpop.f32.mrb[21].mxu1 }
 0x366   : > { %v6234_v49 = vpop.f32.mrb[22].mxu1 }
 0x367   : > { %v6236_v0 = vpop.f32.mrb[23].mxu1 }
 0x36c   : > { %v6239_v35 = vpop.f32.mrb[24].mxu1 }
 0x36d   : > { %v6241_v37 = vpop.f32.mrb[25].mxu1 }
 0x36e   : > { %v6242_v39 = vpop.f32.mrb[26].mxu1 }
 0x36f   : > { %v6244_v43 = vpop.f32.mrb[27].mxu1 }
 0x378   : > { %v6345_v40 = vpop.f32.mrb[12].mxu0 }
 0x379   : > { %v8065_v45 = vadd.f32 %v6345_v40, %v6215_v59  ;;  %v6347_v31 = vpop.f32.mrb[13].mxu0 }
 0x37a   : > { %v6348_v46 = vpop.f32.mrb[14].mxu0 }
 0x37b   : > { %v8066_v48 = vadd.f32 %v6348_v46, %v6218_v22  ;;  %v6350_v51 = vpop.f32.mrb[15].mxu0 }
 0x380   : > { %v6353_v52 = vpop.f32.mrb[16].mxu0 }
 0x381   : > { %v8067_v54 = vadd.f32 %v6353_v52, %v6223_v27  ;;  %v6355_v55 = vpop.f32.mrb[17].mxu0 }
 0x382   : > { %v6356_v3 = vpop.f32.mrb[18].mxu0 }
 0x383   : > { %v8068_v4 = vadd.f32 %v6356_v3, %v6226_v62  ;;  %v6358_v5 = vpop.f32.mrb[19].mxu0 }
 0x388   : > { %v6361_v57 = vpop.f32.mrb[20].mxu0 }
 0x389   : > { %v8069_v53 = vadd.f32 %v6361_v57, %v6231_v34  ;;  %v6363_v6 = vpop.f32.mrb[21].mxu0 }
 0x38a   : > { %v6364_v10 = vpop.f32.mrb[22].mxu0 }
 0x38b   : > { %v8070_v25 = vadd.f32 %v6364_v10, %v6234_v49  ;;  %v6366_v7 = vpop.f32.mrb[23].mxu0 }
 0x390   : > { %v6369_v60 = vpop.f32.mrb[24].mxu0 }
 0x391   : > { %v8071_v11 = vadd.f32 %v6369_v60, %v6239_v35  ;;  %v6371_v12 = vpop.f32.mrb[25].mxu0 }
 0x392   : > { %v6372_v13 = vpop.f32.mrb[26].mxu0 }
 0x393   : > { %v8072_v30 = vadd.f32 %v6372_v13, %v6242_v39  ;;  %v6374_v15 = vpop.f32.mrb[27].mxu0 }
 0x394   : > { %v8007_v58 = vpop.f32.mrb[28].mxu1 }
 0x395   : > { %v6435_v50 = vadd.f32 %v8071_v11, %v8007_v58  ;;  %v6426_v16 = vpop.f32.mrb[29].mxu1 }
 0x396   : > { %v6427_v8 = vadd.f32 %v8069_v53, %v6426_v16  ;;  %v8008_v28 = vpop.f32.mrb[30].mxu1 }
 0x397   : > { %6447 = vst [vmem:[%s10151_s27 + $0x30] sm:$0xff] %v6435_v50  ;;  %v6438_v2 = vadd.f32 %v8072_v30, %v8008_v28  ;;  %v6429_v32 = vpop.f32.mrb[31].mxu1 }
 0x398   : > { %6445 = vst [vmem:[%s10151_s27 + $0x20] sm:$0xff] %v6427_v8  ;;  %v6430_v17 = vadd.f32 %v8070_v25, %v6429_v32 }
 0x399   : > { %6448 = vst [vmem:[%s10151_s27 + $0x38] sm:$0xff] %v6438_v2 }
 0x39a   : > { %6446 = vst [vmem:[%s10151_s27 + $0x28] sm:$0xff] %v6430_v17 }
 0x3b8   : > { %v8003_v9 = vpop.f32.mrb[28].mxu0  ;;  %6452 = sbr.rel (%p7431_p9) target bundleno = 959 (0x3bf), region = 68 }
 0x3b9   : > { %v6419_v44 = vadd.f32 %v8067_v54, %v8003_v9  ;;  %v6410_v61 = vpop.f32.mrb[29].mxu0 }
 0x3ba   : > { %v6411_v26 = vadd.f32 %v8065_v45, %v6410_v61  ;;  %v8004_v1 = vpop.f32.mrb[30].mxu0 }
 0x3bb   : > { %6443 = vst [vmem:[%s10151_s27 + $0x10] sm:$0xff] %v6419_v44  ;;  %v6422_v41 = vadd.f32 %v8068_v4, %v8004_v1  ;;  %v6413_v18 = vpop.f32.mrb[31].mxu0 }
 0x3bc   : > { %6441 = vst [vmem:[%s10151_s27] sm:$0xff] %v6411_v26  ;;  %v6414_v36 = vadd.f32 %v8066_v48, %v6413_v18 }
 0x3bd   : > { %6444 = vst [vmem:[%s10151_s27 + $0x18] sm:$0xff] %v6422_v41 }
 0x3be   : > { %6442 = vst [vmem:[%s10151_s27 + $0x8] sm:$0xff] %v6414_v36 }
 0x3bf PF: > { %6465 = vadd.xlane.f32.xlu1 %v6419_v44  ;;  %6461 = vadd.xlane.f32.xlu0 %v6411_v26  ;;  %v6478_v19 = vmul.f32 %v6414_v36, %v6414_v36  ;;  %v6477_v38 = vmul.f32 %v6411_v26, %v6411_v26  ;;  %v6480_v20 = vmul.f32 %v6422_v41, %v6422_v41  ;;  %s10367_s4 = sld [smem:[#allocation21_spill]]  ;;  %vm6509_vm12 = vcmask 7168   ;;  %s10369_s19 = sld [smem:[#allocation11_spill]] (%p8547_p6)  ;;  %v6601_v32 = vld [vmem:[%s10151_s27 + $0x28] sm:$0xff] (%p8547_p6)  ;;  %v6605_v9 = vld [vmem:[%s10151_s27 + $0x38] sm:$0xff] (%p8547_p6) }
 0x3c0   : > { %v6479_v47 = vmul.f32 %v6419_v44, %v6419_v44  ;;  %v6482_v21 = vmul.f32 %v6430_v17, %v6430_v17  ;;  %v6481_v63 = vmul.f32 %v6427_v8, %v6427_v8  ;;  %v6484_v56 = vmul.f32 %v6438_v2, %v6438_v2  ;;  %s10370_s26 = sld [smem:[#allocation10_spill]] (%p8547_p6)  ;;  %s10371_s24 = sld [smem:[#allocation37_spill]] (%p8547_p6) }
 0x3c1   : > { %v6483_v59 = vmul.f32 %v6435_v50, %v6435_v50 }
 0x3c3   : > { %6467 = vadd.xlane.f32.xlu1 %v6422_v41  ;;  %6463 = vadd.xlane.f32.xlu0 %v6414_v36 }
 0x3c4   : > { %v6597_v28 = vld [vmem:[%s10151_s27 + $0x18] sm:$0xff] (%p8547_p6) }
 0x3c5   : > { %v6502_v42 = vld [vmem:[%s10367_s4 + $0x8] sm:$0xff]  ;;  %v6501_v49 = vld [vmem:[%s10367_s4] sm:$0xff]  ;;  %v6504_v45 = vld [vmem:[%s10367_s4 + $0x18] sm:$0xff]  ;;  %s7433_s28 = sshll.u32 (%p8547_p6), %s10369_s19, 4 }
 0x3c6   : > { %v6503_v31 = vld [vmem:[%s10367_s4 + $0x10] sm:$0xff]  ;;  %v6506_v3 = vld [vmem:[%s10367_s4 + $0x28] sm:$0xff]  ;;  %v6505_v4 = vld [vmem:[%s10367_s4 + $0x20] sm:$0xff]  ;;  %s6547_s20 = sadd.s32 (%p8547_p6), %s10370_s26, %s7433_s28 }
 0x3c7   : > { %6471 = vadd.xlane.f32.xlu1 %v6430_v17  ;;  %6469 = vadd.xlane.f32.xlu0 %v6427_v8  ;;  %v6508_v7 = vld [vmem:[%s10367_s4 + $0x38] sm:$0xff]  ;;  %v6507_v60 = vld [vmem:[%s10367_s4 + $0x30] sm:$0xff]  ;;  %v6593_v16 = vld [vmem:[%s10151_s27 + $0x8] sm:$0xff] (%p8547_p6)  ;;  %s7434_s25 = sshll.u32 (%p8547_p6), %s6547_s20, 3 }
 0x3c8   : > { %v6595_v8 = vld [vmem:[%s10151_s27 + $0x10] sm:$0xff] (%p8547_p6)  ;;  %s6549_s0 = scalar_lea.vmem (%p8547_p6), %s10371_s24, %s7434_s25 }
 0x3c9   : > { %v6603_v17 = vld [vmem:[%s10151_s27 + $0x30] sm:$0xff] (%p8547_p6)  ;;  %6594 = vst [vmem:[%s6549_s0 + $0x10] sm:$0xff] (%p8547_p6), %v6593_v16  ;;  %6596 = vst [vmem:[%s6549_s0 + $0x20] sm:$0xff] (%p8547_p6), %v6595_v8 }
 0x3ca   : > { %6598 = vst [vmem:[%s6549_s0 + $0x30] sm:$0xff] (%p8547_p6), %v6597_v28  ;;  %6602 = vst [vmem:[%s6549_s0 + $0x50] sm:$0xff] (%p8547_p6), %v6601_v32 }
 0x3cb   : > { %6475 = vadd.xlane.f32.xlu1 %v6438_v2  ;;  %6473 = vadd.xlane.f32.xlu0 %v6435_v50  ;;  %v6591_v50 = vld [vmem:[%s10151_s27] sm:$0xff] (%p8547_p6)  ;;  %6604 = vst [vmem:[%s6549_s0 + $0x60] sm:$0xff] (%p8547_p6), %v6603_v17  ;;  %6606 = vst [vmem:[%s6549_s0 + $0x70] sm:$0xff] (%p8547_p6), %v6605_v9 }
 0x3cc   : > { %v6599_v2 = vld [vmem:[%s10151_s27 + $0x20] sm:$0xff] (%p8547_p6)  ;;  %6592 = vst [vmem:[%s6549_s0] sm:$0xff] (%p8547_p6), %v6591_v50 }
 0x3cd   : > { %6600 = vst [vmem:[%s6549_s0 + $0x40] sm:$0xff] (%p8547_p6), %v6599_v2 }
 0x3cf   : > { %6487 = vadd.xlane.f32.xlu1 %v6478_v19  ;;  %6485 = vadd.xlane.f32.xlu0 %v6477_v38 }
 0x3d3   : > { %6491 = vadd.xlane.f32.xlu1 %v6480_v20  ;;  %6489 = vadd.xlane.f32.xlu0 %v6479_v47 }
 0x3d7   : > { %6495 = vadd.xlane.f32.xlu1 %v6482_v21  ;;  %6493 = vadd.xlane.f32.xlu0 %v6481_v63 }
 0x3db   : > { %6499 = vadd.xlane.f32.xlu1 %v6484_v56  ;;  %6497 = vadd.xlane.f32.xlu0 %v6483_v59 }
 0x44c   : > { %v6466_v23 = vpop.xlane.xlu1 %6465  ;;  %v6462_v22 = vpop.xlane.xlu0 %6461 }
 0x450   : > { %v6468_v24 = vpop.xlane.xlu1 %6467  ;;  %v6464_v27 = vpop.xlane.xlu0 %6463 }
 0x454   : > { %v6472_v29 = vpop.xlane.xlu1 %6471  ;;  %v6470_v62 = vpop.xlane.xlu0 %6469 }
 0x458   : > { %v6476_v33 = vpop.xlane.xlu1 %6475  ;;  %v6474_v34 = vpop.xlane.xlu0 %6473 }
 0x45c   : > { %v6488_v0 = vpop.xlane.xlu1 %6487  ;;  %v6486_v35 = vpop.xlane.xlu0 %6485 }
 0x45d   : > { %v6511_v37 = vsel %vm6509_vm12, %v6464_v27, %v6488_v0  ;;  %v6510_v39 = vsel %vm6509_vm12, %v6462_v22, %v6486_v35 }
 0x45e   : > { %v6519_v43 = vadd.f32 %v6511_v37, %v6502_v42  ;;  %v6518_v40 = vadd.f32 %v6510_v39, %v6501_v49 }
 0x460   : > { %6527 = vst.msk [vmem:[%s10367_s4 + $0x8] sm:$0xff] %vm774_vm3, %v6519_v43  ;;  %6526 = vst.msk [vmem:[%s10367_s4] sm:$0xff] %vm774_vm3, %v6518_v40  ;;  %v6492_v46 = vpop.xlane.xlu1 %6491  ;;  %v6490_v48 = vpop.xlane.xlu0 %6489 }
 0x461   : > { %v6513_v51 = vsel %vm6509_vm12, %v6468_v24, %v6492_v46  ;;  %v6512_v52 = vsel %vm6509_vm12, %v6466_v23, %v6490_v48 }
 0x462   : > { %v6521_v54 = vadd.f32 %v6513_v51, %v6504_v45  ;;  %v6520_v55 = vadd.f32 %v6512_v52, %v6503_v31 }
 0x464   : > { %6529 = vst.msk [vmem:[%s10367_s4 + $0x18] sm:$0xff] %vm774_vm3, %v6521_v54  ;;  %6528 = vst.msk [vmem:[%s10367_s4 + $0x10] sm:$0xff] %vm774_vm3, %v6520_v55  ;;  %v6496_v5 = vpop.xlane.xlu1 %6495  ;;  %v6494_v57 = vpop.xlane.xlu0 %6493 }
 0x465   : > { %v6515_v53 = vsel %vm6509_vm12, %v6472_v29, %v6496_v5  ;;  %v6514_v6 = vsel %vm6509_vm12, %v6470_v62, %v6494_v57 }
 0x466   : > { %v6523_v10 = vadd.f32 %v6515_v53, %v6506_v3  ;;  %v6522_v25 = vadd.f32 %v6514_v6, %v6505_v4  ;;  %6545 = sbr.rel (!%p8547_p6) target bundleno = 1133 (0x46d), region = 72 }
 0x468   : > { %6531 = vst.msk [vmem:[%s10367_s4 + $0x28] sm:$0xff] %vm774_vm3, %v6523_v10  ;;  %6530 = vst.msk [vmem:[%s10367_s4 + $0x20] sm:$0xff] %vm774_vm3, %v6522_v25  ;;  %v6500_v11 = vpop.xlane.xlu1 %6499  ;;  %v6498_v12 = vpop.xlane.xlu0 %6497 }
 0x469   : > { %v6517_v13 = vsel %vm6509_vm12, %v6476_v33, %v6500_v11  ;;  %v6516_v30 = vsel %vm6509_vm12, %v6474_v34, %v6498_v12 }
 0x46a   : > { %v6525_v15 = vadd.f32 %v6517_v13, %v6508_v7  ;;  %v6524_v58 = vadd.f32 %v6516_v30, %v6507_v60 }
 0x46c   : > { %6533 = vst.msk [vmem:[%s10367_s4 + $0x38] sm:$0xff] %vm774_vm3, %v6525_v15  ;;  %6532 = vst.msk [vmem:[%s10367_s4 + $0x30] sm:$0xff] %vm774_vm3, %v6524_v58 }
 0x46d PF: > { %s10372_s8 = sld [smem:[#allocation14_spill]]  ;;  %s10373_s16 = sld [smem:[#allocation9_spill]] }
 0x46e   : > { %s10374_s17 = sld [smem:[#allocation18_spill]]  ;;  %s10375_s18 = sld [smem:[#allocation12_spill]] }
 0x46f   : > { %s10376_s2 = sld [smem:[#allocation13_spill]]  ;;  %s10377_s19 = sld [smem:[#allocation15_spill]] }
 0x470   : > { %s10378_s20 = sld [smem:[#allocation17_spill]] }
 0x473   : > { %s40_s21 = sadd.s32 1, %s10372_s8  }
 0x474   : > { %p37_p6 = scmp.ge.s32.totalorder %s40_s21, 6  }
 0x476   :  { %39 = sbr.rel (!%p37_p6) target bundleno = 43 (0x2b), region = 260 }

</bundles_post_ra>
